<compile_context>
chip_gen: v6e
topology: v6e:2x2x1
jax: 0.10.0
libtpu: 0.0.40
codegen_flags: <defaults>
</compile_context>

<pallas_src>
import math

import jax
import jax.numpy as jnp
from jax.experimental import pallas as pl
from jax.experimental.pallas import tpu as pltpu


_TILE_N = 256   # token tile (multiple of 8 sublanes / 128 lanes)
_LANE = 128     # TPU lane width


def _round_up(x, m):
    return ((x + m - 1) // m) * m


def _make_adaptive_input_kernel(cutoffs, n_clusters):
    """cutoffs = [c0, c1, ..., n_classes] (static python ints)."""
    cutoff_values = [0] + list(cutoffs)
    hi_prec = jax.lax.Precision.HIGHEST   # exact f32 gather-via-matmul

    def kernel(flags_ref, tok_ref, head_ref, *refs):
        # flags_ref : SMEM (num_tiles, n_clusters) int32  (scalar prefetch)
        # tok_ref   : VMEM (TILE_N, 1) int32
        # head_ref  : VMEM (head_pad, D_pad) f32
        # refs      : [emb_0, linT_0, ..., emb_{k-1}, linT_{k-1}, out]
        out_ref = refs[-1]
        tail_refs = refs[:-1]
        tile = pl.program_id(0)
        tok = tok_ref[...]                                  # (TILE_N, 1)
        n = tok.shape[0]

        # ---- head cluster: one-hot row gather on the MXU -----------------
        # No masking needed: padded head rows are zero and tokens outside
        # [0, head_size) (including the -1 padding tokens) match nothing or
        # match a zero row.
        head_w = head_ref[...]                              # (head_pad, D_pad)
        iota0 = jax.lax.broadcasted_iota(jnp.int32, (n, head_w.shape[0]), 1)
        oh0 = (tok == iota0).astype(jnp.float32)
        out_ref[...] = jnp.dot(oh0, head_w, precision=hi_prec,
                               preferred_element_type=jnp.float32)

        # ---- tail clusters: small embedding -> projection to in_features --
        for c in range(n_clusters):
            low = cutoff_values[c + 1]
            flag = flags_ref[tile, c]   # does any token in this tile hit cluster c?

            @pl.when(flag > 0)
            def _(c=c, low=low):
                emb_w = tail_refs[2 * c][...]               # (osz_pad, hsz_pad)
                lin_wt = tail_refs[2 * c + 1][...]          # (hsz_pad, D_pad)
                tok_s = tok - low                           # shift tokens once
                iota = jax.lax.broadcasted_iota(
                    jnp.int32, (n, emb_w.shape[0]), 1)
                oh = (tok_s == iota).astype(jnp.float32)    # (TILE_N, osz_pad)
                hidden = jnp.dot(oh, emb_w, precision=hi_prec,
                                 preferred_element_type=jnp.float32)
                proj = jnp.dot(hidden, lin_wt, precision=hi_prec,
                               preferred_element_type=jnp.float32)
                out_ref[...] += proj

    return kernel


class AdaptiveInputPallas:
    """JAX/Pallas port of the PyTorch AdaptiveInput module (eval-mode forward)."""

    def __init__(self, in_features, n_classes, cutoffs=None, div_value=2.0,
                 head_bias=False, tail_drop=0.5, key=None):
        if not cutoffs:
            cutoffs = [5000, 10000]
        cutoffs = list(cutoffs)
        if (cutoffs != sorted(cutoffs) or min(cutoffs) <= 0
                or max(cutoffs) >= n_classes - 1
                or len(set(cutoffs)) != len(cutoffs)
                or any(int(c) != c for c in cutoffs)):
            raise ValueError("cutoffs should be a sequence of unique, positive "
                             "integers sorted in an increasing order, where each "
                             "value is between 1 and n_classes-1")

        self.in_features = in_features
        self.n_classes = n_classes
        self.cutoffs = cutoffs + [n_classes]
        self.div_value = div_value
        self.n_clusters = len(self.cutoffs) - 1
        self.head_size = self.cutoffs[0]

        if key is None:
            key = jax.random.PRNGKey(0)
        keys = jax.random.split(key, 1 + 2 * self.n_clusters)

        # nn.Embedding default init: N(0, 1)
        self.head_w = jax.random.normal(
            keys[0], (self.head_size, in_features), jnp.float32)

        self.tail = []
        for i in range(self.n_clusters):
            hsz = int(in_features // div_value ** (i + 1))
            osz = self.cutoffs[i + 1] - self.cutoffs[i]
            emb = jax.random.normal(keys[1 + 2 * i], (osz, hsz), jnp.float32)
            # nn.Linear default init: U(-1/sqrt(fan_in), 1/sqrt(fan_in)), no bias
            bound = 1.0 / math.sqrt(hsz)
            lin = jax.random.uniform(keys[2 + 2 * i], (in_features, hsz),
                                     jnp.float32, -bound, bound)
            self.tail.append((emb, lin))
        # TODO(synk): nn.Dropout(tail_drop) is omitted (eval-mode identity);
        # training-time stochastic dropout is not reproduced.

        # ---- pre-padded / pre-transposed weights (built once) -------------
        self._d_pad = _round_up(in_features, _LANE)
        head_pad = _round_up(self.head_size, _LANE)
        self._head_pad_w = jnp.zeros((head_pad, self._d_pad), jnp.float32) \
            .at[:self.head_size, :in_features].set(self.head_w)

        self._tail_pad = []
        for (emb, lin) in self.tail:
            osz, hsz = emb.shape
            osz_pad = _round_up(osz, _LANE)
            hsz_pad = _round_up(hsz, _LANE)
            emb_p = jnp.zeros((osz_pad, hsz_pad), jnp.float32) \
                .at[:osz, :hsz].set(emb)
            lin_t_p = jnp.zeros((hsz_pad, self._d_pad), jnp.float32) \
                .at[:hsz, :in_features].set(lin.T)
            self._tail_pad.append((emb_p, lin_t_p))

        self._kernel = _make_adaptive_input_kernel(self.cutoffs, self.n_clusters)
        self._forward = jax.jit(self._forward_impl)

    # ------------------------------------------------------------------ #
    def _forward_impl(self, tokens):
        b, s = tokens.shape
        n = b * s
        n_pad = _round_up(max(n, 1), _TILE_N)
        num_tiles = n_pad // _TILE_N
        d_pad = self._d_pad

        tok_flat = tokens.reshape(-1).astype(jnp.int32)
        # pad with -1: matches no embedding row anywhere -> contributes zeros
        tok_padded = jnp.full((n_pad,), -1, jnp.int32).at[:n].set(tok_flat)
        tok2d = tok_padded.reshape(n_pad, 1)

        # per-tile "cluster hit" flags (scalar-prefetched into SMEM)
        tok_tiles = tok_padded.reshape(num_tiles, _TILE_N)
        cutoff_values = [0] + self.cutoffs
        flag_cols = []
        for c in range(self.n_clusters):
            low, high = cutoff_values[c + 1], cutoff_values[c + 2]
            flag_cols.append(
                jnp.any((tok_tiles >= low) & (tok_tiles < high), axis=1))
        flags = jnp.stack(flag_cols, axis=1).astype(jnp.int32)

        # ---- specs --------------------------------------------------------
        in_specs = [
            pl.BlockSpec((_TILE_N, 1), lambda i, flags: (i, 0)),      # tokens
            pl.BlockSpec(self._head_pad_w.shape, lambda i, flags: (0, 0)),
        ]
        operands = [tok2d, self._head_pad_w]
        for emb_p, lin_t_p in self._tail_pad:
            in_specs.append(pl.BlockSpec(emb_p.shape, lambda i, flags: (0, 0)))
            in_specs.append(pl.BlockSpec(lin_t_p.shape, lambda i, flags: (0, 0)))
            operands.append(emb_p)
            operands.append(lin_t_p)

        out_spec = pl.BlockSpec((_TILE_N, d_pad), lambda i, flags: (i, 0))

        # ---- cost estimate ------------------------------------------------
        flops = 2 * n_pad * self._head_pad_w.shape[0] * d_pad
        bytes_accessed = (flags.size + tok2d.size + self._head_pad_w.size
                          + n_pad * d_pad) * 4
        for emb_p, lin_t_p in self._tail_pad:
            flops += 2 * n_pad * (emb_p.shape[0] * emb_p.shape[1]
                                  + lin_t_p.shape[0] * lin_t_p.shape[1])
            bytes_accessed += (emb_p.size + lin_t_p.size) * 4

        out = pl.pallas_call(
            self._kernel,
            out_shape=jax.ShapeDtypeStruct((n_pad, d_pad), jnp.float32),
            grid_spec=pltpu.PrefetchScalarGridSpec(
                num_scalar_prefetch=1,
                grid=(num_tiles,),
                in_specs=in_specs,
                out_specs=out_spec,
            ),
            compiler_params=pltpu.CompilerParams(
                dimension_semantics=("parallel",),
                vmem_limit_bytes=48 * 1024 * 1024,
            ),
            cost_estimate=pl.CostEstimate(
                flops=int(flops), transcendentals=0,
                bytes_accessed=int(bytes_accessed)),
        )(flags, *operands)

        return out[:n, :self.in_features].reshape(b, s, self.in_features)

    def __call__(self, tokens):
        return self._forward(tokens)


def _reference(mod, tokens):
    """Pure-JAX reference matching the PyTorch forward (eval mode)."""
    b, s = tokens.shape
    tok = tokens.reshape(-1)
    out = jnp.zeros((tok.shape[0], mod.in_features), jnp.float32)
    cutoff_values = [0] + mod.cutoffs
    mask = (tok >= 0) & (tok < cutoff_values[1])
    head_out = jnp.take(mod.head_w, jnp.clip(tok, 0, mod.head_size - 1), axis=0)
    out = jnp.where(mask[:, None], head_out, out)
    for i, (emb, lin) in enumerate(mod.tail):
        low, high = cutoff_values[i + 1], cutoff_values[i + 2]
        mask = (tok >= low) & (tok < high)
        idx = jnp.clip(tok - low, 0, emb.shape[0] - 1)
        val = jnp.dot(jnp.take(emb, idx, axis=0), lin.T,
                      precision=jax.lax.Precision.HIGHEST)
        out = jnp.where(mask[:, None], val, out)
    return out.reshape(b, s, -1)


if __name__ == "__main__":
    key = jax.random.PRNGKey(0)
    in_features = 32
    n_classes = 64
    cutoffs = [16, 32]
    mod = AdaptiveInputPallas(in_features, n_classes, cutoffs, key=key)

    # small shape (single token tile)
    B, S = 2, 8
    tokens = jax.random.randint(jax.random.fold_in(key, 123), (B, S),
                                0, n_classes, dtype=jnp.int32)
    out = jax.block_until_ready(mod(tokens))
    ref = _reference(mod, tokens)
    assert out.shape == (B, S, in_features)
    assert jnp.allclose(out, ref, atol=1e-5, rtol=1e-5), "mismatch vs reference (small)"

    # multi-tile shape (exercises grid pipelining + per-tile cluster skipping)
    B2, S2 = 2, 320
    tokens2 = jax.random.randint(jax.random.fold_in(key, 7), (B2, S2),
                                 0, n_classes, dtype=jnp.int32)
    out2 = jax.block_until_ready(mod(tokens2))
    ref2 = _reference(mod, tokens2)
    assert out2.shape == (B2, S2, in_features)
    assert jnp.allclose(out2, ref2, atol=1e-5, rtol=1e-5), "mismatch vs reference (multi-tile)"

    print("KERNEL_OK")
</pallas_src>

<mosaic_0001>
module attributes {stable_mosaic.version = 11 : i64} {
  func.func @kernel(%arg0: i32, %arg1: memref<1x2xi32, #tpu.memory_space<smem>>, %arg2: memref<256x1xi32, #tpu.memory_space<vmem>>, %arg3: memref<128x128xf32, #tpu.memory_space<vmem>>, %arg4: memref<128x128xf32, #tpu.memory_space<vmem>>, %arg5: memref<128x128xf32, #tpu.memory_space<vmem>>, %arg6: memref<128x128xf32, #tpu.memory_space<vmem>>, %arg7: memref<128x128xf32, #tpu.memory_space<vmem>>, %arg8: memref<256x128xf32, #tpu.memory_space<vmem>>) attributes {dimension_semantics = [#tpu.dimension_semantics<parallel>], iteration_bounds = array<i64: 1>, scalar_prefetch = 1 : i64, scratch_operands = 0 : i64, tpu.core_type = #tpu.core_type<tc>, window_params = [{transform_indices = @transform_0, window_bounds = array<i64: 256, 1>}, {pipeline_mode = #tpu.pipeline_mode<synchronous>, transform_indices = @transform_1, window_bounds = array<i64: 128, 128>}, {pipeline_mode = #tpu.pipeline_mode<synchronous>, transform_indices = @transform_2, window_bounds = array<i64: 128, 128>}, {pipeline_mode = #tpu.pipeline_mode<synchronous>, transform_indices = @transform_3, window_bounds = array<i64: 128, 128>}, {pipeline_mode = #tpu.pipeline_mode<synchronous>, transform_indices = @transform_4, window_bounds = array<i64: 128, 128>}, {pipeline_mode = #tpu.pipeline_mode<synchronous>, transform_indices = @transform_5, window_bounds = array<i64: 128, 128>}, {transform_indices = @transform_6, window_bounds = array<i64: 256, 128>}]} {
    %c0 = arith.constant 0 : index
    %c0_0 = arith.constant 0 : index
    %0 = vector.load %arg2[%c0, %c0_0] : memref<256x1xi32, #tpu.memory_space<vmem>>, vector<256x1xi32>
    %c0_1 = arith.constant 0 : index
    %c0_2 = arith.constant 0 : index
    %1 = vector.load %arg3[%c0_1, %c0_2] : memref<128x128xf32, #tpu.memory_space<vmem>>, vector<128x128xf32>
    %2 = tpu.iota {dimensions = array<i32: 1>} : vector<256x128xi32>
    %3 = vector.broadcast %0 : vector<256x1xi32> to vector<256x128xi32>
    %4 = arith.cmpi eq, %3, %2 : vector<256x128xi32>
    %5 = arith.extui %4 : vector<256x128xi1> to vector<256x128xi32>
    %6 = arith.sitofp %5 : vector<256x128xi32> to vector<256x128xf32>
    %cst = arith.constant dense<0.000000e+00> : vector<256x128xf32>
    %7 = tpu.matmul %6, %1, %cst {dimension_numbers = #tpu.dot_dimension_numbers<[1], [0], [0], [1], [0, 0, 1, 1], [], []>, precision = #tpu.contract_precision<fp32>} : vector<256x128xf32>, vector<128x128xf32>, vector<256x128xf32> -> vector<256x128xf32>
    %c0_3 = arith.constant 0 : index
    %c0_4 = arith.constant 0 : index
    %8 = vector.load %arg8[%c0_3, %c0_4] : memref<256x128xf32, #tpu.memory_space<vmem>>, vector<256x128xf32>
    tpu.vector_store %arg8[%c0_3, %c0_4], %7 {strides = array<i32>} : memref<256x128xf32, #tpu.memory_space<vmem>>, vector<256x128xf32>,
    %9 = arith.index_cast %arg0 : i32 to index
    %c0_5 = arith.constant 0 : index
    %10 = memref.load %arg1[%9, %c0_5] : memref<1x2xi32, #tpu.memory_space<smem>>
    %c0_i32 = arith.constant 0 : i32
    %11 = arith.cmpi sgt, %10, %c0_i32 : i32
    %12 = arith.extui %11 : i1 to i32
    %c0_i32_6 = arith.constant 0 : i32
    %13 = arith.cmpi ne, %12, %c0_i32_6 : i32
    scf.if %13 {
      %c0_9 = arith.constant 0 : index
      %c0_10 = arith.constant 0 : index
      %19 = vector.load %arg4[%c0_9, %c0_10] : memref<128x128xf32, #tpu.memory_space<vmem>>, vector<128x128xf32>
      %c0_11 = arith.constant 0 : index
      %c0_12 = arith.constant 0 : index
      %20 = vector.load %arg5[%c0_11, %c0_12] : memref<128x128xf32, #tpu.memory_space<vmem>>, vector<128x128xf32>
      %c16_i32 = arith.constant 16 : i32
      %21 = vector.broadcast %c16_i32 : i32 to vector<256x1xi32>
      %22 = arith.subi %0, %21 : vector<256x1xi32>
      %23 = tpu.iota {dimensions = array<i32: 1>} : vector<256x128xi32>
      %24 = vector.broadcast %22 : vector<256x1xi32> to vector<256x128xi32>
      %25 = arith.cmpi eq, %24, %23 : vector<256x128xi32>
      %26 = arith.extui %25 : vector<256x128xi1> to vector<256x128xi32>
      %27 = arith.sitofp %26 : vector<256x128xi32> to vector<256x128xf32>
      %cst_13 = arith.constant dense<0.000000e+00> : vector<256x128xf32>
      %28 = tpu.matmul %27, %19, %cst_13 {dimension_numbers = #tpu.dot_dimension_numbers<[1], [0], [0], [1], [0, 0, 1, 1], [], []>, precision = #tpu.contract_precision<fp32>} : vector<256x128xf32>, vector<128x128xf32>, vector<256x128xf32> -> vector<256x128xf32>
      %cst_14 = arith.constant dense<0.000000e+00> : vector<256x128xf32>
      %29 = tpu.matmul %28, %20, %cst_14 {dimension_numbers = #tpu.dot_dimension_numbers<[1], [0], [0], [1], [0, 0, 1, 1], [], []>, precision = #tpu.contract_precision<fp32>} : vector<256x128xf32>, vector<128x128xf32>, vector<256x128xf32> -> vector<256x128xf32>
      %c0_15 = arith.constant 0 : index
      %c0_16 = arith.constant 0 : index
      %30 = vector.load %arg8[%c0_15, %c0_16] : memref<256x128xf32, #tpu.memory_space<vmem>>, vector<256x128xf32>
      %31 = arith.addf %30, %29 : vector<256x128xf32>
      %c0_17 = arith.constant 0 : index
      %c0_18 = arith.constant 0 : index
      %32 = vector.load %arg8[%c0_17, %c0_18] : memref<256x128xf32, #tpu.memory_space<vmem>>, vector<256x128xf32>
      tpu.vector_store %arg8[%c0_17, %c0_18], %31 {strides = array<i32>} : memref<256x128xf32, #tpu.memory_space<vmem>>, vector<256x128xf32>,
    } else {
    }
    %14 = arith.index_cast %arg0 : i32 to index
    %c1 = arith.constant 1 : index
    %15 = memref.load %arg1[%14, %c1] : memref<1x2xi32, #tpu.memory_space<smem>>
    %c0_i32_7 = arith.constant 0 : i32
    %16 = arith.cmpi sgt, %15, %c0_i32_7 : i32
    %17 = arith.extui %16 : i1 to i32
    %c0_i32_8 = arith.constant 0 : i32
    %18 = arith.cmpi ne, %17, %c0_i32_8 : i32
    scf.if %18 {
      %c0_9 = arith.constant 0 : index
      %c0_10 = arith.constant 0 : index
      %19 = vector.load %arg6[%c0_9, %c0_10] : memref<128x128xf32, #tpu.memory_space<vmem>>, vector<128x128xf32>
      %c0_11 = arith.constant 0 : index
      %c0_12 = arith.constant 0 : index
      %20 = vector.load %arg7[%c0_11, %c0_12] : memref<128x128xf32, #tpu.memory_space<vmem>>, vector<128x128xf32>
      %c32_i32 = arith.constant 32 : i32
      %21 = vector.broadcast %c32_i32 : i32 to vector<256x1xi32>
      %22 = arith.subi %0, %21 : vector<256x1xi32>
      %23 = tpu.iota {dimensions = array<i32: 1>} : vector<256x128xi32>
      %24 = vector.broadcast %22 : vector<256x1xi32> to vector<256x128xi32>
      %25 = arith.cmpi eq, %24, %23 : vector<256x128xi32>
      %26 = arith.extui %25 : vector<256x128xi1> to vector<256x128xi32>
      %27 = arith.sitofp %26 : vector<256x128xi32> to vector<256x128xf32>
      %cst_13 = arith.constant dense<0.000000e+00> : vector<256x128xf32>
      %28 = tpu.matmul %27, %19, %cst_13 {dimension_numbers = #tpu.dot_dimension_numbers<[1], [0], [0], [1], [0, 0, 1, 1], [], []>, precision = #tpu.contract_precision<fp32>} : vector<256x128xf32>, vector<128x128xf32>, vector<256x128xf32> -> vector<256x128xf32>
      %cst_14 = arith.constant dense<0.000000e+00> : vector<256x128xf32>
      %29 = tpu.matmul %28, %20, %cst_14 {dimension_numbers = #tpu.dot_dimension_numbers<[1], [0], [0], [1], [0, 0, 1, 1], [], []>, precision = #tpu.contract_precision<fp32>} : vector<256x128xf32>, vector<128x128xf32>, vector<256x128xf32> -> vector<256x128xf32>
      %c0_15 = arith.constant 0 : index
      %c0_16 = arith.constant 0 : index
      %30 = vector.load %arg8[%c0_15, %c0_16] : memref<256x128xf32, #tpu.memory_space<vmem>>, vector<256x128xf32>
      %31 = arith.addf %30, %29 : vector<256x128xf32>
      %c0_17 = arith.constant 0 : index
      %c0_18 = arith.constant 0 : index
      %32 = vector.load %arg8[%c0_17, %c0_18] : memref<256x128xf32, #tpu.memory_space<vmem>>, vector<256x128xf32>
      tpu.vector_store %arg8[%c0_17, %c0_18], %31 {strides = array<i32>} : memref<256x128xf32, #tpu.memory_space<vmem>>, vector<256x128xf32>,
    } else {
    }
    return
  }
  func.func @transform_0(%arg0: i32, %arg1: memref<1x2xi32, #tpu.memory_space<smem>>) -> (i32, i32) {
    %c0_i32 = arith.constant 0 : i32
    %c0_i32_0 = arith.constant 0 : i32
    return %arg0, %c0_i32 : i32, i32
  }
  func.func @transform_1(%arg0: i32, %arg1: memref<1x2xi32, #tpu.memory_space<smem>>) -> (i32, i32) {
    %c0_i32 = arith.constant 0 : i32
    %c0_i32_0 = arith.constant 0 : i32
    %c0_i32_1 = arith.constant 0 : i32
    return %c0_i32, %c0_i32_0 : i32, i32
  }
  func.func @transform_2(%arg0: i32, %arg1: memref<1x2xi32, #tpu.memory_space<smem>>) -> (i32, i32) {
    %c0_i32 = arith.constant 0 : i32
    %c0_i32_0 = arith.constant 0 : i32
    %c0_i32_1 = arith.constant 0 : i32
    return %c0_i32, %c0_i32_0 : i32, i32
  }
  func.func @transform_3(%arg0: i32, %arg1: memref<1x2xi32, #tpu.memory_space<smem>>) -> (i32, i32) {
    %c0_i32 = arith.constant 0 : i32
    %c0_i32_0 = arith.constant 0 : i32
    %c0_i32_1 = arith.constant 0 : i32
    return %c0_i32, %c0_i32_0 : i32, i32
  }
  func.func @transform_4(%arg0: i32, %arg1: memref<1x2xi32, #tpu.memory_space<smem>>) -> (i32, i32) {
    %c0_i32 = arith.constant 0 : i32
    %c0_i32_0 = arith.constant 0 : i32
    %c0_i32_1 = arith.constant 0 : i32
    return %c0_i32, %c0_i32_0 : i32, i32
  }
  func.func @transform_5(%arg0: i32, %arg1: memref<1x2xi32, #tpu.memory_space<smem>>) -> (i32, i32) {
    %c0_i32 = arith.constant 0 : i32
    %c0_i32_0 = arith.constant 0 : i32
    %c0_i32_1 = arith.constant 0 : i32
    return %c0_i32, %c0_i32_0 : i32, i32
  }
  func.func @transform_6(%arg0: i32, %arg1: memref<1x2xi32, #tpu.memory_space<smem>>) -> (i32, i32) {
    %c0_i32 = arith.constant 0 : i32
    %c0_i32_0 = arith.constant 0 : i32
    return %arg0, %c0_i32 : i32, i32
  }
}

</mosaic_0001>

<bundles_post_ra>
// kernel: _forward_impl.1
= control target key start
LH: loop header
LB: loop body
LE: loop exit
PB: predicated region body
PF: predicated region fallthrough
CT: control target
= control target key end

     0   :  { %s23402_s0 = inlined_call_operand.vmem [shape: s32[1,2], index: 0, kind: input, shape index: {}]   ;;  %s23403_s1 = inlined_call_operand.vmem [shape: s32[256,1], index: 1, kind: input, shape index: {}]   ;;  %s23404_s2 = inlined_call_operand.hbm [shape: f32[128,128], index: 2, kind: input, shape index: {}]   ;;  %s23405_s3 = inlined_call_operand.hbm [shape: f32[128,128], index: 3, kind: input, shape index: {}]   ;;  %s23406_s4 = inlined_call_operand.hbm [shape: f32[128,128], index: 4, kind: input, shape index: {}]   ;;  %s23407_s5 = inlined_call_operand.vmem [shape: f32[128,128], index: 5, kind: input, shape index: {}]   ;;  %s23408_s6 = inlined_call_operand.vmem [shape: f32[128,128], index: 6, kind: input, shape index: {}]   ;;  %s23409_s7 = inlined_call_operand.vmem [shape: f32[256,128], index: 7, kind: output, shape index: {}]  }
   0x1   :  { %s12_s26 = sshll.u32 %s23402_s0, 4  ;;  %s13_s26 = int_to_ptr.vmem [resolvable:$true] %s12_s26 }
   0x2   :  { %s15249_s27 = scalar_lea.vmem %s13_s26, 16  ;;  %p15254_p1 = scmp.lt.s32.totalorder %s13_s26, %s13_s26 }
   0x3   :  { %p15250_p0 = scmp.ne.s32.totalorder %s13_s26, %s15249_s27  ;;  %p15255_p2 = scmp.lt.s32.totalorder %s15249_s27, %s15249_s27 }
   0x5   :  { %p15256_p3 = por %p15255_p2, %p15254_p1 }
   0x7   :  { %p15257_p4 = pnand %p15256_p3, %p15250_p0 }
   0x9   :  { %15260 = shalt.err (!%p15257_p4)  }
   0xa   :  { %s15327_s28 = smov [#allocation3]  }
   0xb   :  { %15 = dma.vmem_to_smem %s13_s26, 16, %s15327_s28, [#allocation2] }
   0xc   :  { %15321 = dma.done.wait [#allocation2], 16 }
   0xd   :  { %15322 = vsyncadd [#allocation2], 4294967280 }
   0xe   :  { %17 = sfence }
   0xf   :  { %18 = vsyncpa [#allocation5], 0 }
  0x10   :  { %19 = vsyncpa [#allocation7], 0  ;;  %s15328_s29 = smov [#allocation6]   ;;  %s15329_s8 = smov [#allocation4]  }
  0x11   :  { %s39_s30 = sshll.u32 %s15328_s29, 4  ;;  %s27_s9 = sshll.u32 %s15329_s8, 4  ;;  %s40_s30 = int_to_ptr.vmem [resolvable:$true] %s39_s30  ;;  %s28_s9 = int_to_ptr.vmem [resolvable:$true] %s27_s9 }
  0x12   :  { %s15269_s0 = scalar_lea.vmem %s40_s30, 2048  ;;  %p15274_p6 = scmp.lt.s32.totalorder %s40_s30, %s40_s30 }
  0x13   :  { %p15270_p5 = scmp.ne.s32.totalorder %s40_s30, %s15269_s0  ;;  %p15275_p7 = scmp.lt.s32.totalorder %s15269_s0, %s15269_s0 }
  0x15   :  { %p15276_p8 = por %p15275_p7, %p15274_p6 }
  0x17   :  { %p15277_p9 = pnand %p15276_p8, %p15270_p5 }
  0x19   :  { %15280 = shalt.err (!%p15277_p9)
}
  0x1a   :  { %s15330_s10 = smov 128   ;;  %s15331_s11 = smov 8  }
  0x1b   :  { %45 = dma.hbm_to_vmem [thread:$0]  %s23405_s3, 2048, %s40_s30, [#allocation7], %s15330_s10, %s15330_s10, %s15331_s11  }
  0x1c   :  { %s15289_s14 = scalar_lea.vmem %s28_s9, 2048  ;;  %p15294_p11 = scmp.lt.s32.totalorder %s28_s9, %s28_s9 }
  0x1d   :  { %p15290_p10 = scmp.ne.s32.totalorder %s28_s9, %s15289_s14  ;;  %p15295_p12 = scmp.lt.s32.totalorder %s15289_s14, %s15289_s14 }
  0x1f   :  { %p15296_p13 = por %p15295_p12, %p15294_p11 }
  0x21   :  { %p15297_p0 = pnand %p15296_p13, %p15290_p10 }
  0x23   :  { %15300 = shalt.err (!%p15297_p0)
}
  0x24   :  { %33 = dma.hbm_to_vmem [thread:$0]  %s23404_s2, 2048, %s28_s9, [#allocation5], %s15330_s10, %s15330_s10, %s15331_s11  }
  0x25   :  { %s15332_s17 = smov [#allocation8]  }
  0x26   :  { %s51_s18 = sshll.u32 %s15332_s17, 4  ;;  %s52_s18 = int_to_ptr.vmem [resolvable:$true] %s51_s18 }
  0x27   :  { %s15309_s19 = scalar_lea.vmem %s52_s18, 2048  ;;  %p15314_p2 = scmp.lt.s32.totalorder %s52_s18, %s52_s18 }
  0x28   :  { %p15310_p1 = scmp.ne.s32.totalorder %s52_s18, %s15309_s19  ;;  %p15315_p3 = scmp.lt.s32.totalorder %s15309_s19, %s15309_s19 }
  0x2a   :  { %p15316_p4 = por %p15315_p3, %p15314_p2 }
  0x2c   :  { %p15317_p5 = pnand %p15316_p4, %p15310_p1 }
  0x2e   :  { %15320 = shalt.err (!%p15317_p5)
}
  0x2f   :  { %57 = dma.hbm_to_vmem [thread:$0]  %s23406_s4, 2048, %s52_s18, [#allocation7], %s15330_s10, %s15330_s10, %s15331_s11  }
  0x30   :  { %15323 = dma.done.wait [#allocation5], 2048  }
  0x31   :  { %15324 = vsyncadd [#allocation5], 4294965248 }
  0x32   :  { %15325 = dma.done.wait [#allocation7], 4096  }
  0x33   :  { %15326 = vsyncadd [#allocation7], 4294963200  ;;  %s15394_s21 = sld [smem:[#allocation3]]  ;;  %v15333_v0 = vmov 0   ;;  %v15399_v1 = vld [vmem:[%s23403_s1 + $0x10] sm:$0xff]  ;;  %v15404_v2 = vld [vmem:[%s23403_s1] sm:$0xff] }
  0x34   :  { %15244 = vset.pattern.permute.xlu1 %v15333_v0  ;;  %15243 = vset.pattern.permute.xlu0 %v15333_v0  ;;  %24170 = vst [vmem:[#allocation12_spill] sm:$0xff] %v15399_v1  ;;  %24171 = vst [vmem:[#allocation13_spill] sm:$0xff] %v15404_v2  ;;  %v15411_v3 = vld [vmem:[%s23403_s1 + $0x18] sm:$0xff]  ;;  %v15416_v4 = vld [vmem:[%s23403_s1 + $0x8] sm:$0xff] }
  0x35   :  { %128 = vperm.xlu1 %15244, %v15399_v1   ;;  %122 = vperm.xlu0 %15243, %v15404_v2   ;;  %24172 = vst [vmem:[#allocation14_spill] sm:$0xff] %v15411_v3  ;;  %24173 = vst [vmem:[#allocation15_spill] sm:$0xff] %v15416_v4  ;;  %v15423_v5 = vld [vmem:[%s23403_s1 + $0x28] sm:$0xff]  ;;  %v15428_v6 = vld [vmem:[%s23403_s1 + $0x20] sm:$0xff] }
  0x36   :  { %24174 = vst [vmem:[#allocation16_spill] sm:$0xff] %v15423_v5  ;;  %24175 = vst [vmem:[#allocation17_spill] sm:$0xff] %v15428_v6  ;;  %v15435_v7 = vld [vmem:[%s23403_s1 + $0x38] sm:$0xff]  ;;  %v15440_v8 = vld [vmem:[%s23403_s1 + $0x30] sm:$0xff] }
  0x37   :  { %24176 = vst [vmem:[#allocation18_spill] sm:$0xff] %v15435_v7  ;;  %24177 = vst [vmem:[#allocation19_spill] sm:$0xff] %v15440_v8  ;;  %v118_v9 = vld [vmem:[#allocation4 + $0x78] sm:$0xff]  ;;  %v117_v11 = vld [vmem:[#allocation4 + $0x70] sm:$0xff] }
  0x38   :  { %v15442_v10 = vand.u32 4294901760, %v118_v9  ;;  %v116_v12 = vld [vmem:[#allocation4 + $0x68] sm:$0xff]  ;;  %v115_v13 = vld [vmem:[#allocation4 + $0x60] sm:$0xff]  ;;  %v15444_v14 = vand.u32 4294901760, %v117_v11  ;;  %v114_v17 = vld [vmem:[#allocation4 + $0x58] sm:$0xff] }
  0x39   :  { %131 = vperm.xlu1 %15244, %v15411_v3   ;;  %125 = vperm.xlu0 %15243, %v15416_v4   ;;  %v15446_v15 = vand.u32 4294901760, %v116_v12  ;;  %v15448_v16 = vand.u32 4294901760, %v115_v13  ;;  %v113_v18 = vld [vmem:[#allocation4 + $0x50] sm:$0xff]  ;;  %v15455_v20 = vand.u32 4294901760, %v114_v17  ;;  %v15460_v21 = vld [vmem:[%s23403_s1 + $0x48] sm:$0xff]  ;;  %v15465_v22 = vld [vmem:[%s23403_s1 + $0x40] sm:$0xff] }
  0x3a   :  { %v15453_v19 = vsub.f32 %v118_v9, %v15442_v10  ;;  %24178 = vst [vmem:[#allocation20_spill] sm:$0xff] %v15460_v21  ;;  %24179 = vst [vmem:[#allocation21_spill] sm:$0xff] %v15465_v22  ;;  %v15468_v23 = vsub.f32 %v117_v11, %v15444_v14  ;;  %12828 = vmatprep.subr.mxu0 %v15442_v10  ;;  %v15481_v27 = vand.u32 4294901760, %v113_v18  ;;  %v112_v28 = vld [vmem:[#allocation4 + $0x48] sm:$0xff]  ;;  %v111_v33 = vld [vmem:[#allocation4 + $0x40] sm:$0xff]  ;;  %p11065_p6 = scmp.le.s32.totalorder %s15394_s21, 0 }
  0x3b   :  { %v15471_v24 = vsub.f32 %v116_v12, %v15446_v15  ;;  %v15474_v25 = vsub.f32 %v115_v13, %v15448_v16  ;;  %12829 = vmatpush3.msra.mxu0 %v15442_v10  ;;  %v15490_v31 = vsub.f32 %v114_v17, %v15455_v20  ;;  %v15500_v34 = vld [vmem:[%s23403_s1 + $0x58] sm:$0xff]  ;;  %v15505_v35 = vld [vmem:[%s23403_s1 + $0x50] sm:$0xff]  ;;  %v15513_v38 = vand.u32 4294901760, %v112_v28  ;;  %v15532_v46 = vld [vmem:[%s23403_s1 + $0x68] sm:$0xff] }
  0x3c   :  { %v15478_v26 = vand.u32 4294901760, %v15453_v19  ;;  %v15484_v29 = vand.u32 4294901760, %v15468_v23  ;;  %12830 = vmatprep.subr.mxu0 %v15444_v14  ;;  %24180 = vst [vmem:[#allocation22_spill] sm:$0xff] %v15500_v34  ;;  %24181 = vst [vmem:[#allocation23_spill] sm:$0xff] %v15505_v35  ;;  %v15518_v41 = vsub.f32 %v113_v18, %v15481_v27  ;;  %v15525_v44 = vand.u32 4294901760, %v111_v33  ;;  %v110_v45 = vld [vmem:[#allocation4 + $0x38] sm:$0xff] }
  0x3d   :  { %137 = vperm.xlu1 %15244, %v15423_v5   ;;  %134 = vperm.xlu0 %15243, %v15428_v6   ;;  %v15487_v30 = vand.u32 4294901760, %v15471_v24  ;;  %v15510_v37 = vand.u32 4294901760, %v15474_v25  ;;  %v15522_v43 = vand.u32 4294901760, %v15490_v31  ;;  %24182 = vst [vmem:[#allocation24_spill] sm:$0xff] %v15532_v46  ;;  %v15537_v47 = vld [vmem:[%s23403_s1 + $0x60] sm:$0xff]  ;;  %v15542_v49 = vsub.f32 %v112_v28, %v15513_v38  ;;  %v109_v53 = vld [vmem:[#allocation4 + $0x30] sm:$0xff] }
  0x3e   :  { %v718_v32 = vsub.f32 %v15453_v19, %v15478_v26  ;;  %v725_v36 = vsub.f32 %v15468_v23, %v15484_v29  ;;  %12831 = vmatpush3.msra.mxu0 %v15444_v14  ;;  %24183 = vst [vmem:[#allocation25_spill] sm:$0xff] %v15537_v47  ;;  %v15546_v51 = vand.u32 4294901760, %v15518_v41  ;;  %v15549_v52 = vand.u32 4294901760, %v110_v45  ;;  %v108_v56 = vld [vmem:[#allocation4 + $0x28] sm:$0xff]  ;;  %v15562_v57 = vld [vmem:[%s23403_s1 + $0x78] sm:$0xff]  ;;  %v15567_v58 = vld [vmem:[%s23403_s1 + $0x70] sm:$0xff] }
  0x3f   :  { %v732_v40 = vsub.f32 %v15471_v24, %v15487_v30  ;;  %12832 = vmatprep.subr.mxu0 %v15446_v15  ;;  %v739_v48 = vsub.f32 %v15474_v25, %v15510_v37  ;;  %v746_v54 = vsub.f32 %v15490_v31, %v15522_v43  ;;  %v15554_v55 = vsub.f32 %v111_v33, %v15525_v44  ;;  %v107_v12 = vld [vmem:[#allocation4 + $0x20] sm:$0xff]  ;;  %v15592_v13 = vld [vmem:[%s23403_s1 + $0x88] sm:$0xff] }
  0x40   :  { %v719_v39 = vand.u32 4294901760, %v718_v32  ;;  %v726_v42 = vand.u32 4294901760, %v725_v36  ;;  %12833 = vmatpush3.msra.mxu0 %v15446_v15  ;;  %24184 = vst [vmem:[#allocation26_spill] sm:$0xff] %v15562_v57  ;;  %24185 = vst [vmem:[#allocation27_spill] sm:$0xff] %v15567_v58  ;;  %v15570_v60 = vand.u32 4294901760, %v15542_v49  ;;  %v15573_v61 = vand.u32 4294901760, %v109_v53 }
  0x41   :  { %143 = vperm.xlu1 %15244, %v15435_v7   ;;  %140 = vperm.xlu0 %15243, %v15440_v8   ;;  %v733_v50 = vand.u32 4294901760, %v732_v40  ;;  %v740_v59 = vand.u32 4294901760, %v739_v48  ;;  %v753_v62 = vsub.f32 %v15518_v41, %v15546_v51  ;;  %v15578_v63 = vsub.f32 %v110_v45, %v15549_v52  ;;  %24188 = vst [vmem:[#allocation30_spill] sm:$0xff] %v15592_v13  ;;  %v15597_v17 = vld [vmem:[%s23403_s1 + $0x80] sm:$0xff]  ;;  %v105_v45 = vld [vmem:[#allocation4 + $0x10] sm:$0xff]  ;;  %v15622_v48 = vld [vmem:[%s23403_s1 + $0x98] sm:$0xff] }
  0x42   :  { %12908 = vmatprep.subr.mxu1 %v719_v39  ;;  %12834 = vmatprep.subr.mxu0 %v15448_v16  ;;  %24186 = vst [vmem:[#allocation28_spill] sm:$0xff] %v15570_v60  ;;  %v747_v0 = vand.u32 4294901760, %v746_v54  ;;  %v15582_v9 = vand.u32 4294901760, %v15554_v55  ;;  %v15585_v11 = vand.u32 4294901760, %v108_v56  ;;  %24189 = vst [vmem:[#allocation31_spill] sm:$0xff] %v15597_v17  ;;  %v760_v18 = vsub.f32 %v15542_v49, %v15570_v60 }
  0x43   :  { %12909 = vmatpush3.msra.mxu1 %v719_v39  ;;  %12835 = vmatpush3.msra.mxu0 %v15448_v16  ;;  %v15602_v28 = vsub.f32 %v109_v53, %v15573_v61  ;;  %v754_v32 = vand.u32 4294901760, %v753_v62  ;;  %v15606_v33 = vand.u32 4294901760, %v15578_v63  ;;  %v15609_v36 = vand.u32 4294901760, %v107_v12  ;;  %v106_v39 = vld [vmem:[#allocation4 + $0x18] sm:$0xff]  ;;  %24192 = vst [vmem:[#allocation34_spill] sm:$0xff] %v15622_v48 }
  0x44   :  { %12910 = vmatprep.subr.mxu1 %v726_v42  ;;  %12836 = vmatprep.subr.mxu0 %v15455_v20  ;;  %24187 = vst [vmem:[#allocation29_spill] sm:$0xff] %v15582_v9  ;;  %v767_v40 = vsub.f32 %v15554_v55, %v15582_v9  ;;  %v761_v53 = vand.u32 4294901760, %v760_v18  ;;  %v15645_v18 = vand.u32 4294901760, %v105_v45  ;;  %v24218_v5 = vmov 0.0  }
  0x45   :  { %149 = vperm.xlu1 %15244, %v15460_v21   ;;  %146 = vperm.xlu0 %15243, %v15465_v22   ;;  %24190 = vst [vmem:[#allocation32_spill] sm:$0xff] %v15606_v33  ;;  %24191 = vst [vmem:[#allocation33_spill] sm:$0xff] %v15609_v36  ;;  %v15630_v54 = vand.u32 4294901760, %v15602_v28  ;;  %v15638_v62 = vsub.f32 %v107_v12, %v15609_v36  ;;  %v15652_v12 = vld [vmem:[%s23403_s1 + $0xa8] sm:$0xff] }
  0x46   :  { %12911 = vmatpush3.msra.mxu1 %v726_v42  ;;  %12837 = vmatpush3.msra.mxu0 %v15455_v20  ;;  %v15614_v42 = vsub.f32 %v108_v56, %v15585_v11  ;;  %v15633_v56 = vand.u32 4294901760, %v106_v39  ;;  %24196 = vst [vmem:[#allocation38_spill] sm:$0xff] %v15652_v12 }
  0x47   :  { %12912 = vmatprep.subr.mxu1 %v733_v50  ;;  %12838 = vmatprep.subr.mxu0 %v15481_v27  ;;  %24194 = vst [vmem:[#allocation36_spill] sm:$0xff] %v15630_v54 }
  0x48   :  { %12913 = vmatpush3.msra.mxu1 %v733_v50  ;;  %12839 = vmatpush3.msra.mxu0 %v15481_v27  ;;  %v15627_v50 = vld [vmem:[%s23403_s1 + $0x90] sm:$0xff] }
  0x49   :  { %155 = vperm.xlu1 %15244, %v15500_v34   ;;  %152 = vperm.xlu0 %15243, %v15505_v35   ;;  %24193 = vst [vmem:[#allocation35_spill] sm:$0xff] %v15627_v50  ;;  %v15674_v35 = vsub.f32 %v105_v45, %v15645_v18 }
  0x4a   :  { %12914 = vmatprep.subr.mxu1 %v740_v59  ;;  %12840 = vmatprep.subr.mxu0 %v15513_v38 }
  0x4b   :  { %12915 = vmatpush3.msra.mxu1 %v740_v59  ;;  %12841 = vmatpush3.msra.mxu0 %v15513_v38  ;;  %v774_v59 = vsub.f32 %v15578_v63, %v15606_v33 }
  0x4c   :  { %12916 = vmatprep.subr.mxu1 %v747_v0  ;;  %12842 = vmatprep.subr.mxu0 %v15525_v44 }
  0x4d   :  { %161 = vperm.xlu1 %15244, %v15532_v46   ;;  %158 = vperm.xlu0 %15243, %v15537_v47   ;;  %v103_v47 = vld [vmem:[#allocation4] sm:$0xff] }
  0x4e   :  { %12917 = vmatpush3.msra.mxu1 %v747_v0  ;;  %12843 = vmatpush3.msra.mxu0 %v15525_v44  ;;  %v15642_v0 = vand.u32 4294901760, %v15614_v42 }
  0x4f   :  { %12918 = vmatprep.subr.mxu1 %v754_v32  ;;  %12844 = vmatprep.subr.mxu0 %v15549_v52 }
  0x50   :  { %12919 = vmatpush3.msra.mxu1 %v754_v32  ;;  %24195 = vst [vmem:[#allocation37_spill] sm:$0xff] %v15642_v0  ;;  %12845 = vmatpush3.msra.mxu0 %v15549_v52  ;;  %v15657_v32 = vld [vmem:[%s23403_s1 + $0xa0] sm:$0xff]  ;;  %v788_v46 = vsub.f32 %v15614_v42, %v15642_v0 }
  0x51   :  { %167 = vperm.xlu1 %15244, %v15562_v57   ;;  %164 = vperm.xlu0 %15243, %v15567_v58   ;;  %24197 = vst [vmem:[#allocation39_spill] sm:$0xff] %v15657_v32  ;;  %v15662_v58 = vsub.f32 %v106_v39, %v15633_v56  ;;  %v15682_v39 = vld [vmem:[%s23403_s1 + $0xb8] sm:$0xff] }
  0x52   :  { %12920 = vmatprep.subr.mxu1 %v761_v53  ;;  %12846 = vmatprep.subr.mxu0 %v15573_v61  ;;  %24199 = vst [vmem:[#allocation41_spill] sm:$0xff] %v15682_v39  ;;  %v789_v22 = vand.u32 4294901760, %v788_v46 }
  0x53   :  { %12921 = vmatpush3.msra.mxu1 %v761_v53  ;;  %12847 = vmatpush3.msra.mxu0 %v15573_v61  ;;  %v15687_v53 = vld [vmem:[%s23403_s1 + $0xb0] sm:$0xff]  ;;  %v15690_v45 = vand.u32 4294901760, %v15662_v58 }
  0x54   :  { %12848 = vmatprep.subr.mxu0 %v15585_v11  ;;  %24200 = vst [vmem:[#allocation42_spill] sm:$0xff] %v15687_v53 }
  0x55   :  { %173 = vperm.xlu1 %15244, %v15592_v13   ;;  %170 = vperm.xlu0 %15243, %v15597_v17   ;;  %v768_v17 = vand.u32 4294901760, %v767_v40  ;;  %v104_v13 = vld [vmem:[#allocation4 + $0x8] sm:$0xff]  ;;  %v781_v40 = vsub.f32 %v15602_v28, %v15630_v54  ;;  %24201 = vst [vmem:[#allocation43_spill] sm:$0xff] %v15690_v45  ;;  %v802_v46 = vsub.f32 %v15662_v58, %v15690_v45 }
  0x56   :  { %v15669_v57 = vand.u32 4294901760, %v104_v13  ;;  %12849 = vmatpush3.msra.mxu0 %v15585_v11 }
  0x57   :  { %12922 = vmatprep.subr.mxu1 %v768_v17  ;;  %12850 = vmatprep.subr.mxu0 %v15609_v36 }
  0x58   :  { %12923 = vmatpush3.msra.mxu1 %v768_v17  ;;  %v15698_v34 = vsub.f32 %v104_v13, %v15669_v57  ;;  %v15702_v17 = vand.u32 4294901760, %v15674_v35  ;;  %12851 = vmatpush3.msra.mxu0 %v15609_v36  ;;  %v15715_v13 = vld [vmem:[%s23403_s1 + $0xc0] sm:$0xff] }
  0x59   :  { %179 = vperm.xlu1 %15244, %v15622_v48   ;;  %176 = vperm.xlu0 %15243, %v15627_v50   ;;  %v775_v50 = vand.u32 4294901760, %v774_v59  ;;  %v15666_v48 = vand.u32 4294901760, %v15638_v62  ;;  %v782_v59 = vand.u32 4294901760, %v781_v40  ;;  %v15710_v40 = vld [vmem:[%s23403_s1 + $0xc8] sm:$0xff]  ;;  %24204 = vst [vmem:[#allocation46_spill] sm:$0xff] %v15715_v13 }
  0x5a   :  { %24202 = vst [vmem:[#allocation44_spill] sm:$0xff] %v15702_v17  ;;  %24203 = vst [vmem:[#allocation45_spill] sm:$0xff] %v15710_v40  ;;  %12852 = vmatprep.subr.mxu0 %v15633_v56  ;;  %v809_v21 = vsub.f32 %v15674_v35, %v15702_v17 }
  0x5b   :  { %24198 = vst [vmem:[#allocation40_spill] sm:$0xff] %v15666_v48  ;;  %12924 = vmatprep.subr.mxu1 %v775_v50  ;;  %12853 = vmatpush3.msra.mxu0 %v15633_v56 }
  0x5c   :  { %12925 = vmatpush3.msra.mxu1 %v775_v50  ;;  %12854 = vmatprep.subr.mxu0 %v15645_v18 }
  0x5d   :  { %185 = vperm.xlu1 %15244, %v15652_v12   ;;  %182 = vperm.xlu0 %15243, %v15657_v32   ;;  %v15693_v12 = vand.u32 4294901760, %v103_v47  ;;  %v795_v32 = vsub.f32 %v15638_v62, %v15666_v48 }
  0x5e   :  { %12926 = vmatprep.subr.mxu1 %v782_v59  ;;  %12855 = vmatpush3.msra.mxu0 %v15645_v18 }
  0x5f   :  { %v15720_v50 = vsub.f32 %v103_v47, %v15693_v12  ;;  %12927 = vmatpush3.msra.mxu1 %v782_v59  ;;  %v15735_v47 = vld [vmem:[%s23403_s1 + $0xd8] sm:$0xff]  ;;  %v803_v59 = vand.u32 4294901760, %v802_v46  ;;  %12856 = vmatprep.subr.mxu0 %v15669_v57  ;;  %v15760_v46 = vld [vmem:[%s23403_s1 + $0xe0] sm:$0xff] }
  0x60   :  { %12928 = vmatprep.subr.mxu1 %v789_v22  ;;  %24206 = vst [vmem:[#allocation48_spill] sm:$0xff] %v15735_v47  ;;  %12857 = vmatpush3.msra.mxu0 %v15669_v57  ;;  %24210 = vst [vmem:[#allocation52_spill] sm:$0xff] %v15760_v46 }
  0x61   :  { %191 = vperm.xlu1 %15244, %v15682_v39   ;;  %188 = vperm.xlu0 %15243, %v15687_v53   ;;  %v796_v53 = vand.u32 4294901760, %v795_v32  ;;  %v15724_v39 = vand.u32 4294901760, %v15698_v34  ;;  %v15740_v32 = vld [vmem:[%s23403_s1 + $0xd0] sm:$0xff]  ;;  %v15743_v8 = vand.u32 4294901760, %v15720_v50 }
  0x62   :  { %24207 = vst [vmem:[#allocation49_spill] sm:$0xff] %v15740_v32  ;;  %12929 = vmatpush3.msra.mxu1 %v789_v22  ;;  %v15755_v22 = vld [vmem:[%s23403_s1 + $0xe8] sm:$0xff]  ;;  %12858 = vmatprep.subr.mxu0 %v15693_v12 }
  0x63   :  { %24205 = vst [vmem:[#allocation47_spill] sm:$0xff] %v15724_v39  ;;  %24208 = vst [vmem:[#allocation50_spill] sm:$0xff] %v15743_v8  ;;  %12930 = vmatprep.subr.mxu1 %v796_v53  ;;  %12859 = vmatpush3.msra.mxu0 %v15693_v12 }
  0x64   :  { %12931 = vmatpush3.msra.mxu1 %v796_v53  ;;  %24209 = vst [vmem:[#allocation51_spill] sm:$0xff] %v15755_v22  ;;  %12988 = vmatprep.subr.mxu0 %v15453_v19 }
  0x65   :  { %197 = vperm.xlu1 %15244, %v15710_v40   ;;  %194 = vperm.xlu0 %15243, %v15715_v13   ;;  %v816_v13 = vsub.f32 %v15698_v34, %v15724_v39  ;;  %v810_v40 = vand.u32 4294901760, %v809_v21  ;;  %v823_v21 = vsub.f32 %v15720_v50, %v15743_v8 }
  0x66   :  { %12932 = vmatprep.subr.mxu1 %v803_v59 }
  0x67   :  { %12933 = vmatpush3.msra.mxu1 %v803_v59  ;;  %v817_v53 = vand.u32 4294901760, %v816_v13  ;;  %v824_v13 = vand.u32 4294901760, %v823_v21  ;;  %v119_v59 = vlaneseq }
  0x68   :  { %12934 = vmatprep.subr.mxu1 %v810_v40 }
  0x69   :  { %203 = vperm.xlu1 %15244, %v15735_v47   ;;  %200 = vperm.xlu0 %15243, %v15740_v32   ;;  %v15772_v32 = vld [vmem:[%s23403_s1 + $0xf8] sm:$0xff]  ;;  %v15777_v47 = vld [vmem:[%s23403_s1 + $0xf0] sm:$0xff] }
  0x6a   :  { %24211 = vst [vmem:[#allocation53_spill] sm:$0xff] %v15772_v32  ;;  %24212 = vst [vmem:[#allocation54_spill] sm:$0xff] %v15777_v47  ;;  %12935 = vmatpush3.msra.mxu1 %v810_v40  ;;  %v23437_v40 = vmov 0.0  }
  0x6b   :  { %12936 = vmatprep.subr.mxu1 %v817_v53 }
  0x6c   :  { %12937 = vmatpush3.msra.mxu1 %v817_v53 }
  0x6d   :  { %209 = vperm.xlu1 %15244, %v15755_v22   ;;  %206 = vperm.xlu0 %15243, %v15760_v46   ;;  %v15782_v46 = vand.u32 127, %v119_v59 }
  0x6e   :  { %12938 = vmatprep.subr.mxu1 %v824_v13 }
  0x6f   :  { %12939 = vmatpush3.msra.mxu1 %v824_v13  ;;  %24213 = vst [vmem:[#allocation55_spill] sm:$0xff] %v15782_v46  ;;  %v23558_v13 = vmov 1.0  }
  0x70   :  { %13068 = vmatprep.subr.mxu1 %v15442_v10 }
  0x71   :  { %215 = vperm.xlu1 %15244, %v15772_v32   ;;  %212 = vperm.xlu0 %15243, %v15777_v47  }
  0xb0   :  { %v15784_v22 = vpop.permute.xlu1 %128  ;;  %v15786_v7 = vpop.permute.xlu0 %122 }
  0xb1   :  { %24214 = vst [vmem:[#allocation56_spill] sm:$0xff] %v15784_v22  ;;  %24215 = vst [vmem:[#allocation57_spill] sm:$0xff] %v15786_v7  ;;  %vm219_vm0 = vcmp.eq.s32.totalorder %v15784_v22, %v15782_v46  ;;  %vm217_vm1 = vcmp.eq.s32.totalorder %v15786_v7, %v15782_v46 }
  0xb2   :  { %v10939_v21 = vsel %vm219_vm0, 1.0, %v23437_v40  ;;  %v10937_v53 = vsel %vm217_vm1, 1.0, %v23437_v40  ;;  %12940 = vmatprep.mubr.msk.f32.mxu1 %vm217_vm1, %v23558_v13 }
  0xb3   :  { %v15804_v59 = vsub.f32 %v10939_v21, %v10939_v21  ;;  %v15806_v47 = vsub.f32 %v10937_v53, %v10937_v53 }
  0xb4   :  { %v15808_v32 = vpop.permute.xlu1 %131  ;;  %v15810_v6 = vpop.permute.xlu0 %125 }
  0xb5   :  { %24216 = vst [vmem:[#allocation58_spill] sm:$0xff] %v15808_v32  ;;  %24217 = vst [vmem:[#allocation59_spill] sm:$0xff] %v15810_v6  ;;  %vm220_vm2 = vcmp.eq.s32.totalorder %v15808_v32, %v15782_v46  ;;  %vm218_vm3 = vcmp.eq.s32.totalorder %v15810_v6, %v15782_v46  ;;  %v24219_v2 = vand.u32 4294901760, %v15806_v47 }
  0xb6   :  { %v10940_v21 = vsel %vm220_vm2, 1.0, %v24218_v5  ;;  %v10938_v53 = vsel %vm218_vm3, 1.0, %v24218_v5  ;;  %12941 = vmatmul.mubr.msk.f32.vlgmr.msra.gmra.mxu1 %vm218_vm3, %v23558_v13 }
  0xb7   :  { %v15830_v3 = vsub.f32 %v10940_v21, %v10940_v21  ;;  %v15832_v40 = vsub.f32 %v10938_v53, %v10938_v53  ;;  %12943 = vmatprep.mubr.msk.f32.mxu1 %vm219_vm0, %v23558_v13  ;;  %v397_v1 = vsub.f32 %v15806_v47, %v24219_v2  ;;  %13069 = vmatpush3.msra.mxu1 %v15442_v10 }
  0xb8   :  { %v15841_v8 = vpop.permute.xlu1 %137  ;;  %v15843_v39 = vpop.permute.xlu0 %134  ;;  %13070 = vmatprep.subr.mxu1 %v15444_v14 }
  0xb9   :  { %24220 = vst [vmem:[#allocation60_spill] sm:$0xff] %v15841_v8  ;;  %24221 = vst [vmem:[#allocation61_spill] sm:$0xff] %v15843_v39  ;;  %vm222_vm4 = vcmp.eq.s32.totalorder %v15841_v8, %v15782_v46  ;;  %vm221_vm5 = vcmp.eq.s32.totalorder %v15843_v39, %v15782_v46  ;;  %v398_v21 = vand.u32 4294901760, %v397_v1  ;;  %v24222_v1 = vand.u32 4294901760, %v15804_v59  ;;  %13071 = vmatpush3.msra.mxu1 %v15444_v14 }
  0xba   :  { %v10942_v2 = vsel %vm222_vm4, 1.0, %v24218_v5  ;;  %v10941_v4 = vsel %vm221_vm5, 1.0, %v24218_v5  ;;  %12944 = vmatmul.mubr.msk.f32.gmra.mxu1 %vm220_vm2, %v23558_v13  ;;  %v23462_v22 = vand.u32 4294901760, %v15830_v3  ;;  %v24223_v17 = vand.u32 4294901760, %v15832_v40  ;;  %13072 = vmatprep.subr.mxu1 %v15446_v15 }
  0xbb   :  { %v417_v53 = vsub.f32 %v15804_v59, %v24222_v1  ;;  %v15868_v6 = vsub.f32 %v10942_v2, %v10942_v2  ;;  %v15870_v7 = vsub.f32 %v10941_v4, %v10941_v4  ;;  %12860 = vmatprep.mubr.f32.mxu0 %v398_v21  ;;  %12946 = vmatprep.mubr.msk.f32.mxu1 %vm221_vm5, %v23558_v13 }
  0xbc   :  { %v407_v32 = vsub.f32 %v15832_v40, %v24223_v17  ;;  %v15879_v45 = vpop.permute.xlu1 %143  ;;  %v15881_v48 = vpop.permute.xlu0 %140  ;;  %v427_v2 = vsub.f32 %v15830_v3, %v23462_v22  ;;  %13073 = vmatpush3.msra.mxu1 %v15446_v15 }
  0xbd   :  { %24224 = vst [vmem:[#allocation62_spill] sm:$0xff] %v15879_v45  ;;  %24225 = vst [vmem:[#allocation63_spill] sm:$0xff] %v15881_v48  ;;  %vm224_vm6 = vcmp.eq.s32.totalorder %v15879_v45, %v15782_v46  ;;  %vm223_vm7 = vcmp.eq.s32.totalorder %v15881_v48, %v15782_v46  ;;  %v23471_v22 = vand.u32 4294901760, %v15868_v6  ;;  %v24226_v0 = vand.u32 4294901760, %v15870_v7  ;;  %13074 = vmatprep.subr.mxu1 %v15448_v16 }
  0xbe   :  { %v408_v4 = vand.u32 4294901760, %v407_v32  ;;  %v10944_v17 = vsel %vm224_vm6, 1.0, %v24218_v5  ;;  %v10943_v1 = vsel %vm223_vm7, 1.0, %v24218_v5  ;;  %12947 = vmatmul.mubr.msk.f32.gmra.mxu1 %vm222_vm4, %v23558_v13  ;;  %v418_v32 = vand.u32 4294901760, %v417_v53 }
  0xbf   :  { %v15906_v21 = vsub.f32 %v10944_v17, %v10944_v17  ;;  %v15908_v39 = vsub.f32 %v10943_v1, %v10943_v1  ;;  %12949 = vmatprep.mubr.msk.f32.mxu1 %vm223_vm7, %v23558_v13  ;;  %v437_v54 = vsub.f32 %v15870_v7, %v24226_v0  ;;  %v428_v17 = vand.u32 4294901760, %v427_v2  ;;  %13075 = vmatpush3.msra.mxu1 %v15448_v16 }
  0xc0   :  { %12861 = vmatmul.mubr.f32.vlgmr.msra.gmra.mxu0 %v408_v4  ;;  %v15918_v8 = vpop.permute.xlu1 %149  ;;  %v15920_v53 = vpop.permute.xlu0 %146  ;;  %v447_v4 = vsub.f32 %v15868_v6, %v23471_v22  ;;  %13076 = vmatprep.subr.mxu1 %v15455_v20 }
  0xc1   :  { %12989 = vmatpush3.msra.mxu0 %v15453_v19  ;;  %24227 = vst [vmem:[#allocation64_spill] sm:$0xff] %v15918_v8  ;;  %12863 = vmatprep.mubr.f32.mxu0 %v418_v32  ;;  %24228 = vst [vmem:[#allocation65_spill] sm:$0xff] %v15920_v53  ;;  %vm226_vm8 = vcmp.eq.s32.totalorder %v15918_v8, %v15782_v46  ;;  %vm225_vm9 = vcmp.eq.s32.totalorder %v15920_v53, %v15782_v46  ;;  %v438_v0 = vand.u32 4294901760, %v437_v54 }
  0xc2   :  { %12990 = vmatprep.subr.mxu0 %v15468_v23  ;;  %v23477_v19 = vand.u32 4294901760, %v15908_v39  ;;  %v10946_v2 = vsel %vm226_vm8, 1.0, %v24218_v5  ;;  %v10945_v1 = vsel %vm225_vm9, 1.0, %v24218_v5  ;;  %12950 = vmatmul.mubr.msk.f32.gmra.mxu1 %vm224_vm6, %v23558_v13  ;;  %v23476_v54 = vand.u32 4294901760, %v15906_v21 }
  0xc3   :  { %12991 = vmatpush3.msra.mxu0 %v15468_v23  ;;  %v15946_v32 = vsub.f32 %v10946_v2, %v10946_v2  ;;  %v15948_v22 = vsub.f32 %v10945_v1, %v10945_v1  ;;  %12952 = vmatprep.mubr.msk.f32.mxu1 %vm225_vm9, %v23558_v13  ;;  %v448_v2 = vand.u32 4294901760, %v447_v4 }
  0xc4   :  { %12864 = vmatmul.mubr.f32.gmra.mxu0 %v428_v17  ;;  %v457_v48 = vsub.f32 %v15908_v39, %v23477_v19  ;;  %v15957_v45 = vpop.permute.xlu1 %155  ;;  %v15959_v23 = vpop.permute.xlu0 %152  ;;  %12992 = vmatprep.subr.mxu0 %v15471_v24  ;;  %v467_v17 = vsub.f32 %v15906_v21, %v23476_v54 }
  0xc5   :  { %24229 = vst [vmem:[#allocation66_spill] sm:$0xff] %v15957_v45  ;;  %12866 = vmatprep.mubr.f32.mxu0 %v438_v0  ;;  %24230 = vst [vmem:[#allocation67_spill] sm:$0xff] %v15959_v23  ;;  %vm228_vm10 = vcmp.eq.s32.totalorder %v15957_v45, %v15782_v46  ;;  %vm227_vm11 = vcmp.eq.s32.totalorder %v15959_v23, %v15782_v46  ;;  %12993 = vmatpush3.msra.mxu0 %v15471_v24  ;;  %v23484_v0 = vand.u32 4294901760, %v15948_v22 }
  0xc6   :  { %v458_v1 = vand.u32 4294901760, %v457_v48  ;;  %v10948_v4 = vsel %vm228_vm10, 1.0, %v24218_v5  ;;  %v10947_v54 = vsel %vm227_vm11, 1.0, %v24218_v5  ;;  %12953 = vmatmul.mubr.msk.f32.gmra.mxu1 %vm226_vm8, %v23558_v13  ;;  %12994 = vmatprep.subr.mxu0 %v15474_v25  ;;  %v468_v24 = vand.u32 4294901760, %v467_v17 }
  0xc7   :  { %v15986_v48 = vsub.f32 %v10948_v4, %v10948_v4  ;;  %v15988_v19 = vsub.f32 %v10947_v54, %v10947_v54  ;;  %12955 = vmatprep.mubr.msk.f32.mxu1 %vm227_vm11, %v23558_v13  ;;  %v477_v53 = vsub.f32 %v15948_v22, %v23484_v0  ;;  %12995 = vmatpush3.msra.mxu0 %v15474_v25  ;;  %v24233_v54 = vand.u32 4294901760, %v15946_v32 }
  0xc8   :  { %12867 = vmatmul.mubr.f32.gmra.mxu0 %v448_v2  ;;  %v15997_v8 = vpop.permute.xlu1 %161  ;;  %v15999_v33 = vpop.permute.xlu0 %158  ;;  %12996 = vmatprep.subr.mxu0 %v15490_v31 }
  0xc9   :  { %24231 = vst [vmem:[#allocation68_spill] sm:$0xff] %v15997_v8  ;;  %12869 = vmatprep.mubr.f32.mxu0 %v458_v1  ;;  %24232 = vst [vmem:[#allocation69_spill] sm:$0xff] %v15999_v33  ;;  %v487_v2 = vsub.f32 %v15946_v32, %v24233_v54  ;;  %vm23496_vm12 = vcmp.eq.s32.totalorder %v15997_v8, %v15782_v46  ;;  %vm229_vm13 = vcmp.eq.s32.totalorder %v15999_v33, %v15782_v46 }
  0xca   :  { %v478_v4 = vand.u32 4294901760, %v477_v53  ;;  %v23489_v1 = vand.u32 4294901760, %v15988_v19  ;;  %v10950_v25 = vsel %vm23496_vm12, 1.0, %v24218_v5  ;;  %v10949_v17 = vsel %vm229_vm13, 1.0, %v24218_v5  ;;  %12956 = vmatmul.mubr.msk.f32.gmra.mxu1 %vm228_vm10, %v23558_v13  ;;  %12997 = vmatpush3.msra.mxu0 %v15490_v31 }
  0xcb   :  { %v16026_v54 = vsub.f32 %v10950_v25, %v10950_v25  ;;  %v16028_v0 = vsub.f32 %v10949_v17, %v10949_v17  ;;  %12958 = vmatprep.mubr.msk.f32.mxu1 %vm229_vm13, %v23558_v13  ;;  %v488_v53 = vand.u32 4294901760, %v487_v2  ;;  %v24236_v25 = vand.u32 4294901760, %v15986_v48  ;;  %13077 = vmatpush3.msra.mxu1 %v15455_v20 }
  0xcc   :  { %12870 = vmatmul.mubr.f32.gmra.mxu0 %v468_v24  ;;  %v497_v23 = vsub.f32 %v15988_v19, %v23489_v1  ;;  %v16037_v45 = vpop.permute.xlu1 %167  ;;  %v16039_v31 = vpop.permute.xlu0 %164  ;;  %12998 = vmatprep.subr.mxu0 %v15518_v41 }
  0xcd   :  { %24234 = vst [vmem:[#allocation70_spill] sm:$0xff] %v16037_v45  ;;  %12872 = vmatprep.mubr.f32.mxu0 %v478_v4  ;;  %24235 = vst [vmem:[#allocation71_spill] sm:$0xff] %v16039_v31  ;;  %v507_v24 = vsub.f32 %v15986_v48, %v24236_v25  ;;  %vm23504_vm14 = vcmp.eq.s32.totalorder %v16037_v45, %v15782_v46  ;;  %vm23497_vm15 = vcmp.eq.s32.totalorder %v16039_v31, %v15782_v46 }
  0xce   :  { %v498_v17 = vand.u32 4294901760, %v497_v23  ;;  %v10952_v2 = vsel %vm23504_vm14, 1.0, %v24218_v5  ;;  %v10951_v25 = vsel %vm23497_vm15, 1.0, %v24218_v5  ;;  %12959 = vmatmul.mubr.msk.f32.gmra.mxu1 %vm23496_vm12, %v23558_v13  ;;  %12999 = vmatpush3.msra.mxu0 %v15518_v41  ;;  %v24238_v33 = vand.u32 4294901760, %v16028_v0 }
  0xcf   :  { %v16066_v1 = vsub.f32 %v10952_v2, %v10952_v2  ;;  %v16068_v4 = vsub.f32 %v10951_v25, %v10951_v25  ;;  %12961 = vmatprep.mubr.msk.f32.mxu1 %vm23497_vm15, %v23558_v13  ;;  %v508_v23 = vand.u32 4294901760, %v507_v24  ;;  %13078 = vmatprep.subr.mxu1 %v15481_v27  ;;  %v24241_v2 = vand.u32 4294901760, %v16026_v54 }
  0xd0   :  { %12873 = vmatmul.mubr.f32.gmra.mxu0 %v488_v53  ;;  %v517_v9 = vsub.f32 %v16028_v0, %v24238_v33  ;;  %v16077_v8 = vpop.permute.xlu1 %173  ;;  %v16079_v41 = vpop.permute.xlu0 %170  ;;  %13079 = vmatpush3.msra.mxu1 %v15481_v27 }
  0xd1   :  { %24237 = vst [vmem:[#allocation72_spill] sm:$0xff] %v16066_v1  ;;  %24239 = vst [vmem:[#allocation73_spill] sm:$0xff] %v16077_v8  ;;  %12875 = vmatprep.mubr.f32.mxu0 %v498_v17  ;;  %v527_v53 = vsub.f32 %v16026_v54, %v24241_v2  ;;  %vm23512_vm12 = vcmp.eq.s32.totalorder %v16077_v8, %v15782_v46  ;;  %vm23505_vm15 = vcmp.eq.s32.totalorder %v16079_v41, %v15782_v46 }
  0xd2   :  { %24240 = vst [vmem:[#allocation74_spill] sm:$0xff] %v16079_v41  ;;  %v518_v25 = vand.u32 4294901760, %v517_v9  ;;  %13000 = vmatprep.subr.mxu0 %v15542_v49  ;;  %v10954_v24 = vsel %vm23512_vm12, 1.0, %v24218_v5  ;;  %v10953_v17 = vsel %vm23505_vm15, 1.0, %v24218_v5  ;;  %12962 = vmatmul.mubr.msk.f32.gmra.mxu1 %vm23504_vm14, %v23558_v13  ;;  %v24243_v31 = vand.u32 4294901760, %v16068_v4 }
  0xd3   :  { %13001 = vmatpush3.msra.mxu0 %v15542_v49  ;;  %v16106_v2 = vsub.f32 %v10954_v24, %v10954_v24  ;;  %v16108_v33 = vsub.f32 %v10953_v17, %v10953_v17  ;;  %12964 = vmatprep.mubr.msk.f32.mxu1 %vm23505_vm15, %v23558_v13  ;;  %v528_v9 = vand.u32 4294901760, %v527_v53  ;;  %v24246_v24 = vand.u32 4294901760, %v16066_v1 }
  0xd4   :  { %12876 = vmatmul.mubr.f32.gmra.mxu0 %v508_v23  ;;  %v537_v60 = vsub.f32 %v16068_v4, %v24243_v31  ;;  %v16117_v45 = vpop.permute.xlu1 %179  ;;  %v16119_v49 = vpop.permute.xlu0 %176  ;;  %13080 = vmatprep.subr.mxu1 %v15513_v38 }
  0xd5   :  { %24242 = vst [vmem:[#allocation75_spill] sm:$0xff] %v16106_v2  ;;  %24244 = vst [vmem:[#allocation76_spill] sm:$0xff] %v16117_v45  ;;  %12878 = vmatprep.mubr.f32.mxu0 %v518_v25  ;;  %v547_v23 = vsub.f32 %v16066_v1, %v24246_v24  ;;  %vm23520_vm14 = vcmp.eq.s32.totalorder %v16117_v45, %v15782_v46  ;;  %vm23513_vm15 = vcmp.eq.s32.totalorder %v16119_v49, %v15782_v46 }
  0xd6   :  { %24245 = vst [vmem:[#allocation77_spill] sm:$0xff] %v16119_v49  ;;  %v538_v17 = vand.u32 4294901760, %v537_v60  ;;  %13081 = vmatpush3.msra.mxu1 %v15513_v38  ;;  %13002 = vmatprep.subr.mxu0 %v15554_v55  ;;  %v10956_v53 = vsel %vm23520_vm14, 1.0, %v24218_v5  ;;  %v10955_v25 = vsel %vm23513_vm15, 1.0, %v24218_v5  ;;  %v24248_v41 = vand.u32 4294901760, %v16108_v33 }
  0xd7   :  { %12965 = vmatmul.mubr.msk.f32.gmra.mxu1 %vm23512_vm12, %v23558_v13  ;;  %13003 = vmatpush3.msra.mxu0 %v15554_v55  ;;  %v16146_v24 = vsub.f32 %v10956_v53, %v10956_v53  ;;  %v16148_v31 = vsub.f32 %v10955_v25, %v10955_v25  ;;  %v548_v60 = vand.u32 4294901760, %v547_v23  ;;  %v24251_v53 = vand.u32 4294901760, %v16106_v2 }
  0xd8   :  { %12879 = vmatmul.mubr.f32.gmra.mxu0 %v528_v9  ;;  %12967 = vmatprep.mubr.msk.f32.mxu1 %vm23513_vm15, %v23558_v13  ;;  %v557_v1 = vsub.f32 %v16108_v33, %v24248_v41  ;;  %v16157_v8 = vpop.permute.xlu1 %185  ;;  %v16159_v55 = vpop.permute.xlu0 %182 }
  0xd9   :  { %24247 = vst [vmem:[#allocation78_spill] sm:$0xff] %v16146_v24  ;;  %24249 = vst [vmem:[#allocation79_spill] sm:$0xff] %v16157_v8  ;;  %12881 = vmatprep.mubr.f32.mxu0 %v538_v17  ;;  %13082 = vmatprep.subr.mxu1 %v15525_v44  ;;  %v567_v9 = vsub.f32 %v16106_v2, %v24251_v53  ;;  %vm23528_vm12 = vcmp.eq.s32.totalorder %v16157_v8, %v15782_v46  ;;  %v24253_v49 = vand.u32 4294901760, %v16148_v31 }
  0xda   :  { %24250 = vst [vmem:[#allocation80_spill] sm:$0xff] %v16159_v55  ;;  %vm23521_vm15 = vcmp.eq.s32.totalorder %v16159_v55, %v15782_v46  ;;  %v558_v25 = vand.u32 4294901760, %v557_v1  ;;  %13083 = vmatpush3.msra.mxu1 %v15525_v44  ;;  %13004 = vmatprep.subr.mxu0 %v15578_v63  ;;  %v10958_v23 = vsel %vm23528_vm12, 1.0, %v24218_v5 }
  0xdb   :  { %v10957_v17 = vsel %vm23521_vm15, 1.0, %v24218_v5  ;;  %12968 = vmatmul.mubr.msk.f32.gmra.mxu1 %vm23520_vm14, %v23558_v13  ;;  %13005 = vmatpush3.msra.mxu0 %v15578_v63  ;;  %v16186_v53 = vsub.f32 %v10958_v23, %v10958_v23  ;;  %v577_v2 = vsub.f32 %v16148_v31, %v24253_v49  ;;  %v568_v1 = vand.u32 4294901760, %v567_v9 }
  0xdc   :  { %v16188_v41 = vsub.f32 %v10957_v17, %v10957_v17  ;;  %12882 = vmatmul.mubr.f32.gmra.mxu0 %v548_v60  ;;  %12970 = vmatprep.mubr.msk.f32.mxu1 %vm23521_vm15, %v23558_v13  ;;  %v16197_v45 = vpop.permute.xlu1 %191  ;;  %v16199_v63 = vpop.permute.xlu0 %188  ;;  %v24256_v23 = vand.u32 4294901760, %v16146_v24 }
  0xdd   :  { %24252 = vst [vmem:[#allocation81_spill] sm:$0xff] %v16186_v53  ;;  %24254 = vst [vmem:[#allocation82_spill] sm:$0xff] %v16197_v45  ;;  %12884 = vmatprep.mubr.f32.mxu0 %v558_v25  ;;  %13084 = vmatprep.subr.mxu1 %v15549_v52  ;;  %vm23536_vm14 = vcmp.eq.s32.totalorder %v16197_v45, %v15782_v46  ;;  %vm23529_vm15 = vcmp.eq.s32.totalorder %v16199_v63, %v15782_v46  ;;  %v578_v17 = vand.u32 4294901760, %v577_v2 }
  0xde   :  { %24255 = vst [vmem:[#allocation83_spill] sm:$0xff] %v16199_v63  ;;  %v587_v60 = vsub.f32 %v16146_v24, %v24256_v23  ;;  %13085 = vmatpush3.msra.mxu1 %v15549_v52  ;;  %13006 = vmatprep.subr.mxu0 %v15602_v28  ;;  %v10960_v9 = vsel %vm23536_vm14, 1.0, %v24218_v5  ;;  %v10959_v25 = vsel %vm23529_vm15, 1.0, %v24218_v5  ;;  %v24258_v55 = vand.u32 4294901760, %v16188_v41 }
  0xdf   :  { %12971 = vmatmul.mubr.msk.f32.gmra.mxu1 %vm23528_vm12, %v23558_v13  ;;  %13007 = vmatpush3.msra.mxu0 %v15602_v28  ;;  %v16226_v23 = vsub.f32 %v10960_v9, %v10960_v9  ;;  %v16228_v49 = vsub.f32 %v10959_v25, %v10959_v25  ;;  %v24261_v9 = vand.u32 4294901760, %v16186_v53 }
  0xe0   :  { %12885 = vmatmul.mubr.f32.gmra.mxu0 %v568_v1  ;;  %12973 = vmatprep.mubr.msk.f32.mxu1 %vm23529_vm15, %v23558_v13  ;;  %v597_v24 = vsub.f32 %v16188_v41, %v24258_v55  ;;  %v16237_v8 = vpop.permute.xlu1 %197  ;;  %v16239_v28 = vpop.permute.xlu0 %194  ;;  %v588_v2 = vand.u32 4294901760, %v587_v60 }
  0xe1   :  { %24257 = vst [vmem:[#allocation84_spill] sm:$0xff] %v16226_v23  ;;  %24259 = vst [vmem:[#allocation85_spill] sm:$0xff] %v16237_v8  ;;  %12887 = vmatprep.mubr.f32.mxu0 %v578_v17  ;;  %13086 = vmatprep.subr.mxu1 %v15573_v61  ;;  %v607_v1 = vsub.f32 %v16186_v53, %v24261_v9  ;;  %vm23544_vm12 = vcmp.eq.s32.totalorder %v16237_v8, %v15782_v46  ;;  %v24263_v63 = vand.u32 4294901760, %v16228_v49 }
  0xe2   :  { %24260 = vst [vmem:[#allocation86_spill] sm:$0xff] %v16239_v28  ;;  %vm23537_vm15 = vcmp.eq.s32.totalorder %v16239_v28, %v15782_v46  ;;  %v598_v25 = vand.u32 4294901760, %v597_v24  ;;  %13087 = vmatpush3.msra.mxu1 %v15573_v61  ;;  %13008 = vmatprep.subr.mxu0 %v15614_v42  ;;  %v10962_v60 = vsel %vm23544_vm12, 1.0, %v24218_v5 }
  0xe3   :  { %v10961_v17 = vsel %vm23537_vm15, 1.0, %v24218_v5  ;;  %12974 = vmatmul.mubr.msk.f32.gmra.mxu1 %vm23536_vm14, %v23558_v13  ;;  %13009 = vmatpush3.msra.mxu0 %v15614_v42  ;;  %v16266_v9 = vsub.f32 %v10962_v60, %v10962_v60  ;;  %v617_v53 = vsub.f32 %v16228_v49, %v24263_v63  ;;  %v608_v24 = vand.u32 4294901760, %v607_v1 }
  0xe4   :  { %v16268_v55 = vsub.f32 %v10961_v17, %v10961_v17  ;;  %12888 = vmatmul.mubr.f32.gmra.mxu0 %v588_v2  ;;  %12976 = vmatprep.mubr.msk.f32.mxu1 %vm23537_vm15, %v23558_v13  ;;  %v16277_v45 = vpop.permute.xlu1 %203  ;;  %v16279_v42 = vpop.permute.xlu0 %200  ;;  %v24266_v60 = vand.u32 4294901760, %v16226_v23 }
  0xe5   :  { %24262 = vst [vmem:[#allocation87_spill] sm:$0xff] %v16266_v9  ;;  %24264 = vst [vmem:[#allocation88_spill] sm:$0xff] %v16277_v45  ;;  %12890 = vmatprep.mubr.f32.mxu0 %v598_v25  ;;  %13088 = vmatprep.subr.mxu1 %v15585_v11  ;;  %vm23554_vm14 = vcmp.eq.s32.totalorder %v16277_v45, %v15782_v46  ;;  %vm23545_vm15 = vcmp.eq.s32.totalorder %v16279_v42, %v15782_v46  ;;  %v618_v17 = vand.u32 4294901760, %v617_v53 }
  0xe6   :  { %24265 = vst [vmem:[#allocation89_spill] sm:$0xff] %v16279_v42  ;;  %v627_v2 = vsub.f32 %v16226_v23, %v24266_v60  ;;  %13089 = vmatpush3.msra.mxu1 %v15585_v11  ;;  %13010 = vmatprep.subr.mxu0 %v15638_v62  ;;  %v10964_v1 = vsel %vm23554_vm14, 1.0, %v24218_v5  ;;  %v10963_v25 = vsel %vm23545_vm15, 1.0, %v24218_v5  ;;  %v24267_v28 = vand.u32 4294901760, %v16268_v55 }
  0xe7   :  { %12977 = vmatmul.mubr.msk.f32.gmra.mxu1 %vm23544_vm12, %v23558_v13  ;;  %13011 = vmatpush3.msra.mxu0 %v15638_v62  ;;  %v16306_v60 = vsub.f32 %v10964_v1, %v10964_v1  ;;  %v16308_v63 = vsub.f32 %v10963_v25, %v10963_v25  ;;  %v24269_v1 = vand.u32 4294901760, %v16266_v9 }
  0xe8   :  { %12891 = vmatmul.mubr.f32.gmra.mxu0 %v608_v24  ;;  %12979 = vmatprep.mubr.msk.f32.mxu1 %vm23545_vm15, %v23558_v13  ;;  %v637_v23 = vsub.f32 %v16268_v55, %v24267_v28  ;;  %v16317_v8 = vpop.permute.xlu1 %209  ;;  %v16319_v62 = vpop.permute.xlu0 %206  ;;  %v628_v53 = vand.u32 4294901760, %v627_v2 }
  0xe9   :  { %24268 = vst [vmem:[#allocation90_spill] sm:$0xff] %v16317_v8  ;;  %12893 = vmatprep.mubr.f32.mxu0 %v618_v17  ;;  %13090 = vmatprep.subr.mxu1 %v15609_v36  ;;  %v647_v24 = vsub.f32 %v16266_v9, %v24269_v1  ;;  %vm246_vm12 = vcmp.eq.s32.totalorder %v16317_v8, %v15782_v46  ;;  %v24270_v42 = vand.u32 4294901760, %v16308_v63 }
  0xea   :  { %vm23555_vm15 = vcmp.eq.s32.totalorder %v16319_v62, %v15782_v46  ;;  %v638_v25 = vand.u32 4294901760, %v637_v23  ;;  %13091 = vmatpush3.msra.mxu1 %v15609_v36  ;;  %13012 = vmatprep.subr.mxu0 %v15662_v58  ;;  %v10966_v2 = vsel %vm246_vm12, 1.0, %v24218_v5 }
  0xeb   :  { %v10965_v17 = vsel %vm23555_vm15, 1.0, %v24218_v5  ;;  %12980 = vmatmul.mubr.msk.f32.gmra.mxu1 %vm23554_vm14, %v23558_v13  ;;  %13092 = vmatprep.subr.mxu1 %v15633_v56  ;;  %v16346_v1 = vsub.f32 %v10966_v2, %v10966_v2  ;;  %v657_v9 = vsub.f32 %v16308_v63, %v24270_v42  ;;  %v648_v23 = vand.u32 4294901760, %v647_v24 }
  0xec   :  { %v16348_v28 = vsub.f32 %v10965_v17, %v10965_v17  ;;  %12894 = vmatmul.mubr.f32.gmra.mxu0 %v628_v53  ;;  %12982 = vmatprep.mubr.msk.f32.mxu1 %vm23555_vm15, %v23558_v13  ;;  %v16357_v45 = vpop.permute.xlu1 %215  ;;  %v16359_v36 = vpop.permute.xlu0 %212  ;;  %v24272_v2 = vand.u32 4294901760, %v16306_v60 }
  0xed   :  { %12896 = vmatprep.mubr.f32.mxu0 %v638_v25  ;;  %24271 = vst [vmem:[#allocation91_spill] sm:$0xff] %v16359_v36  ;;  %13013 = vmatpush3.msra.mxu0 %v15662_v58  ;;  %vm248_vm14 = vcmp.eq.s32.totalorder %v16357_v45, %v15782_v46  ;;  %vm247_vm15 = vcmp.eq.s32.totalorder %v16359_v36, %v15782_v46  ;;  %v658_v42 = vand.u32 4294901760, %v657_v9  ;;  %v686_v9 = vand.u32 4294901760, %v16346_v1 }
  0xee   :  { %v667_v53 = vsub.f32 %v16306_v60, %v24272_v2  ;;  %13093 = vmatpush3.msra.mxu1 %v15633_v56  ;;  %13014 = vmatprep.subr.mxu0 %v15674_v35  ;;  %v676_v25 = vand.u32 4294901760, %v16348_v28  ;;  %v10968_v58 = vsel %vm248_vm14, 1.0, %v24218_v5  ;;  %v10967_v24 = vsel %vm247_vm15, 1.0, %v24218_v5 }
  0xef   :  { %12983 = vmatmul.mubr.msk.f32.gmra.mxu1 %vm246_vm12, %v23558_v13  ;;  %13094 = vmatprep.subr.mxu1 %v15645_v18  ;;  %v16386_v17 = vsub.f32 %v10968_v58, %v10968_v58  ;;  %v16388_v2 = vsub.f32 %v10967_v24, %v10967_v24  ;;  %v24273_v36 = vmov 1.0  }
  0xf0   :  { %12897 = vmatmul.mubr.f32.gmra.mxu0 %v648_v23  ;;  %12985 = vmatprep.mubr.msk.f32.mxu1 %vm247_vm15, %v23558_v13  ;;  %v677_v5 = vsub.f32 %v16348_v28, %v676_v25  ;;  %v668_v8 = vand.u32 4294901760, %v667_v53  ;;  %v687_v23 = vsub.f32 %v16346_v1, %v686_v9  ;;  %v24274_v53 = vand.u32 4294901760, %v15806_v47 }
  0xf1   :  { %12899 = vmatprep.mubr.f32.mxu0 %v658_v42  ;;  %13095 = vmatpush3.msra.mxu1 %v15645_v18  ;;  %v23562_v24 = vand.u32 4294901760, %v16388_v2  ;;  %v706_v13 = vand.u32 4294901760, %v16386_v17 }
  0xf2   :  { %13096 = vmatprep.subr.mxu1 %v15669_v57  ;;  %13015 = vmatpush3.msra.mxu0 %v15674_v35  ;;  %v678_v58 = vand.u32 4294901760, %v677_v5  ;;  %v688_v42 = vand.u32 4294901760, %v687_v23 }
  0xf3   :  { %12986 = vmatmul.mubr.msk.f32.gmra.mxu1 %vm248_vm14, %v24273_v36  ;;  %13016 = vmatprep.subr.mxu0 %v15698_v34  ;;  %v697_v35 = vsub.f32 %v16388_v2, %v23562_v24  ;;  %v24275_v24 = vand.u32 4294901760, %v15832_v40 }
  0xf4   :  { %12900 = vmatmul.mubr.f32.gmra.mxu0 %v668_v8  ;;  %13097 = vmatpush3.msra.mxu1 %v15669_v57  ;;  %v707_v8 = vsub.f32 %v16386_v17, %v706_v13 }
  0xf5   :  { %13100 = vmatprep.mubr.f32.mxu1 %v24274_v53  ;;  %12902 = vmatprep.mubr.f32.mxu0 %v678_v58  ;;  %v698_v5 = vand.u32 4294901760, %v697_v35  ;;  %v24276_v58 = vand.u32 4294901760, %v15804_v59  ;;  %v24313_v35 = vld [vmem:[#allocation40_spill] sm:$0xff] }
  0xf6   :  { %13098 = vmatprep.subr.mxu1 %v15693_v12  ;;  %13017 = vmatpush3.msra.mxu0 %v15698_v34  ;;  %v708_v23 = vand.u32 4294901760, %v707_v8  ;;  %v24277_v34 = vand.u32 4294901760, %v15830_v3  ;;  %v24335_v8 = vld [vmem:[#allocation71_spill] sm:$0xff] }
  0xf7   :  { %13099 = vmatpush3.msra.mxu1 %v15693_v12  ;;  %13018 = vmatprep.subr.mxu0 %v15720_v50 }
  0xf8   :  { %13101 = vmatmul.mubr.f32.vlgmr.msra.gmra.mxu1 %v24275_v24  ;;  %12903 = vmatmul.mubr.f32.gmra.mxu0 %v688_v42  ;;  %v24278_v24 = vand.u32 4294901760, %v15870_v7 }
  0xf9   :  { %13103 = vmatprep.mubr.f32.mxu1 %v24276_v58  ;;  %12905 = vmatprep.mubr.f32.mxu0 %v698_v5  ;;  %v24333_v5 = vld [vmem:[#allocation68_spill] sm:$0xff]  ;;  %v24337_v58 = vld [vmem:[#allocation70_spill] sm:$0xff] }
  0xfa   :  { %13019 = vmatpush3.msra.mxu0 %v15720_v50  ;;  %13228 = vmatprep.subr.mxu1 %v15442_v10  ;;  %v24279_v50 = vand.u32 4294901760, %v15868_v6 }
  0xfb   :  { %13148 = vmatprep.subr.mxu0 %v15478_v26  ;;  %13229 = vmatpush3.msra.mxu1 %v15442_v10  ;;  %v24280_v10 = vand.u32 4294901760, %v15908_v39 }
  0xfc   :  { %13104 = vmatmul.mubr.f32.gmra.mxu1 %v24277_v34  ;;  %12906 = vmatmul.mubr.f32.gmra.mxu0 %v708_v23  ;;  %v24339_v23 = vld [vmem:[#allocation74_spill] sm:$0xff]  ;;  %v24341_v34 = vld [vmem:[#allocation73_spill] sm:$0xff] }
  0xfd   :  { %13106 = vmatprep.mubr.f32.mxu1 %v24278_v24  ;;  %13020 = vmatprep.mubr.f32.mxu0 %v15806_v47  ;;  %v24282_v47 = vand.u32 4294901760, %v15948_v22  ;;  %v24344_v24 = vld [vmem:[#allocation77_spill] sm:$0xff] }
  0xfe   :  { %13230 = vmatprep.subr.mxu1 %v15444_v14 }
  0xff   :  { %13231 = vmatpush3.msra.mxu1 %v15444_v14  ;;  %v24281_v14 = vand.u32 4294901760, %v15906_v21 }
 0x100   :  { %13107 = vmatmul.mubr.f32.gmra.mxu1 %v24279_v50  ;;  %13021 = vmatmul.mubr.f32.vlgmr.msra.gmra.mxu0 %v15832_v40  ;;  %v24299_v40 = vand.u32 4294901760, %v16188_v41  ;;  %v24347_v50 = vld [vmem:[#allocation76_spill] sm:$0xff] }
 0x101   :  { %13109 = vmatprep.mubr.f32.mxu1 %v24280_v10  ;;  %13149 = vmatpush3.msra.mxu0 %v15478_v26  ;;  %v24283_v26 = vand.u32 4294901760, %v15946_v32  ;;  %v24350_v10 = vld [vmem:[#allocation80_spill] sm:$0xff] }
 0x102   :  { %13023 = vmatprep.mubr.f32.mxu0 %v15804_v59  ;;  %13150 = vmatprep.subr.mxu0 %v15484_v29  ;;  %v24300_v59 = vld [vmem:[#allocation32_spill] sm:$0xff] }
 0x103   :  { %13151 = vmatpush3.msra.mxu0 %v15484_v29  ;;  %13232 = vmatprep.subr.mxu1 %v15446_v15 }
 0x104   :  { %13110 = vmatmul.mubr.f32.gmra.mxu1 %v24281_v14  ;;  %13024 = vmatmul.mubr.f32.gmra.mxu0 %v15830_v3  ;;  %v24284_v3 = vand.u32 4294901760, %v15988_v19  ;;  %v24353_v14 = vld [vmem:[#allocation79_spill] sm:$0xff] }
 0x105   :  { %13112 = vmatprep.mubr.f32.mxu1 %v24282_v47  ;;  %13026 = vmatprep.mubr.f32.mxu0 %v15870_v7  ;;  %v24285_v7 = vand.u32 4294901760, %v15986_v48  ;;  %v24356_v47 = vld [vmem:[#allocation83_spill] sm:$0xff] }
 0x106   :  { %13152 = vmatprep.subr.mxu0 %v15487_v30  ;;  %13233 = vmatpush3.msra.mxu1 %v15446_v15  ;;  %v24287_v15 = vand.u32 4294901760, %v16026_v54 }
 0x107   :  { %13153 = vmatpush3.msra.mxu0 %v15487_v30  ;;  %13234 = vmatprep.subr.mxu1 %v15448_v16  ;;  %v24291_v30 = vand.u32 4294901760, %v16108_v33 }
 0x108   :  { %13113 = vmatmul.mubr.f32.gmra.mxu1 %v24283_v26  ;;  %13027 = vmatmul.mubr.f32.gmra.mxu0 %v15868_v6  ;;  %v24286_v6 = vand.u32 4294901760, %v16028_v0  ;;  %v24359_v26 = vld [vmem:[#allocation82_spill] sm:$0xff] }
 0x109   :  { %13115 = vmatprep.mubr.f32.mxu1 %v24284_v3  ;;  %13029 = vmatprep.mubr.f32.mxu0 %v15908_v39  ;;  %v24296_v39 = vld [vmem:[#allocation29_spill] sm:$0xff]  ;;  %v24362_v3 = vld [vmem:[#allocation86_spill] sm:$0xff] }
 0x10a   :  { %13154 = vmatprep.subr.mxu0 %v15510_v37  ;;  %13235 = vmatpush3.msra.mxu1 %v15448_v16  ;;  %v24288_v16 = vand.u32 4294901760, %v16068_v4 }
 0x10b   :  { %13155 = vmatpush3.msra.mxu0 %v15510_v37  ;;  %13236 = vmatprep.subr.mxu1 %v15455_v20  ;;  %v24292_v37 = vld [vmem:[#allocation28_spill] sm:$0xff] }
 0x10c   :  { %13116 = vmatmul.mubr.f32.gmra.mxu1 %v24285_v7  ;;  %13030 = vmatmul.mubr.f32.gmra.mxu0 %v15906_v21  ;;  %v24365_v7 = vld [vmem:[#allocation85_spill] sm:$0xff] }
 0x10d   :  { %13118 = vmatprep.mubr.f32.mxu1 %v24286_v6  ;;  %13032 = vmatprep.mubr.f32.mxu0 %v15948_v22  ;;  %v24368_v6 = vld [vmem:[#allocation89_spill] sm:$0xff] }
 0x10e   :  { %13156 = vmatprep.subr.mxu0 %v15522_v43  ;;  %13237 = vmatpush3.msra.mxu1 %v15455_v20  ;;  %v24289_v20 = vld [vmem:[#allocation72_spill] sm:$0xff] }
 0x10f   :  { %13157 = vmatpush3.msra.mxu0 %v15522_v43  ;;  %13238 = vmatprep.subr.mxu1 %v15481_v27  ;;  %v24290_v29 = vand.u32 4294901760, %v24289_v20 }
 0x110   :  { %13119 = vmatmul.mubr.f32.gmra.mxu1 %v24287_v15  ;;  %13033 = vmatmul.mubr.f32.gmra.mxu0 %v15946_v32  ;;  %v24304_v32 = vld [vmem:[#allocation36_spill] sm:$0xff] }
 0x111   :  { %13121 = vmatprep.mubr.f32.mxu1 %v24288_v16  ;;  %13035 = vmatprep.mubr.f32.mxu0 %v15988_v19  ;;  %v24303_v19 = vand.u32 4294901760, %v16228_v49  ;;  %v24371_v15 = vld [vmem:[#allocation88_spill] sm:$0xff] }
 0x112   :  { %13158 = vmatprep.subr.mxu0 %v15546_v51  ;;  %13239 = vmatpush3.msra.mxu1 %v15481_v27  ;;  %v24293_v27 = vld [vmem:[#allocation75_spill] sm:$0xff] }
 0x113   :  { %13159 = vmatpush3.msra.mxu0 %v15546_v51  ;;  %13240 = vmatprep.subr.mxu1 %v15513_v38  ;;  %v24294_v43 = vand.u32 4294901760, %v24293_v27  ;;  %v24295_v51 = vand.u32 4294901760, %v16148_v31 }
 0x114   :  { %13122 = vmatmul.mubr.f32.gmra.mxu1 %v24290_v29  ;;  %13036 = vmatmul.mubr.f32.gmra.mxu0 %v15986_v48  ;;  %v24307_v48 = vand.u32 4294901760, %v16268_v55 }
 0x115   :  { %13124 = vmatprep.mubr.f32.mxu1 %v24291_v30  ;;  %13038 = vmatprep.mubr.f32.mxu0 %v16028_v0 }
 0x116   :  { %13160 = vmatprep.subr.mxu0 %v24292_v37  ;;  %13241 = vmatpush3.msra.mxu1 %v15513_v38  ;;  %v24297_v38 = vld [vmem:[#allocation78_spill] sm:$0xff] }
 0x117   :  { %13161 = vmatpush3.msra.mxu0 %v24292_v37  ;;  %13242 = vmatprep.subr.mxu1 %v15525_v44  ;;  %v24298_v22 = vand.u32 4294901760, %v24297_v38 }
 0x118   :  { %13125 = vmatmul.mubr.f32.gmra.mxu1 %v24294_v43  ;;  %13039 = vmatmul.mubr.f32.gmra.mxu0 %v16026_v54  ;;  %v24308_v54 = vld [vmem:[#allocation37_spill] sm:$0xff] }
 0x119   :  { %13127 = vmatprep.mubr.f32.mxu1 %v24295_v51  ;;  %13041 = vmatprep.mubr.f32.mxu0 %v16068_v4  ;;  %v24310_v4 = vld [vmem:[#allocation87_spill] sm:$0xff] }
 0x11a   :  { %13162 = vmatprep.subr.mxu0 %v24296_v39  ;;  %13243 = vmatpush3.msra.mxu1 %v15525_v44  ;;  %v24301_v44 = vld [vmem:[#allocation81_spill] sm:$0xff] }
 0x11b   :  { %13163 = vmatpush3.msra.mxu0 %v24296_v39  ;;  %13244 = vmatprep.subr.mxu1 %v15549_v52  ;;  %v24302_v21 = vand.u32 4294901760, %v24301_v44 }
 0x11c   :  { %13128 = vmatmul.mubr.f32.gmra.mxu1 %v24298_v22  ;;  %13042 = vmatmul.mubr.f32.gmra.mxu0 %v24289_v20 }
 0x11d   :  { %13130 = vmatprep.mubr.f32.mxu1 %v24299_v40  ;;  %13044 = vmatprep.mubr.f32.mxu0 %v16108_v33  ;;  %v24311_v33 = vand.u32 4294901760, %v24310_v4 }
 0x11e   :  { %13164 = vmatprep.subr.mxu0 %v24300_v59  ;;  %13245 = vmatpush3.msra.mxu1 %v15549_v52  ;;  %v24305_v52 = vld [vmem:[#allocation84_spill] sm:$0xff] }
 0x11f   :  { %13165 = vmatpush3.msra.mxu0 %v24300_v59  ;;  %13246 = vmatprep.subr.mxu1 %v15573_v61  ;;  %v24306_v0 = vand.u32 4294901760, %v24305_v52 }
 0x120   :  { %13131 = vmatmul.mubr.f32.gmra.mxu1 %v24302_v21  ;;  %13045 = vmatmul.mubr.f32.gmra.mxu0 %v24293_v27 }
 0x121   :  { %13133 = vmatprep.mubr.f32.mxu1 %v24303_v19  ;;  %13047 = vmatprep.mubr.f32.mxu0 %v16148_v31  ;;  %v24312_v31 = vand.u32 4294901760, %v16308_v63 }
 0x122   :  { %13166 = vmatprep.subr.mxu0 %v24304_v32  ;;  %13247 = vmatpush3.msra.mxu1 %v15573_v61  ;;  %v24309_v61 = vld [vmem:[#allocation33_spill] sm:$0xff] }
 0x123   :  { %13167 = vmatpush3.msra.mxu0 %v24304_v32  ;;  %13248 = vmatprep.subr.mxu1 %v15585_v11 }
 0x124   :  { %13134 = vmatmul.mubr.f32.gmra.mxu1 %v24306_v0  ;;  %13048 = vmatmul.mubr.f32.gmra.mxu0 %v24297_v38 }
 0x125   :  { %13136 = vmatprep.mubr.f32.mxu1 %v24307_v48  ;;  %13050 = vmatprep.mubr.f32.mxu0 %v16188_v41  ;;  %v24315_v41 = vld [vmem:[#allocation43_spill] sm:$0xff] }
 0x126   :  { %13168 = vmatprep.subr.mxu0 %v24308_v54  ;;  %13249 = vmatpush3.msra.mxu1 %v15585_v11  ;;  %v24314_v11 = vand.u32 4294901760, %v16306_v60 }
 0x127   :  { %13169 = vmatpush3.msra.mxu0 %v24308_v54  ;;  %13250 = vmatprep.subr.mxu1 %v24309_v61 }
 0x128   :  { %13137 = vmatmul.mubr.f32.gmra.mxu1 %v24311_v33  ;;  %13051 = vmatmul.mubr.f32.gmra.mxu0 %v24301_v44 }
 0x129   :  { %13139 = vmatprep.mubr.f32.mxu1 %v24312_v31  ;;  %13053 = vmatprep.mubr.f32.mxu0 %v16228_v49  ;;  %v24316_v49 = vand.u32 4294901760, %v16388_v2 }
 0x12a   :  { %13170 = vmatprep.subr.mxu0 %v24313_v35  ;;  %13251 = vmatpush3.msra.mxu1 %v24309_v61 }
 0x12b   :  { %13171 = vmatpush3.msra.mxu0 %v24313_v35  ;;  %13252 = vmatprep.subr.mxu1 %v15633_v56 }
 0x12c   :  { %13140 = vmatmul.mubr.f32.gmra.mxu1 %v24314_v11  ;;  %13054 = vmatmul.mubr.f32.gmra.mxu0 %v24305_v52 }
 0x12d   :  { %13142 = vmatprep.mubr.f32.mxu1 %v676_v25  ;;  %13056 = vmatprep.mubr.f32.mxu0 %v16268_v55  ;;  %v24317_v55 = vld [vmem:[#allocation44_spill] sm:$0xff] }
 0x12e   :  { %13172 = vmatprep.subr.mxu0 %v24315_v41  ;;  %13253 = vmatpush3.msra.mxu1 %v15633_v56 }
 0x12f   :  { %13173 = vmatpush3.msra.mxu0 %v24315_v41  ;;  %13254 = vmatprep.subr.mxu1 %v15645_v18 }
 0x130   :  { %13143 = vmatmul.mubr.f32.gmra.mxu1 %v686_v9  ;;  %13057 = vmatmul.mubr.f32.gmra.mxu0 %v24310_v4 }
 0x131   :  { %13145 = vmatprep.mubr.f32.mxu1 %v24316_v49  ;;  %13059 = vmatprep.mubr.f32.mxu0 %v16308_v63 }
 0x132   :  { %13255 = vmatpush3.msra.mxu1 %v15645_v18  ;;  %13174 = vmatprep.subr.mxu0 %v24317_v55  ;;  %v24319_v18 = vld [vmem:[#allocation47_spill] sm:$0xff] }
 0x133   :  { %13256 = vmatprep.subr.mxu1 %v15669_v57  ;;  %13175 = vmatpush3.msra.mxu0 %v24317_v55 }
 0x134   :  { %13146 = vmatmul.mubr.f32.gmra.mxu1 %v706_v13  ;;  %13060 = vmatmul.mubr.f32.gmra.mxu0 %v16306_v60  ;;  %v24322_v13 = vld [vmem:[#allocation50_spill] sm:$0xff] }
 0x135   :  { %13257 = vmatpush3.msra.mxu1 %v15669_v57  ;;  %13260 = vmatprep.mubr.msk.f32.mxu1 %vm217_vm1, %v24273_v36 }
 0x136   :  { %13062 = vmatprep.mubr.f32.mxu0 %v16348_v28  ;;  %13258 = vmatprep.subr.mxu1 %v15693_v12 }
 0x137   :  { %13259 = vmatpush3.msra.mxu1 %v15693_v12  ;;  %13176 = vmatprep.subr.mxu0 %v24319_v18 }
 0x138   :  { %13261 = vmatmul.mubr.msk.f32.vlgmr.msra.gmra.mxu1 %vm218_vm3, %v24273_v36  ;;  %13063 = vmatmul.mubr.f32.gmra.mxu0 %v16346_v1 }
 0x139   :  { %13177 = vmatpush3.msra.mxu0 %v24319_v18  ;;  %13263 = vmatprep.mubr.msk.f32.mxu1 %vm219_vm0, %v24273_v36 }
 0x13a   :  { %13065 = vmatprep.mubr.f32.mxu0 %v16388_v2  ;;  %13178 = vmatprep.subr.mxu0 %v24322_v13 }
 0x13b   :  { %13179 = vmatpush3.msra.mxu0 %v24322_v13 }
 0x13c   :  { %13264 = vmatmul.mubr.msk.f32.gmra.mxu1 %vm220_vm2, %v24273_v36  ;;  %13066 = vmatmul.mubr.f32.gmra.mxu0 %v16386_v17 }
 0x13d   :  { %13266 = vmatprep.mubr.msk.f32.mxu1 %vm221_vm5, %v24273_v36  ;;  %13180 = vmatprep.mubr.msk.f32.mxu0 %vm217_vm1, %v24273_v36  ;;  %vm24336_vm1 = vcmp.eq.s32.totalorder %v24335_v8, %v15782_v46 }
 0x140   :  { %13267 = vmatmul.mubr.msk.f32.gmra.mxu1 %vm222_vm4, %v24273_v36  ;;  %13181 = vmatmul.mubr.msk.f32.vlgmr.msra.gmra.mxu0 %vm218_vm3, %v24273_v36  ;;  %vm24340_vm3 = vcmp.eq.s32.totalorder %v24339_v23, %v15782_v46 }
 0x141   :  { %13269 = vmatprep.mubr.msk.f32.mxu1 %vm223_vm7, %v24273_v36  ;;  %13183 = vmatprep.mubr.msk.f32.mxu0 %vm219_vm0, %v24273_v36  ;;  %vm24334_vm0 = vcmp.eq.s32.totalorder %v24333_v5, %v15782_v46 }
 0x144   :  { %13270 = vmatmul.mubr.msk.f32.gmra.mxu1 %vm224_vm6, %v24273_v36  ;;  %13184 = vmatmul.mubr.msk.f32.gmra.mxu0 %vm220_vm2, %v24273_v36  ;;  %vm24338_vm2 = vcmp.eq.s32.totalorder %v24337_v58, %v15782_v46 }
 0x145   :  { %13272 = vmatprep.mubr.msk.f32.mxu1 %vm225_vm9, %v24273_v36  ;;  %13186 = vmatprep.mubr.msk.f32.mxu0 %vm221_vm5, %v24273_v36  ;;  %vm24343_vm5 = vmmov %vm24334_vm0 }
 0x148   :  { %13273 = vmatmul.mubr.msk.f32.gmra.mxu1 %vm226_vm8, %v24273_v36  ;;  %13187 = vmatmul.mubr.msk.f32.gmra.mxu0 %vm222_vm4, %v24273_v36  ;;  %vm24342_vm4 = vcmp.eq.s32.totalorder %v24341_v34, %v15782_v46 }
 0x149   :  { %13275 = vmatprep.mubr.msk.f32.mxu1 %vm227_vm11, %v24273_v36  ;;  %13189 = vmatprep.mubr.msk.f32.mxu0 %vm223_vm7, %v24273_v36  ;;  %vm24346_vm7 = vmmov %vm24336_vm1 }
 0x14c   :  { %13276 = vmatmul.mubr.msk.f32.gmra.mxu1 %vm228_vm10, %v24273_v36  ;;  %13190 = vmatmul.mubr.msk.f32.gmra.mxu0 %vm224_vm6, %v24273_v36  ;;  %vm24345_vm6 = vcmp.eq.s32.totalorder %v24344_v24, %v15782_v46 }
 0x14d   :  { %13278 = vmatprep.mubr.msk.f32.mxu1 %vm229_vm13, %v24273_v36  ;;  %13192 = vmatprep.mubr.msk.f32.mxu0 %vm225_vm9, %v24273_v36  ;;  %vm24349_vm9 = vmmov %vm24338_vm2 }
 0x150   :  { %13279 = vmatmul.mubr.msk.f32.gmra.mxu1 %vm24334_vm0, %v24273_v36  ;;  %13193 = vmatmul.mubr.msk.f32.gmra.mxu0 %vm226_vm8, %v24273_v36  ;;  %vm24348_vm8 = vcmp.eq.s32.totalorder %v24347_v50, %v15782_v46  ;;  %vm24355_vm0 = vmmov %vm24342_vm4 }
 0x151   :  { %13281 = vmatprep.mubr.msk.f32.mxu1 %vm24336_vm1, %v24273_v36  ;;  %13195 = vmatprep.mubr.msk.f32.mxu0 %vm227_vm11, %v24273_v36  ;;  %vm24352_vm11 = vmmov %vm24340_vm3  ;;  %vm24357_vm1 = vcmp.eq.s32.totalorder %v24356_v47, %v15782_v46 }
 0x154   :  { %13282 = vmatmul.mubr.msk.f32.gmra.mxu1 %vm24338_vm2, %v24273_v36  ;;  %13196 = vmatmul.mubr.msk.f32.gmra.mxu0 %vm228_vm10, %v24273_v36  ;;  %vm24351_vm10 = vcmp.eq.s32.totalorder %v24350_v10, %v15782_v46  ;;  %vm24358_vm2 = vmmov %vm24345_vm6 }
 0x155   :  { %13284 = vmatprep.mubr.msk.f32.mxu1 %vm24340_vm3, %v24273_v36  ;;  %13198 = vmatprep.mubr.msk.f32.mxu0 %vm229_vm13, %v24273_v36  ;;  %vm24354_vm13 = vcmp.eq.s32.totalorder %v24353_v14, %v15782_v46  ;;  %vm24360_vm3 = vcmp.eq.s32.totalorder %v24359_v26, %v15782_v46 }
 0x158   :  { %13285 = vmatmul.mubr.msk.f32.gmra.mxu1 %vm24342_vm4, %v24273_v36  ;;  %13199 = vmatmul.mubr.msk.f32.gmra.mxu0 %vm24343_vm5, %v24273_v36  ;;  %vm24361_vm4 = vmmov %vm24348_vm8  ;;  %vm24363_vm5 = vcmp.eq.s32.totalorder %v24362_v3, %v15782_v46 }
 0x159   :  { %13287 = vmatprep.mubr.msk.f32.mxu1 %vm24345_vm6, %v24273_v36  ;;  %13201 = vmatprep.mubr.msk.f32.mxu0 %vm24346_vm7, %v24273_v36  ;;  %vm24364_vm6 = vmmov %vm24351_vm10  ;;  %vm24366_vm7 = vcmp.eq.s32.totalorder %v24365_v7, %v15782_v46 }
 0x15c   :  { %13288 = vmatmul.mubr.msk.f32.gmra.mxu1 %vm24348_vm8, %v24273_v36  ;;  %13202 = vmatmul.mubr.msk.f32.gmra.mxu0 %vm24349_vm9, %v24273_v36  ;;  %vm24367_vm8 = vmmov %vm24354_vm13  ;;  %vm24369_vm9 = vcmp.eq.s32.totalorder %v24368_v6, %v15782_v46 }
 0x15d   :  { %13290 = vmatprep.mubr.msk.f32.mxu1 %vm24351_vm10, %v24273_v36  ;;  %13204 = vmatprep.mubr.msk.f32.mxu0 %vm24352_vm11, %v24273_v36  ;;  %vm24370_vm10 = vmmov %vm24357_vm1  ;;  %vm24372_vm11 = vcmp.eq.s32.totalorder %v24371_v15, %v15782_v46 }
 0x160   :  { %13291 = vmatmul.mubr.msk.f32.gmra.mxu1 %vm24354_vm13, %v24273_v36  ;;  %13205 = vmatmul.mubr.msk.f32.gmra.mxu0 %vm24355_vm0, %v24273_v36  ;;  %vm24373_vm13 = vmmov %vm24360_vm3  ;;  %vm24374_vm0 = vcmp.eq.s32.totalorder %v16319_v62, %v15782_v46 }
 0x161   :  { %13293 = vmatprep.mubr.msk.f32.mxu1 %vm24357_vm1, %v24273_v36  ;;  %13207 = vmatprep.mubr.msk.f32.mxu0 %vm24358_vm2, %v24273_v36  ;;  %vm24375_vm1 = vmmov %vm24363_vm5 }
 0x162   :  { %vm24377_vm2 = vmmov %vm24366_vm7 }
 0x164   :  { %13294 = vmatmul.mubr.msk.f32.gmra.mxu1 %vm24360_vm3, %v24273_v36  ;;  %13208 = vmatmul.mubr.msk.f32.gmra.mxu0 %vm24361_vm4, %v24273_v36  ;;  %vm24379_vm3 = vmmov %vm24369_vm9 }
 0x165   :  { %13296 = vmatprep.mubr.msk.f32.mxu1 %vm24363_vm5, %v24273_v36  ;;  %13210 = vmatprep.mubr.msk.f32.mxu0 %vm24364_vm6, %v24273_v36  ;;  %vm24380_vm4 = vmmov %vm24372_vm11 }
 0x166   :  { %vm24381_vm5 = vmmov %vm24374_vm0 }
 0x168   :  { %13297 = vmatmul.mubr.msk.f32.gmra.mxu1 %vm24366_vm7, %v24273_v36  ;;  %13211 = vmatmul.mubr.msk.f32.gmra.mxu0 %vm24367_vm8, %v24273_v36 }
 0x169   :  { %13299 = vmatprep.mubr.msk.f32.mxu1 %vm24369_vm9, %v24273_v36  ;;  %13213 = vmatprep.mubr.msk.f32.mxu0 %vm24370_vm10, %v24273_v36 }
 0x16c   :  { %13300 = vmatmul.mubr.msk.f32.gmra.mxu1 %vm24372_vm11, %v24273_v36  ;;  %13214 = vmatmul.mubr.msk.f32.gmra.mxu0 %vm24373_vm13, %v24273_v36 }
 0x16d   :  { %13302 = vmatprep.mubr.msk.f32.mxu1 %vm24374_vm0, %v24273_v36  ;;  %13216 = vmatprep.mubr.msk.f32.mxu0 %vm24375_vm1, %v24273_v36 }
 0x170   :  { %13303 = vmatmul.mubr.msk.f32.gmra.mxu1 %vm246_vm12, %v24273_v36  ;;  %13217 = vmatmul.mubr.msk.f32.gmra.mxu0 %vm24377_vm2, %v24273_v36 }
 0x171   :  { %13305 = vmatprep.mubr.msk.f32.mxu1 %vm247_vm15, %v24273_v36  ;;  %13219 = vmatprep.mubr.msk.f32.mxu0 %vm24379_vm3, %v24273_v36 }
 0x174   :  { %13306 = vmatmul.mubr.msk.f32.gmra.mxu1 %vm248_vm14, %v24273_v36  ;;  %13220 = vmatmul.mubr.msk.f32.gmra.mxu0 %vm24380_vm4, %v24273_v36 }
 0x175   :  { %13222 = vmatprep.mubr.msk.f32.mxu0 %vm24381_vm5, %v24273_v36 }
 0x176   :  { %v12942_v29 = vpop.f32.mrf.mxu1 }
 0x178   :  { %13223 = vmatmul.mubr.msk.f32.gmra.mxu0 %vm246_vm12, %v24273_v36  ;;  %v861_v30 = vpop.f32.mrf.mxu1 }
 0x179   :  { %13225 = vmatprep.mubr.msk.f32.mxu0 %vm247_vm15, %v24273_v36 }
 0x17a   :  { %v12945_v37 = vpop.f32.mrf.mxu1 }
 0x17c   :  { %13226 = vmatmul.mubr.msk.f32.gmra.mxu0 %vm248_vm14, %v24273_v36  ;;  %v873_v62 = vpop.f32.mrf.mxu1 }
 0x17e   :  { %v12948_v27 = vpop.f32.mrf.mxu1 }
 0x180   :  { %v12862_v43 = vpop.f32.mrf.mxu0  ;;  %v885_v39 = vpop.f32.mrf.mxu1 }
 0x181   :  { %v16838_v51 = vadd.f32 %v12942_v29, %v12862_v43 }
 0x182   :  { %v400_v38 = vpop.f32.mrf.mxu0  ;;  %v12951_v40 = vpop.f32.mrf.mxu1 }
 0x183   :  { %v16840_v22 = vadd.f32 %v861_v30, %v400_v38 }
 0x184   :  { %v12865_v59 = vpop.f32.mrf.mxu0  ;;  %v897_v21 = vpop.f32.mrf.mxu1 }
 0x185   :  { %v16842_v44 = vadd.f32 %v12945_v37, %v12865_v59 }
 0x186   :  { %v420_v19 = vpop.f32.mrf.mxu0  ;;  %v12954_v52 = vpop.f32.mrf.mxu1 }
 0x187   :  { %v16844_v32 = vadd.f32 %v873_v62, %v420_v19 }
 0x188   :  { %v12868_v45 = vpop.f32.mrf.mxu0  ;;  %v909_v0 = vpop.f32.mrf.mxu1 }
 0x189   :  { %v16846_v36 = vadd.f32 %v12948_v27, %v12868_v45 }
 0x18a   :  { %v440_v48 = vpop.f32.mrf.mxu0  ;;  %v12957_v61 = vpop.f32.mrf.mxu1 }
 0x18b   :  { %v16848_v54 = vadd.f32 %v885_v39, %v440_v48 }
 0x18c   :  { %v12871_v4 = vpop.f32.mrf.mxu0  ;;  %v921_v31 = vpop.f32.mrf.mxu1 }
 0x18d   :  { %v16850_v33 = vadd.f32 %v12951_v40, %v12871_v4 }
 0x18e   :  { %v460_v35 = vpop.f32.mrf.mxu0  ;;  %v12960_v41 = vpop.f32.mrf.mxu1 }
 0x18f   :  { %v16852_v11 = vadd.f32 %v897_v21, %v460_v35 }
 0x190   :  { %v12874_v49 = vpop.f32.mrf.mxu0  ;;  %v933_v56 = vpop.f32.mrf.mxu1 }
 0x191   :  { %v16854_v55 = vadd.f32 %v12954_v52, %v12874_v49 }
 0x192   :  { %v480_v18 = vpop.f32.mrf.mxu0  ;;  %v12963_v57 = vpop.f32.mrf.mxu1 }
 0x193   :  { %v16856_v63 = vadd.f32 %v909_v0, %v480_v18 }
 0x194   :  { %v12877_v13 = vpop.f32.mrf.mxu0  ;;  %v945_v60 = vpop.f32.mrf.mxu1 }
 0x195   :  { %v16858_v12 = vadd.f32 %v12957_v61, %v12877_v13 }
 0x196   :  { %v500_v28 = vpop.f32.mrf.mxu0 }
 0x197   :  { %v16860_v1 = vadd.f32 %v921_v31, %v500_v28  ;;  %v12966_v25 = vpop.f32.mrf.mxu1 }
 0x198   :  { %v12880_v9 = vpop.f32.mrf.mxu0 }
 0x199   :  { %v16862_v17 = vadd.f32 %v12960_v41, %v12880_v9  ;;  %v957_v2 = vpop.f32.mrf.mxu1 }
 0x19a   :  { %v520_v53 = vpop.f32.mrf.mxu0 }
 0x19b   :  { %v16864_v42 = vadd.f32 %v933_v56, %v520_v53  ;;  %v12969_v5 = vpop.f32.mrf.mxu1 }
 0x19c   :  { %v12883_v8 = vpop.f32.mrf.mxu0 }
 0x19d   :  { %v16866_v58 = vadd.f32 %v12963_v57, %v12883_v8  ;;  %v969_v23 = vpop.f32.mrf.mxu1 }
 0x19e   :  { %v540_v34 = vpop.f32.mrf.mxu0 }
 0x19f   :  { %v16868_v24 = vadd.f32 %v945_v60, %v540_v34  ;;  %v12972_v50 = vpop.f32.mrf.mxu1 }
 0x1a0   :  { %v12886_v10 = vpop.f32.mrf.mxu0 }
 0x1a1   :  { %v16870_v14 = vadd.f32 %v12966_v25, %v12886_v10  ;;  %v981_v47 = vpop.f32.mrf.mxu1 }
 0x1a2   :  { %v560_v26 = vpop.f32.mrf.mxu0 }
 0x1a3   :  { %v16872_v3 = vadd.f32 %v957_v2, %v560_v26  ;;  %v12975_v7 = vpop.f32.mrf.mxu1 }
 0x1a4   :  { %v12889_v6 = vpop.f32.mrf.mxu0 }
 0x1a5   :  { %24382 = vst [vmem:[#allocation72_spill] sm:$0xff] %v16872_v3  ;;  %v16874_v15 = vadd.f32 %v12969_v5, %v12889_v6  ;;  %v993_v16 = vpop.f32.mrf.mxu1 }
 0x1a6   :  { %v580_v20 = vpop.f32.mrf.mxu0 }
 0x1a7   :  { %24383 = vst [vmem:[#allocation28_spill] sm:$0xff] %v16874_v15  ;;  %v16876_v29 = vadd.f32 %v969_v23, %v580_v20  ;;  %v12978_v30 = vpop.f32.mrf.mxu1 }
 0x1a8   :  { %v12892_v37 = vpop.f32.mrf.mxu0 }
 0x1a9   :  { %24384 = vst [vmem:[#allocation75_spill] sm:$0xff] %v16876_v29  ;;  %v16878_v62 = vadd.f32 %v12972_v50, %v12892_v37  ;;  %v1005_v27 = vpop.f32.mrf.mxu1 }
 0x1aa   :  { %v600_v43 = vpop.f32.mrf.mxu0 }
 0x1ab   :  { %24385 = vst [vmem:[#allocation29_spill] sm:$0xff] %v16878_v62  ;;  %v16880_v39 = vadd.f32 %v981_v47, %v600_v43  ;;  %v12981_v38 = vpop.f32.mrf.mxu1 }
 0x1ac   :  { %v12895_v40 = vpop.f32.mrf.mxu0 }
 0x1ad   :  { %24386 = vst [vmem:[#allocation78_spill] sm:$0xff] %v16880_v39  ;;  %v16882_v59 = vadd.f32 %v12975_v7, %v12895_v40  ;;  %v1017_v21 = vpop.f32.mrf.mxu1 }
 0x1ae   :  { %v620_v19 = vpop.f32.mrf.mxu0 }
 0x1af   :  { %24387 = vst [vmem:[#allocation32_spill] sm:$0xff] %v16882_v59  ;;  %v16884_v52 = vadd.f32 %v993_v16, %v620_v19  ;;  %v12984_v45 = vpop.f32.mrf.mxu1 }
 0x1b0   :  { %v12898_v0 = vpop.f32.mrf.mxu0 }
 0x1b1   :  { %24388 = vst [vmem:[#allocation81_spill] sm:$0xff] %v16884_v52  ;;  %v16886_v48 = vadd.f32 %v12978_v30, %v12898_v0  ;;  %v1029_v61 = vpop.f32.mrf.mxu1 }
 0x1b2   :  { %v640_v4 = vpop.f32.mrf.mxu0 }
 0x1b3   :  { %24389 = vst [vmem:[#allocation36_spill] sm:$0xff] %v16886_v48  ;;  %v16888_v31 = vadd.f32 %v1005_v27, %v640_v4  ;;  %v12987_v35 = vpop.f32.mrf.mxu1 }
 0x1b4   :  { %v12901_v41 = vpop.f32.mrf.mxu0 }
 0x1b5   :  { %24390 = vst [vmem:[#allocation84_spill] sm:$0xff] %v16888_v31  ;;  %v16890_v49 = vadd.f32 %v12981_v38, %v12901_v41  ;;  %v1041_v56 = vpop.f32.mrf.mxu1 }
 0x1b6   :  { %v660_v18 = vpop.f32.mrf.mxu0 }
 0x1b7   :  { %24391 = vst [vmem:[#allocation37_spill] sm:$0xff] %v16890_v49  ;;  %v16892_v57 = vadd.f32 %v1017_v21, %v660_v18 }
 0x1b8   :  { %v16894_v13 = vpop.f32.mrf.mxu1  ;;  %v12904_v60 = vpop.f32.mrf.mxu0 }
 0x1b9   :  { %24392 = vst [vmem:[#allocation33_spill] sm:$0xff] %v16892_v57  ;;  %v16896_v28 = vadd.f32 %v12984_v45, %v12904_v60 }
 0x1ba   :  { %v16898_v25 = vpop.f32.mrf.mxu1  ;;  %v680_v9 = vpop.f32.mrf.mxu0 }
 0x1bb   :  { %24393 = vst [vmem:[#allocation87_spill] sm:$0xff] %v16896_v28  ;;  %v16900_v2 = vadd.f32 %v1029_v61, %v680_v9 }
 0x1bc   :  { %v16902_v53 = vpop.f32.mrf.mxu1  ;;  %v12907_v5 = vpop.f32.mrf.mxu0 }
 0x1bd   :  { %24394 = vst [vmem:[#allocation40_spill] sm:$0xff] %v16900_v2  ;;  %v16904_v8 = vadd.f32 %v12987_v35, %v12907_v5 }
 0x1be   :  { %v16906_v23 = vpop.f32.mrf.mxu1  ;;  %v700_v34 = vpop.f32.mrf.mxu0 }
 0x1bf   :  { %24395 = vst [vmem:[#allocation43_spill] sm:$0xff] %v16904_v8  ;;  %v16908_v50 = vadd.f32 %v1041_v56, %v700_v34 }
 0x1c0   :  { %v16910_v10 = vpop.f32.mrf.mxu1  ;;  %v13022_v47 = vpop.f32.mrf.mxu0 }
 0x1c1   :  { %24396 = vst [vmem:[#allocation44_spill] sm:$0xff] %v16908_v50 }
 0x1c2   :  { %v16912_v26 = vpop.f32.mrf.mxu1  ;;  %v1151_v7 = vpop.f32.mrf.mxu0 }
 0x1c4   :  { %v16914_v6 = vpop.f32.mrf.mxu1  ;;  %v13025_v16 = vpop.f32.mrf.mxu0 }
 0x1c6   :  { %v16916_v20 = vpop.f32.mrf.mxu1  ;;  %v16918_v30 = vpop.f32.mrf.mxu0 }
 0x1c8   :  { %v16920_v37 = vpop.f32.mrf.mxu1  ;;  %v16922_v27 = vpop.f32.mrf.mxu0 }
 0x1ca   :  { %v16924_v43 = vpop.f32.mrf.mxu1  ;;  %v16926_v38 = vpop.f32.mrf.mxu0 }
 0x1cc   :  { %v16928_v40 = vpop.f32.mrf.mxu1  ;;  %v16930_v21 = vpop.f32.mrf.mxu0 }
 0x1ce   :  { %v16932_v19 = vpop.f32.mrf.mxu1  ;;  %v16934_v45 = vpop.f32.mrf.mxu0 }
 0x1d0   :  { %v16936_v0 = vpop.f32.mrf.mxu1  ;;  %v16938_v61 = vpop.f32.mrf.mxu0 }
 0x1d2   :  { %v16940_v4 = vpop.f32.mrf.mxu1  ;;  %v16942_v35 = vpop.f32.mrf.mxu0 }
 0x1d4   :  { %v16944_v41 = vpop.f32.mrf.mxu1  ;;  %v16946_v56 = vpop.f32.mrf.mxu0 }
 0x1d6   :  { %v16948_v18 = vpop.f32.mrf.mxu1  ;;  %v16950_v60 = vpop.f32.mrf.mxu0 }
 0x1d7   :  { %24397 = vst [vmem:[#allocation57_spill] sm:$0xff] %v16948_v18 }
 0x1d8   :  { %v16952_v9 = vpop.f32.mrf.mxu1  ;;  %v16954_v5 = vpop.f32.mrf.mxu0 }
 0x1d9   :  { %24398 = vst [vmem:[#allocation47_spill] sm:$0xff] %v16952_v9 }
 0x1da   :  { %v16956_v34 = vpop.f32.mrf.mxu1  ;;  %v16958_v46 = vpop.f32.mrf.mxu0 }
 0x1db   :  { %24399 = vst [vmem:[#allocation59_spill] sm:$0xff] %v16956_v34 }
 0x1dc   :  { %v16960_v50 = vpop.f32.mrf.mxu1  ;;  %v16962_v8 = vpop.f32.mrf.mxu0 }
 0x1dd   :  { %24400 = vst [vmem:[#allocation56_spill] sm:$0xff] %v16960_v50 }
 0x1de   :  { %v16964_v2 = vpop.f32.mrf.mxu1  ;;  %v16966_v28 = vpop.f32.mrf.mxu0 }
 0x1df   :  { %24401 = vst [vmem:[#allocation50_spill] sm:$0xff] %v16964_v2 }
 0x1e0   :  { %v16968_v57 = vpop.f32.mrf.mxu1  ;;  %v16970_v49 = vpop.f32.mrf.mxu0 }
 0x1e1   :  { %24402 = vst [vmem:[#allocation58_spill] sm:$0xff] %v16968_v57 }
 0x1e2   :  { %v16972_v31 = vpop.f32.mrf.mxu1  ;;  %v16974_v48 = vpop.f32.mrf.mxu0 }
 0x1e3   :  { %24403 = vst [vmem:[#allocation61_spill] sm:$0xff] %v16972_v31  ;;  %24404 = vst [vmem:[#allocation60_spill] sm:$0xff] %v16974_v48 }
 0x1e4   :  { %v16976_v52 = vpop.f32.mrf.mxu1  ;;  %v16978_v59 = vpop.f32.mrf.mxu0 }
 0x1e5   :  { %24405 = vst [vmem:[#allocation63_spill] sm:$0xff] %v16976_v52  ;;  %24406 = vst [vmem:[#allocation62_spill] sm:$0xff] %v16978_v59 }
 0x1e6   :  { %v16980_v39 = vpop.f32.mrf.mxu1  ;;  %v16982_v50 = vpop.f32.mrf.mxu0 }
 0x1e7   :  { %24407 = vst [vmem:[#allocation65_spill] sm:$0xff] %v16980_v39  ;;  %24408 = vst [vmem:[#allocation64_spill] sm:$0xff] %v16982_v50 }
 0x1e8   :  { %v16984_v62 = vpop.f32.mrf.mxu1  ;;  %v16986_v2 = vpop.f32.mrf.mxu0 }
 0x1e9   :  { %24409 = vst [vmem:[#allocation67_spill] sm:$0xff] %v16984_v62  ;;  %24410 = vst [vmem:[#allocation66_spill] sm:$0xff] %v16986_v2 }
 0x1ea   :  { %v16988_v34 = vpop.f32.mrf.mxu1  ;;  %v16990_v57 = vpop.f32.mrf.mxu0 }
 0x1eb   :  { %24411 = vst [vmem:[#allocation69_spill] sm:$0xff] %v16988_v34  ;;  %24412 = vst [vmem:[#allocation68_spill] sm:$0xff] %v16990_v57 }
 0x1ec   :  { %v16992_v29 = vpop.f32.mrf.mxu1  ;;  %v16994_v31 = vpop.f32.mrf.mxu0 }
 0x1ed   :  { %24413 = vst [vmem:[#allocation71_spill] sm:$0xff] %v16992_v29  ;;  %24414 = vst [vmem:[#allocation70_spill] sm:$0xff] %v16994_v31 }
 0x1ee   :  { %v16996_v9 = vpop.f32.mrf.mxu1  ;;  %v16998_v52 = vpop.f32.mrf.mxu0 }
 0x1ef   :  { %24415 = vst [vmem:[#allocation74_spill] sm:$0xff] %v16996_v9  ;;  %24416 = vst [vmem:[#allocation73_spill] sm:$0xff] %v16998_v52 }
 0x1f0   :  { %v17000_v59 = vpop.f32.mrf.mxu1  ;;  %v17002_v39 = vpop.f32.mrf.mxu0 }
 0x1f1   :  { %24417 = vst [vmem:[#allocation77_spill] sm:$0xff] %v17000_v59  ;;  %24418 = vst [vmem:[#allocation76_spill] sm:$0xff] %v17002_v39  ;;  %v1159_v59 = vadd.f32 %v13022_v47, %v16838_v51 }
 0x1f2   :  { %v17004_v50 = vpop.f32.mrf.mxu1  ;;  %v17006_v62 = vpop.f32.mrf.mxu0 }
 0x1f3   :  { %24419 = vst [vmem:[#allocation80_spill] sm:$0xff] %v17004_v50  ;;  %24420 = vst [vmem:[#allocation79_spill] sm:$0xff] %v17006_v62  ;;  %v1152_v62 = vadd.f32 %v1151_v7, %v16840_v22  ;;  %v1187_v22 = vadd.f32 %v16922_v27, %v16846_v36  ;;  %v1201_v36 = vadd.f32 %v16930_v21, %v16850_v33 }
 0x1f4   :  { %v17008_v2 = vpop.f32.mrf.mxu1  ;;  %v17010_v34 = vpop.f32.mrf.mxu0 }
 0x1f5   :  { %24421 = vst [vmem:[#allocation83_spill] sm:$0xff] %v17008_v2  ;;  %24422 = vst [vmem:[#allocation82_spill] sm:$0xff] %v17010_v34  ;;  %v1458_v51 = vadd.f32 %v16898_v25, %v1152_v62 }
 0x1f6   :  { %v17012_v57 = vpop.f32.mrf.mxu1  ;;  %v17014_v29 = vpop.f32.mrf.mxu0 }
 0x1f7   :  { %24423 = vst [vmem:[#allocation86_spill] sm:$0xff] %v17012_v57  ;;  %24424 = vst [vmem:[#allocation85_spill] sm:$0xff] %v17014_v29  ;;  %v1173_v57 = vadd.f32 %v13025_v16, %v16842_v44  ;;  %v1466_v29 = vadd.f32 %v16894_v13, %v1159_v59  ;;  %v1180_v59 = vadd.f32 %v16926_v38, %v16848_v54 }
 0x1f8   :  { %v13262_v31 = vpop.f32.mrf.mxu1  ;;  %v17016_v9 = vpop.f32.mrf.mxu0  ;;  %v1498_v54 = vadd.f32 %v16910_v10, %v1187_v22 }
 0x1f9   :  { %24425 = vst [vmem:[#allocation89_spill] sm:$0xff] %v17016_v9  ;;  %v1166_v9 = vadd.f32 %v16918_v30, %v16844_v32  ;;  %v1490_v33 = vadd.f32 %v16912_v26, %v1180_v59  ;;  %v1236_v59 = vadd.f32 %v16958_v46, %v16864_v42 }
 0x1fa   :  { %v2097_v52 = vpop.f32.mrf.mxu1  ;;  %v17018_v15 = vpop.f32.mrf.mxu0 }
 0x1fb   :  { %24426 = vst [vmem:[#allocation88_spill] sm:$0xff] %v17018_v15  ;;  %v1474_v62 = vadd.f32 %v16906_v23, %v1166_v9 }
 0x1fc   :  { %v13265_v39 = vpop.f32.mrf.mxu1  ;;  %v17021_v50 = vpop.f32.mrf.mxu0 }
 0x1fd   :  { %24427 = vst [vmem:[#allocation90_spill] sm:$0xff] %v17021_v50 }
 0x1fe   :  { %v2109_v2 = vpop.f32.mrf.mxu1  ;;  %v17024_v18 = vpop.f32.mrf.mxu0 }
 0x1ff   :  { %24428 = vst [vmem:[#allocation91_spill] sm:$0xff] %v17024_v18  ;;  %v1482_v18 = vadd.f32 %v16902_v53, %v1173_v57 }
 0x200   :  { %v13268_v34 = vpop.f32.mrf.mxu1  ;;  %v13182_v48 = vpop.f32.mrf.mxu0 }
 0x201   :  { %v1831_v15 = vadd.f32 %v13182_v48, %v1466_v29 }
 0x202   :  { %v2121_v47 = vpop.f32.mrf.mxu1  ;;  %v1824_v3 = vpop.f32.mrf.mxu0 }
 0x203   :  { %v2104_v7 = vadd.f32 %v13262_v31, %v1831_v15  ;;  %v1825_v50 = vadd.f32 %v1824_v3, %v1458_v51  ;;  %v1222_v51 = vadd.f32 %v16950_v60, %v16860_v1 }
 0x204   :  { %v13271_v44 = vpop.f32.mrf.mxu1  ;;  %v13185_v16 = vpop.f32.mrf.mxu0 }
 0x205   :  { %2288 = vst [vmem:[%s23409_s7 + $0x8] sm:$0xff] %v2104_v7  ;;  %v2098_v32 = vadd.f32 %v2097_v52, %v1825_v50  ;;  %v1843_v29 = vadd.f32 %v13185_v16, %v1482_v18  ;;  %v1194_v52 = vadd.f32 %v16934_v45, %v16852_v11  ;;  %v1514_v11 = vadd.f32 %v16914_v6, %v1201_v36 }
 0x206   :  { %v2133_v48 = vpop.f32.mrf.mxu1  ;;  %v1836_v13 = vpop.f32.mrf.mxu0  ;;  %v1229_v18 = vadd.f32 %v16946_v56, %v16858_v12  ;;  %v1243_v7 = vadd.f32 %v16954_v5, %v16862_v17  ;;  %v1538_v17 = vadd.f32 %v16932_v19, %v1222_v51  ;;  %v1250_v36 = vadd.f32 %v16966_v28, %v16868_v24  ;;  %v24439_v51 = vld [vmem:[#allocation66_spill] sm:$0xff] }
 0x207   :  { %2287 = vst [vmem:[%s23409_s7] sm:$0xff] %v2098_v32  ;;  %v2116_v3 = vadd.f32 %v13265_v39, %v1843_v29  ;;  %v1837_v15 = vadd.f32 %v1836_v13, %v1474_v62  ;;  %v1215_v39 = vadd.f32 %v16938_v61, %v16854_v55  ;;  %v1506_v55 = vadd.f32 %v16916_v20, %v1194_v52  ;;  %v24429_v52 = vld [vmem:[#allocation72_spill] sm:$0xff] }
 0x208   :  { %v13274_v31 = vpop.f32.mrf.mxu1  ;;  %v13188_v57 = vpop.f32.mrf.mxu0  ;;  %v1546_v1 = vadd.f32 %v16928_v40, %v1229_v18  ;;  %v1257_v62 = vadd.f32 %v16962_v8, %v16866_v58  ;;  %v1562_v46 = vadd.f32 %v16936_v0, %v1243_v7  ;;  %v1554_v58 = vadd.f32 %v16940_v4, %v1236_v59 }
 0x209   :  { %2290 = vst [vmem:[%s23409_s7 + $0x18] sm:$0xff] %v2116_v3  ;;  %v2110_v25 = vadd.f32 %v2109_v2, %v1837_v15  ;;  %v1855_v53 = vadd.f32 %v13188_v57, %v1498_v54  ;;  %v1208_v2 = vadd.f32 %v16942_v35, %v16856_v63  ;;  %v1530_v63 = vadd.f32 %v16920_v37, %v1215_v39  ;;  %v24432_v39 = vld [vmem:[#allocation28_spill] sm:$0xff] }
 0x20a   :  { %v2145_v23 = vpop.f32.mrf.mxu1  ;;  %v1848_v50 = vpop.f32.mrf.mxu0  ;;  %v1271_v54 = vadd.f32 %v16970_v49, %v16870_v14  ;;  %v1578_v24 = vadd.f32 %v16944_v41, %v1257_v62  ;;  %v24431_v14 = vld [vmem:[#allocation57_spill] sm:$0xff]  ;;  %v24445_v62 = vld [vmem:[#allocation70_spill] sm:$0xff] }
 0x20b   :  { %2289 = vst [vmem:[%s23409_s7 + $0x10] sm:$0xff] %v2110_v25  ;;  %v2128_v10 = vadd.f32 %v13268_v34, %v1855_v53  ;;  %v1849_v30 = vadd.f32 %v1848_v50, %v1490_v33  ;;  %v1522_v12 = vadd.f32 %v16924_v43, %v1208_v2  ;;  %v24430_v25 = vld [vmem:[#allocation60_spill] sm:$0xff]  ;;  %v1570_v49 = vadd.f32 %v24431_v14, %v1250_v36 }
 0x20c   :  { %v13277_v27 = vpop.f32.mrf.mxu1  ;;  %v13191_v38 = vpop.f32.mrf.mxu0  ;;  %v1264_v53 = vadd.f32 %v24430_v25, %v24429_v52  ;;  %v24450_v52 = vld [vmem:[#allocation36_spill] sm:$0xff] }
 0x20d   :  { %2292 = vst [vmem:[%s23409_s7 + $0x28] sm:$0xff] %v2128_v10  ;;  %v2122_v26 = vadd.f32 %v2121_v47, %v1849_v30  ;;  %v1867_v21 = vadd.f32 %v13191_v38, %v1514_v11  ;;  %v24433_v10 = vld [vmem:[#allocation62_spill] sm:$0xff] }
 0x20e   :  { %v2157_v45 = vpop.f32.mrf.mxu1  ;;  %v1860_v61 = vpop.f32.mrf.mxu0  ;;  %v1285_v30 = vadd.f32 %v24433_v10, %v24432_v39  ;;  %v24453_v39 = vld [vmem:[#allocation84_spill] sm:$0xff] }
 0x20f   :  { %2291 = vst [vmem:[%s23409_s7 + $0x20] sm:$0xff] %v2122_v26  ;;  %v2140_v6 = vadd.f32 %v13271_v44, %v1867_v21  ;;  %v1861_v9 = vadd.f32 %v1860_v61, %v1506_v55  ;;  %v24435_v21 = vld [vmem:[#allocation75_spill] sm:$0xff]  ;;  %v24436_v55 = vld [vmem:[#allocation64_spill] sm:$0xff] }
 0x210   :  { %v13280_v35 = vpop.f32.mrf.mxu1  ;;  %v13194_v34 = vpop.f32.mrf.mxu0 }
 0x211   :  { %2294 = vst [vmem:[%s23409_s7 + $0x38] sm:$0xff] %v2140_v6  ;;  %v2134_v20 = vadd.f32 %v2133_v48, %v1861_v9  ;;  %v1879_v47 = vadd.f32 %v13194_v34, %v1530_v63  ;;  %v24437_v6 = vld [vmem:[#allocation59_spill] sm:$0xff]  ;;  %v24438_v34 = vld [vmem:[#allocation29_spill] sm:$0xff] }
 0x212   :  { %v2169_v56 = vpop.f32.mrf.mxu1  ;;  %v1872_v22 = vpop.f32.mrf.mxu0  ;;  %v1586_v9 = vadd.f32 %v24437_v6, %v1264_v53 }
 0x213   :  { %2293 = vst [vmem:[%s23409_s7 + $0x30] sm:$0xff] %v2134_v20  ;;  %v2152_v37 = vadd.f32 %v13274_v31, %v1879_v47  ;;  %v1873_v44 = vadd.f32 %v1872_v22, %v1522_v12  ;;  %v1299_v20 = vadd.f32 %v24439_v51, %v24438_v34  ;;  %v24460_v34 = vld [vmem:[#allocation85_spill] sm:$0xff] }
 0x214   :  { %v13283_v60 = vpop.f32.mrf.mxu1  ;;  %v13197_v16 = vpop.f32.mrf.mxu0 }
 0x215   :  { %2296 = vst [vmem:[%s23409_s7 + $0x48] sm:$0xff] %v2152_v37  ;;  %v2146_v43 = vadd.f32 %v2145_v23, %v1873_v44  ;;  %v1891_v32 = vadd.f32 %v13197_v16, %v1546_v1  ;;  %v24441_v44 = vld [vmem:[#allocation78_spill] sm:$0xff]  ;;  %v24442_v1 = vld [vmem:[#allocation68_spill] sm:$0xff] }
 0x216   :  { %v2181_v5 = vpop.f32.mrf.mxu1  ;;  %v1884_v29 = vpop.f32.mrf.mxu0 }
 0x217   :  { %2295 = vst [vmem:[%s23409_s7 + $0x40] sm:$0xff] %v2146_v43  ;;  %v2164_v40 = vadd.f32 %v13277_v27, %v1891_v32  ;;  %v1885_v48 = vadd.f32 %v1884_v29, %v1538_v17  ;;  %v24434_v27 = vld [vmem:[#allocation47_spill] sm:$0xff]  ;;  %v24443_v43 = vld [vmem:[#allocation50_spill] sm:$0xff]  ;;  %v24444_v29 = vld [vmem:[#allocation32_spill] sm:$0xff] }
 0x218   :  { %v13286_v42 = vpop.f32.mrf.mxu1  ;;  %v13200_v13 = vpop.f32.mrf.mxu0  ;;  %v1594_v38 = vadd.f32 %v24434_v27, %v1271_v54 }
 0x219   :  { %2298 = vst [vmem:[%s23409_s7 + $0x58] sm:$0xff] %v2164_v40  ;;  %v2158_v19 = vadd.f32 %v2157_v45, %v1885_v48  ;;  %v1903_v3 = vadd.f32 %v13200_v13, %v1562_v46  ;;  %v1278_v45 = vadd.f32 %v24436_v55, %v24435_v21  ;;  %v1313_v40 = vadd.f32 %v24445_v62, %v24444_v29  ;;  %v24457_v21 = vld [vmem:[#allocation82_spill] sm:$0xff] }
 0x21a   :  { %v2193_v8 = vpop.f32.mrf.mxu1  ;;  %v1896_v15 = vpop.f32.mrf.mxu0 }
 0x21b   :  { %2297 = vst [vmem:[%s23409_s7 + $0x50] sm:$0xff] %v2158_v19  ;;  %v2176_v0 = vadd.f32 %v13280_v35, %v1903_v3  ;;  %v1897_v31 = vadd.f32 %v1896_v15, %v1554_v58  ;;  %v1602_v32 = vadd.f32 %v24443_v43, %v1278_v45  ;;  %v24447_v3 = vld [vmem:[#allocation81_spill] sm:$0xff] }
 0x21c   :  { %v13289_v28 = vpop.f32.mrf.mxu1  ;;  %v13203_v57 = vpop.f32.mrf.mxu0  ;;  %v24448_v58 = vld [vmem:[#allocation73_spill] sm:$0xff] }
 0x21d   :  { %2300 = vst [vmem:[%s23409_s7 + $0x68] sm:$0xff] %v2176_v0  ;;  %v2170_v4 = vadd.f32 %v2169_v56, %v1897_v31  ;;  %v1915_v33 = vadd.f32 %v13203_v57, %v1578_v24  ;;  %v24440_v56 = vld [vmem:[#allocation56_spill] sm:$0xff]  ;;  %v24449_v0 = vld [vmem:[#allocation61_spill] sm:$0xff] }
 0x21e   :  { %v2205_v23 = vpop.f32.mrf.mxu1  ;;  %v1908_v50 = vpop.f32.mrf.mxu0  ;;  %v1610_v22 = vadd.f32 %v24440_v56, %v1285_v30 }
 0x21f   :  { %2299 = vst [vmem:[%s23409_s7 + $0x60] sm:$0xff] %v2170_v4  ;;  %v2188_v41 = vadd.f32 %v13283_v60, %v1915_v33  ;;  %v1909_v11 = vadd.f32 %v1908_v50, %v1570_v49  ;;  %v1292_v60 = vadd.f32 %v24442_v1, %v24441_v44  ;;  %v24452_v33 = vld [vmem:[#allocation63_spill] sm:$0xff] }
 0x220   :  { %v13292_v2 = vpop.f32.mrf.mxu1  ;;  %v13206_v26 = vpop.f32.mrf.mxu0  ;;  %v1642_v14 = vadd.f32 %v24452_v33, %v1313_v40  ;;  %v24467_v40 = vld [vmem:[#allocation74_spill] sm:$0xff] }
 0x221   :  { %2302 = vst [vmem:[%s23409_s7 + $0x78] sm:$0xff] %v2188_v41  ;;  %v2182_v61 = vadd.f32 %v2181_v5, %v1909_v11  ;;  %v1927_v18 = vadd.f32 %v13206_v26, %v1594_v38  ;;  %v1618_v31 = vadd.f32 %v24449_v0, %v1292_v60  ;;  %v24455_v11 = vld [vmem:[#allocation65_spill] sm:$0xff]  ;;  %v24464_v60 = vld [vmem:[#allocation71_spill] sm:$0xff]  ;;  %v24471_v0 = vld [vmem:[#allocation44_spill] sm:$0xff] }
 0x222   :  { %v2217_v63 = vpop.f32.mrf.mxu1  ;;  %v1920_v35 = vpop.f32.mrf.mxu0  ;;  %v24456_v26 = vld [vmem:[#allocation37_spill] sm:$0xff] }
 0x223   :  { %2301 = vst [vmem:[%s23409_s7 + $0x70] sm:$0xff] %v2182_v61  ;;  %v2200_v47 = vadd.f32 %v13286_v42, %v1927_v18  ;;  %v1921_v12 = vadd.f32 %v1920_v35, %v1586_v9  ;;  %v24446_v42 = vld [vmem:[#allocation58_spill] sm:$0xff]  ;;  %v24458_v61 = vld [vmem:[#allocation67_spill] sm:$0xff]  ;;  %v24459_v35 = vld [vmem:[#allocation33_spill] sm:$0xff] }
 0x224   :  { %v13295_v7 = vpop.f32.mrf.mxu1  ;;  %v13209_v37 = vpop.f32.mrf.mxu0  ;;  %v1626_v13 = vadd.f32 %v24446_v42, %v1299_v20  ;;  %v24468_v42 = vld [vmem:[#allocation43_spill] sm:$0xff] }
 0x225   :  { %2304 = vst [vmem:[%s23409_s7 + $0x88] sm:$0xff] %v2200_v47  ;;  %v2194_v16 = vadd.f32 %v2193_v8, %v1921_v12  ;;  %v1939_v59 = vadd.f32 %v13209_v37, %v1610_v22  ;;  %v1306_v8 = vadd.f32 %v24448_v58, %v24447_v3  ;;  %v24461_v47 = vld [vmem:[#allocation69_spill] sm:$0xff]  ;;  %v24462_v22 = vld [vmem:[#allocation87_spill] sm:$0xff] }
 0x226   :  { %v2229_v17 = vpop.f32.mrf.mxu1  ;;  %v1932_v5 = vpop.f32.mrf.mxu0  ;;  %v24463_v37 = vld [vmem:[#allocation89_spill] sm:$0xff] }
 0x227   :  { %2303 = vst [vmem:[%s23409_s7 + $0x80] sm:$0xff] %v2194_v16  ;;  %v2212_v48 = vadd.f32 %v13289_v28, %v1939_v59  ;;  %v1933_v46 = vadd.f32 %v1932_v5, %v1602_v32  ;;  %v24451_v28 = vld [vmem:[#allocation76_spill] sm:$0xff]  ;;  %v1634_v27 = vadd.f32 %v24455_v11, %v1306_v8  ;;  %v24470_v58 = vld [vmem:[#allocation77_spill] sm:$0xff] }
 0x228   :  { %v13298_v36 = vpop.f32.mrf.mxu1  ;;  %v13212_v19 = vpop.f32.mrf.mxu0  ;;  %v1327_v25 = vadd.f32 %v24451_v28, %v24450_v52  ;;  %v24465_v32 = vld [vmem:[#allocation40_spill] sm:$0xff] }
 0x229   :  { %2306 = vst [vmem:[%s23409_s7 + $0x98] sm:$0xff] %v2212_v48  ;;  %v2206_v15 = vadd.f32 %v2205_v23, %v1933_v46  ;;  %v1951_v54 = vadd.f32 %v13212_v19, %v1626_v13  ;;  %v24454_v23 = vld [vmem:[#allocation79_spill] sm:$0xff]  ;;  %v24466_v5 = vld [vmem:[#allocation88_spill] sm:$0xff]  ;;  %v24469_v13 = vld [vmem:[#allocation90_spill] sm:$0xff] }
 0x22a   :  { %v2241_v24 = vpop.f32.mrf.mxu1  ;;  %v1944_v57 = vpop.f32.mrf.mxu0  ;;  %v1320_v10 = vadd.f32 %v24454_v23, %v24453_v39  ;;  %v1658_v18 = vadd.f32 %v24458_v61, %v1327_v25  ;;  %v24473_v28 = vld [vmem:[#allocation80_spill] sm:$0xff] }
 0x22b   :  { %2305 = vst [vmem:[%s23409_s7 + $0x90] sm:$0xff] %v2206_v15  ;;  %v2224_v53 = vadd.f32 %v13292_v2, %v1951_v54  ;;  %v1945_v4 = vadd.f32 %v1944_v57, %v1618_v31  ;;  %v1341_v2 = vadd.f32 %v24457_v21, %v24456_v26  ;;  %v24472_v31 = vld [vmem:[#allocation91_spill] sm:$0xff] }
 0x22c   :  { %v13301_v49 = vpop.f32.mrf.mxu1  ;;  %v13215_v50 = vpop.f32.mrf.mxu0  ;;  %v1650_v12 = vadd.f32 %v24461_v47, %v1320_v10 }
 0x22d   :  { %2308 = vst [vmem:[%s23409_s7 + $0xa8] sm:$0xff] %v2224_v53  ;;  %v2218_v30 = vadd.f32 %v2217_v63, %v1945_v4  ;;  %v1963_v41 = vadd.f32 %v13215_v50, %v1642_v14  ;;  %v1334_v63 = vadd.f32 %v24460_v34, %v24459_v35  ;;  %v1674_v16 = vadd.f32 %v24464_v60, %v1341_v2  ;;  %v24474_v14 = vld [vmem:[#allocation83_spill] sm:$0xff] }
 0x22e   :  { %v1956_v38 = vpop.f32.mrf.mxu0  ;;  %v2253_v6 = vpop.f32.mrf.mxu1 }
 0x22f   :  { %2307 = vst [vmem:[%s23409_s7 + $0xa0] sm:$0xff] %v2218_v30  ;;  %v2236_v55 = vadd.f32 %v13295_v7, %v1963_v41  ;;  %v1957_v45 = vadd.f32 %v1956_v38, %v1634_v27  ;;  %v1355_v7 = vadd.f32 %v24463_v37, %v24462_v22  ;;  %v1666_v48 = vadd.f32 %v24467_v40, %v1334_v63  ;;  %v24475_v30 = vld [vmem:[#allocation86_spill] sm:$0xff] }
 0x230   :  { %v13218_v9 = vpop.f32.mrf.mxu0  ;;  %v13304_v59 = vpop.f32.mrf.mxu1 }
 0x231   :  { %2310 = vst [vmem:[%s23409_s7 + $0xb8] sm:$0xff] %v2236_v55  ;;  %v2230_v51 = vadd.f32 %v2229_v17, %v1957_v45  ;;  %v1975_v20 = vadd.f32 %v13218_v9, %v1658_v18  ;;  %v1348_v17 = vadd.f32 %v24466_v5, %v24465_v32  ;;  %v1690_v8 = vadd.f32 %v24470_v58, %v1355_v7 }
 0x232   :  { %v1968_v56 = vpop.f32.mrf.mxu0  ;;  %v2265_v15 = vpop.f32.mrf.mxu1 }
 0x233   :  { %2309 = vst [vmem:[%s23409_s7 + $0xb0] sm:$0xff] %v2230_v51  ;;  %v2248_v44 = vadd.f32 %v13298_v36, %v1975_v20  ;;  %v1969_v1 = vadd.f32 %v1968_v56, %v1650_v12  ;;  %v1369_v36 = vadd.f32 %v24469_v13, %v24468_v42  ;;  %v1682_v25 = vadd.f32 %v24473_v28, %v1348_v17 }
 0x234   :  { %v13221_v43 = vpop.f32.mrf.mxu0  ;;  %v13307_v50 = vpop.f32.mrf.mxu1 }
 0x235   :  { %2312 = vst [vmem:[%s23409_s7 + $0xc8] sm:$0xff] %v2248_v44  ;;  %v2242_v29 = vadd.f32 %v2241_v24, %v1969_v1  ;;  %v1987_v62 = vadd.f32 %v13221_v43, %v1674_v16  ;;  %v1362_v24 = vadd.f32 %v24472_v31, %v24471_v0 }
 0x236   :  { %v1980_v46 = vpop.f32.mrf.mxu0  ;;  %v2277_v26 = vpop.f32.mrf.mxu1 }
 0x237   :  { %2311 = vst [vmem:[%s23409_s7 + $0xc0] sm:$0xff] %v2242_v29  ;;  %v2260_v19 = vadd.f32 %v13301_v49, %v1987_v62  ;;  %v1981_v3 = vadd.f32 %v1980_v46, %v1666_v48  ;;  %v1706_v49 = vadd.f32 %v24474_v14, %v1369_v36  ;;  %v1698_v41 = vadd.f32 %v24475_v30, %v1362_v24 }
 0x238   :  { %v13224_v54 = vpop.f32.mrf.mxu0 }
 0x239   :  { %2314 = vst [vmem:[%s23409_s7 + $0xd8] sm:$0xff] %v2260_v19  ;;  %v2254_v57 = vadd.f32 %v2253_v6, %v1981_v3  ;;  %v1999_v52 = vadd.f32 %v13224_v54, %v1690_v8 }
 0x23a   :  { %v1992_v53 = vpop.f32.mrf.mxu0 }
 0x23b   :  { %2313 = vst [vmem:[%s23409_s7 + $0xd0] sm:$0xff] %v2254_v57  ;;  %v2272_v4 = vadd.f32 %v13304_v59, %v1999_v52  ;;  %v1993_v33 = vadd.f32 %v1992_v53, %v1682_v25 }
 0x23c   :  { %v13227_v39 = vpop.f32.mrf.mxu0 }
 0x23d   :  { %2316 = vst [vmem:[%s23409_s7 + $0xe8] sm:$0xff] %v2272_v4  ;;  %v2266_v23 = vadd.f32 %v2265_v15, %v1993_v33  ;;  %v2011_v10 = vadd.f32 %v13227_v39, %v1706_v49 }
 0x23e   :  { %v2004_v11 = vpop.f32.mrf.mxu0 }
 0x23f   :  { %2315 = vst [vmem:[%s23409_s7 + $0xe0] sm:$0xff] %v2266_v23  ;;  %v2284_v27 = vadd.f32 %v13307_v50, %v2011_v10  ;;  %v2005_v38 = vadd.f32 %v2004_v11, %v1698_v41  ;;  %2324 = sbr.rel (%p11065_p6) target bundleno = 1456 (0x5b0), region = 41 }
 0x241   :  { %2318 = vst [vmem:[%s23409_s7 + $0xf8] sm:$0xff] %v2284_v27  ;;  %v2278_v21 = vadd.f32 %v2277_v26, %v2005_v38 }
 0x243   :  { %2317 = vst [vmem:[%s23409_s7 + $0xf0] sm:$0xff] %v2278_v21 }
 0x244   :  { %v24476_v2 = vld [vmem:[#allocation12_spill] sm:$0xff]  ;;  %v24477_v45 = vld [vmem:[#allocation13_spill] sm:$0xff]  ;;  %v15336_v18 = vmov 0   ;;  %v24478_v6 = vld [vmem:[#allocation14_spill] sm:$0xff] }
 0x245   :  { %v11068_v55 = vadd.s32 4294967280, %v24476_v2  ;;  %v11066_v61 = vadd.s32 4294967280, %v24477_v45  ;;  %15246 = vset.pattern.permute.xlu1 %v15336_v18  ;;  %15245 = vset.pattern.permute.xlu0 %v15336_v18  ;;  %v11069_v9 = vadd.s32 4294967280, %v24478_v6  ;;  %v24479_v35 = vld [vmem:[#allocation15_spill] sm:$0xff]  ;;  %v2339_v51 = vld [vmem:[#allocation6 + $0x70] sm:$0xff]  ;;  %v2338_v20 = vld [vmem:[#allocation6 + $0x68] sm:$0xff] }
 0x246   :  { %v11067_v34 = vadd.s32 4294967280, %v24479_v35  ;;  %v2340_v63 = vld [vmem:[#allocation6 + $0x78] sm:$0xff]  ;;  %v24480_v47 = vld [vmem:[#allocation16_spill] sm:$0xff]  ;;  %v24481_v56 = vld [vmem:[#allocation17_spill] sm:$0xff]  ;;  %v17222_v1 = vand.u32 4294901760, %v2339_v51  ;;  %v17224_v60 = vand.u32 4294901760, %v2338_v20 }
 0x247   :  { %2396 = vperm.xlu1 %15246, %v11068_v55   ;;  %2390 = vperm.xlu0 %15245, %v11066_v61   ;;  %v11071_v12 = vadd.s32 4294967280, %v24480_v47  ;;  %v11070_v22 = vadd.s32 4294967280, %v24481_v56  ;;  %v2337_v37 = vld [vmem:[#allocation6 + $0x60] sm:$0xff]  ;;  %v2336_v7 = vld [vmem:[#allocation6 + $0x58] sm:$0xff]  ;;  %v17220_v44 = vand.u32 4294901760, %v2340_v63  ;;  %v24482_v16 = vld [vmem:[#allocation18_spill] sm:$0xff] }
 0x248   :  { %v11073_v59 = vadd.s32 4294967280, %v24482_v16  ;;  %v17227_v43 = vand.u32 4294901760, %v2337_v37  ;;  %v17229_v32 = vand.u32 4294901760, %v2336_v7  ;;  %v2335_v5 = vld [vmem:[#allocation6 + $0x50] sm:$0xff]  ;;  %v24483_v17 = vld [vmem:[#allocation19_spill] sm:$0xff]  ;;  %v17236_v40 = vsub.f32 %v2339_v51, %v17222_v1  ;;  %v2334_v3 = vld [vmem:[#allocation6 + $0x48] sm:$0xff] }
 0x249   :  { %v11072_v29 = vadd.s32 4294967280, %v24483_v17  ;;  %v17233_v62 = vsub.f32 %v2340_v63, %v17220_v44  ;;  %v17239_v48 = vsub.f32 %v2338_v20, %v17224_v60  ;;  %13308 = vmatprep.subr.mxu0 %v17220_v44  ;;  %v17255_v19 = vand.u32 4294901760, %v2335_v5  ;;  %v24484_v8 = vld [vmem:[#allocation20_spill] sm:$0xff]  ;;  %v24485_v54 = vld [vmem:[#allocation21_spill] sm:$0xff]  ;;  %v2332_v50 = vld [vmem:[#allocation6 + $0x38] sm:$0xff] }
 0x24a   :  { %v17242_v46 = vsub.f32 %v2337_v37, %v17227_v43  ;;  %v17249_v13 = vand.u32 4294901760, %v17236_v40  ;;  %13309 = vmatpush3.msra.mxu0 %v17220_v44  ;;  %v17258_v58 = vsub.f32 %v2336_v7, %v17229_v32  ;;  %v11075_v15 = vadd.s32 4294967280, %v24484_v8  ;;  %v2333_v57 = vld [vmem:[#allocation6 + $0x40] sm:$0xff]  ;;  %v24486_v39 = vld [vmem:[#allocation22_spill] sm:$0xff]  ;;  %v24487_v10 = vld [vmem:[#allocation23_spill] sm:$0xff] }
 0x24b   :  { %2399 = vperm.xlu1 %15246, %v11069_v9   ;;  %2393 = vperm.xlu0 %15245, %v11067_v34   ;;  %v17246_v42 = vand.u32 4294901760, %v17233_v62  ;;  %v17252_v36 = vand.u32 4294901760, %v17239_v48  ;;  %v11074_v0 = vadd.s32 4294967280, %v24485_v54  ;;  %v17271_v28 = vand.u32 4294901760, %v2334_v3  ;;  %v2331_v21 = vld [vmem:[#allocation6 + $0x30] sm:$0xff]  ;;  %v24489_v45 = vld [vmem:[#allocation24_spill] sm:$0xff] }
 0x24c   :  { %13310 = vmatprep.subr.mxu0 %v17222_v1  ;;  %v2993_v24 = vsub.f32 %v17236_v40, %v17249_v13  ;;  %v17268_v52 = vand.u32 4294901760, %v17242_v46  ;;  %v17276_v4 = vsub.f32 %v2335_v5, %v17255_v19  ;;  %v17280_v14 = vand.u32 4294901760, %v17258_v58  ;;  %v24490_v18 = vld [vmem:[#allocation25_spill] sm:$0xff]  ;;  %v24493_v37 = vld [vmem:[#allocation26_spill] sm:$0xff]  ;;  %v24494_v16 = vld [vmem:[#allocation27_spill] sm:$0xff] }
 0x24d   :  { %v2986_v31 = vsub.f32 %v17233_v62, %v17246_v42  ;;  %13311 = vmatpush3.msra.mxu0 %v17222_v1  ;;  %v3000_v53 = vsub.f32 %v17239_v48, %v17252_v36  ;;  %v17283_v49 = vand.u32 4294901760, %v2333_v57  ;;  %v11077_v23 = vadd.s32 4294967280, %v24486_v39  ;;  %v2330_v9 = vld [vmem:[#allocation6 + $0x28] sm:$0xff] }
 0x24e   :  { %13312 = vmatprep.subr.mxu0 %v17224_v60  ;;  %v2994_v33 = vand.u32 4294901760, %v2993_v24  ;;  %v11076_v30 = vadd.s32 4294967280, %v24487_v10  ;;  %v3007_v41 = vsub.f32 %v17242_v46, %v17268_v52  ;;  %v17290_v11 = vsub.f32 %v2334_v3, %v17271_v28 }
 0x24f   :  { %2405 = vperm.xlu1 %15246, %v11071_v12   ;;  %2402 = vperm.xlu0 %15245, %v11070_v22   ;;  %v2987_v25 = vand.u32 4294901760, %v2986_v31  ;;  %v3001_v27 = vand.u32 4294901760, %v3000_v53  ;;  %v17294_v38 = vand.u32 4294901760, %v17276_v4  ;;  %v17297_v26 = vand.u32 4294901760, %v2332_v50  ;;  %v2329_v22 = vld [vmem:[#allocation6 + $0x20] sm:$0xff]  ;;  %v24496_v31 = vld [vmem:[#allocation30_spill] sm:$0xff] }
 0x250   :  { %13313 = vmatpush3.msra.mxu0 %v17224_v60  ;;  %v3014_v2 = vsub.f32 %v17258_v58, %v17280_v14  ;;  %v17302_v55 = vsub.f32 %v2333_v57, %v17283_v49  ;;  %v11079_v61 = vadd.s32 4294967280, %v24489_v45  ;;  %v11078_v6 = vadd.s32 4294967280, %v24490_v18  ;;  %v24497_v57 = vld [vmem:[#allocation31_spill] sm:$0xff]  ;;  %v2327_v53 = vld [vmem:[#allocation6 + $0x10] sm:$0xff] }
 0x251   :  { %13388 = vmatprep.subr.mxu1 %v2987_v25  ;;  %13314 = vmatprep.subr.mxu0 %v17227_v43  ;;  %24488 = vst [vmem:[#allocation92_spill] sm:$0xff] %v17294_v38  ;;  %v3008_v35 = vand.u32 4294901760, %v3007_v41  ;;  %v17308_v34 = vand.u32 4294901760, %v17290_v11  ;;  %v17311_v63 = vand.u32 4294901760, %v2331_v21  ;;  %v3021_v51 = vsub.f32 %v17276_v4, %v17294_v38 }
 0x252   :  { %13389 = vmatpush3.msra.mxu1 %v2987_v25  ;;  %13315 = vmatpush3.msra.mxu0 %v17227_v43  ;;  %v17316_v20 = vsub.f32 %v2332_v50, %v17297_v26  ;;  %v3015_v47 = vand.u32 4294901760, %v3014_v2  ;;  %v17320_v12 = vand.u32 4294901760, %v17302_v55  ;;  %v17323_v56 = vand.u32 4294901760, %v2330_v9  ;;  %v24500_v2 = vld [vmem:[#allocation34_spill] sm:$0xff] }
 0x253   :  { %2411 = vperm.xlu1 %15246, %v11073_v59   ;;  %2408 = vperm.xlu0 %15245, %v11072_v29   ;;  %24491 = vst [vmem:[#allocation93_spill] sm:$0xff] %v17308_v34  ;;  %v11081_v7 = vadd.s32 4294967280, %v24493_v37  ;;  %v11080_v59 = vadd.s32 4294967280, %v24494_v16  ;;  %v3028_v5 = vsub.f32 %v17290_v11, %v17308_v34  ;;  %v17330_v17 = vsub.f32 %v2331_v21, %v17311_v63  ;;  %v2326_v21 = vld [vmem:[#allocation6 + $0x8] sm:$0xff]  ;;  %v24503_v16 = vld [vmem:[#allocation38_spill] sm:$0xff] }
 0x254   :  { %13390 = vmatprep.subr.mxu1 %v2994_v33  ;;  %13316 = vmatprep.subr.mxu0 %v17229_v32  ;;  %24492 = vst [vmem:[#allocation94_spill] sm:$0xff] %v17320_v12  ;;  %v3022_v29 = vand.u32 4294901760, %v3021_v51  ;;  %v17334_v3 = vand.u32 4294901760, %v17316_v20  ;;  %v17337_v8 = vand.u32 4294901760, %v2329_v22  ;;  %v3035_v54 = vsub.f32 %v17302_v55, %v17320_v12 }
 0x255   :  { %13391 = vmatpush3.msra.mxu1 %v2994_v33  ;;  %13317 = vmatpush3.msra.mxu0 %v17229_v32  ;;  %v11083_v24 = vadd.s32 4294967280, %v24496_v31  ;;  %v11082_v25 = vadd.s32 4294967280, %v24497_v57  ;;  %v3029_v33 = vand.u32 4294901760, %v3028_v5  ;;  %v17348_v50 = vand.u32 4294901760, %v17330_v17  ;;  %v24504_v5 = vld [vmem:[#allocation39_spill] sm:$0xff] }
 0x256   :  { %13392 = vmatprep.subr.mxu1 %v3001_v27  ;;  %13318 = vmatprep.subr.mxu0 %v17255_v19  ;;  %24495 = vst [vmem:[#allocation95_spill] sm:$0xff] %v17334_v3  ;;  %v17356_v10 = vsub.f32 %v2329_v22, %v17337_v8  ;;  %v11085_v45 = vadd.s32 4294967280, %v24500_v2  ;;  %v2325_v22 = vld [vmem:[#allocation6] sm:$0xff] }
 0x257   :  { %2417 = vperm.xlu1 %15246, %v11075_v15   ;;  %2414 = vperm.xlu0 %15245, %v11074_v0   ;;  %v2328_v15 = vld [vmem:[#allocation6 + $0x18] sm:$0xff]  ;;  %v17342_v0 = vsub.f32 %v2330_v9, %v17323_v56  ;;  %24498 = vst [vmem:[#allocation96_spill] sm:$0xff] %v17348_v50  ;;  %v17391_v31 = vand.u32 4294901760, %v2325_v22 }
 0x258   :  { %13393 = vmatpush3.msra.mxu1 %v3001_v27  ;;  %13319 = vmatpush3.msra.mxu0 %v17255_v19  ;;  %v17351_v39 = vand.u32 4294901760, %v2328_v15  ;;  %v17363_v27 = vand.u32 4294901760, %v2327_v53  ;;  %v17374_v51 = vand.u32 4294901760, %v17356_v10 }
 0x259   :  { %13394 = vmatprep.subr.mxu1 %v3008_v35  ;;  %13320 = vmatprep.subr.mxu0 %v17271_v28  ;;  %v17360_v41 = vand.u32 4294901760, %v17342_v0 }
 0x25a   :  { %13395 = vmatpush3.msra.mxu1 %v3008_v35  ;;  %13321 = vmatpush3.msra.mxu0 %v17271_v28  ;;  %v17370_v9 = vsub.f32 %v2328_v15, %v17351_v39  ;;  %24502 = vst [vmem:[#allocation98_spill] sm:$0xff] %v17374_v51 }
 0x25b   :  { %2423 = vperm.xlu1 %15246, %v11077_v23   ;;  %2420 = vperm.xlu0 %15245, %v11076_v30   ;;  %v3042_v23 = vsub.f32 %v17316_v20, %v17334_v3  ;;  %v3036_v30 = vand.u32 4294901760, %v3035_v54  ;;  %24499 = vst [vmem:[#allocation97_spill] sm:$0xff] %v17360_v41  ;;  %v3056_v37 = vsub.f32 %v17342_v0, %v17360_v41 }
 0x25c   :  { %13396 = vmatprep.subr.mxu1 %v3015_v47  ;;  %13322 = vmatprep.subr.mxu0 %v17283_v49  ;;  %v17388_v54 = vand.u32 4294901760, %v17370_v9 }
 0x25d   :  { %13397 = vmatpush3.msra.mxu1 %v3015_v47  ;;  %13323 = vmatpush3.msra.mxu0 %v17283_v49  ;;  %v3043_v35 = vand.u32 4294901760, %v3042_v23  ;;  %v17377_v47 = vand.u32 4294901760, %v2326_v21 }
 0x25e   :  { %13398 = vmatprep.subr.mxu1 %v3022_v29  ;;  %13324 = vmatprep.subr.mxu0 %v17297_v26  ;;  %24505 = vst [vmem:[#allocation99_spill] sm:$0xff] %v17388_v54 }
 0x25f   :  { %2429 = vperm.xlu1 %15246, %v11079_v61   ;;  %2426 = vperm.xlu0 %15245, %v11078_v6   ;;  %v24501_v61 = vld [vmem:[#allocation35_spill] sm:$0xff]  ;;  %v3049_v6 = vsub.f32 %v17330_v17, %v17348_v50  ;;  %v17396_v57 = vsub.f32 %v2326_v21, %v17377_v47  ;;  %v3070_v21 = vsub.f32 %v17370_v9, %v17388_v54 }
 0x260   :  { %13399 = vmatpush3.msra.mxu1 %v3022_v29  ;;  %13325 = vmatpush3.msra.mxu0 %v17297_v26  ;;  %v11084_v18 = vadd.s32 4294967280, %v24501_v61  ;;  %v11086_v29 = vadd.s32 4294967280, %v24504_v5 }
 0x261   :  { %13400 = vmatprep.subr.mxu1 %v3029_v33  ;;  %13326 = vmatprep.subr.mxu0 %v17311_v63  ;;  %v3050_v15 = vand.u32 4294901760, %v3049_v6 }
 0x262   :  { %13401 = vmatpush3.msra.mxu1 %v3029_v33  ;;  %13327 = vmatpush3.msra.mxu0 %v17311_v63  ;;  %v24507_v33 = vld [vmem:[#allocation41_spill] sm:$0xff] }
 0x263   :  { %2435 = vperm.xlu1 %15246, %v11081_v7   ;;  %2432 = vperm.xlu0 %15245, %v11080_v59   ;;  %v17382_v7 = vsub.f32 %v2327_v53, %v17363_v27  ;;  %v11087_v59 = vadd.s32 4294967280, %v24503_v16  ;;  %v11089_v23 = vadd.s32 4294967280, %v24507_v33  ;;  %v24514_v33 = vld [vmem:[#allocation49_spill] sm:$0xff] }
 0x264   :  { %13402 = vmatprep.subr.mxu1 %v3036_v30  ;;  %13328 = vmatprep.subr.mxu0 %v17323_v56 }
 0x265   :  { %13403 = vmatpush3.msra.mxu1 %v3036_v30  ;;  %13329 = vmatpush3.msra.mxu0 %v17323_v56  ;;  %v17400_v53 = vand.u32 4294901760, %v17382_v7  ;;  %v24508_v30 = vld [vmem:[#allocation42_spill] sm:$0xff] }
 0x266   :  { %13404 = vmatprep.subr.mxu1 %v3043_v35  ;;  %13330 = vmatprep.subr.mxu0 %v17337_v8  ;;  %v11088_v2 = vadd.s32 4294967280, %v24508_v30 }
 0x267   :  { %2441 = vperm.xlu1 %15246, %v11083_v24   ;;  %2438 = vperm.xlu0 %15245, %v11082_v25   ;;  %v3063_v24 = vsub.f32 %v17356_v10, %v17374_v51  ;;  %v3057_v25 = vand.u32 4294901760, %v3056_v37  ;;  %24506 = vst [vmem:[#allocation100_spill] sm:$0xff] %v17400_v53  ;;  %v3077_v6 = vsub.f32 %v17382_v7, %v17400_v53  ;;  %v24511_v37 = vld [vmem:[#allocation46_spill] sm:$0xff] }
 0x268   :  { %13405 = vmatpush3.msra.mxu1 %v3043_v35  ;;  %13331 = vmatpush3.msra.mxu0 %v17337_v8  ;;  %v24510_v35 = vld [vmem:[#allocation45_spill] sm:$0xff]  ;;  %v11090_v16 = vadd.s32 4294967280, %v24511_v37 }
 0x269   :  { %13406 = vmatprep.subr.mxu1 %v3050_v15  ;;  %13332 = vmatprep.subr.mxu0 %v17351_v39  ;;  %v3064_v61 = vand.u32 4294901760, %v3063_v24  ;;  %v24513_v24 = vld [vmem:[#allocation48_spill] sm:$0xff]  ;;  %v24517_v37 = vld [vmem:[#allocation53_spill] sm:$0xff] }
 0x26a   :  { %13407 = vmatpush3.msra.mxu1 %v3050_v15  ;;  %13333 = vmatpush3.msra.mxu0 %v17351_v39  ;;  %v3078_v15 = vand.u32 4294901760, %v3077_v6  ;;  %v24516_v6 = vld [vmem:[#allocation52_spill] sm:$0xff] }
 0x26b   :  { %2447 = vperm.xlu1 %15246, %v11085_v45   ;;  %2444 = vperm.xlu0 %15245, %v11084_v18   ;;  %v17408_v45 = vsub.f32 %v2325_v22, %v17391_v31  ;;  %v17412_v18 = vand.u32 4294901760, %v17396_v57  ;;  %v11091_v22 = vadd.s32 4294967280, %v24510_v35  ;;  %v11094_v35 = vadd.s32 4294967280, %v24516_v6 }
 0x26c   :  { %13408 = vmatprep.subr.mxu1 %v3057_v25  ;;  %13334 = vmatprep.subr.mxu0 %v17363_v27 }
 0x26d   :  { %24509 = vst [vmem:[#allocation101_spill] sm:$0xff] %v17412_v18  ;;  %13409 = vmatpush3.msra.mxu1 %v3057_v25  ;;  %v17421_v5 = vand.u32 4294901760, %v17408_v45  ;;  %13335 = vmatpush3.msra.mxu0 %v17363_v27  ;;  %v11093_v25 = vadd.s32 4294967280, %v24513_v24 }
 0x26e   :  { %13410 = vmatprep.subr.mxu1 %v3064_v61  ;;  %13336 = vmatprep.subr.mxu0 %v17377_v47 }
 0x26f   :  { %2453 = vperm.xlu1 %15246, %v11087_v59   ;;  %2450 = vperm.xlu0 %15245, %v11086_v29   ;;  %v3071_v59 = vand.u32 4294901760, %v3070_v21  ;;  %24512 = vst [vmem:[#allocation102_spill] sm:$0xff] %v17421_v5  ;;  %v3084_v29 = vsub.f32 %v17396_v57, %v17412_v18  ;;  %v3091_v30 = vsub.f32 %v17408_v45, %v17421_v5  ;;  %v24515_v21 = vld [vmem:[#allocation51_spill] sm:$0xff] }
 0x270   :  { %13411 = vmatpush3.msra.mxu1 %v3064_v61  ;;  %13337 = vmatpush3.msra.mxu0 %v17377_v47  ;;  %v11095_v61 = vadd.s32 4294967280, %v24515_v21 }
 0x271   :  { %13412 = vmatprep.subr.mxu1 %v3071_v59  ;;  %13338 = vmatprep.subr.mxu0 %v17391_v31 }
 0x272   :  { %13413 = vmatpush3.msra.mxu1 %v3071_v59  ;;  %13339 = vmatpush3.msra.mxu0 %v17391_v31  ;;  %v24518_v59 = vld [vmem:[#allocation54_spill] sm:$0xff] }
 0x273   :  { %2459 = vperm.xlu1 %15246, %v11089_v23   ;;  %2456 = vperm.xlu0 %15245, %v11088_v2   ;;  %v11092_v23 = vadd.s32 4294967280, %v24514_v33  ;;  %v3085_v2 = vand.u32 4294901760, %v3084_v29  ;;  %v11096_v29 = vadd.s32 4294967280, %v24518_v59  ;;  %v23566_v33 = vmov 0.0  }
 0x274   :  { %13414 = vmatprep.subr.mxu1 %v3078_v15  ;;  %13468 = vmatprep.subr.mxu0 %v17233_v62  ;;  %v24526_v59 = vmov 0.0  }
 0x275   :  { %13415 = vmatpush3.msra.mxu1 %v3078_v15  ;;  %v24521_v15 = vld [vmem:[#allocation55_spill] sm:$0xff] }
 0x276   :  { %13416 = vmatprep.subr.mxu1 %v3085_v2 }
 0x277   :  { %2465 = vperm.xlu1 %15246, %v11091_v22   ;;  %2462 = vperm.xlu0 %15245, %v11090_v16   ;;  %v3092_v22 = vand.u32 4294901760, %v3091_v30  ;;  %v11097_v16 = vadd.s32 4294967280, %v24517_v37 }
 0x278   :  { %13417 = vmatpush3.msra.mxu1 %v3085_v2  ;;  %v23571_v2 = vmov 1.0  }
 0x279   :  { %13418 = vmatprep.subr.mxu1 %v3092_v22 }
 0x27a   :  { %13419 = vmatpush3.msra.mxu1 %v3092_v22 }
 0x27b   :  { %2471 = vperm.xlu1 %15246, %v11093_v25   ;;  %2468 = vperm.xlu0 %15245, %v11092_v23  }
 0x27c   :  { %13548 = vmatprep.subr.mxu1 %v17220_v44 }
 0x27f   :  { %2477 = vperm.xlu1 %15246, %v11095_v61   ;;  %2474 = vperm.xlu0 %15245, %v11094_v35  }
 0x283   :  { %2483 = vperm.xlu1 %15246, %v11097_v16   ;;  %2480 = vperm.xlu0 %15245, %v11096_v29  }
 0x2c2   :  { %v17440_v24 = vpop.permute.xlu1 %2396  ;;  %v17442_v25 = vpop.permute.xlu0 %2390 }
 0x2c3   :  { %24519 = vst [vmem:[#allocation103_spill] sm:$0xff] %v17440_v24  ;;  %24520 = vst [vmem:[#allocation104_spill] sm:$0xff] %v17442_v25  ;;  %vm2487_vm12 = vcmp.eq.s32.totalorder %v17440_v24, %v24521_v15  ;;  %vm2485_vm14 = vcmp.eq.s32.totalorder %v17442_v25, %v24521_v15  ;;  %v24527_v24 = vmov 1.0  }
 0x2c4   :  { %v11100_v23 = vsel %vm2487_vm12, 1.0, %v23566_v33  ;;  %v11098_v30 = vsel %vm2485_vm14, 1.0, %v23566_v33  ;;  %13420 = vmatprep.mubr.msk.f32.mxu1 %vm2485_vm14, %v23571_v2 }
 0x2c5   :  { %v17460_v21 = vsub.f32 %v11100_v23, %v11100_v23  ;;  %v17462_v61 = vsub.f32 %v11098_v30, %v11098_v30 }
 0x2c6   :  { %v17464_v6 = vpop.permute.xlu1 %2399  ;;  %v17466_v35 = vpop.permute.xlu0 %2393 }
 0x2c7   :  { %24522 = vst [vmem:[#allocation105_spill] sm:$0xff] %v17464_v6  ;;  %24523 = vst [vmem:[#allocation106_spill] sm:$0xff] %v17466_v35  ;;  %vm2488_vm15 = vcmp.eq.s32.totalorder %v17464_v6, %v24521_v15  ;;  %vm2486_vm6 = vcmp.eq.s32.totalorder %v17466_v35, %v24521_v15  ;;  %v23570_v22 = vand.u32 4294901760, %v17462_v61 }
 0x2c8   :  { %v11101_v37 = vsel %vm2488_vm15, 1.0, %v23566_v33  ;;  %v11099_v16 = vsel %vm2486_vm6, 1.0, %v23566_v33  ;;  %13421 = vmatmul.mubr.msk.f32.vlgmr.msra.gmra.mxu1 %vm2486_vm6, %v23571_v2 }
 0x2c9   :  { %v17486_v29 = vsub.f32 %v11101_v37, %v11101_v37  ;;  %v17488_v23 = vsub.f32 %v11099_v16, %v11099_v16  ;;  %13423 = vmatprep.mubr.msk.f32.mxu1 %vm2487_vm12, %v23571_v2  ;;  %v2665_v30 = vsub.f32 %v17462_v61, %v23570_v22  ;;  %13549 = vmatpush3.msra.mxu1 %v17220_v44 }
 0x2ca   :  { %v17497_v33 = vpop.permute.xlu1 %2405  ;;  %v17499_v5 = vpop.permute.xlu0 %2402  ;;  %13550 = vmatprep.subr.mxu1 %v17222_v1 }
 0x2cb   :  { %24524 = vst [vmem:[#allocation107_spill] sm:$0xff] %v17497_v33  ;;  %24525 = vst [vmem:[#allocation108_spill] sm:$0xff] %v17499_v5  ;;  %vm2490_vm7 = vcmp.eq.s32.totalorder %v17497_v33, %v24521_v15  ;;  %vm2489_vm8 = vcmp.eq.s32.totalorder %v17499_v5, %v24521_v15  ;;  %v2666_v37 = vand.u32 4294901760, %v2665_v30  ;;  %v24528_v30 = vand.u32 4294901760, %v17460_v21  ;;  %13551 = vmatpush3.msra.mxu1 %v17222_v1 }
 0x2cc   :  { %v11103_v22 = vsel %vm2490_vm7, 1.0, %v24526_v59  ;;  %v11102_v2 = vsel %vm2489_vm8, 1.0, %v24526_v59  ;;  %13424 = vmatmul.mubr.msk.f32.gmra.mxu1 %vm2488_vm15, %v24527_v24  ;;  %v23589_v35 = vand.u32 4294901760, %v17486_v29  ;;  %v24529_v53 = vand.u32 4294901760, %v17488_v23  ;;  %13552 = vmatprep.subr.mxu1 %v17224_v60 }
 0x2cd   :  { %v2685_v16 = vsub.f32 %v17460_v21, %v24528_v30  ;;  %v17524_v18 = vsub.f32 %v11103_v22, %v11103_v22  ;;  %v17526_v25 = vsub.f32 %v11102_v2, %v11102_v2  ;;  %13340 = vmatprep.mubr.f32.mxu0 %v2666_v37  ;;  %13426 = vmatprep.mubr.msk.f32.mxu1 %vm2489_vm8, %v24527_v24 }
 0x2ce   :  { %v2675_v6 = vsub.f32 %v17488_v23, %v24529_v53  ;;  %v17535_v54 = vpop.permute.xlu1 %2411  ;;  %v17537_v51 = vpop.permute.xlu0 %2408  ;;  %v2695_v22 = vsub.f32 %v17486_v29, %v23589_v35  ;;  %13553 = vmatpush3.msra.mxu1 %v17224_v60 }
 0x2cf   :  { %24530 = vst [vmem:[#allocation109_spill] sm:$0xff] %v17535_v54  ;;  %24531 = vst [vmem:[#allocation110_spill] sm:$0xff] %v17537_v51  ;;  %vm2492_vm9 = vcmp.eq.s32.totalorder %v17535_v54, %v24521_v15  ;;  %vm2491_vm10 = vcmp.eq.s32.totalorder %v17537_v51, %v24521_v15  ;;  %v23598_v35 = vand.u32 4294901760, %v17524_v18  ;;  %v24532_v41 = vand.u32 4294901760, %v17526_v25  ;;  %13554 = vmatprep.subr.mxu1 %v17227_v43 }
 0x2d0   :  { %v2676_v2 = vand.u32 4294901760, %v2675_v6  ;;  %v11105_v53 = vsel %vm2492_vm9, 1.0, %v24526_v59  ;;  %v11104_v30 = vsel %vm2491_vm10, 1.0, %v24526_v59  ;;  %13427 = vmatmul.mubr.msk.f32.gmra.mxu1 %vm2490_vm7, %v24527_v24  ;;  %v2686_v6 = vand.u32 4294901760, %v2685_v16 }
 0x2d1   :  { %v17562_v37 = vsub.f32 %v11105_v53, %v11105_v53  ;;  %v17564_v5 = vsub.f32 %v11104_v30, %v11104_v30  ;;  %13429 = vmatprep.mubr.msk.f32.mxu1 %vm2491_vm10, %v24527_v24  ;;  %v2705_v50 = vsub.f32 %v17526_v25, %v24532_v41  ;;  %v2696_v53 = vand.u32 4294901760, %v2695_v22  ;;  %13555 = vmatpush3.msra.mxu1 %v17227_v43 }
 0x2d2   :  { %13341 = vmatmul.mubr.f32.vlgmr.msra.gmra.mxu0 %v2676_v2  ;;  %v17574_v33 = vpop.permute.xlu1 %2417  ;;  %v17576_v16 = vpop.permute.xlu0 %2414  ;;  %v2715_v2 = vsub.f32 %v17524_v18, %v23598_v35  ;;  %13556 = vmatprep.subr.mxu1 %v17229_v32 }
 0x2d3   :  { %13469 = vmatpush3.msra.mxu0 %v17233_v62  ;;  %24533 = vst [vmem:[#allocation111_spill] sm:$0xff] %v17574_v33  ;;  %24534 = vst [vmem:[#allocation112_spill] sm:$0xff] %v17576_v16  ;;  %13343 = vmatprep.mubr.f32.mxu0 %v2686_v6  ;;  %vm2494_vm11 = vcmp.eq.s32.totalorder %v17574_v33, %v24521_v15  ;;  %vm2493_vm13 = vcmp.eq.s32.totalorder %v17576_v16, %v24521_v15  ;;  %v2706_v41 = vand.u32 4294901760, %v2705_v50 }
 0x2d4   :  { %13470 = vmatprep.subr.mxu0 %v17236_v40  ;;  %v23606_v62 = vand.u32 4294901760, %v17564_v5  ;;  %v11107_v22 = vsel %vm2494_vm11, 1.0, %v24526_v59  ;;  %v11106_v30 = vsel %vm2493_vm13, 1.0, %v24526_v59  ;;  %13430 = vmatmul.mubr.msk.f32.gmra.mxu1 %vm2492_vm9, %v24527_v24  ;;  %v23605_v50 = vand.u32 4294901760, %v17562_v37 }
 0x2d5   :  { %13471 = vmatpush3.msra.mxu0 %v17236_v40  ;;  %v17602_v6 = vsub.f32 %v11107_v22, %v11107_v22  ;;  %v17604_v35 = vsub.f32 %v11106_v30, %v11106_v30  ;;  %13432 = vmatprep.mubr.msk.f32.mxu1 %vm2493_vm13, %v24527_v24  ;;  %v2716_v40 = vand.u32 4294901760, %v2715_v2 }
 0x2d6   :  { %13344 = vmatmul.mubr.f32.gmra.mxu0 %v2696_v53  ;;  %v2725_v51 = vsub.f32 %v17564_v5, %v23606_v62  ;;  %v17613_v54 = vpop.permute.xlu1 %2423  ;;  %v17615_v3 = vpop.permute.xlu0 %2420  ;;  %13472 = vmatprep.subr.mxu0 %v17239_v48  ;;  %v2735_v53 = vsub.f32 %v17562_v37, %v23605_v50 }
 0x2d7   :  { %24535 = vst [vmem:[#allocation113_spill] sm:$0xff] %v17613_v54  ;;  %24536 = vst [vmem:[#allocation114_spill] sm:$0xff] %v17615_v3  ;;  %13346 = vmatprep.mubr.f32.mxu0 %v2706_v41  ;;  %vm2496_vm0 = vcmp.eq.s32.totalorder %v17613_v54, %v24521_v15  ;;  %vm2495_vm1 = vcmp.eq.s32.totalorder %v17615_v3, %v24521_v15  ;;  %13473 = vmatpush3.msra.mxu0 %v17239_v48  ;;  %v23611_v30 = vand.u32 4294901760, %v17604_v35 }
 0x2d8   :  { %v2726_v22 = vand.u32 4294901760, %v2725_v51  ;;  %v11109_v2 = vsel %vm2496_vm0, 1.0, %v24526_v59  ;;  %v11108_v41 = vsel %vm2495_vm1, 1.0, %v24526_v59  ;;  %13433 = vmatmul.mubr.msk.f32.gmra.mxu1 %vm2494_vm11, %v24527_v24  ;;  %13474 = vmatprep.subr.mxu0 %v17242_v46  ;;  %v2736_v48 = vand.u32 4294901760, %v2735_v53 }
 0x2d9   :  { %v17642_v51 = vsub.f32 %v11109_v2, %v11109_v2  ;;  %v17644_v50 = vsub.f32 %v11108_v41, %v11108_v41  ;;  %13435 = vmatprep.mubr.msk.f32.mxu1 %vm2495_vm1, %v24527_v24  ;;  %v2745_v62 = vsub.f32 %v17604_v35, %v23611_v30  ;;  %13475 = vmatpush3.msra.mxu0 %v17242_v46  ;;  %v24539_v2 = vand.u32 4294901760, %v17602_v6 }
 0x2da   :  { %13347 = vmatmul.mubr.f32.gmra.mxu0 %v2716_v40  ;;  %v17653_v33 = vpop.permute.xlu1 %2429  ;;  %v17655_v16 = vpop.permute.xlu0 %2426  ;;  %13476 = vmatprep.subr.mxu0 %v17258_v58 }
 0x2db   :  { %24537 = vst [vmem:[#allocation115_spill] sm:$0xff] %v17653_v33  ;;  %24538 = vst [vmem:[#allocation116_spill] sm:$0xff] %v17655_v16  ;;  %13349 = vmatprep.mubr.f32.mxu0 %v2726_v22  ;;  %v2755_v40 = vsub.f32 %v17602_v6, %v24539_v2  ;;  %vm23626_vm2 = vcmp.eq.s32.totalorder %v17653_v33, %v24521_v15  ;;  %vm2497_vm3 = vcmp.eq.s32.totalorder %v17655_v16, %v24521_v15 }
 0x2dc   :  { %v2746_v41 = vand.u32 4294901760, %v2745_v62  ;;  %v23619_v22 = vand.u32 4294901760, %v17644_v50  ;;  %v11111_v46 = vsel %vm23626_vm2, 1.0, %v24526_v59  ;;  %v11110_v53 = vsel %vm2497_vm3, 1.0, %v24526_v59  ;;  %13436 = vmatmul.mubr.msk.f32.gmra.mxu1 %vm2496_vm0, %v24527_v24  ;;  %13477 = vmatpush3.msra.mxu0 %v17258_v58 }
 0x2dd   :  { %v23618_v62 = vand.u32 4294901760, %v17642_v51  ;;  %v17682_v2 = vsub.f32 %v11111_v46, %v11111_v46  ;;  %v17684_v30 = vsub.f32 %v11110_v53, %v11110_v53  ;;  %13438 = vmatprep.mubr.msk.f32.mxu1 %vm2497_vm3, %v24527_v24  ;;  %v2756_v58 = vand.u32 4294901760, %v2755_v40  ;;  %13557 = vmatpush3.msra.mxu1 %v17229_v32 }
 0x2de   :  { %13350 = vmatmul.mubr.f32.gmra.mxu0 %v2736_v48  ;;  %v2765_v3 = vsub.f32 %v17644_v50, %v23619_v22  ;;  %v17693_v54 = vpop.permute.xlu1 %2435  ;;  %v17695_v12 = vpop.permute.xlu0 %2432  ;;  %13478 = vmatprep.subr.mxu0 %v17276_v4 }
 0x2df   :  { %24540 = vst [vmem:[#allocation117_spill] sm:$0xff] %v17693_v54  ;;  %24541 = vst [vmem:[#allocation118_spill] sm:$0xff] %v17695_v12  ;;  %13352 = vmatprep.mubr.f32.mxu0 %v2746_v41  ;;  %v2775_v48 = vsub.f32 %v17642_v51, %v23618_v62  ;;  %vm23636_vm4 = vcmp.eq.s32.totalorder %v17693_v54, %v24521_v15  ;;  %vm23627_vm5 = vcmp.eq.s32.totalorder %v17695_v12, %v24521_v15 }
 0x2e0   :  { %v2766_v46 = vand.u32 4294901760, %v2765_v3  ;;  %v23629_v41 = vand.u32 4294901760, %v17684_v30  ;;  %v11113_v40 = vsel %vm23636_vm4, 1.0, %v24526_v59  ;;  %v11112_v53 = vsel %vm23627_vm5, 1.0, %v24526_v59  ;;  %13439 = vmatmul.mubr.msk.f32.gmra.mxu1 %vm23626_vm2, %v24527_v24  ;;  %13479 = vmatpush3.msra.mxu0 %v17276_v4 }
 0x2e1   :  { %v23628_v3 = vand.u32 4294901760, %v17682_v2  ;;  %v17722_v62 = vsub.f32 %v11113_v40, %v11113_v40  ;;  %v17724_v22 = vsub.f32 %v11112_v53, %v11112_v53  ;;  %13441 = vmatprep.mubr.msk.f32.mxu1 %vm23627_vm5, %v24527_v24  ;;  %v2776_v4 = vand.u32 4294901760, %v2775_v48  ;;  %13558 = vmatprep.subr.mxu1 %v17255_v19 }
 0x2e2   :  { %13353 = vmatmul.mubr.f32.gmra.mxu0 %v2756_v58  ;;  %v2785_v16 = vsub.f32 %v17684_v30, %v23629_v41  ;;  %v17733_v33 = vpop.permute.xlu1 %2441  ;;  %v17735_v34 = vpop.permute.xlu0 %2438  ;;  %13559 = vmatpush3.msra.mxu1 %v17255_v19 }
 0x2e3   :  { %24542 = vst [vmem:[#allocation119_spill] sm:$0xff] %v17722_v62  ;;  %24543 = vst [vmem:[#allocation120_spill] sm:$0xff] %v17733_v33  ;;  %13355 = vmatprep.mubr.f32.mxu0 %v2766_v46  ;;  %v2795_v58 = vsub.f32 %v17682_v2, %v23628_v3  ;;  %vm23646_vm2 = vcmp.eq.s32.totalorder %v17733_v33, %v24521_v15  ;;  %vm23637_vm5 = vcmp.eq.s32.totalorder %v17735_v34, %v24521_v15 }
 0x2e4   :  { %24544 = vst [vmem:[#allocation121_spill] sm:$0xff] %v17735_v34  ;;  %v2786_v40 = vand.u32 4294901760, %v2785_v16  ;;  %13480 = vmatprep.subr.mxu0 %v17290_v11  ;;  %v23639_v46 = vand.u32 4294901760, %v17724_v22  ;;  %v11115_v48 = vsel %vm23646_vm2, 1.0, %v24526_v59  ;;  %v11114_v53 = vsel %vm23637_vm5, 1.0, %v24526_v59  ;;  %13442 = vmatmul.mubr.msk.f32.gmra.mxu1 %vm23636_vm4, %v24527_v24 }
 0x2e5   :  { %13481 = vmatpush3.msra.mxu0 %v17290_v11  ;;  %v23638_v16 = vand.u32 4294901760, %v17722_v62  ;;  %v17762_v3 = vsub.f32 %v11115_v48, %v11115_v48  ;;  %v17764_v41 = vsub.f32 %v11114_v53, %v11114_v53  ;;  %13444 = vmatprep.mubr.msk.f32.mxu1 %vm23637_vm5, %v24527_v24  ;;  %v2796_v11 = vand.u32 4294901760, %v2795_v58 }
 0x2e6   :  { %13356 = vmatmul.mubr.f32.gmra.mxu0 %v2776_v4  ;;  %v2805_v12 = vsub.f32 %v17724_v22, %v23639_v46  ;;  %v17773_v54 = vpop.permute.xlu1 %2447  ;;  %v17775_v38 = vpop.permute.xlu0 %2444  ;;  %13560 = vmatprep.subr.mxu1 %v17271_v28 }
 0x2e7   :  { %24545 = vst [vmem:[#allocation122_spill] sm:$0xff] %v17762_v3  ;;  %24546 = vst [vmem:[#allocation123_spill] sm:$0xff] %v17773_v54  ;;  %13358 = vmatprep.mubr.f32.mxu0 %v2786_v40  ;;  %v2815_v4 = vsub.f32 %v17722_v62, %v23638_v16  ;;  %vm23656_vm4 = vcmp.eq.s32.totalorder %v17773_v54, %v24521_v15  ;;  %vm23647_vm5 = vcmp.eq.s32.totalorder %v17775_v38, %v24521_v15 }
 0x2e8   :  { %24547 = vst [vmem:[#allocation124_spill] sm:$0xff] %v17775_v38  ;;  %v2806_v48 = vand.u32 4294901760, %v2805_v12  ;;  %13561 = vmatpush3.msra.mxu1 %v17271_v28  ;;  %13482 = vmatprep.subr.mxu0 %v17302_v55  ;;  %v23649_v40 = vand.u32 4294901760, %v17764_v41  ;;  %v11117_v58 = vsel %vm23656_vm4, 1.0, %v24526_v59  ;;  %v11116_v53 = vsel %vm23647_vm5, 1.0, %v24526_v59 }
 0x2e9   :  { %13445 = vmatmul.mubr.msk.f32.gmra.mxu1 %vm23646_vm2, %v24527_v24  ;;  %13483 = vmatpush3.msra.mxu0 %v17302_v55  ;;  %v23648_v12 = vand.u32 4294901760, %v17762_v3  ;;  %v17802_v16 = vsub.f32 %v11117_v58, %v11117_v58  ;;  %v17804_v46 = vsub.f32 %v11116_v53, %v11116_v53  ;;  %v2816_v55 = vand.u32 4294901760, %v2815_v4 }
 0x2ea   :  { %13359 = vmatmul.mubr.f32.gmra.mxu0 %v2796_v11  ;;  %13447 = vmatprep.mubr.msk.f32.mxu1 %vm23647_vm5, %v24527_v24  ;;  %v2825_v34 = vsub.f32 %v17764_v41, %v23649_v40  ;;  %v17813_v33 = vpop.permute.xlu1 %2453  ;;  %v17815_v62 = vpop.permute.xlu0 %2450 }
 0x2eb   :  { %24548 = vst [vmem:[#allocation125_spill] sm:$0xff] %v17802_v16  ;;  %24549 = vst [vmem:[#allocation126_spill] sm:$0xff] %v17813_v33  ;;  %13361 = vmatprep.mubr.f32.mxu0 %v2806_v48  ;;  %13562 = vmatprep.subr.mxu1 %v17283_v49  ;;  %v2835_v11 = vsub.f32 %v17762_v3, %v23648_v12  ;;  %vm23666_vm2 = vcmp.eq.s32.totalorder %v17813_v33, %v24521_v15  ;;  %v23659_v48 = vand.u32 4294901760, %v17804_v46 }
 0x2ec   :  { %24550 = vst [vmem:[#allocation127_spill] sm:$0xff] %v17815_v62  ;;  %vm23657_vm5 = vcmp.eq.s32.totalorder %v17815_v62, %v24521_v15  ;;  %v2826_v58 = vand.u32 4294901760, %v2825_v34  ;;  %13563 = vmatpush3.msra.mxu1 %v17283_v49  ;;  %13484 = vmatprep.subr.mxu0 %v17316_v20  ;;  %v11119_v4 = vsel %vm23666_vm2, 1.0, %v24526_v59  ;;  %v23658_v34 = vand.u32 4294901760, %v17802_v16 }
 0x2ed   :  { %v11118_v53 = vsel %vm23657_vm5, 1.0, %v24526_v59  ;;  %13448 = vmatmul.mubr.msk.f32.gmra.mxu1 %vm23656_vm4, %v24527_v24  ;;  %13485 = vmatpush3.msra.mxu0 %v17316_v20  ;;  %v17842_v12 = vsub.f32 %v11119_v4, %v11119_v4  ;;  %v2845_v38 = vsub.f32 %v17804_v46, %v23659_v48  ;;  %v2836_v20 = vand.u32 4294901760, %v2835_v11 }
 0x2ee   :  { %v17844_v40 = vsub.f32 %v11118_v53, %v11118_v53  ;;  %13362 = vmatmul.mubr.f32.gmra.mxu0 %v2816_v55  ;;  %13450 = vmatprep.mubr.msk.f32.mxu1 %vm23657_vm5, %v24527_v24  ;;  %v17853_v54 = vpop.permute.xlu1 %2459  ;;  %v17855_v3 = vpop.permute.xlu0 %2456  ;;  %v2855_v55 = vsub.f32 %v17802_v16, %v23658_v34 }
 0x2ef   :  { %24551 = vst [vmem:[#allocation128_spill] sm:$0xff] %v17842_v12  ;;  %24552 = vst [vmem:[#allocation129_spill] sm:$0xff] %v17853_v54  ;;  %13364 = vmatprep.mubr.f32.mxu0 %v2826_v58  ;;  %13564 = vmatprep.subr.mxu1 %v17297_v26  ;;  %vm23676_vm4 = vcmp.eq.s32.totalorder %v17853_v54, %v24521_v15  ;;  %vm23667_vm5 = vcmp.eq.s32.totalorder %v17855_v3, %v24521_v15  ;;  %v2846_v4 = vand.u32 4294901760, %v2845_v38 }
 0x2f0   :  { %24553 = vst [vmem:[#allocation130_spill] sm:$0xff] %v17855_v3  ;;  %13565 = vmatpush3.msra.mxu1 %v17297_v26  ;;  %13486 = vmatprep.subr.mxu0 %v17330_v17  ;;  %v23669_v58 = vand.u32 4294901760, %v17844_v40  ;;  %v11121_v11 = vsel %vm23676_vm4, 1.0, %v24526_v59  ;;  %v11120_v53 = vsel %vm23667_vm5, 1.0, %v24526_v59  ;;  %v23668_v38 = vand.u32 4294901760, %v17842_v12 }
 0x2f1   :  { %13451 = vmatmul.mubr.msk.f32.gmra.mxu1 %vm23666_vm2, %v24527_v24  ;;  %13487 = vmatpush3.msra.mxu0 %v17330_v17  ;;  %v17882_v34 = vsub.f32 %v11121_v11, %v11121_v11  ;;  %v17884_v48 = vsub.f32 %v11120_v53, %v11120_v53  ;;  %v2856_v17 = vand.u32 4294901760, %v2855_v55 }
 0x2f2   :  { %13365 = vmatmul.mubr.f32.gmra.mxu0 %v2836_v20  ;;  %13453 = vmatprep.mubr.msk.f32.mxu1 %vm23667_vm5, %v24527_v24  ;;  %v2865_v62 = vsub.f32 %v17844_v40, %v23669_v58  ;;  %v17893_v33 = vpop.permute.xlu1 %2465  ;;  %v17895_v16 = vpop.permute.xlu0 %2462  ;;  %v2875_v20 = vsub.f32 %v17842_v12, %v23668_v38 }
 0x2f3   :  { %24554 = vst [vmem:[#allocation131_spill] sm:$0xff] %v17882_v34  ;;  %24555 = vst [vmem:[#allocation132_spill] sm:$0xff] %v17893_v33  ;;  %13367 = vmatprep.mubr.f32.mxu0 %v2846_v4  ;;  %13566 = vmatprep.subr.mxu1 %v17311_v63  ;;  %vm23686_vm2 = vcmp.eq.s32.totalorder %v17893_v33, %v24521_v15  ;;  %vm23677_vm5 = vcmp.eq.s32.totalorder %v17895_v16, %v24521_v15  ;;  %v23679_v4 = vand.u32 4294901760, %v17884_v48 }
 0x2f4   :  { %24556 = vst [vmem:[#allocation133_spill] sm:$0xff] %v17895_v16  ;;  %v2866_v11 = vand.u32 4294901760, %v2865_v62  ;;  %13567 = vmatpush3.msra.mxu1 %v17311_v63  ;;  %13488 = vmatprep.subr.mxu0 %v17342_v0  ;;  %v11123_v55 = vsel %vm23686_vm2, 1.0, %v24526_v59  ;;  %v11122_v53 = vsel %vm23677_vm5, 1.0, %v24526_v59  ;;  %v23678_v62 = vand.u32 4294901760, %v17882_v34 }
 0x2f5   :  { %13454 = vmatmul.mubr.msk.f32.gmra.mxu1 %vm23676_vm4, %v24527_v24  ;;  %13489 = vmatpush3.msra.mxu0 %v17342_v0  ;;  %v17922_v38 = vsub.f32 %v11123_v55, %v11123_v55  ;;  %v17924_v58 = vsub.f32 %v11122_v53, %v11122_v53  ;;  %v2885_v3 = vsub.f32 %v17884_v48, %v23679_v4  ;;  %v2876_v0 = vand.u32 4294901760, %v2875_v20 }
 0x2f6   :  { %13368 = vmatmul.mubr.f32.gmra.mxu0 %v2856_v17  ;;  %13456 = vmatprep.mubr.msk.f32.mxu1 %vm23677_vm5, %v24527_v24  ;;  %v17933_v54 = vpop.permute.xlu1 %2471  ;;  %v17935_v12 = vpop.permute.xlu0 %2468  ;;  %v2895_v17 = vsub.f32 %v17882_v34, %v23678_v62 }
 0x2f7   :  { %24557 = vst [vmem:[#allocation134_spill] sm:$0xff] %v17922_v38  ;;  %24558 = vst [vmem:[#allocation135_spill] sm:$0xff] %v17933_v54  ;;  %13370 = vmatprep.mubr.f32.mxu0 %v2866_v11  ;;  %13568 = vmatprep.subr.mxu1 %v17323_v56  ;;  %vm23696_vm4 = vcmp.eq.s32.totalorder %v17933_v54, %v24521_v15  ;;  %vm23687_vm5 = vcmp.eq.s32.totalorder %v17935_v12, %v24521_v15  ;;  %v2886_v55 = vand.u32 4294901760, %v2885_v3 }
 0x2f8   :  { %24559 = vst [vmem:[#allocation136_spill] sm:$0xff] %v17935_v12  ;;  %13569 = vmatpush3.msra.mxu1 %v17323_v56  ;;  %13490 = vmatprep.subr.mxu0 %v17356_v10  ;;  %v23689_v11 = vand.u32 4294901760, %v17924_v58  ;;  %v11125_v20 = vsel %vm23696_vm4, 1.0, %v24526_v59  ;;  %v11124_v53 = vsel %vm23687_vm5, 1.0, %v24526_v59  ;;  %v23688_v3 = vand.u32 4294901760, %v17922_v38 }
 0x2f9   :  { %13457 = vmatmul.mubr.msk.f32.gmra.mxu1 %vm23686_vm2, %v24527_v24  ;;  %13491 = vmatpush3.msra.mxu0 %v17356_v10  ;;  %v17962_v62 = vsub.f32 %v11125_v20, %v11125_v20  ;;  %v17964_v4 = vsub.f32 %v11124_v53, %v11124_v53  ;;  %v2896_v10 = vand.u32 4294901760, %v2895_v17 }
 0x2fa   :  { %13371 = vmatmul.mubr.f32.gmra.mxu0 %v2876_v0  ;;  %13459 = vmatprep.mubr.msk.f32.mxu1 %vm23687_vm5, %v24527_v24  ;;  %v2905_v16 = vsub.f32 %v17924_v58, %v23689_v11  ;;  %v17973_v33 = vpop.permute.xlu1 %2477  ;;  %v17975_v34 = vpop.permute.xlu0 %2474  ;;  %v2915_v0 = vsub.f32 %v17922_v38, %v23688_v3 }
 0x2fb   :  { %24560 = vst [vmem:[#allocation137_spill] sm:$0xff] %v17973_v33  ;;  %13373 = vmatprep.mubr.f32.mxu0 %v2886_v55  ;;  %13570 = vmatprep.subr.mxu1 %v17337_v8  ;;  %vm2514_vm2 = vcmp.eq.s32.totalorder %v17973_v33, %v24521_v15  ;;  %vm23697_vm5 = vcmp.eq.s32.totalorder %v17975_v34, %v24521_v15  ;;  %v23698_v55 = vand.u32 4294901760, %v17964_v4 }
 0x2fc   :  { %v2906_v20 = vand.u32 4294901760, %v2905_v16  ;;  %13571 = vmatpush3.msra.mxu1 %v17337_v8  ;;  %13492 = vmatprep.subr.mxu0 %v17370_v9  ;;  %v11127_v17 = vsel %vm2514_vm2, 1.0, %v24526_v59  ;;  %v11126_v53 = vsel %vm23697_vm5, 1.0, %v24526_v59  ;;  %v2916_v16 = vand.u32 4294901760, %v2915_v0 }
 0x2fd   :  { %13460 = vmatmul.mubr.msk.f32.gmra.mxu1 %vm23696_vm4, %v24527_v24  ;;  %13572 = vmatprep.subr.mxu1 %v17351_v39  ;;  %v18002_v3 = vsub.f32 %v11127_v17, %v11127_v17  ;;  %v18004_v11 = vsub.f32 %v11126_v53, %v11126_v53  ;;  %v2925_v12 = vsub.f32 %v17964_v4, %v23698_v55  ;;  %v24562_v17 = vand.u32 4294901760, %v17962_v62 }
 0x2fe   :  { %13374 = vmatmul.mubr.f32.gmra.mxu0 %v2896_v10  ;;  %13462 = vmatprep.mubr.msk.f32.mxu1 %vm23697_vm5, %v24527_v24  ;;  %v18013_v54 = vpop.permute.xlu1 %2483  ;;  %v18015_v38 = vpop.permute.xlu0 %2480 }
 0x2ff   :  { %24561 = vst [vmem:[#allocation138_spill] sm:$0xff] %v18015_v38  ;;  %13376 = vmatprep.mubr.f32.mxu0 %v2906_v20  ;;  %13493 = vmatpush3.msra.mxu0 %v17370_v9  ;;  %v2935_v10 = vsub.f32 %v17962_v62, %v24562_v17  ;;  %vm2516_vm4 = vcmp.eq.s32.totalorder %v18013_v54, %v24521_v15  ;;  %v2926_v53 = vand.u32 4294901760, %v2925_v12  ;;  %v2944_v20 = vand.u32 4294901760, %v18004_v11 }
 0x300   :  { %vm2515_vm5 = vcmp.eq.s32.totalorder %v18015_v38, %v24521_v15  ;;  %13573 = vmatpush3.msra.mxu1 %v17351_v39  ;;  %13494 = vmatprep.subr.mxu0 %v17382_v7  ;;  %v11129_v9 = vsel %vm2516_vm4, 1.0, %v24526_v59  ;;  %v2954_v12 = vand.u32 4294901760, %v18002_v3 }
 0x301   :  { %v11128_v0 = vsel %vm2515_vm5, 1.0, %v24526_v59  ;;  %13463 = vmatmul.mubr.msk.f32.gmra.mxu1 %vm2514_vm2, %v24527_v24  ;;  %13574 = vmatprep.subr.mxu1 %v17363_v27  ;;  %v18042_v17 = vsub.f32 %v11129_v9, %v11129_v9  ;;  %v2945_v59 = vsub.f32 %v18004_v11, %v2944_v20  ;;  %v2936_v33 = vand.u32 4294901760, %v2935_v10 }
 0x302   :  { %v18044_v55 = vsub.f32 %v11128_v0, %v11128_v0  ;;  %13377 = vmatmul.mubr.f32.gmra.mxu0 %v2916_v16  ;;  %13465 = vmatprep.mubr.msk.f32.mxu1 %vm2515_vm5, %v24527_v24  ;;  %v2955_v16 = vsub.f32 %v18002_v3, %v2954_v12  ;;  %v24563_v10 = vand.u32 4294901760, %v17462_v61 }
 0x303   :  { %13379 = vmatprep.mubr.f32.mxu0 %v2926_v53  ;;  %13575 = vmatpush3.msra.mxu1 %v17363_v27  ;;  %v2946_v9 = vand.u32 4294901760, %v2945_v59  ;;  %v2974_v38 = vand.u32 4294901760, %v18042_v17 }
 0x304   :  { %13576 = vmatprep.subr.mxu1 %v17377_v47  ;;  %13495 = vmatpush3.msra.mxu0 %v17382_v7  ;;  %v23703_v0 = vand.u32 4294901760, %v18044_v55  ;;  %v2956_v53 = vand.u32 4294901760, %v2955_v16 }
 0x305   :  { %13466 = vmatmul.mubr.msk.f32.gmra.mxu1 %vm2516_vm4, %v24527_v24  ;;  %13496 = vmatprep.subr.mxu0 %v17396_v57 }
 0x306   :  { %13380 = vmatmul.mubr.f32.gmra.mxu0 %v2936_v33  ;;  %13577 = vmatpush3.msra.mxu1 %v17377_v47  ;;  %v2965_v7 = vsub.f32 %v18044_v55, %v23703_v0  ;;  %v2975_v33 = vsub.f32 %v18042_v17, %v2974_v38  ;;  %v24564_v0 = vand.u32 4294901760, %v17488_v23 }
 0x307   :  { %13580 = vmatprep.mubr.f32.mxu1 %v24563_v10  ;;  %13382 = vmatprep.mubr.f32.mxu0 %v2946_v9  ;;  %v24565_v9 = vand.u32 4294901760, %v17460_v21  ;;  %v24602_v10 = vld [vmem:[#allocation98_spill] sm:$0xff] }
 0x308   :  { %13578 = vmatprep.subr.mxu1 %v17391_v31  ;;  %13497 = vmatpush3.msra.mxu0 %v17396_v57  ;;  %v2966_v59 = vand.u32 4294901760, %v2965_v7  ;;  %v2976_v16 = vand.u32 4294901760, %v2975_v33  ;;  %v24566_v57 = vand.u32 4294901760, %v17486_v29  ;;  %v24601_v7 = vand.u32 4294901760, %v17964_v4  ;;  %v24624_v33 = vld [vmem:[#allocation118_spill] sm:$0xff] }
 0x309   :  { %13579 = vmatpush3.msra.mxu1 %v17391_v31  ;;  %13498 = vmatprep.subr.mxu0 %v17408_v45 }
 0x30a   :  { %13581 = vmatmul.mubr.f32.vlgmr.msra.gmra.mxu1 %v24564_v0  ;;  %13383 = vmatmul.mubr.f32.gmra.mxu0 %v2956_v53  ;;  %v24567_v0 = vand.u32 4294901760, %v17526_v25 }
 0x30b   :  { %13583 = vmatprep.mubr.f32.mxu1 %v24565_v9  ;;  %13385 = vmatprep.mubr.f32.mxu0 %v2966_v59  ;;  %v24622_v59 = vld [vmem:[#allocation115_spill] sm:$0xff] }
 0x30c   :  { %13499 = vmatpush3.msra.mxu0 %v17408_v45  ;;  %13708 = vmatprep.subr.mxu1 %v17220_v44  ;;  %v24568_v45 = vand.u32 4294901760, %v17524_v18  ;;  %v2356_v9 = vld [vmem:[#allocation8 + $0x78] sm:$0xff] }
 0x30d   :  { %13628 = vmatprep.subr.mxu0 %v17246_v42  ;;  %13709 = vmatpush3.msra.mxu1 %v17220_v44  ;;  %v24569_v44 = vand.u32 4294901760, %v17564_v5 }
 0x30e   :  { %13584 = vmatmul.mubr.f32.gmra.mxu1 %v24566_v57  ;;  %13386 = vmatmul.mubr.f32.gmra.mxu0 %v2976_v16  ;;  %v18342_v16 = vand.u32 4294901760, %v2356_v9  ;;  %v24627_v57 = vld [vmem:[#allocation117_spill] sm:$0xff] }
 0x30f   :  { %13586 = vmatprep.mubr.f32.mxu1 %v24567_v0  ;;  %13500 = vmatprep.mubr.f32.mxu0 %v17462_v61  ;;  %v24571_v61 = vand.u32 4294901760, %v17604_v35  ;;  %v24629_v0 = vld [vmem:[#allocation121_spill] sm:$0xff] }
 0x310   :  { %13710 = vmatprep.subr.mxu1 %v17222_v1 }
 0x311   :  { %13711 = vmatpush3.msra.mxu1 %v17222_v1  ;;  %v24570_v1 = vand.u32 4294901760, %v17562_v37 }
 0x312   :  { %13587 = vmatmul.mubr.f32.gmra.mxu1 %v24568_v45  ;;  %13501 = vmatmul.mubr.f32.vlgmr.msra.gmra.mxu0 %v17488_v23  ;;  %v18361_v45 = vsub.f32 %v2356_v9, %v18342_v16 }
 0x313   :  { %13589 = vmatprep.mubr.f32.mxu1 %v24569_v44  ;;  %13629 = vmatpush3.msra.mxu0 %v17246_v42  ;;  %v24572_v42 = vand.u32 4294901760, %v17602_v6  ;;  %v2355_v44 = vld [vmem:[#allocation8 + $0x70] sm:$0xff] }
 0x314   :  { %13503 = vmatprep.mubr.f32.mxu0 %v17460_v21  ;;  %13630 = vmatprep.subr.mxu0 %v17249_v13 }
 0x315   :  { %13631 = vmatpush3.msra.mxu0 %v17249_v13  ;;  %13712 = vmatprep.subr.mxu1 %v17224_v60  ;;  %v24573_v13 = vand.u32 4294901760, %v17644_v50 }
 0x316   :  { %13590 = vmatmul.mubr.f32.gmra.mxu1 %v24570_v1  ;;  %13504 = vmatmul.mubr.f32.gmra.mxu0 %v17486_v29  ;;  %v24586_v29 = vld [vmem:[#allocation94_spill] sm:$0xff]  ;;  %v18366_v1 = vand.u32 4294901760, %v18361_v45 }
 0x317   :  { %13592 = vmatprep.mubr.f32.mxu1 %v24571_v61  ;;  %13506 = vmatprep.mubr.f32.mxu0 %v17526_v25  ;;  %v24582_v25 = vld [vmem:[#allocation93_spill] sm:$0xff]  ;;  %v18368_v61 = vand.u32 4294901760, %v2355_v44 }
 0x318   :  { %13632 = vmatprep.subr.mxu0 %v17252_v36  ;;  %13713 = vmatpush3.msra.mxu1 %v17224_v60  ;;  %v24574_v60 = vand.u32 4294901760, %v17642_v51  ;;  %24632 = vst [vmem:[#allocation93_spill] sm:$0xff] %v18366_v1 }
 0x319   :  { %13633 = vmatpush3.msra.mxu0 %v17252_v36  ;;  %13714 = vmatprep.subr.mxu1 %v17227_v43  ;;  %v24575_v36 = vand.u32 4294901760, %v17684_v30 }
 0x31a   :  { %13593 = vmatmul.mubr.f32.gmra.mxu1 %v24572_v42  ;;  %13507 = vmatmul.mubr.f32.gmra.mxu0 %v17524_v18  ;;  %v24578_v18 = vld [vmem:[#allocation92_spill] sm:$0xff] }
 0x31b   :  { %13595 = vmatprep.mubr.f32.mxu1 %v24573_v13  ;;  %13509 = vmatprep.mubr.f32.mxu0 %v17564_v5  ;;  %v24581_v5 = vand.u32 4294901760, %v17764_v41  ;;  %24626 = vst [vmem:[#allocation92_spill] sm:$0xff] %v18342_v16  ;;  %v24634_v42 = vld [vmem:[#allocation120_spill] sm:$0xff] }
 0x31c   :  { %13634 = vmatprep.subr.mxu0 %v17268_v52  ;;  %13715 = vmatpush3.msra.mxu1 %v17227_v43  ;;  %v24576_v43 = vand.u32 4294901760, %v17682_v2  ;;  %v24637_v13 = vld [vmem:[#allocation124_spill] sm:$0xff] }
 0x31d   :  { %13635 = vmatpush3.msra.mxu0 %v17268_v52  ;;  %13716 = vmatprep.subr.mxu1 %v17229_v32  ;;  %v24577_v52 = vand.u32 4294901760, %v17724_v22 }
 0x31e   :  { %13596 = vmatmul.mubr.f32.gmra.mxu1 %v24574_v60  ;;  %13510 = vmatmul.mubr.f32.gmra.mxu0 %v17562_v37  ;;  %v24589_v37 = vand.u32 4294901760, %v17844_v40  ;;  %v4960_v60 = vsub.f32 %v18361_v45, %v18366_v1 }
 0x31f   :  { %13598 = vmatprep.mubr.f32.mxu1 %v24575_v36  ;;  %13512 = vmatprep.mubr.f32.mxu0 %v17604_v35  ;;  %v24585_v35 = vand.u32 4294901760, %v17804_v46  ;;  %v18389_v36 = vsub.f32 %v2355_v44, %v18368_v61 }
 0x320   :  { %13636 = vmatprep.subr.mxu0 %v17280_v14  ;;  %13717 = vmatpush3.msra.mxu1 %v17229_v32  ;;  %v24579_v32 = vld [vmem:[#allocation119_spill] sm:$0xff] }
 0x321   :  { %13637 = vmatpush3.msra.mxu0 %v17280_v14  ;;  %13718 = vmatprep.subr.mxu1 %v17255_v19  ;;  %v24580_v14 = vand.u32 4294901760, %v24579_v32  ;;  %24631 = vst [vmem:[#allocation119_spill] sm:$0xff] %v18361_v45  ;;  %24640 = vst [vmem:[#allocation94_spill] sm:$0xff] %v18389_v36 }
 0x322   :  { %13599 = vmatmul.mubr.f32.gmra.mxu1 %v24576_v43  ;;  %13513 = vmatmul.mubr.f32.gmra.mxu0 %v17602_v6  ;;  %v2354_v43 = vld [vmem:[#allocation8 + $0x68] sm:$0xff] }
 0x323   :  { %13601 = vmatprep.mubr.f32.mxu1 %v24577_v52  ;;  %13515 = vmatprep.mubr.f32.mxu0 %v17644_v50  ;;  %v24590_v50 = vld [vmem:[#allocation95_spill] sm:$0xff]  ;;  %v4961_v52 = vand.u32 4294901760, %v4960_v60  ;;  %v2346_v60 = vld [vmem:[#allocation8 + $0x28] sm:$0xff] }
 0x324   :  { %13638 = vmatprep.subr.mxu0 %v24578_v18  ;;  %13719 = vmatpush3.msra.mxu1 %v17255_v19  ;;  %v24583_v19 = vld [vmem:[#allocation122_spill] sm:$0xff] }
 0x325   :  { %13639 = vmatpush3.msra.mxu0 %v24578_v18  ;;  %13720 = vmatprep.subr.mxu1 %v17271_v28  ;;  %v24584_v21 = vand.u32 4294901760, %v24583_v19  ;;  %24633 = vst [vmem:[#allocation122_spill] sm:$0xff] %v18368_v61  ;;  %v18394_v18 = vand.u32 4294901760, %v18389_v36 }
 0x326   :  { %13602 = vmatmul.mubr.f32.gmra.mxu1 %v24580_v14  ;;  %13516 = vmatmul.mubr.f32.gmra.mxu0 %v17642_v51  ;;  %v24594_v51 = vld [vmem:[#allocation96_spill] sm:$0xff]  ;;  %v24643_v14 = vld [vmem:[#allocation123_spill] sm:$0xff] }
 0x327   :  { %13604 = vmatprep.mubr.f32.mxu1 %v24581_v5  ;;  %13518 = vmatprep.mubr.f32.mxu0 %v17684_v30  ;;  %v24593_v30 = vand.u32 4294901760, %v17884_v48  ;;  %v24646_v5 = vld [vmem:[#allocation127_spill] sm:$0xff] }
 0x328   :  { %13640 = vmatprep.subr.mxu0 %v24582_v25  ;;  %13721 = vmatpush3.msra.mxu1 %v17271_v28  ;;  %v24587_v28 = vld [vmem:[#allocation125_spill] sm:$0xff] }
 0x329   :  { %13641 = vmatpush3.msra.mxu0 %v24582_v25  ;;  %13722 = vmatprep.subr.mxu1 %v17283_v49  ;;  %v24588_v23 = vand.u32 4294901760, %v24587_v28  ;;  %24641 = vst [vmem:[#allocation125_spill] sm:$0xff] %v18394_v18  ;;  %v4967_v25 = vsub.f32 %v18389_v36, %v18394_v18 }
 0x32a   :  { %13605 = vmatmul.mubr.f32.gmra.mxu1 %v24584_v21  ;;  %13519 = vmatmul.mubr.f32.gmra.mxu0 %v17682_v2  ;;  %v24597_v2 = vand.u32 4294901760, %v17924_v58  ;;  %v2353_v21 = vld [vmem:[#allocation8 + $0x60] sm:$0xff] }
 0x32b   :  { %13607 = vmatprep.mubr.f32.mxu1 %v24585_v35  ;;  %13521 = vmatprep.mubr.f32.mxu0 %v17724_v22  ;;  %v4968_v35 = vand.u32 4294901760, %v4967_v25  ;;  %v2345_v25 = vld [vmem:[#allocation8 + $0x20] sm:$0xff] }
 0x32c   :  { %13642 = vmatprep.subr.mxu0 %v24586_v29  ;;  %13723 = vmatpush3.msra.mxu1 %v17283_v49  ;;  %v24591_v49 = vld [vmem:[#allocation128_spill] sm:$0xff] }
 0x32d   :  { %13643 = vmatpush3.msra.mxu0 %v24586_v29  ;;  %13724 = vmatprep.subr.mxu1 %v17297_v26  ;;  %v24592_v6 = vand.u32 4294901760, %v24591_v49 }
 0x32e   :  { %13608 = vmatmul.mubr.f32.gmra.mxu1 %v24588_v23  ;;  %13522 = vmatmul.mubr.f32.gmra.mxu0 %v24579_v32  ;;  %v18396_v32 = vand.u32 4294901760, %v2354_v43  ;;  %v24652_v23 = vld [vmem:[#allocation126_spill] sm:$0xff] }
 0x32f   :  { %13610 = vmatprep.mubr.f32.mxu1 %v24589_v37  ;;  %13524 = vmatprep.mubr.f32.mxu0 %v17764_v41  ;;  %v24598_v41 = vld [vmem:[#allocation97_spill] sm:$0xff]  ;;  %v24655_v37 = vld [vmem:[#allocation130_spill] sm:$0xff] }
 0x330   :  { %13644 = vmatprep.subr.mxu0 %v24590_v50  ;;  %13725 = vmatpush3.msra.mxu1 %v17297_v26  ;;  %v24595_v26 = vld [vmem:[#allocation131_spill] sm:$0xff]  ;;  %24642 = vst [vmem:[#allocation95_spill] sm:$0xff] %v18396_v32 }
 0x331   :  { %13645 = vmatpush3.msra.mxu0 %v24590_v50  ;;  %13726 = vmatprep.subr.mxu1 %v17311_v63  ;;  %v24596_v22 = vand.u32 4294901760, %v24595_v26 }
 0x332   :  { %13611 = vmatmul.mubr.f32.gmra.mxu1 %v24592_v6  ;;  %13525 = vmatmul.mubr.f32.gmra.mxu0 %v24583_v19  ;;  %v18417_v19 = vsub.f32 %v2354_v43, %v18396_v32  ;;  %v2352_v6 = vld [vmem:[#allocation8 + $0x58] sm:$0xff] }
 0x333   :  { %13613 = vmatprep.mubr.f32.mxu1 %v24593_v30  ;;  %13527 = vmatprep.mubr.f32.mxu0 %v17804_v46 }
 0x334   :  { %13646 = vmatprep.subr.mxu0 %v24594_v51  ;;  %13727 = vmatpush3.msra.mxu1 %v17311_v63  ;;  %v24599_v63 = vld [vmem:[#allocation134_spill] sm:$0xff]  ;;  %24649 = vst [vmem:[#allocation128_spill] sm:$0xff] %v18417_v19  ;;  %v18422_v29 = vand.u32 4294901760, %v18417_v19 }
 0x335   :  { %13647 = vmatpush3.msra.mxu0 %v24594_v51  ;;  %13728 = vmatprep.subr.mxu1 %v17323_v56  ;;  %v24600_v46 = vand.u32 4294901760, %v24599_v63 }
 0x336   :  { %13614 = vmatmul.mubr.f32.gmra.mxu1 %v24596_v22  ;;  %13528 = vmatmul.mubr.f32.gmra.mxu0 %v24587_v28  ;;  %24650 = vst [vmem:[#allocation96_spill] sm:$0xff] %v18422_v29  ;;  %v18424_v28 = vand.u32 4294901760, %v2353_v21  ;;  %v4974_v50 = vsub.f32 %v18417_v19, %v18422_v29  ;;  %v24661_v22 = vld [vmem:[#allocation129_spill] sm:$0xff] }
 0x337   :  { %13616 = vmatprep.mubr.f32.mxu1 %v24597_v2  ;;  %13530 = vmatprep.mubr.f32.mxu0 %v17844_v40  ;;  %v24604_v40 = vld [vmem:[#allocation99_spill] sm:$0xff]  ;;  %v24664_v2 = vld [vmem:[#allocation133_spill] sm:$0xff] }
 0x338   :  { %13648 = vmatprep.subr.mxu0 %v24598_v41  ;;  %13729 = vmatpush3.msra.mxu1 %v17323_v56  ;;  %v24603_v56 = vand.u32 4294901760, %v17962_v62  ;;  %24651 = vst [vmem:[#allocation131_spill] sm:$0xff] %v18424_v28  ;;  %v4975_v30 = vand.u32 4294901760, %v4974_v50  ;;  %v18608_v50 = vand.u32 4294901760, %v2345_v25 }
 0x339   :  { %13649 = vmatpush3.msra.mxu0 %v24598_v41  ;;  %13730 = vmatprep.subr.mxu1 %v17337_v8 }
 0x33a   :  { %13617 = vmatmul.mubr.f32.gmra.mxu1 %v24600_v46  ;;  %13531 = vmatmul.mubr.f32.gmra.mxu0 %v24591_v49  ;;  %v18445_v49 = vsub.f32 %v2353_v21, %v18424_v28  ;;  %v2351_v46 = vld [vmem:[#allocation8 + $0x50] sm:$0xff]  ;;  %24703 = vst [vmem:[#allocation117_spill] sm:$0xff] %v18608_v50 }
 0x33b   :  { %13619 = vmatprep.mubr.f32.mxu1 %v24601_v7  ;;  %13533 = vmatprep.mubr.f32.mxu0 %v17884_v48  ;;  %v24606_v48 = vld [vmem:[#allocation100_spill] sm:$0xff] }
 0x33c   :  { %13650 = vmatprep.subr.mxu0 %v24602_v10  ;;  %13731 = vmatpush3.msra.mxu1 %v17337_v8  ;;  %v24605_v8 = vand.u32 4294901760, %v18044_v55  ;;  %24658 = vst [vmem:[#allocation97_spill] sm:$0xff] %v18445_v49  ;;  %v18450_v51 = vand.u32 4294901760, %v18445_v49 }
 0x33d   :  { %13651 = vmatpush3.msra.mxu0 %v24602_v10  ;;  %13732 = vmatprep.subr.mxu1 %v17351_v39 }
 0x33e   :  { %13620 = vmatmul.mubr.f32.gmra.mxu1 %v24603_v56  ;;  %13534 = vmatmul.mubr.f32.gmra.mxu0 %v24595_v26  ;;  %24659 = vst [vmem:[#allocation134_spill] sm:$0xff] %v18450_v51  ;;  %v18452_v26 = vand.u32 4294901760, %v2352_v6  ;;  %v4981_v41 = vsub.f32 %v18445_v49, %v18450_v51  ;;  %v18480_v56 = vand.u32 4294901760, %v2351_v46 }
 0x33f   :  { %13622 = vmatprep.mubr.f32.mxu1 %v2944_v20  ;;  %13536 = vmatprep.mubr.f32.mxu0 %v17924_v58 }
 0x340   :  { %13652 = vmatprep.subr.mxu0 %v24604_v40  ;;  %13733 = vmatpush3.msra.mxu1 %v17351_v39  ;;  %24660 = vst [vmem:[#allocation98_spill] sm:$0xff] %v18452_v26  ;;  %v4982_v7 = vand.u32 4294901760, %v4981_v41  ;;  %24669 = vst [vmem:[#allocation104_spill] sm:$0xff] %v18480_v56  ;;  %v18501_v39 = vsub.f32 %v2351_v46, %v18480_v56 }
 0x341   :  { %13653 = vmatpush3.msra.mxu0 %v24604_v40  ;;  %13734 = vmatprep.subr.mxu1 %v17363_v27  ;;  %v24670_v40 = vld [vmem:[#allocation132_spill] sm:$0xff] }
 0x342   :  { %13623 = vmatmul.mubr.f32.gmra.mxu1 %v2954_v12  ;;  %13537 = vmatmul.mubr.f32.gmra.mxu0 %v24599_v63  ;;  %v18473_v63 = vsub.f32 %v2352_v6, %v18452_v26  ;;  %v2344_v6 = vld [vmem:[#allocation8 + $0x18] sm:$0xff] }
 0x343   :  { %13625 = vmatprep.mubr.f32.mxu1 %v24605_v8  ;;  %13539 = vmatprep.mubr.f32.mxu0 %v17964_v4  ;;  %v24673_v8 = vld [vmem:[#allocation136_spill] sm:$0xff]  ;;  %v18621_v46 = vand.u32 4294901760, %v2344_v6 }
 0x344   :  { %13735 = vmatpush3.msra.mxu1 %v17363_v27  ;;  %13654 = vmatprep.subr.mxu0 %v24606_v48  ;;  %v24608_v27 = vld [vmem:[#allocation101_spill] sm:$0xff]  ;;  %24667 = vst [vmem:[#allocation99_spill] sm:$0xff] %v18473_v63  ;;  %v18478_v10 = vand.u32 4294901760, %v18473_v63 }
 0x345   :  { %13736 = vmatprep.subr.mxu1 %v17377_v47  ;;  %13655 = vmatpush3.msra.mxu0 %v24606_v48  ;;  %24676 = vst [vmem:[#allocation101_spill] sm:$0xff] %v18501_v39  ;;  %24705 = vst [vmem:[#allocation120_spill] sm:$0xff] %v18621_v46 }
 0x346   :  { %13626 = vmatmul.mubr.f32.gmra.mxu1 %v2974_v38  ;;  %13540 = vmatmul.mubr.f32.gmra.mxu0 %v17962_v62  ;;  %v24611_v38 = vld [vmem:[#allocation102_spill] sm:$0xff]  ;;  %24668 = vst [vmem:[#allocation100_spill] sm:$0xff] %v18478_v10  ;;  %v4988_v48 = vsub.f32 %v18473_v63, %v18478_v10 }
 0x347   :  { %13737 = vmatpush3.msra.mxu1 %v17377_v47  ;;  %13740 = vmatprep.mubr.msk.f32.mxu1 %vm2485_vm14, %v24527_v24  ;;  %v18506_v47 = vand.u32 4294901760, %v18501_v39 }
 0x348   :  { %13542 = vmatprep.mubr.f32.mxu0 %v18004_v11  ;;  %13738 = vmatprep.subr.mxu1 %v17391_v31  ;;  %v4989_v58 = vand.u32 4294901760, %v4988_v48  ;;  %v2349_v11 = vld [vmem:[#allocation8 + $0x40] sm:$0xff] }
 0x349   :  { %13739 = vmatpush3.msra.mxu1 %v17391_v31  ;;  %13656 = vmatprep.subr.mxu0 %v24608_v27  ;;  %24677 = vst [vmem:[#allocation106_spill] sm:$0xff] %v18506_v47  ;;  %v24679_v31 = vld [vmem:[#allocation135_spill] sm:$0xff]  ;;  %v4995_v4 = vsub.f32 %v18501_v39, %v18506_v47  ;;  %v18536_v20 = vand.u32 4294901760, %v2349_v11 }
 0x34a   :  { %13741 = vmatmul.mubr.msk.f32.vlgmr.msra.gmra.mxu1 %vm2486_vm6, %v24527_v24  ;;  %13543 = vmatmul.mubr.f32.gmra.mxu0 %v18002_v3 }
 0x34b   :  { %13657 = vmatpush3.msra.mxu0 %v24608_v27  ;;  %13743 = vmatprep.mubr.msk.f32.mxu1 %vm2487_vm12, %v24527_v24  ;;  %v2350_v27 = vld [vmem:[#allocation8 + $0x48] sm:$0xff]  ;;  %v4996_v3 = vand.u32 4294901760, %v4995_v4  ;;  %24686 = vst [vmem:[#allocation108_spill] sm:$0xff] %v18536_v20 }
 0x34c   :  { %13545 = vmatprep.mubr.f32.mxu0 %v18044_v55  ;;  %13658 = vmatprep.subr.mxu0 %v24611_v38 }
 0x34d   :  { %13659 = vmatpush3.msra.mxu0 %v24611_v38  ;;  %13868 = vmatprep.subr.mxu1 %v4961_v52  ;;  %v18508_v38 = vand.u32 4294901760, %v2350_v27 }
 0x34e   :  { %13744 = vmatmul.mubr.msk.f32.gmra.mxu1 %vm2488_vm15, %v24527_v24  ;;  %13546 = vmatmul.mubr.f32.gmra.mxu0 %v18042_v17  ;;  %v2348_v17 = vld [vmem:[#allocation8 + $0x38] sm:$0xff] }
 0x34f   :  { %13746 = vmatprep.mubr.msk.f32.mxu1 %vm2489_vm8, %v24527_v24  ;;  %13660 = vmatprep.mubr.msk.f32.mxu0 %vm2485_vm14, %v24527_v24  ;;  %vm24625_vm14 = vcmp.eq.s32.totalorder %v24624_v33, %v24521_v15  ;;  %24678 = vst [vmem:[#allocation103_spill] sm:$0xff] %v18508_v38  ;;  %v18529_v62 = vsub.f32 %v2350_v27, %v18508_v38  ;;  %v18559_v9 = vand.u32 4294901760, %v2348_v17 }
 0x350   :  { %13788 = vmatprep.subr.mxu0 %v18342_v16  ;;  %13869 = vmatpush3.msra.mxu1 %v4961_v52  ;;  %v18557_v33 = vsub.f32 %v2349_v11, %v18536_v20  ;;  %v2342_v11 = vld [vmem:[#allocation8 + $0x8] sm:$0xff] }
 0x351   :  { %13870 = vmatprep.subr.mxu1 %v4968_v35  ;;  %24684 = vst [vmem:[#allocation102_spill] sm:$0xff] %v18529_v62  ;;  %v18534_v55 = vand.u32 4294901760, %v18529_v62  ;;  %24692 = vst [vmem:[#allocation110_spill] sm:$0xff] %v18559_v9 }
 0x352   :  { %13747 = vmatmul.mubr.msk.f32.gmra.mxu1 %vm2490_vm7, %v24527_v24  ;;  %13661 = vmatmul.mubr.msk.f32.vlgmr.msra.gmra.mxu0 %vm2486_vm6, %v24527_v24  ;;  %vm24630_vm6 = vcmp.eq.s32.totalorder %v24629_v0, %v24521_v15  ;;  %24691 = vst [vmem:[#allocation107_spill] sm:$0xff] %v18557_v33  ;;  %v18564_v44 = vand.u32 4294901760, %v18557_v33 }
 0x353   :  { %13749 = vmatprep.mubr.msk.f32.mxu1 %vm2491_vm10, %v24527_v24  ;;  %13663 = vmatprep.mubr.msk.f32.mxu0 %vm2487_vm12, %v24527_v24  ;;  %vm24623_vm12 = vcmp.eq.s32.totalorder %v24622_v59, %v24521_v15  ;;  %24685 = vst [vmem:[#allocation105_spill] sm:$0xff] %v18534_v55  ;;  %v5002_v59 = vsub.f32 %v18529_v62, %v18534_v55 }
 0x354   :  { %13789 = vmatpush3.msra.mxu0 %v18342_v16  ;;  %13871 = vmatpush3.msra.mxu1 %v4968_v35  ;;  %24693 = vst [vmem:[#allocation109_spill] sm:$0xff] %v18564_v44  ;;  %v5009_v43 = vsub.f32 %v18557_v33, %v18564_v44 }
 0x355   :  { %13790 = vmatprep.subr.mxu0 %v18368_v61  ;;  %13872 = vmatprep.subr.mxu1 %v4975_v30  ;;  %v5003_v0 = vand.u32 4294901760, %v5002_v59  ;;  %v18651_v59 = vand.u32 4294901760, %v2342_v11 }
 0x356   :  { %13750 = vmatmul.mubr.msk.f32.gmra.mxu1 %vm2492_vm9, %v24527_v24  ;;  %13664 = vmatmul.mubr.msk.f32.gmra.mxu0 %vm2488_vm15, %v24527_v24  ;;  %vm24628_vm15 = vcmp.eq.s32.totalorder %v24627_v57, %v24521_v15  ;;  %v2347_v57 = vld [vmem:[#allocation8 + $0x30] sm:$0xff]  ;;  %v5010_v35 = vand.u32 4294901760, %v5009_v43 }
 0x357   :  { %13752 = vmatprep.mubr.msk.f32.mxu1 %vm2493_vm13, %v24527_v24  ;;  %13666 = vmatprep.mubr.msk.f32.mxu0 %vm2489_vm8, %v24527_v24  ;;  %vm24636_vm8 = vmmov %vm24623_vm12  ;;  %24712 = vst [vmem:[#allocation133_spill] sm:$0xff] %v18651_v59 }
 0x358   :  { %13791 = vmatpush3.msra.mxu0 %v18368_v61  ;;  %13873 = vmatpush3.msra.mxu1 %v4975_v30 }
 0x359   :  { %13792 = vmatprep.subr.mxu0 %v18396_v32  ;;  %13874 = vmatprep.subr.mxu1 %v4982_v7 }
 0x35a   :  { %13753 = vmatmul.mubr.msk.f32.gmra.mxu1 %vm2494_vm11, %v24527_v24  ;;  %13667 = vmatmul.mubr.msk.f32.gmra.mxu0 %vm2490_vm7, %v24527_v24  ;;  %vm24635_vm7 = vcmp.eq.s32.totalorder %v24634_v42, %v24521_v15  ;;  %v18567_v42 = vsub.f32 %v2348_v17, %v18559_v9 }
 0x35b   :  { %13755 = vmatprep.mubr.msk.f32.mxu1 %vm2495_vm1, %v24527_v24  ;;  %13669 = vmatprep.mubr.msk.f32.mxu0 %vm2491_vm10, %v24527_v24  ;;  %vm24639_vm10 = vmmov %vm24625_vm14 }
 0x35c   :  { %13793 = vmatpush3.msra.mxu0 %v18396_v32  ;;  %13875 = vmatpush3.msra.mxu1 %v4982_v7  ;;  %24694 = vst [vmem:[#allocation112_spill] sm:$0xff] %v18567_v42  ;;  %v18586_v52 = vand.u32 4294901760, %v18567_v42  ;;  %v18625_v7 = vsub.f32 %v2345_v25, %v18608_v50 }
 0x35d   :  { %13794 = vmatprep.subr.mxu0 %v18424_v28  ;;  %13876 = vmatprep.subr.mxu1 %v4989_v58 }
 0x35e   :  { %13756 = vmatmul.mubr.msk.f32.gmra.mxu1 %vm2496_vm0, %v24527_v24  ;;  %13670 = vmatmul.mubr.msk.f32.gmra.mxu0 %vm2492_vm9, %v24527_v24  ;;  %vm24638_vm9 = vcmp.eq.s32.totalorder %v24637_v13, %v24521_v15  ;;  %v18569_v13 = vand.u32 4294901760, %v2347_v57  ;;  %24698 = vst [vmem:[#allocation114_spill] sm:$0xff] %v18586_v52  ;;  %24706 = vst [vmem:[#allocation124_spill] sm:$0xff] %v18625_v7  ;;  %v18640_v4 = vand.u32 4294901760, %v18625_v7 }
 0x35f   :  { %13758 = vmatprep.mubr.msk.f32.mxu1 %vm2497_vm3, %v24527_v24  ;;  %13672 = vmatprep.mubr.msk.f32.mxu0 %vm2493_vm13, %v24527_v24  ;;  %vm24645_vm13 = vmmov %vm24628_vm15 }
 0x360   :  { %13795 = vmatpush3.msra.mxu0 %v18424_v28  ;;  %13877 = vmatpush3.msra.mxu1 %v4989_v58  ;;  %24695 = vst [vmem:[#allocation111_spill] sm:$0xff] %v18569_v13  ;;  %v18631_v58 = vsub.f32 %v2344_v6, %v18621_v46  ;;  %24709 = vst [vmem:[#allocation126_spill] sm:$0xff] %v18640_v4  ;;  %v5037_v54 = vsub.f32 %v18625_v7, %v18640_v4 }
 0x361   :  { %13796 = vmatprep.subr.mxu0 %v18452_v26  ;;  %13878 = vmatprep.subr.mxu1 %v4996_v3 }
 0x362   :  { %13759 = vmatmul.mubr.msk.f32.gmra.mxu1 %vm24623_vm12, %v24527_v24  ;;  %13673 = vmatmul.mubr.msk.f32.gmra.mxu0 %vm2494_vm11, %v24527_v24  ;;  %vm24644_vm11 = vcmp.eq.s32.totalorder %v24643_v14, %v24521_v15  ;;  %vm24654_vm12 = vmmov %vm24635_vm7  ;;  %v18589_v14 = vsub.f32 %v2347_v57, %v18569_v13  ;;  %24707 = vst [vmem:[#allocation123_spill] sm:$0xff] %v18631_v58  ;;  %v18646_v17 = vand.u32 4294901760, %v18631_v58 }
 0x363   :  { %13761 = vmatprep.mubr.msk.f32.mxu1 %vm24625_vm14, %v24527_v24  ;;  %13675 = vmatprep.mubr.msk.f32.mxu0 %vm2495_vm1, %v24527_v24  ;;  %vm24648_vm1 = vmmov %vm24630_vm6  ;;  %vm24656_vm14 = vcmp.eq.s32.totalorder %v24655_v37, %v24521_v15 }
 0x364   :  { %13797 = vmatpush3.msra.mxu0 %v18452_v26  ;;  %13879 = vmatpush3.msra.mxu1 %v4996_v3  ;;  %24699 = vst [vmem:[#allocation113_spill] sm:$0xff] %v18589_v14  ;;  %24710 = vst [vmem:[#allocation130_spill] sm:$0xff] %v18646_v17  ;;  %v5044_v57 = vsub.f32 %v18631_v58, %v18646_v17 }
 0x365   :  { %13798 = vmatprep.subr.mxu0 %v18480_v56  ;;  %13880 = vmatprep.subr.mxu1 %v5003_v0 }
 0x366   :  { %13762 = vmatmul.mubr.msk.f32.gmra.mxu1 %vm24628_vm15, %v24527_v24  ;;  %13676 = vmatmul.mubr.msk.f32.gmra.mxu0 %vm2496_vm0, %v24527_v24  ;;  %vm24647_vm0 = vcmp.eq.s32.totalorder %v24646_v5, %v24521_v15  ;;  %vm24657_vm15 = vmmov %vm24638_vm9  ;;  %v18591_v5 = vand.u32 4294901760, %v2346_v60 }
 0x367   :  { %13764 = vmatprep.mubr.msk.f32.mxu1 %vm24630_vm6, %v24527_v24  ;;  %13678 = vmatprep.mubr.msk.f32.mxu0 %vm2497_vm3, %v24527_v24  ;;  %vm24653_vm3 = vcmp.eq.s32.totalorder %v24652_v23, %v24521_v15  ;;  %vm24662_vm6 = vcmp.eq.s32.totalorder %v24661_v22, %v24521_v15  ;;  %v18598_v23 = vand.u32 4294901760, %v18589_v14 }
 0x368   :  { %13799 = vmatpush3.msra.mxu0 %v18480_v56  ;;  %24700 = vst [vmem:[#allocation116_spill] sm:$0xff] %v18591_v5  ;;  %13881 = vmatpush3.msra.mxu1 %v5003_v0  ;;  %v18601_v37 = vsub.f32 %v2346_v60, %v18591_v5  ;;  %v18663_v60 = vsub.f32 %v2342_v11, %v18651_v59 }
 0x369   :  { %13800 = vmatprep.subr.mxu0 %v18508_v38  ;;  %24701 = vst [vmem:[#allocation115_spill] sm:$0xff] %v18598_v23  ;;  %13882 = vmatprep.subr.mxu1 %v5010_v35 }
 0x36a   :  { %13765 = vmatmul.mubr.msk.f32.gmra.mxu1 %vm24635_vm7, %v24527_v24  ;;  %13679 = vmatmul.mubr.msk.f32.gmra.mxu0 %vm24636_vm8, %v24527_v24  ;;  %vm24663_vm7 = vmmov %vm24644_vm11  ;;  %vm24665_vm8 = vcmp.eq.s32.totalorder %v24664_v2, %v24521_v15  ;;  %24702 = vst [vmem:[#allocation118_spill] sm:$0xff] %v18601_v37  ;;  %v5023_v2 = vsub.f32 %v18589_v14, %v18598_v23  ;;  %v18619_v41 = vand.u32 4294901760, %v18601_v37 }
 0x36b   :  { %13767 = vmatprep.mubr.msk.f32.mxu1 %vm24638_vm9, %v24527_v24  ;;  %13681 = vmatprep.mubr.msk.f32.mxu0 %vm24639_vm10, %v24527_v24  ;;  %vm24666_vm9 = vmmov %vm24647_vm0  ;;  %vm24671_vm10 = vcmp.eq.s32.totalorder %v24670_v40, %v24521_v15  ;;  %v2343_v40 = vld [vmem:[#allocation8 + $0x10] sm:$0xff]  ;;  %24714 = vst [vmem:[#allocation136_spill] sm:$0xff] %v18663_v60 }
 0x36c   :  { %13801 = vmatpush3.msra.mxu0 %v18508_v38  ;;  %24704 = vst [vmem:[#allocation121_spill] sm:$0xff] %v18619_v41  ;;  %13883 = vmatpush3.msra.mxu1 %v5010_v35  ;;  %v5024_v48 = vand.u32 4294901760, %v5023_v2  ;;  %v5030_v27 = vsub.f32 %v18601_v37, %v18619_v41  ;;  %v5038_v35 = vand.u32 4294901760, %v5037_v54 }
 0x36d   :  { %13802 = vmatprep.subr.mxu0 %v18536_v20 }
 0x36e   :  { %13768 = vmatmul.mubr.msk.f32.gmra.mxu1 %vm24644_vm11, %v24527_v24  ;;  %13682 = vmatmul.mubr.msk.f32.gmra.mxu0 %vm24645_vm13, %v24527_v24  ;;  %vm24672_vm11 = vmmov %vm24653_vm3  ;;  %vm24674_vm13 = vcmp.eq.s32.totalorder %v24673_v8, %v24521_v15  ;;  %v5031_v12 = vand.u32 4294901760, %v5030_v27 }
 0x36f   :  { %13770 = vmatprep.mubr.msk.f32.mxu1 %vm24647_vm0, %v24527_v24  ;;  %13684 = vmatprep.mubr.msk.f32.mxu0 %vm24648_vm1, %v24527_v24  ;;  %vm24675_vm0 = vmmov %vm24656_vm14  ;;  %vm24680_vm1 = vcmp.eq.s32.totalorder %v24679_v31, %v24521_v15  ;;  %v18633_v31 = vand.u32 4294901760, %v2343_v40 }
 0x370   :  { %13803 = vmatpush3.msra.mxu0 %v18536_v20 }
 0x371   :  { %13804 = vmatprep.subr.mxu0 %v18559_v9  ;;  %24708 = vst [vmem:[#allocation127_spill] sm:$0xff] %v18633_v31  ;;  %v18649_v53 = vsub.f32 %v2343_v40, %v18633_v31  ;;  %v18676_v40 = vand.u32 4294901760, %v18663_v60 }
 0x372   :  { %13771 = vmatmul.mubr.msk.f32.gmra.mxu1 %vm24653_vm3, %v24527_v24  ;;  %13685 = vmatmul.mubr.msk.f32.gmra.mxu0 %vm24654_vm12, %v24527_v24  ;;  %vm24681_vm3 = vmmov %vm24662_vm6  ;;  %vm24682_vm12 = vcmp.eq.s32.totalorder %v17975_v34, %v24521_v15  ;;  %v5016_v34 = vsub.f32 %v18567_v42, %v18586_v52 }
 0x373   :  { %13773 = vmatprep.mubr.msk.f32.mxu1 %vm24656_vm14, %v24527_v24  ;;  %13687 = vmatprep.mubr.msk.f32.mxu0 %vm24657_vm15, %v24527_v24  ;;  %vm24683_vm14 = vmmov %vm24665_vm8  ;;  %24711 = vst [vmem:[#allocation129_spill] sm:$0xff] %v18649_v53  ;;  %v18660_v0 = vand.u32 4294901760, %v18649_v53 }
 0x374   :  { %vm24688_vm15 = vmmov %vm24671_vm10  ;;  %13805 = vmatpush3.msra.mxu0 %v18559_v9  ;;  %v5017_v22 = vand.u32 4294901760, %v5016_v34  ;;  %24716 = vst [vmem:[#allocation137_spill] sm:$0xff] %v18676_v40 }
 0x375   :  { %13806 = vmatprep.subr.mxu0 %v18569_v13  ;;  %24713 = vst [vmem:[#allocation132_spill] sm:$0xff] %v18660_v0  ;;  %v5051_v2 = vsub.f32 %v18649_v53, %v18660_v0 }
 0x376   :  { %13774 = vmatmul.mubr.msk.f32.gmra.mxu1 %vm24662_vm6, %v24527_v24  ;;  %13688 = vmatmul.mubr.msk.f32.gmra.mxu0 %vm24663_vm7, %v24527_v24  ;;  %vm24690_vm6 = vmmov %vm24674_vm13 }
 0x377   :  { %13776 = vmatprep.mubr.msk.f32.mxu1 %vm24665_vm8, %v24527_v24  ;;  %13690 = vmatprep.mubr.msk.f32.mxu0 %vm24666_vm9, %v24527_v24  ;;  %vm24696_vm7 = vmmov %vm24680_vm1  ;;  %v5052_v11 = vand.u32 4294901760, %v5051_v2 }
 0x378   :  { %vm24697_vm8 = vmmov %vm24682_vm12  ;;  %13807 = vmatpush3.msra.mxu0 %v18569_v13  ;;  %13884 = vmatprep.subr.mxu1 %v5017_v22 }
 0x379   :  { %13808 = vmatprep.subr.mxu0 %v18591_v5  ;;  %13885 = vmatpush3.msra.mxu1 %v5017_v22  ;;  %v5045_v22 = vand.u32 4294901760, %v5044_v57 }
 0x37a   :  { %13777 = vmatmul.mubr.msk.f32.gmra.mxu1 %vm24671_vm10, %v24527_v24  ;;  %13691 = vmatmul.mubr.msk.f32.gmra.mxu0 %vm24672_vm11, %v24527_v24 }
 0x37b   :  { %13779 = vmatprep.mubr.msk.f32.mxu1 %vm24674_vm13, %v24527_v24  ;;  %13693 = vmatprep.mubr.msk.f32.mxu0 %vm24675_vm0, %v24527_v24 }
 0x37c   :  { %13886 = vmatprep.subr.mxu1 %v5024_v48  ;;  %13809 = vmatpush3.msra.mxu0 %v18591_v5 }
 0x37d   :  { %13887 = vmatpush3.msra.mxu1 %v5024_v48  ;;  %13810 = vmatprep.subr.mxu0 %v18608_v50 }
 0x37e   :  { %13780 = vmatmul.mubr.msk.f32.gmra.mxu1 %vm24680_vm1, %v24527_v24  ;;  %13694 = vmatmul.mubr.msk.f32.gmra.mxu0 %vm24681_vm3, %v24527_v24 }
 0x37f   :  { %13782 = vmatprep.mubr.msk.f32.mxu1 %vm24682_vm12, %v24527_v24  ;;  %13696 = vmatprep.mubr.msk.f32.mxu0 %vm24683_vm14, %v24527_v24 }
 0x380   :  { %13888 = vmatprep.subr.mxu1 %v5031_v12  ;;  %13811 = vmatpush3.msra.mxu0 %v18608_v50 }
 0x381   :  { %13889 = vmatpush3.msra.mxu1 %v5031_v12  ;;  %13812 = vmatprep.subr.mxu0 %v18621_v46  ;;  %v5058_v12 = vsub.f32 %v18663_v60, %v18676_v40 }
 0x382   :  { %13783 = vmatmul.mubr.msk.f32.gmra.mxu1 %vm2514_vm2, %v24527_v24  ;;  %13697 = vmatmul.mubr.msk.f32.gmra.mxu0 %vm24688_vm15, %v24527_v24 }
 0x383   :  { %13785 = vmatprep.mubr.msk.f32.mxu1 %vm2515_vm5, %v24527_v24  ;;  %13699 = vmatprep.mubr.msk.f32.mxu0 %vm24690_vm6, %v24527_v24 }
 0x384   :  { %13813 = vmatpush3.msra.mxu0 %v18621_v46  ;;  %13890 = vmatprep.subr.mxu1 %v5038_v35 }
 0x385   :  { %13814 = vmatprep.subr.mxu0 %v18633_v31  ;;  %13891 = vmatpush3.msra.mxu1 %v5038_v35 }
 0x386   :  { %13786 = vmatmul.mubr.msk.f32.gmra.mxu1 %vm2516_vm4, %v24527_v24  ;;  %13700 = vmatmul.mubr.msk.f32.gmra.mxu0 %vm24696_vm7, %v24527_v24 }
 0x387   :  { %13702 = vmatprep.mubr.msk.f32.mxu0 %vm24697_vm8, %v24527_v24  ;;  %13815 = vmatpush3.msra.mxu0 %v18633_v31 }
 0x388   :  { %v13422_v21 = vpop.f32.mrf.mxu1  ;;  %13892 = vmatprep.subr.mxu1 %v5045_v22  ;;  %13816 = vmatprep.subr.mxu0 %v18651_v59 }
 0x389   :  { %13893 = vmatpush3.msra.mxu1 %v5045_v22  ;;  %13817 = vmatpush3.msra.mxu0 %v18651_v59 }
 0x38a   :  { %13703 = vmatmul.mubr.msk.f32.gmra.mxu0 %vm2514_vm2, %v24527_v24  ;;  %v18610_v30 = vpop.f32.mrf.mxu1  ;;  %13894 = vmatprep.subr.mxu1 %v5052_v11 }
 0x38b   :  { %13705 = vmatprep.mubr.msk.f32.mxu0 %vm2515_vm5, %v24527_v24  ;;  %13895 = vmatpush3.msra.mxu1 %v5052_v11 }
 0x38c   :  { %v13425_v8 = vpop.f32.mrf.mxu1 }
 0x38e   :  { %13706 = vmatmul.mubr.msk.f32.gmra.mxu0 %vm2516_vm4, %v24527_v24  ;;  %v18642_v3 = vpop.f32.mrf.mxu1  ;;  %v2341_v24 = vld [vmem:[#allocation8] sm:$0xff] }
 0x38f   :  { %v18665_v43 = vand.u32 4294901760, %v2341_v24 }
 0x390   :  { %v13428_v15 = vpop.f32.mrf.mxu1 }
 0x391   :  { %24715 = vst [vmem:[#allocation135_spill] sm:$0xff] %v18665_v43  ;;  %v18682_v27 = vsub.f32 %v2341_v24, %v18665_v43  ;;  %v5059_v24 = vand.u32 4294901760, %v5058_v12  ;;  %13818 = vmatprep.subr.mxu0 %v18665_v43 }
 0x392   :  { %v13342_v25 = vpop.f32.mrf.mxu0  ;;  %v18670_v6 = vpop.f32.mrf.mxu1  ;;  %13819 = vmatpush3.msra.mxu0 %v18665_v43 }
 0x393   :  { %v18668_v34 = vadd.f32 %v13422_v21, %v13342_v25  ;;  %24717 = vst [vmem:[#allocation138_spill] sm:$0xff] %v18682_v27  ;;  %v18688_v57 = vand.u32 4294901760, %v18682_v27  ;;  %13896 = vmatprep.subr.mxu1 %v5059_v24  ;;  %13948 = vmatprep.subr.mxu0 %v18361_v45 }
 0x394   :  { %v18678_v48 = vpop.f32.mrf.mxu0  ;;  %v13431_v21 = vpop.f32.mrf.mxu1  ;;  %13897 = vmatpush3.msra.mxu1 %v5059_v24 }
 0x395   :  { %24718 = vst [vmem:[#allocation139_spill] sm:$0xff] %v18688_v57  ;;  %v5065_v2 = vsub.f32 %v18682_v27, %v18688_v57 }
 0x396   :  { %v13345_v54 = vpop.f32.mrf.mxu0  ;;  %v18693_v0 = vpop.f32.mrf.mxu1 }
 0x397   :  { %v18691_v25 = vadd.f32 %v13425_v8, %v13345_v54  ;;  %v5066_v54 = vand.u32 4294901760, %v5065_v2 }
 0x398   :  { %v18696_v35 = vpop.f32.mrf.mxu0  ;;  %v13434_v40 = vpop.f32.mrf.mxu1 }
 0x399   :  { %13898 = vmatprep.subr.mxu1 %v5066_v54 }
 0x39a   :  { %v13348_v8 = vpop.f32.mrf.mxu0  ;;  %v18705_v12 = vpop.f32.mrf.mxu1  ;;  %13899 = vmatpush3.msra.mxu1 %v5066_v54 }
 0x39b   :  { %v18703_v22 = vadd.f32 %v13428_v15, %v13348_v8  ;;  %14028 = vmatprep.subr.mxu1 %v18342_v16 }
 0x39c   :  { %v18707_v17 = vpop.f32.mrf.mxu0  ;;  %v13437_v57 = vpop.f32.mrf.mxu1 }
 0x39e   :  { %v13351_v4 = vpop.f32.mrf.mxu0  ;;  %v18712_v41 = vpop.f32.mrf.mxu1 }
 0x39f   :  { %v18710_v11 = vadd.f32 %v13431_v21, %v13351_v4 }
 0x3a0   :  { %v18714_v2 = vpop.f32.mrf.mxu0  ;;  %v13440_v23 = vpop.f32.mrf.mxu1 }
 0x3a2   :  { %v13354_v15 = vpop.f32.mrf.mxu0  ;;  %v18718_v52 = vpop.f32.mrf.mxu1 }
 0x3a3   :  { %v18716_v8 = vadd.f32 %v13434_v40, %v13354_v15 }
 0x3a4   :  { %v18720_v24 = vpop.f32.mrf.mxu0  ;;  %v13443_v44 = vpop.f32.mrf.mxu1 }
 0x3a6   :  { %v13357_v55 = vpop.f32.mrf.mxu0  ;;  %v18724_v47 = vpop.f32.mrf.mxu1 }
 0x3a7   :  { %v18722_v54 = vadd.f32 %v13437_v57, %v13357_v55 }
 0x3a8   :  { %v18726_v4 = vpop.f32.mrf.mxu0 }
 0x3a9   :  { %v13446_v21 = vpop.f32.mrf.mxu1 }
 0x3aa   :  { %v13360_v10 = vpop.f32.mrf.mxu0 }
 0x3ab   :  { %v18728_v51 = vadd.f32 %v13440_v23, %v13360_v10  ;;  %v18730_v29 = vpop.f32.mrf.mxu1 }
 0x3ac   :  { %v18732_v40 = vpop.f32.mrf.mxu0 }
 0x3ad   :  { %24719 = vst [vmem:[#allocation140_spill] sm:$0xff] %v18728_v51  ;;  %v13449_v15 = vpop.f32.mrf.mxu1 }
 0x3ae   :  { %v13363_v18 = vpop.f32.mrf.mxu0 }
 0x3af   :  { %v18734_v1 = vadd.f32 %v13443_v44, %v13363_v18  ;;  %v18736_v27 = vpop.f32.mrf.mxu1 }
 0x3b0   :  { %v18738_v55 = vpop.f32.mrf.mxu0 }
 0x3b1   :  { %24720 = vst [vmem:[#allocation141_spill] sm:$0xff] %v18734_v1  ;;  %v13452_v57 = vpop.f32.mrf.mxu1 }
 0x3b2   :  { %v13366_v60 = vpop.f32.mrf.mxu0 }
 0x3b3   :  { %v18740_v53 = vadd.f32 %v13446_v21, %v13366_v60  ;;  %v18742_v58 = vpop.f32.mrf.mxu1 }
 0x3b4   :  { %v18744_v10 = vpop.f32.mrf.mxu0 }
 0x3b5   :  { %24721 = vst [vmem:[#allocation142_spill] sm:$0xff] %v18740_v53  ;;  %v13455_v23 = vpop.f32.mrf.mxu1 }
 0x3b6   :  { %v13369_v43 = vpop.f32.mrf.mxu0 }
 0x3b7   :  { %v18746_v7 = vadd.f32 %v13449_v15, %v13369_v43  ;;  %v18748_v59 = vpop.f32.mrf.mxu1 }
 0x3b8   :  { %v18750_v18 = vpop.f32.mrf.mxu0 }
 0x3b9   :  { %24722 = vst [vmem:[#allocation143_spill] sm:$0xff] %v18746_v7  ;;  %v13458_v44 = vpop.f32.mrf.mxu1 }
 0x3ba   :  { %v13372_v37 = vpop.f32.mrf.mxu0 }
 0x3bb   :  { %v18752_v31 = vadd.f32 %v13452_v57, %v13372_v37  ;;  %v18754_v14 = vpop.f32.mrf.mxu1 }
 0x3bc   :  { %v18756_v60 = vpop.f32.mrf.mxu0 }
 0x3bd   :  { %24723 = vst [vmem:[#allocation144_spill] sm:$0xff] %v18752_v31  ;;  %v13461_v21 = vpop.f32.mrf.mxu1 }
 0x3be   :  { %v13375_v46 = vpop.f32.mrf.mxu0 }
 0x3bf   :  { %v18758_v42 = vadd.f32 %v13455_v23, %v13375_v46  ;;  %v18760_v50 = vpop.f32.mrf.mxu1 }
 0x3c0   :  { %v18762_v43 = vpop.f32.mrf.mxu0 }
 0x3c1   :  { %24724 = vst [vmem:[#allocation145_spill] sm:$0xff] %v18758_v42  ;;  %v13464_v15 = vpop.f32.mrf.mxu1 }
 0x3c2   :  { %v13378_v33 = vpop.f32.mrf.mxu0 }
 0x3c3   :  { %v18764_v5 = vadd.f32 %v13458_v44, %v13378_v33  ;;  %v18766_v62 = vpop.f32.mrf.mxu1 }
 0x3c4   :  { %v18768_v37 = vpop.f32.mrf.mxu0 }
 0x3c5   :  { %24725 = vst [vmem:[#allocation146_spill] sm:$0xff] %v18764_v5  ;;  %v13467_v57 = vpop.f32.mrf.mxu1 }
 0x3c6   :  { %v13381_v13 = vpop.f32.mrf.mxu0 }
 0x3c7   :  { %v18770_v39 = vadd.f32 %v13461_v21, %v13381_v13  ;;  %v18772_v9 = vpop.f32.mrf.mxu1 }
 0x3c8   :  { %v18774_v46 = vpop.f32.mrf.mxu0 }
 0x3c9   :  { %24726 = vst [vmem:[#allocation147_spill] sm:$0xff] %v18770_v39 }
 0x3ca   :  { %v18776_v23 = vpop.f32.mrf.mxu1  ;;  %v13384_v63 = vpop.f32.mrf.mxu0 }
 0x3cb   :  { %v18778_v20 = vadd.f32 %v13464_v15, %v13384_v63 }
 0x3cc   :  { %v18780_v49 = vpop.f32.mrf.mxu1  ;;  %v18782_v33 = vpop.f32.mrf.mxu0 }
 0x3cd   :  { %24727 = vst [vmem:[#allocation148_spill] sm:$0xff] %v18778_v20 }
 0x3ce   :  { %v18784_v44 = vpop.f32.mrf.mxu1  ;;  %v13387_v38 = vpop.f32.mrf.mxu0 }
 0x3cf   :  { %v18786_v19 = vadd.f32 %v13467_v57, %v13387_v38 }
 0x3d0   :  { %v18788_v13 = vpop.f32.mrf.mxu1  ;;  %v18790_v21 = vpop.f32.mrf.mxu0 }
 0x3d1   :  { %24728 = vst [vmem:[#allocation149_spill] sm:$0xff] %v18786_v19  ;;  %24729 = vst [vmem:[#allocation150_spill] sm:$0xff] %v18788_v13 }
 0x3d2   :  { %v18792_v39 = vpop.f32.mrf.mxu1  ;;  %v18794_v56 = vpop.f32.mrf.mxu0 }
 0x3d3   :  { %24730 = vst [vmem:[#allocation151_spill] sm:$0xff] %v18792_v39 }
 0x3d4   :  { %v18796_v5 = vpop.f32.mrf.mxu1  ;;  %v18798_v63 = vpop.f32.mrf.mxu0 }
 0x3d5   :  { %24731 = vst [vmem:[#allocation152_spill] sm:$0xff] %v18796_v5 }
 0x3d6   :  { %v18800_v15 = vpop.f32.mrf.mxu1  ;;  %v18802_v20 = vpop.f32.mrf.mxu0 }
 0x3d7   :  { %24732 = vst [vmem:[#allocation153_spill] sm:$0xff] %v18800_v15 }
 0x3d8   :  { %v18804_v36 = vpop.f32.mrf.mxu1  ;;  %v18806_v38 = vpop.f32.mrf.mxu0 }
 0x3d9   :  { %24733 = vst [vmem:[#allocation154_spill] sm:$0xff] %v18804_v36 }
 0x3da   :  { %v18808_v57 = vpop.f32.mrf.mxu1  ;;  %v18810_v19 = vpop.f32.mrf.mxu0 }
 0x3db   :  { %24734 = vst [vmem:[#allocation155_spill] sm:$0xff] %v18808_v57 }
 0x3dc   :  { %v18812_v45 = vpop.f32.mrf.mxu1  ;;  %v18814_v26 = vpop.f32.mrf.mxu0 }
 0x3dd   :  { %24735 = vst [vmem:[#allocation156_spill] sm:$0xff] %v18812_v45 }
 0x3de   :  { %v18816_v28 = vpop.f32.mrf.mxu1  ;;  %v18818_v32 = vpop.f32.mrf.mxu0 }
 0x3df   :  { %24736 = vst [vmem:[#allocation157_spill] sm:$0xff] %v18816_v28 }
 0x3e0   :  { %v18820_v42 = vpop.f32.mrf.mxu1  ;;  %v18822_v61 = vpop.f32.mrf.mxu0 }
 0x3e1   :  { %24737 = vst [vmem:[#allocation158_spill] sm:$0xff] %v18820_v42 }
 0x3e2   :  { %v18824_v16 = vpop.f32.mrf.mxu1  ;;  %v18826_v31 = vpop.f32.mrf.mxu0 }
 0x3e3   :  { %24738 = vst [vmem:[#allocation159_spill] sm:$0xff] %v18824_v16 }
 0x3e4   :  { %v18828_v7 = vpop.f32.mrf.mxu1  ;;  %v18830_v53 = vpop.f32.mrf.mxu0 }
 0x3e5   :  { %24739 = vst [vmem:[#allocation160_spill] sm:$0xff] %v18828_v7 }
 0x3e6   :  { %v18832_v1 = vpop.f32.mrf.mxu1  ;;  %v18834_v45 = vpop.f32.mrf.mxu0 }
 0x3e7   :  { %24740 = vst [vmem:[#allocation161_spill] sm:$0xff] %v18832_v1 }
 0x3e8   :  { %v18836_v57 = vpop.f32.mrf.mxu1  ;;  %v18838_v28 = vpop.f32.mrf.mxu0 }
 0x3e9   :  { %24741 = vst [vmem:[#allocation162_spill] sm:$0xff] %v18836_v57 }
 0x3ea   :  { %v18840_v36 = vpop.f32.mrf.mxu1  ;;  %v18842_v42 = vpop.f32.mrf.mxu0 }
 0x3eb   :  { %24742 = vst [vmem:[#allocation163_spill] sm:$0xff] %v18840_v36  ;;  %24743 = vst [vmem:[#allocation164_spill] sm:$0xff] %v18842_v42 }
 0x3ec   :  { %v18844_v15 = vpop.f32.mrf.mxu1  ;;  %v18846_v16 = vpop.f32.mrf.mxu0 }
 0x3ed   :  { %24744 = vst [vmem:[#allocation165_spill] sm:$0xff] %v18844_v15  ;;  %24745 = vst [vmem:[#allocation166_spill] sm:$0xff] %v18846_v16 }
 0x3ee   :  { %v18848_v5 = vpop.f32.mrf.mxu1  ;;  %v18850_v7 = vpop.f32.mrf.mxu0 }
 0x3ef   :  { %24746 = vst [vmem:[#allocation167_spill] sm:$0xff] %v18848_v5  ;;  %24747 = vst [vmem:[#allocation168_spill] sm:$0xff] %v18850_v7 }
 0x3f0   :  { %v18852_v39 = vpop.f32.mrf.mxu1  ;;  %v18854_v1 = vpop.f32.mrf.mxu0 }
 0x3f1   :  { %24748 = vst [vmem:[#allocation169_spill] sm:$0xff] %v18852_v39  ;;  %24749 = vst [vmem:[#allocation170_spill] sm:$0xff] %v18854_v1 }
 0x3f2   :  { %v18856_v51 = vpop.f32.mrf.mxu1  ;;  %v18858_v57 = vpop.f32.mrf.mxu0 }
 0x3f3   :  { %24750 = vst [vmem:[#allocation171_spill] sm:$0xff] %v18856_v51  ;;  %24751 = vst [vmem:[#allocation172_spill] sm:$0xff] %v18858_v57 }
 0x3f4   :  { %v18860_v13 = vpop.f32.mrf.mxu1  ;;  %v18862_v36 = vpop.f32.mrf.mxu0 }
 0x3f5   :  { %24752 = vst [vmem:[#allocation173_spill] sm:$0xff] %v18860_v13  ;;  %24753 = vst [vmem:[#allocation174_spill] sm:$0xff] %v18862_v36 }
 0x3f6   :  { %v18864_v42 = vpop.f32.mrf.mxu1  ;;  %v18866_v15 = vpop.f32.mrf.mxu0 }
 0x3f7   :  { %24754 = vst [vmem:[#allocation175_spill] sm:$0xff] %v18864_v42  ;;  %24755 = vst [vmem:[#allocation176_spill] sm:$0xff] %v18866_v15 }
 0x3f8   :  { %v18868_v16 = vpop.f32.mrf.mxu1  ;;  %v18870_v5 = vpop.f32.mrf.mxu0 }
 0x3f9   :  { %24756 = vst [vmem:[#allocation177_spill] sm:$0xff] %v18868_v16  ;;  %24757 = vst [vmem:[#allocation178_spill] sm:$0xff] %v18870_v5 }
 0x3fa   :  { %v18872_v7 = vpop.f32.mrf.mxu1  ;;  %v18874_v39 = vpop.f32.mrf.mxu0 }
 0x3fb   :  { %24758 = vst [vmem:[#allocation179_spill] sm:$0xff] %v18872_v7  ;;  %24759 = vst [vmem:[#allocation180_spill] sm:$0xff] %v18874_v39 }
 0x3fc   :  { %v18876_v1 = vpop.f32.mrf.mxu1  ;;  %v18878_v51 = vpop.f32.mrf.mxu0 }
 0x3fd   :  { %24760 = vst [vmem:[#allocation181_spill] sm:$0xff] %v18876_v1  ;;  %24761 = vst [vmem:[#allocation182_spill] sm:$0xff] %v18878_v51 }
 0x3fe   :  { %v18880_v57 = vpop.f32.mrf.mxu1  ;;  %v18882_v13 = vpop.f32.mrf.mxu0 }
 0x3ff   :  { %24762 = vst [vmem:[#allocation183_spill] sm:$0xff] %v18880_v57  ;;  %24763 = vst [vmem:[#allocation184_spill] sm:$0xff] %v18882_v13 }
 0x400   :  { %v18884_v36 = vpop.f32.mrf.mxu1  ;;  %v18886_v42 = vpop.f32.mrf.mxu0 }
 0x401   :  { %24764 = vst [vmem:[#allocation185_spill] sm:$0xff] %v18884_v36 }
 0x402   :  { %v18888_v15 = vpop.f32.mrf.mxu1  ;;  %v18890_v16 = vpop.f32.mrf.mxu0 }
 0x403   :  { %24765 = vst [vmem:[#allocation186_spill] sm:$0xff] %v18888_v15  ;;  %24766 = vst [vmem:[#allocation187_spill] sm:$0xff] %v18890_v16  ;;  %v3130_v15 = vadd.f32 %v18610_v30, %v18678_v48  ;;  %v3142_v16 = vadd.f32 %v18642_v3, %v18696_v35  ;;  %v3214_v30 = vadd.f32 %v18724_v47, %v18738_v55  ;;  %v24777_v55 = vld [vmem:[#allocation166_spill] sm:$0xff] }
 0x404   :  { %v18892_v5 = vpop.f32.mrf.mxu1  ;;  %v18894_v7 = vpop.f32.mrf.mxu0  ;;  %v3441_v35 = vadd.f32 %v18802_v20, %v18691_v25  ;;  %v18957_v20 = vadd.f32 %v18766_v62, %v18782_v33  ;;  %v3497_v62 = vadd.f32 %v18834_v45, %v18722_v54  ;;  %v24776_v45 = vld [vmem:[#allocation152_spill] sm:$0xff] }
 0x405   :  { %24767 = vst [vmem:[#allocation188_spill] sm:$0xff] %v18892_v5  ;;  %v3154_v5 = vadd.f32 %v18670_v6, %v18707_v17  ;;  %v3226_v17 = vadd.f32 %v18730_v29, %v18744_v10  ;;  %v18930_v6 = vadd.f32 %v18742_v58, %v18756_v60  ;;  %v3420_v47 = vadd.f32 %v18798_v63, %v3130_v15  ;;  %v24778_v60 = vld [vmem:[#allocation153_spill] sm:$0xff] }
 0x406   :  { %v18896_v39 = vpop.f32.mrf.mxu1  ;;  %v18898_v1 = vpop.f32.mrf.mxu0  ;;  %v3434_v29 = vadd.f32 %v18806_v38, %v3142_v16  ;;  %v18946_v58 = vadd.f32 %v18754_v14, %v18768_v37  ;;  %v3469_v16 = vadd.f32 %v18818_v32, %v18710_v11  ;;  %v3483_v14 = vadd.f32 %v18826_v31, %v18716_v8  ;;  %v24772_v11 = vld [vmem:[#allocation150_spill] sm:$0xff]  ;;  %v24782_v15 = vld [vmem:[#allocation157_spill] sm:$0xff] }
 0x407   :  { %24768 = vst [vmem:[#allocation189_spill] sm:$0xff] %v18896_v39  ;;  %v3166_v39 = vadd.f32 %v18693_v0, %v18714_v2  ;;  %v3238_v0 = vadd.f32 %v18736_v27, %v18750_v18  ;;  %v3726_v31 = vadd.f32 %v18780_v49, %v3420_v47  ;;  %v24779_v37 = vld [vmem:[#allocation154_spill] sm:$0xff]  ;;  %v18996_v38 = vadd.f32 %v24782_v15, %v3497_v62 }
 0x408   :  { %v18900_v51 = vpop.f32.mrf.mxu1  ;;  %v18902_v57 = vpop.f32.mrf.mxu0  ;;  %v3742_v8 = vadd.f32 %v24772_v11, %v3434_v29  ;;  %v24785_v47 = vld [vmem:[#allocation170_spill] sm:$0xff] }
 0x409   :  { %24769 = vst [vmem:[#allocation190_spill] sm:$0xff] %v18900_v51  ;;  %24770 = vst [vmem:[#allocation191_spill] sm:$0xff] %v18902_v57  ;;  %v3178_v51 = vadd.f32 %v18705_v12, %v18720_v24  ;;  %v3190_v57 = vadd.f32 %v18712_v41, %v18726_v4  ;;  %v3427_v41 = vadd.f32 %v18794_v56, %v18668_v34  ;;  %v24774_v24 = vld [vmem:[#allocation164_spill] sm:$0xff]  ;;  %v24786_v29 = vld [vmem:[#allocation142_spill] sm:$0xff] }
 0x40a   :  { %v13742_v13 = vpop.f32.mrf.mxu1  ;;  %v18904_v36 = vpop.f32.mrf.mxu0  ;;  %v18950_v56 = vadd.f32 %v18760_v50, %v18774_v46  ;;  %v3448_v34 = vadd.f32 %v18814_v26, %v3154_v5  ;;  %v3462_v25 = vadd.f32 %v18822_v61, %v3166_v39  ;;  %v24780_v46 = vld [vmem:[#allocation155_spill] sm:$0xff]  ;;  %v24791_v11 = vld [vmem:[#allocation174_spill] sm:$0xff] }
 0x40b   :  { %24771 = vst [vmem:[#allocation192_spill] sm:$0xff] %v18904_v36  ;;  %v3202_v36 = vadd.f32 %v18718_v52, %v18732_v40  ;;  %v18936_v52 = vadd.f32 %v18748_v59, %v18762_v43  ;;  %v3455_v59 = vadd.f32 %v18810_v19, %v18703_v22  ;;  %v18968_v19 = vadd.f32 %v18772_v9, %v18790_v21  ;;  %v24773_v9 = vld [vmem:[#allocation140_spill] sm:$0xff] }
 0x40c   :  { %v4365_v48 = vpop.f32.mrf.mxu1  ;;  %v18922_v3 = vpop.f32.mrf.mxu0  ;;  %v3476_v26 = vadd.f32 %v18830_v53, %v3178_v51  ;;  %v3734_v5 = vadd.f32 %v18776_v23, %v3427_v41  ;;  %v3490_v32 = vadd.f32 %v18838_v28, %v3190_v57  ;;  %v3750_v22 = vadd.f32 %v18784_v44, %v3441_v35  ;;  %v24775_v53 = vld [vmem:[#allocation151_spill] sm:$0xff]  ;;  %v24781_v21 = vld [vmem:[#allocation156_spill] sm:$0xff]  ;;  %v24783_v57 = vld [vmem:[#allocation141_spill] sm:$0xff] }
 0x40d   :  { %v3511_v4 = vadd.f32 %v24774_v24, %v24773_v9  ;;  %v3766_v40 = vadd.f32 %v24775_v53, %v3455_v59  ;;  %v3758_v54 = vadd.f32 %v24776_v45, %v3448_v34  ;;  %v3504_v10 = vadd.f32 %v24777_v55, %v3202_v36  ;;  %v24784_v36 = vld [vmem:[#allocation168_spill] sm:$0xff]  ;;  %v24792_v24 = vld [vmem:[#allocation143_spill] sm:$0xff]  ;;  %v24794_v53 = vld [vmem:[#allocation178_spill] sm:$0xff] }
 0x40e   :  { %v13745_v12 = vpop.f32.mrf.mxu1  ;;  %v18942_v27 = vpop.f32.mrf.mxu0  ;;  %v3782_v43 = vadd.f32 %v24778_v60, %v3469_v16  ;;  %v18987_v49 = vadd.f32 %v24779_v37, %v3462_v25  ;;  %v18990_v23 = vadd.f32 %v24780_v46, %v3483_v14  ;;  %v18993_v63 = vadd.f32 %v24781_v21, %v3476_v26  ;;  %v24787_v59 = vld [vmem:[#allocation172_spill] sm:$0xff]  ;;  %v24788_v14 = vld [vmem:[#allocation158_spill] sm:$0xff] }
 0x40f   :  { %v3525_v41 = vadd.f32 %v24784_v36, %v24783_v57  ;;  %v3518_v35 = vadd.f32 %v24785_v47, %v3214_v30  ;;  %v3539_v34 = vadd.f32 %v24787_v59, %v24786_v29  ;;  %v3532_v9 = vadd.f32 %v24791_v11, %v3226_v17  ;;  %v24795_v60 = vld [vmem:[#allocation160_spill] sm:$0xff]  ;;  %v24800_v36 = vld [vmem:[#allocation162_spill] sm:$0xff]  ;;  %v24805_v11 = vld [vmem:[#allocation169_spill] sm:$0xff] }
 0x410   :  { %v4377_v2 = vpop.f32.mrf.mxu1  ;;  %v18964_v50 = vpop.f32.mrf.mxu0  ;;  %v3546_v45 = vadd.f32 %v24794_v53, %v3238_v0  ;;  %v24797_v46 = vld [vmem:[#allocation144_spill] sm:$0xff]  ;;  %v24799_v0 = vld [vmem:[#allocation161_spill] sm:$0xff] }
 0x411   :  { %v24798_v17 = vld [vmem:[#allocation180_spill] sm:$0xff]  ;;  %v19030_v57 = vadd.f32 %v24799_v0, %v3525_v41  ;;  %v19033_v47 = vadd.f32 %v24800_v36, %v3518_v35  ;;  %v24803_v35 = vld [vmem:[#allocation165_spill] sm:$0xff] }
 0x412   :  { %v18975_v61 = vpop.f32.mrf.mxu1  ;;  %v13662_v39 = vpop.f32.mrf.mxu0  ;;  %v24812_v0 = vld [vmem:[#allocation184_spill] sm:$0xff] }
 0x413   :  { %v4099_v51 = vadd.f32 %v13662_v39, %v3734_v5  ;;  %v19004_v5 = vadd.f32 %v24788_v14, %v3490_v32  ;;  %v19018_v32 = vadd.f32 %v24795_v60, %v3504_v10  ;;  %v24801_v10 = vld [vmem:[#allocation163_spill] sm:$0xff] }
 0x414   :  { %v4389_v28 = vpop.f32.mrf.mxu1  ;;  %v4092_v18 = vpop.f32.mrf.mxu0  ;;  %v19036_v29 = vadd.f32 %v24801_v10, %v3539_v34  ;;  %v24804_v34 = vld [vmem:[#allocation167_spill] sm:$0xff] }
 0x415   :  { %v4372_v33 = vadd.f32 %v13742_v13, %v4099_v51  ;;  %v4093_v44 = vadd.f32 %v4092_v18, %v3726_v31  ;;  %v24790_v31 = vld [vmem:[#allocation159_spill] sm:$0xff]  ;;  %v24793_v51 = vld [vmem:[#allocation176_spill] sm:$0xff] }
 0x416   :  { %v13751_v16 = vpop.f32.mrf.mxu1  ;;  %v13665_v25 = vpop.f32.mrf.mxu0  ;;  %v19009_v62 = vadd.f32 %v24790_v31, %v3511_v4  ;;  %v3553_v30 = vadd.f32 %v24793_v51, %v24792_v24  ;;  %v24806_v24 = vld [vmem:[#allocation182_spill] sm:$0xff] }
 0x417   :  { %v19006_v13 = vand.u32 4294901760, %v4372_v33  ;;  %v4366_v26 = vadd.f32 %v4365_v48, %v4093_v44  ;;  %v4111_v39 = vadd.f32 %v13665_v25, %v3750_v22  ;;  %v3567_v44 = vadd.f32 %v24798_v17, %v24797_v46 }
 0x418   :  { %v19015_v55 = vpop.f32.mrf.mxu1  ;;  %v4104_v18 = vpop.f32.mrf.mxu0  ;;  %v19052_v31 = vadd.f32 %v24804_v34, %v3553_v30 }
 0x419   :  { %24789 = vst [vmem:[#allocation150_spill] sm:$0xff] %v19006_v13  ;;  %v19021_v37 = vsub.f32 %v4372_v33, %v19006_v13  ;;  %v19023_v48 = vand.u32 4294901760, %v4366_v26  ;;  %v4384_v22 = vadd.f32 %v13745_v12, %v4111_v39  ;;  %v4105_v4 = vadd.f32 %v4104_v18, %v3742_v8  ;;  %v24808_v18 = vld [vmem:[#allocation92_spill] sm:$0xff] }
 0x41a   :  { %v19027_v21 = vpop.f32.mrf.mxu1  ;;  %v13668_v15 = vpop.f32.mrf.mxu0  ;;  %v19049_v39 = vadd.f32 %v24803_v35, %v3532_v9 }
 0x41b   :  { %24796 = vst [vmem:[#allocation140_spill] sm:$0xff] %v19023_v48  ;;  %v23799_v33 = vand.u32 4294901760, %v19021_v37  ;;  %v19040_v12 = vsub.f32 %v4366_v26, %v19023_v48  ;;  %v19042_v8 = vand.u32 4294901760, %v4384_v22  ;;  %v4378_v59 = vadd.f32 %v4377_v2, %v4105_v4  ;;  %13900 = vmatprep.mubr.f32.mxu1 %v19023_v48 }
 0x41c   :  { %v4123_v25 = vadd.f32 %v13668_v15, %v3766_v40  ;;  %v19045_v14 = vpop.f32.mrf.mxu1  ;;  %v4116_v41 = vpop.f32.mrf.mxu0  ;;  %13901 = vmatmul.mubr.f32.vlgmr.msra.gmra.mxu1 %v19006_v13  ;;  %v19055_v26 = vadd.f32 %v24805_v11, %v3546_v45  ;;  %v3560_v2 = vadd.f32 %v24806_v24, %v18930_v6  ;;  %v24809_v6 = vld [vmem:[#allocation122_spill] sm:$0xff] }
 0x41d   :  { %24802 = vst [vmem:[#allocation164_spill] sm:$0xff] %v19042_v8  ;;  %v19060_v51 = vsub.f32 %v4384_v22, %v19042_v8  ;;  %v19062_v40 = vand.u32 4294901760, %v4378_v59  ;;  %v4117_v53 = vadd.f32 %v4116_v41, %v3758_v54  ;;  %14029 = vmatpush3.msra.mxu1 %v24808_v18  ;;  %v4649_v9 = vsub.f32 %v19021_v37, %v23799_v33  ;;  %v24810_v22 = vld [vmem:[#allocation171_spill] sm:$0xff] }
 0x41e   :  { %v4396_v30 = vadd.f32 %v18975_v61, %v4123_v25  ;;  %v19069_v60 = vpop.f32.mrf.mxu1  ;;  %v13671_v45 = vpop.f32.mrf.mxu0  ;;  %v23801_v4 = vand.u32 4294901760, %v19040_v12  ;;  %14030 = vmatprep.subr.mxu1 %v24809_v6  ;;  %v19074_v46 = vadd.f32 %v24810_v22, %v3567_v44  ;;  %v24811_v61 = vld [vmem:[#allocation145_spill] sm:$0xff]  ;;  %v24816_v33 = vld [vmem:[#allocation131_spill] sm:$0xff] }
 0x41f   :  { %24807 = vst [vmem:[#allocation151_spill] sm:$0xff] %v19062_v40  ;;  %v19077_v54 = vsub.f32 %v4378_v59, %v19062_v40  ;;  %v4390_v17 = vadd.f32 %v4389_v28, %v4117_v53  ;;  %v4135_v15 = vadd.f32 %v13671_v45, %v3782_v43  ;;  %13903 = vmatprep.mubr.f32.mxu1 %v19062_v40  ;;  %v23800_v28 = vand.u32 4294901760, %v19060_v51  ;;  %v24814_v43 = vld [vmem:[#allocation95_spill] sm:$0xff] }
 0x420   :  { %14031 = vmatpush3.msra.mxu1 %v24809_v6  ;;  %v3581_v36 = vadd.f32 %v24812_v0, %v24811_v61  ;;  %v19083_v10 = vand.u32 4294901760, %v4396_v30  ;;  %v19085_v25 = vpop.f32.mrf.mxu1  ;;  %v4128_v41 = vpop.f32.mrf.mxu0  ;;  %v4639_v44 = vsub.f32 %v19040_v12, %v23801_v4  ;;  %v4650_v24 = vand.u32 4294901760, %v4649_v9  ;;  %v24821_v4 = vld [vmem:[#allocation119_spill] sm:$0xff] }
 0x421   :  { %13904 = vmatmul.mubr.f32.gmra.mxu1 %v19042_v8  ;;  %14032 = vmatprep.subr.mxu1 %v24814_v43  ;;  %v19093_v59 = vand.u32 4294901760, %v4390_v17  ;;  %v4408_v35 = vadd.f32 %v13751_v16, %v4135_v15  ;;  %v4129_v34 = vadd.f32 %v4128_v41, %v18987_v49  ;;  %v23802_v11 = vand.u32 4294901760, %v19077_v54 }
 0x422   :  { %24813 = vst [vmem:[#allocation152_spill] sm:$0xff] %v19083_v10  ;;  %14033 = vmatpush3.msra.mxu1 %v24814_v43  ;;  %v19099_v53 = vsub.f32 %v4396_v30, %v19083_v10  ;;  %v19101_v45 = vpop.f32.mrf.mxu1  ;;  %v13674_v22 = vpop.f32.mrf.mxu0  ;;  %v4640_v61 = vand.u32 4294901760, %v4639_v44  ;;  %v4669_v0 = vsub.f32 %v19060_v51, %v23800_v28  ;;  %v19118_v15 = vadd.f32 %v18886_v42, %v18936_v52  ;;  %v24820_v28 = vld [vmem:[#allocation98_spill] sm:$0xff] }
 0x423   :  { %24815 = vst [vmem:[#allocation166_spill] sm:$0xff] %v19093_v59  ;;  %14034 = vmatprep.subr.mxu1 %v24816_v33  ;;  %v19108_v49 = vsub.f32 %v4390_v17, %v19093_v59  ;;  %v19110_v16 = vand.u32 4294901760, %v4408_v35  ;;  %v4402_v9 = vadd.f32 %v19015_v55, %v4129_v34  ;;  %v4147_v30 = vadd.f32 %v13674_v22, %v18990_v23  ;;  %v24818_v17 = vld [vmem:[#allocation173_spill] sm:$0xff] }
 0x424   :  { %13906 = vmatprep.mubr.f32.mxu1 %v19093_v59  ;;  %14035 = vmatpush3.msra.mxu1 %v24816_v33  ;;  %v19120_v41 = vpop.f32.mrf.mxu1  ;;  %v4140_v44 = vpop.f32.mrf.mxu0  ;;  %v4659_v55 = vsub.f32 %v19077_v54, %v23802_v11  ;;  %v19128_v34 = vadd.f32 %v24818_v17, %v3560_v2  ;;  %v4670_v2 = vand.u32 4294901760, %v4669_v0  ;;  %v24824_v0 = vld [vmem:[#allocation94_spill] sm:$0xff] }
 0x425   :  { %24817 = vst [vmem:[#allocation153_spill] sm:$0xff] %v19110_v16  ;;  %13820 = vmatprep.mubr.f32.mxu0 %v4640_v61  ;;  %13907 = vmatmul.mubr.f32.gmra.mxu1 %v19083_v10  ;;  %v19131_v22 = vsub.f32 %v4408_v35, %v19110_v16  ;;  %v19133_v42 = vand.u32 4294901760, %v4402_v9  ;;  %v4420_v52 = vadd.f32 %v19027_v21, %v4147_v30  ;;  %v24822_v35 = vand.u32 4294901760, %v19099_v53  ;;  %v24825_v30 = vld [vmem:[#allocation146_spill] sm:$0xff] }
 0x426   :  { %v4141_v61 = vadd.f32 %v4140_v44, %v18993_v63  ;;  %13821 = vmatmul.mubr.f32.vlgmr.msra.gmra.mxu0 %v4650_v24  ;;  %14036 = vmatprep.subr.mxu1 %v24820_v28  ;;  %v19139_v11 = vpop.f32.mrf.mxu1  ;;  %v13677_v23 = vpop.f32.mrf.mxu0  ;;  %v4660_v10 = vand.u32 4294901760, %v4659_v55  ;;  %v24826_v44 = vld [vmem:[#allocation187_spill] sm:$0xff] }
 0x427   :  { %24819 = vst [vmem:[#allocation154_spill] sm:$0xff] %v19133_v42  ;;  %13949 = vmatpush3.msra.mxu0 %v24821_v4  ;;  %v4689_v59 = vsub.f32 %v19099_v53, %v24822_v35  ;;  %14037 = vmatpush3.msra.mxu1 %v24820_v28  ;;  %v19147_v63 = vsub.f32 %v4402_v9, %v19133_v42  ;;  %v19149_v21 = vand.u32 4294901760, %v4420_v52  ;;  %v24827_v9 = vand.u32 4294901760, %v19108_v49 }
 0x428   :  { %v4414_v4 = vadd.f32 %v19045_v14, %v4141_v61  ;;  %v4159_v24 = vadd.f32 %v13677_v23, %v18996_v38  ;;  %13909 = vmatprep.mubr.f32.mxu1 %v19133_v42  ;;  %13950 = vmatprep.subr.mxu0 %v24824_v0  ;;  %v19157_v55 = vadd.f32 %v24826_v44, %v24825_v30  ;;  %v19159_v35 = vpop.f32.mrf.mxu1  ;;  %v4152_v17 = vpop.f32.mrf.mxu0  ;;  %v24828_v23 = vld [vmem:[#allocation175_spill] sm:$0xff] }
 0x429   :  { %24823 = vst [vmem:[#allocation155_spill] sm:$0xff] %v19149_v21  ;;  %13823 = vmatprep.mubr.f32.mxu0 %v4660_v10  ;;  %13910 = vmatmul.mubr.f32.gmra.mxu1 %v19110_v16  ;;  %v4679_v14 = vsub.f32 %v19108_v49, %v24827_v9  ;;  %v19167_v61 = vadd.f32 %v24828_v23, %v3581_v36  ;;  %v24830_v16 = vld [vmem:[#allocation104_spill] sm:$0xff]  ;;  %v4690_v36 = vand.u32 4294901760, %v4689_v59  ;;  %v23815_v23 = vand.u32 4294901760, %v19147_v63 }
 0x42a   :  { %v19170_v42 = vsub.f32 %v4420_v52, %v19149_v21  ;;  %v19172_v30 = vand.u32 4294901760, %v4414_v4  ;;  %v4432_v44 = vadd.f32 %v19069_v60, %v4159_v24  ;;  %v4153_v10 = vadd.f32 %v4152_v17, %v19004_v5  ;;  %13824 = vmatmul.mubr.f32.gmra.mxu0 %v4670_v2  ;;  %14038 = vmatprep.subr.mxu1 %v24830_v16  ;;  %v19178_v9 = vpop.f32.mrf.mxu1  ;;  %v13680_v38 = vpop.f32.mrf.mxu0  ;;  %v24833_v59 = vld [vmem:[#allocation128_spill] sm:$0xff] }
 0x42b   :  { %13951 = vmatpush3.msra.mxu0 %v24824_v0  ;;  %v4680_v8 = vand.u32 4294901760, %v4679_v14  ;;  %v24831_v52 = vand.u32 4294901760, %v19131_v22  ;;  %14039 = vmatpush3.msra.mxu1 %v24830_v16  ;;  %v4171_v17 = vadd.f32 %v13680_v38, %v19009_v62  ;;  %v19196_v24 = vadd.f32 %v18894_v7, %v18946_v58 }
 0x42c   :  { %24829 = vst [vmem:[#allocation156_spill] sm:$0xff] %v19172_v30  ;;  %v19186_v5 = vsub.f32 %v4414_v4, %v19172_v30  ;;  %v19188_v60 = vand.u32 4294901760, %v4432_v44  ;;  %v4426_v2 = vadd.f32 %v19085_v25, %v4153_v10  ;;  %13912 = vmatprep.mubr.f32.mxu1 %v19172_v30  ;;  %13952 = vmatprep.subr.mxu0 %v24833_v59  ;;  %v19198_v0 = vpop.f32.mrf.mxu1  ;;  %v4164_v14 = vpop.f32.mrf.mxu0  ;;  %v24834_v4 = vld [vmem:[#allocation177_spill] sm:$0xff] }
 0x42d   :  { %v4709_v40 = vsub.f32 %v19131_v22, %v24831_v52  ;;  %13826 = vmatprep.mubr.f32.mxu0 %v4680_v8  ;;  %13913 = vmatmul.mubr.f32.gmra.mxu1 %v19149_v21  ;;  %v4699_v25 = vsub.f32 %v19147_v63, %v23815_v23  ;;  %v19207_v38 = vadd.f32 %v24834_v4, %v19118_v15  ;;  %v24836_v52 = vld [vmem:[#allocation103_spill] sm:$0xff] }
 0x42e   :  { %24832 = vst [vmem:[#allocation157_spill] sm:$0xff] %v19188_v60  ;;  %v19210_v10 = vsub.f32 %v4432_v44, %v19188_v60  ;;  %v19212_v7 = vand.u32 4294901760, %v4426_v2  ;;  %v4444_v58 = vadd.f32 %v19101_v45, %v4171_v17  ;;  %v4165_v8 = vadd.f32 %v4164_v14, %v19018_v32  ;;  %13827 = vmatmul.mubr.f32.gmra.mxu0 %v4690_v36  ;;  %v19218_v23 = vpop.f32.mrf.mxu1  ;;  %v13683_v62 = vpop.f32.mrf.mxu0 }
 0x42f   :  { %14040 = vmatprep.subr.mxu1 %v24836_v52  ;;  %13953 = vmatpush3.msra.mxu0 %v24833_v59  ;;  %v4700_v21 = vand.u32 4294901760, %v4699_v25  ;;  %v4710_v15 = vand.u32 4294901760, %v4709_v40  ;;  %v23822_v4 = vand.u32 4294901760, %v19186_v5  ;;  %v24837_v44 = vand.u32 4294901760, %v19170_v42  ;;  %v24839_v40 = vld [vmem:[#allocation97_spill] sm:$0xff]  ;;  %v24840_v59 = vld [vmem:[#allocation147_spill] sm:$0xff] }
 0x430   :  { %24835 = vst [vmem:[#allocation141_spill] sm:$0xff] %v19212_v7  ;;  %14041 = vmatpush3.msra.mxu1 %v24836_v52  ;;  %v19226_v32 = vsub.f32 %v4426_v2, %v19212_v7  ;;  %v19228_v45 = vand.u32 4294901760, %v4444_v58  ;;  %v4438_v36 = vadd.f32 %v19120_v41, %v4165_v8  ;;  %v4183_v17 = vadd.f32 %v13683_v62, %v19030_v57  ;;  %v19238_v25 = vpop.f32.mrf.mxu1  ;;  %v24841_v2 = vld [vmem:[#allocation179_spill] sm:$0xff] }
 0x431   :  { %v4729_v30 = vsub.f32 %v19170_v42, %v24837_v44  ;;  %13915 = vmatprep.mubr.f32.mxu1 %v19212_v7  ;;  %13954 = vmatprep.subr.mxu0 %v24839_v40  ;;  %v19236_v14 = vadd.f32 %v18898_v1, %v24840_v59  ;;  %v4176_v44 = vpop.f32.mrf.mxu0  ;;  %v4719_v41 = vsub.f32 %v19186_v5, %v23822_v4 }
 0x432   :  { %24838 = vst [vmem:[#allocation168_spill] sm:$0xff] %v19228_v45  ;;  %13829 = vmatprep.mubr.f32.mxu0 %v4700_v21  ;;  %13916 = vmatmul.mubr.f32.gmra.mxu1 %v19188_v60  ;;  %v19247_v62 = vadd.f32 %v24841_v2, %v19157_v55  ;;  %v19250_v8 = vsub.f32 %v4444_v58, %v19228_v45  ;;  %v19252_v1 = vand.u32 4294901760, %v4438_v36  ;;  %v24843_v60 = vld [vmem:[#allocation108_spill] sm:$0xff]  ;;  %v19258_v4 = vpop.f32.mrf.mxu1  ;;  %v23829_v2 = vand.u32 4294901760, %v19226_v32 }
 0x433   :  { %v4456_v21 = vadd.f32 %v19139_v11, %v4183_v17  ;;  %v4177_v59 = vadd.f32 %v4176_v44, %v19033_v47  ;;  %13830 = vmatmul.mubr.f32.gmra.mxu0 %v4710_v15  ;;  %14042 = vmatprep.subr.mxu1 %v24843_v60  ;;  %v13686_v57 = vpop.f32.mrf.mxu0  ;;  %v4720_v7 = vand.u32 4294901760, %v4719_v41  ;;  %v4730_v55 = vand.u32 4294901760, %v4729_v30  ;;  %v24846_v30 = vld [vmem:[#allocation99_spill] sm:$0xff] }
 0x434   :  { %24842 = vst [vmem:[#allocation170_spill] sm:$0xff] %v19252_v1  ;;  %13955 = vmatpush3.msra.mxu0 %v24839_v40  ;;  %v24844_v58 = vand.u32 4294901760, %v19210_v10  ;;  %14043 = vmatpush3.msra.mxu1 %v24843_v60  ;;  %v19266_v47 = vsub.f32 %v4438_v36, %v19252_v1  ;;  %v4195_v17 = vadd.f32 %v13686_v57, %v19036_v29  ;;  %v24847_v40 = vld [vmem:[#allocation191_spill] sm:$0xff]  ;;  %v19276_v41 = vpop.f32.mrf.mxu1  ;;  %v24848_v29 = vld [vmem:[#allocation181_spill] sm:$0xff] }
 0x435   :  { %v19268_v11 = vand.u32 4294901760, %v4456_v21  ;;  %v4450_v15 = vadd.f32 %v19159_v35, %v4177_v59  ;;  %13918 = vmatprep.mubr.f32.mxu1 %v19252_v1  ;;  %13956 = vmatprep.subr.mxu0 %v24846_v30  ;;  %v3602_v44 = vadd.f32 %v24847_v40, %v18950_v56  ;;  %v4739_v36 = vsub.f32 %v19226_v32, %v23829_v2 }
 0x436   :  { %v4749_v13 = vsub.f32 %v19210_v10, %v24844_v58  ;;  %13832 = vmatprep.mubr.f32.mxu0 %v4720_v7  ;;  %v4188_v58 = vpop.f32.mrf.mxu0  ;;  %13919 = vmatmul.mubr.f32.gmra.mxu1 %v19228_v45  ;;  %v19285_v57 = vadd.f32 %v24848_v29, %v19196_v24  ;;  %v4468_v7 = vadd.f32 %v19178_v9, %v4195_v17  ;;  %v24850_v45 = vld [vmem:[#allocation110_spill] sm:$0xff]  ;;  %v19296_v2 = vpop.f32.mrf.mxu1 }
 0x437   :  { %24845 = vst [vmem:[#allocation142_spill] sm:$0xff] %v19268_v11  ;;  %v19288_v59 = vsub.f32 %v4456_v21, %v19268_v11  ;;  %v19290_v56 = vand.u32 4294901760, %v4450_v15  ;;  %v4189_v40 = vadd.f32 %v4188_v58, %v19049_v39  ;;  %13833 = vmatmul.mubr.f32.gmra.mxu0 %v4730_v55  ;;  %14044 = vmatprep.subr.mxu1 %v24850_v45  ;;  %v4740_v1 = vand.u32 4294901760, %v4739_v36  ;;  %v24855_v58 = vld [vmem:[#allocation192_spill] sm:$0xff] }
 0x438   :  { %13957 = vmatpush3.msra.mxu0 %v24846_v30  ;;  %v13689_v35 = vpop.f32.mrf.mxu0  ;;  %v4750_v24 = vand.u32 4294901760, %v4749_v13  ;;  %v24851_v21 = vand.u32 4294901760, %v19250_v8  ;;  %14045 = vmatpush3.msra.mxu1 %v24850_v45  ;;  %v19306_v9 = vand.u32 4294901760, %v4468_v7  ;;  %v24853_v13 = vld [vmem:[#allocation101_spill] sm:$0xff]  ;;  %v24854_v30 = vld [vmem:[#allocation148_spill] sm:$0xff]  ;;  %v19314_v29 = vpop.f32.mrf.mxu1 }
 0x439   :  { %24849 = vst [vmem:[#allocation172_spill] sm:$0xff] %v19290_v56  ;;  %v19304_v39 = vsub.f32 %v4450_v15, %v19290_v56  ;;  %v4462_v55 = vadd.f32 %v19198_v0, %v4189_v40  ;;  %v4207_v17 = vadd.f32 %v13689_v35, %v19052_v31  ;;  %13921 = vmatprep.mubr.f32.mxu1 %v19290_v56  ;;  %v24856_v15 = vand.u32 4294901760, %v19266_v47  ;;  %v24857_v31 = vld [vmem:[#allocation183_spill] sm:$0xff] }
 0x43a   :  { %v4769_v48 = vsub.f32 %v19250_v8, %v24851_v21  ;;  %24852 = vst [vmem:[#allocation158_spill] sm:$0xff] %v19306_v9  ;;  %13958 = vmatprep.subr.mxu0 %v24853_v13  ;;  %v3623_v36 = vadd.f32 %v24855_v58, %v24854_v30  ;;  %13835 = vmatprep.mubr.f32.mxu0 %v4740_v1  ;;  %v4200_v21 = vpop.f32.mrf.mxu0 }
 0x43b   :  { %13922 = vmatmul.mubr.f32.gmra.mxu1 %v19268_v11  ;;  %v4759_v45 = vsub.f32 %v19266_v47, %v24856_v15  ;;  %v19323_v35 = vadd.f32 %v24857_v31, %v19236_v14  ;;  %v19326_v40 = vsub.f32 %v4468_v7, %v19306_v9  ;;  %v19328_v30 = vand.u32 4294901760, %v4462_v55  ;;  %13836 = vmatmul.mubr.f32.gmra.mxu0 %v4750_v24  ;;  %v24859_v11 = vld [vmem:[#allocation111_spill] sm:$0xff]  ;;  %v19334_v15 = vpop.f32.mrf.mxu1 }
 0x43c   :  { %v4480_v1 = vadd.f32 %v19218_v23, %v4207_v17  ;;  %v4201_v58 = vadd.f32 %v4200_v21, %v19055_v26  ;;  %14046 = vmatprep.subr.mxu1 %v24859_v11  ;;  %13959 = vmatpush3.msra.mxu0 %v24853_v13  ;;  %v13692_v0 = vpop.f32.mrf.mxu0  ;;  %v4770_v14 = vand.u32 4294901760, %v4769_v48  ;;  %v23842_v31 = vand.u32 4294901760, %v19304_v39  ;;  %v24862_v48 = vld [vmem:[#allocation102_spill] sm:$0xff] }
 0x43d   :  { %24858 = vst [vmem:[#allocation159_spill] sm:$0xff] %v19328_v30  ;;  %v4760_v56 = vand.u32 4294901760, %v4759_v45  ;;  %v24860_v7 = vand.u32 4294901760, %v19288_v59  ;;  %14047 = vmatpush3.msra.mxu1 %v24859_v11  ;;  %v19343_v23 = vsub.f32 %v4462_v55, %v19328_v30  ;;  %13924 = vmatprep.mubr.f32.mxu1 %v19328_v30  ;;  %v4219_v45 = vadd.f32 %v13692_v0, %v19074_v46  ;;  %v19351_v13 = vpop.f32.mrf.mxu1  ;;  %v24864_v0 = vld [vmem:[#allocation116_spill] sm:$0xff] }
 0x43e   :  { %v19345_v24 = vand.u32 4294901760, %v4480_v1  ;;  %v4474_v17 = vadd.f32 %v19238_v25, %v4201_v58  ;;  %13960 = vmatprep.subr.mxu0 %v24862_v48  ;;  %v4212_v21 = vpop.f32.mrf.mxu0  ;;  %v4779_v55 = vsub.f32 %v19304_v39, %v23842_v31  ;;  %14048 = vmatprep.subr.mxu1 %v24864_v0 }
 0x43f   :  { %v4789_v60 = vsub.f32 %v19288_v59, %v24860_v7  ;;  %13838 = vmatprep.mubr.f32.mxu0 %v4760_v56  ;;  %13925 = vmatmul.mubr.f32.gmra.mxu1 %v19306_v9  ;;  %v24863_v7 = vld [vmem:[#allocation185_spill] sm:$0xff]  ;;  %v4213_v46 = vadd.f32 %v4212_v21, %v19128_v34  ;;  %v23846_v56 = vand.u32 4294901760, %v19343_v23  ;;  %v4492_v9 = vadd.f32 %v19258_v4, %v4219_v45  ;;  %v19370_v31 = vpop.f32.mrf.mxu1  ;;  %v24866_v45 = vld [vmem:[#allocation107_spill] sm:$0xff] }
 0x440   :  { %24861 = vst [vmem:[#allocation174_spill] sm:$0xff] %v19345_v24  ;;  %v19358_v26 = vadd.f32 %v24863_v7, %v3602_v44  ;;  %v19361_v25 = vsub.f32 %v4480_v1, %v19345_v24  ;;  %v19363_v58 = vand.u32 4294901760, %v4474_v17  ;;  %13839 = vmatmul.mubr.f32.gmra.mxu0 %v4770_v14  ;;  %v13695_v44 = vpop.f32.mrf.mxu0  ;;  %v4780_v7 = vand.u32 4294901760, %v4779_v55  ;;  %14049 = vmatpush3.msra.mxu1 %v24864_v0 }
 0x441   :  { %13961 = vmatpush3.msra.mxu0 %v24862_v48  ;;  %v4790_v30 = vand.u32 4294901760, %v4789_v60  ;;  %v24865_v1 = vand.u32 4294901760, %v19326_v40  ;;  %v4486_v4 = vadd.f32 %v19276_v41, %v4213_v46  ;;  %v4231_v48 = vadd.f32 %v13695_v44, %v19167_v61  ;;  %v24868_v41 = vld [vmem:[#allocation186_spill] sm:$0xff]  ;;  %v4521_v34 = vpop.f32.mrf.mxu1 }
 0x442   :  { %v19378_v14 = vsub.f32 %v4474_v17, %v19363_v58  ;;  %13927 = vmatprep.mubr.f32.mxu1 %v19363_v58  ;;  %13962 = vmatprep.subr.mxu0 %v24866_v45  ;;  %v3616_v60 = vadd.f32 %v18922_v3, %v18957_v20  ;;  %v19386_v21 = vand.u32 4294901760, %v4492_v9  ;;  %v4224_v55 = vpop.f32.mrf.mxu0  ;;  %v4799_v17 = vsub.f32 %v19343_v23, %v23846_v56  ;;  %v24870_v20 = vld [vmem:[#allocation117_spill] sm:$0xff] }
 0x443   :  { %v4809_v11 = vsub.f32 %v19326_v40, %v24865_v1  ;;  %13841 = vmatprep.mubr.f32.mxu0 %v4780_v7  ;;  %13928 = vmatmul.mubr.f32.gmra.mxu1 %v19345_v24  ;;  %v19393_v46 = vadd.f32 %v24868_v41, %v3623_v36  ;;  %v19395_v61 = vand.u32 4294901760, %v4486_v4  ;;  %v4504_v44 = vadd.f32 %v19296_v2, %v4231_v48 }
 0x444   :  { %24867 = vst [vmem:[#allocation143_spill] sm:$0xff] %v19386_v21  ;;  %v4225_v1 = vadd.f32 %v4224_v55, %v19207_v38  ;;  %13842 = vmatmul.mubr.f32.gmra.mxu0 %v4790_v30  ;;  %v23853_v3 = vand.u32 4294901760, %v19378_v14  ;;  %14050 = vmatprep.subr.mxu1 %v24870_v20  ;;  %v19402_v7 = vsub.f32 %v4492_v9, %v19386_v21  ;;  %v13698_v56 = vpop.f32.mrf.mxu0  ;;  %v4800_v36 = vand.u32 4294901760, %v4799_v17 }
 0x445   :  { %24869 = vst [vmem:[#allocation176_spill] sm:$0xff] %v19395_v61  ;;  %13963 = vmatpush3.msra.mxu0 %v24866_v45  ;;  %v4810_v41 = vand.u32 4294901760, %v4809_v11  ;;  %v24871_v24 = vand.u32 4294901760, %v19361_v25  ;;  %14051 = vmatpush3.msra.mxu1 %v24870_v20  ;;  %v19410_v38 = vsub.f32 %v4486_v4, %v19395_v61  ;;  %v19412_v30 = vand.u32 4294901760, %v4504_v44  ;;  %v24873_v45 = vld [vmem:[#allocation112_spill] sm:$0xff]  ;;  %v24874_v11 = vld [vmem:[#allocation149_spill] sm:$0xff] }
 0x446   :  { %v4498_v9 = vadd.f32 %v19314_v29, %v4225_v1  ;;  %v4243_v48 = vadd.f32 %v13698_v56, %v19247_v62  ;;  %13930 = vmatprep.mubr.f32.mxu1 %v19395_v61  ;;  %13964 = vmatprep.subr.mxu0 %v24873_v45  ;;  %v3637_v55 = vadd.f32 %v18942_v27, %v24874_v11  ;;  %v4236_v17 = vpop.f32.mrf.mxu0  ;;  %v24875_v29 = vld [vmem:[#allocation188_spill] sm:$0xff]  ;;  %v13784_v11 = vpop.f32.mrf.mxu1 }
 0x447   :  { %v4829_v2 = vsub.f32 %v19361_v25, %v24871_v24  ;;  %24872 = vst [vmem:[#allocation178_spill] sm:$0xff] %v19412_v30  ;;  %13844 = vmatprep.mubr.f32.mxu0 %v4800_v36  ;;  %13931 = vmatmul.mubr.f32.gmra.mxu1 %v19386_v21  ;;  %v4819_v4 = vsub.f32 %v19378_v14, %v23853_v3  ;;  %v24877_v36 = vld [vmem:[#allocation120_spill] sm:$0xff] }
 0x448   :  { %v3950_v1 = vadd.f32 %v24875_v29, %v3616_v60  ;;  %v19427_v62 = vsub.f32 %v4504_v44, %v19412_v30  ;;  %v19429_v56 = vand.u32 4294901760, %v4498_v9  ;;  %v4516_v61 = vadd.f32 %v19334_v15, %v4243_v48  ;;  %13845 = vmatmul.mubr.f32.gmra.mxu0 %v4810_v41  ;;  %14052 = vmatprep.subr.mxu1 %v24877_v36  ;;  %v13701_v24 = vpop.f32.mrf.mxu0 }
 0x449   :  { %v4237_v27 = vadd.f32 %v4236_v17, %v19285_v57  ;;  %13965 = vmatpush3.msra.mxu0 %v24873_v45  ;;  %v4820_v21 = vand.u32 4294901760, %v4819_v4  ;;  %v4830_v3 = vand.u32 4294901760, %v4829_v2  ;;  %v23854_v60 = vand.u32 4294901760, %v19410_v38  ;;  %14053 = vmatpush3.msra.mxu1 %v24877_v36  ;;  %v24880_v2 = vld [vmem:[#allocation113_spill] sm:$0xff] }
 0x44a   :  { %24876 = vst [vmem:[#allocation160_spill] sm:$0xff] %v19429_v56  ;;  %v24878_v44 = vand.u32 4294901760, %v19402_v7  ;;  %v19442_v57 = vsub.f32 %v4498_v9, %v19429_v56  ;;  %v19444_v41 = vand.u32 4294901760, %v4516_v61  ;;  %13933 = vmatprep.mubr.f32.mxu1 %v19429_v56  ;;  %13966 = vmatprep.subr.mxu0 %v24880_v2  ;;  %v3630_v45 = vadd.f32 %v18964_v50, %v18968_v19  ;;  %v4248_v4 = vpop.f32.mrf.mxu0  ;;  %v24882_v19 = vld [vmem:[#allocation127_spill] sm:$0xff]  ;;  %v24889_v56 = vld [vmem:[#allocation133_spill] sm:$0xff] }
 0x44b   :  { %v4510_v48 = vadd.f32 %v19351_v13, %v4237_v27  ;;  %v4255_v17 = vadd.f32 %v13701_v24, %v19323_v35  ;;  %13847 = vmatprep.mubr.f32.mxu0 %v4820_v21  ;;  %13934 = vmatmul.mubr.f32.gmra.mxu1 %v19412_v30  ;;  %v4839_v9 = vsub.f32 %v19410_v38, %v23854_v60  ;;  %v4533_v35 = vpop.f32.mrf.mxu1 }
 0x44c   :  { %v4849_v29 = vsub.f32 %v19402_v7, %v24878_v44  ;;  %24879 = vst [vmem:[#allocation144_spill] sm:$0xff] %v19444_v41  ;;  %v19457_v44 = vsub.f32 %v4516_v61, %v19444_v41  ;;  %v4249_v27 = vadd.f32 %v4248_v4, %v19358_v26  ;;  %13848 = vmatmul.mubr.f32.gmra.mxu0 %v4830_v3  ;;  %v13704_v24 = vpop.f32.mrf.mxu0  ;;  %v24883_v61 = vand.u32 4294901760, %v19427_v62  ;;  %v24888_v26 = vld [vmem:[#allocation190_spill] sm:$0xff] }
 0x44d   :  { %v19459_v13 = vand.u32 4294901760, %v4510_v48  ;;  %14054 = vmatprep.subr.mxu1 %v24882_v19  ;;  %v4528_v21 = vadd.f32 %v19370_v31, %v4255_v17  ;;  %13967 = vmatpush3.msra.mxu0 %v24880_v2  ;;  %v4840_v15 = vand.u32 4294901760, %v4839_v9  ;;  %v4267_v50 = vadd.f32 %v13704_v24, %v19393_v46  ;;  %v24884_v31 = vld [vmem:[#allocation118_spill] sm:$0xff]  ;;  %v24886_v17 = vld [vmem:[#allocation189_spill] sm:$0xff] }
 0x44e   :  { %v4850_v60 = vand.u32 4294901760, %v4849_v29  ;;  %v4869_v30 = vsub.f32 %v19427_v62, %v24883_v61  ;;  %14055 = vmatpush3.msra.mxu1 %v24882_v19  ;;  %v4522_v4 = vadd.f32 %v4521_v34, %v4249_v27  ;;  %13968 = vmatprep.subr.mxu0 %v24884_v31  ;;  %v4260_v29 = vpop.f32.mrf.mxu0  ;;  %v3974_v9 = vadd.f32 %v24886_v17, %v3637_v55 }
 0x44f   :  { %24881 = vst [vmem:[#allocation180_spill] sm:$0xff] %v19459_v13  ;;  %v19472_v3 = vsub.f32 %v4510_v48, %v19459_v13  ;;  %13936 = vmatprep.mubr.f32.mxu1 %v19459_v13  ;;  %v19477_v2 = vand.u32 4294901760, %v4528_v21  ;;  %13850 = vmatprep.mubr.f32.mxu0 %v4840_v15  ;;  %v24887_v61 = vand.u32 4294901760, %v19442_v57  ;;  %v3966_v34 = vadd.f32 %v24888_v26, %v3630_v45  ;;  %v13787_v15 = vpop.f32.mrf.mxu1 }
 0x450   :  { %13937 = vmatmul.mubr.f32.gmra.mxu1 %v19444_v41  ;;  %v19485_v27 = vand.u32 4294901760, %v4522_v4  ;;  %v4540_v46 = vadd.f32 %v13784_v11, %v4267_v50  ;;  %v4261_v24 = vadd.f32 %v4260_v29, %v3950_v1  ;;  %13851 = vmatmul.mubr.f32.gmra.mxu0 %v4850_v60  ;;  %v13707_v55 = vpop.f32.mrf.mxu0  ;;  %v24890_v45 = vand.u32 4294901760, %v19457_v44 }
 0x451   :  { %24885 = vst [vmem:[#allocation161_spill] sm:$0xff] %v19477_v2  ;;  %v4859_v48 = vsub.f32 %v19442_v57, %v24887_v61  ;;  %v23865_v13 = vand.u32 4294901760, %v19472_v3  ;;  %14056 = vmatprep.subr.mxu1 %v24889_v56  ;;  %v19490_v41 = vsub.f32 %v4528_v21, %v19477_v2  ;;  %13969 = vmatpush3.msra.mxu0 %v24884_v31  ;;  %v4870_v61 = vand.u32 4294901760, %v4869_v30  ;;  %v24891_v21 = vld [vmem:[#allocation124_spill] sm:$0xff] }
 0x452   :  { %v4889_v26 = vsub.f32 %v19457_v44, %v24890_v45  ;;  %14057 = vmatpush3.msra.mxu1 %v24889_v56  ;;  %v19498_v1 = vsub.f32 %v4522_v4, %v19485_v27  ;;  %v19500_v11 = vand.u32 4294901760, %v4540_v46  ;;  %v4534_v60 = vadd.f32 %v4533_v35, %v4261_v24  ;;  %13939 = vmatprep.mubr.f32.mxu1 %v19485_v27  ;;  %v4272_v30 = vpop.f32.mrf.mxu0  ;;  %v24892_v24 = vld [vmem:[#allocation135_spill] sm:$0xff] }
 0x453   :  { %v4860_v17 = vand.u32 4294901760, %v4859_v48  ;;  %v4279_v50 = vadd.f32 %v13707_v55, %v3974_v9  ;;  %13970 = vmatprep.subr.mxu0 %v24891_v21  ;;  %v4879_v29 = vsub.f32 %v19472_v3, %v23865_v13  ;;  %v4273_v9 = vadd.f32 %v4272_v30, %v3966_v34  ;;  %14058 = vmatprep.subr.mxu1 %v24892_v24  ;;  %v4545_v55 = vpop.f32.mrf.mxu1 }
 0x454   :  { %13940 = vmatmul.mubr.f32.gmra.mxu1 %v19477_v2  ;;  %v19510_v4 = vsub.f32 %v4540_v46, %v19500_v11  ;;  %v19512_v48 = vand.u32 4294901760, %v4534_v60  ;;  %13971 = vmatpush3.msra.mxu0 %v24891_v21  ;;  %v4890_v45 = vand.u32 4294901760, %v4889_v26  ;;  %v4898_v31 = vand.u32 4294901760, %v19498_v1 }
 0x455   :  { %13853 = vmatprep.mubr.f32.mxu0 %v4860_v17  ;;  %v4552_v35 = vadd.f32 %v13787_v15, %v4279_v50  ;;  %v4880_v17 = vand.u32 4294901760, %v4879_v29  ;;  %v24893_v2 = vand.u32 4294901760, %v19490_v41  ;;  %14059 = vmatpush3.msra.mxu1 %v24892_v24  ;;  %v24894_v50 = vld [vmem:[#allocation123_spill] sm:$0xff] }
 0x456   :  { %13854 = vmatmul.mubr.f32.gmra.mxu0 %v4870_v61  ;;  %v23867_v46 = vand.u32 4294901760, %v19510_v4  ;;  %v19523_v34 = vsub.f32 %v4534_v60, %v19512_v48  ;;  %v4546_v61 = vadd.f32 %v4545_v55, %v4273_v9  ;;  %13942 = vmatprep.mubr.f32.mxu1 %v19512_v48 }
 0x457   :  { %v4909_v13 = vsub.f32 %v19490_v41, %v24893_v2  ;;  %v19525_v15 = vand.u32 4294901760, %v4552_v35  ;;  %13972 = vmatprep.subr.mxu0 %v24894_v50  ;;  %13856 = vmatprep.mubr.f32.mxu0 %v4880_v17  ;;  %v4899_v2 = vsub.f32 %v19498_v1, %v4898_v31 }
 0x458   :  { %13943 = vmatmul.mubr.f32.gmra.mxu1 %v19500_v11  ;;  %v19536_v21 = vand.u32 4294901760, %v4546_v61  ;;  %v23866_v60 = vand.u32 4294901760, %v19523_v34  ;;  %14188 = vmatprep.subr.mxu1 %v24808_v18 }
 0x459   :  { %v19534_v26 = vsub.f32 %v4552_v35, %v19525_v15  ;;  %13973 = vmatpush3.msra.mxu0 %v24894_v50  ;;  %v4900_v30 = vand.u32 4294901760, %v4899_v2  ;;  %v4910_v29 = vand.u32 4294901760, %v4909_v13  ;;  %v24895_v35 = vld [vmem:[#allocation129_spill] sm:$0xff]  ;;  %v24896_v13 = vand.u32 4294901760, %v19040_v12  ;;  %v24897_v2 = vld [vmem:[#allocation136_spill] sm:$0xff] }
 0x45a   :  { %13857 = vmatmul.mubr.f32.gmra.mxu0 %v4890_v45  ;;  %v19543_v55 = vsub.f32 %v4546_v61, %v19536_v21  ;;  %13945 = vmatprep.mubr.f32.mxu1 %v19536_v21  ;;  %v4919_v17 = vsub.f32 %v19523_v34, %v23866_v60  ;;  %v4929_v45 = vsub.f32 %v19510_v4, %v23867_v46 }
 0x45b   :  { %v4948_v9 = vand.u32 4294901760, %v19534_v26  ;;  %13974 = vmatprep.subr.mxu0 %v24895_v35  ;;  %13859 = vmatprep.mubr.f32.mxu0 %v4900_v30 }
 0x45c   :  { %13946 = vmatmul.mubr.f32.gmra.mxu1 %v19525_v15  ;;  %v4920_v61 = vand.u32 4294901760, %v4919_v17  ;;  %v4938_v50 = vand.u32 4294901760, %v19543_v55  ;;  %13975 = vmatpush3.msra.mxu0 %v24895_v35  ;;  %v4930_v60 = vand.u32 4294901760, %v4929_v45  ;;  %v24899_v35 = vand.u32 4294901760, %v19077_v54 }
 0x45d   :  { %14060 = vmatprep.mubr.f32.mxu1 %v24896_v13  ;;  %13976 = vmatprep.subr.mxu0 %v24897_v2  ;;  %v4949_v30 = vsub.f32 %v19534_v26, %v4948_v9  ;;  %v24900_v13 = vld [vmem:[#allocation138_spill] sm:$0xff] }
 0x45e   :  { %13860 = vmatmul.mubr.f32.gmra.mxu0 %v4910_v29  ;;  %v4939_v46 = vsub.f32 %v19543_v55, %v4938_v50  ;;  %v24898_v29 = vand.u32 4294901760, %v19021_v37 }
 0x45f   :  { %13862 = vmatprep.mubr.f32.mxu0 %v4920_v61  ;;  %13977 = vmatpush3.msra.mxu0 %v24897_v2  ;;  %v4950_v45 = vand.u32 4294901760, %v4949_v30  ;;  %v24901_v61 = vand.u32 4294901760, %v19060_v51  ;;  %v24902_v2 = vld [vmem:[#allocation93_spill] sm:$0xff] }
 0x460   :  { %14061 = vmatmul.mubr.f32.vlgmr.msra.gmra.mxu1 %v24898_v29  ;;  %v4940_v17 = vand.u32 4294901760, %v4939_v46  ;;  %13978 = vmatprep.subr.mxu0 %v24900_v13  ;;  %v24905_v46 = vand.u32 4294901760, %v19147_v63  ;;  %v24906_v30 = vld [vmem:[#allocation125_spill] sm:$0xff]  ;;  %v24914_v29 = vand.u32 4294901760, %v19210_v10 }
 0x461   :  { %14063 = vmatprep.mubr.f32.mxu1 %v24899_v35  ;;  %14189 = vmatpush3.msra.mxu1 %v24808_v18  ;;  %v24904_v18 = vand.u32 4294901760, %v19099_v53  ;;  %v24925_v35 = vld [vmem:[#allocation108_spill] sm:$0xff] }
 0x462   :  { %13863 = vmatmul.mubr.f32.gmra.mxu0 %v4930_v60  ;;  %v24903_v60 = vand.u32 4294901760, %v19108_v49  ;;  %14190 = vmatprep.subr.mxu1 %v24809_v6 }
 0x463   :  { %13865 = vmatprep.mubr.f32.mxu0 %v4940_v17  ;;  %13979 = vmatpush3.msra.mxu0 %v24900_v13  ;;  %v24929_v17 = vld [vmem:[#allocation110_spill] sm:$0xff]  ;;  %v24931_v13 = vand.u32 4294901760, %v19402_v7 }
 0x464   :  { %14064 = vmatmul.mubr.f32.gmra.mxu1 %v24901_v61  ;;  %14108 = vmatprep.subr.mxu0 %v24902_v2  ;;  %v24935_v61 = vand.u32 4294901760, %v19427_v62 }
 0x465   :  { %14066 = vmatprep.mubr.f32.mxu1 %v24903_v60  ;;  %14191 = vmatpush3.msra.mxu1 %v24809_v6  ;;  %v24909_v6 = vld [vmem:[#allocation96_spill] sm:$0xff]  ;;  %v24961_v60 = vld [vmem:[#allocation142_spill] sm:$0xff] }
 0x466   :  { %13866 = vmatmul.mubr.f32.gmra.mxu0 %v4950_v45  ;;  %14192 = vmatprep.subr.mxu1 %v24814_v43  ;;  %v24933_v45 = vld [vmem:[#allocation111_spill] sm:$0xff] }
 0x467   :  { %13980 = vmatprep.mubr.f32.mxu0 %v19040_v12  ;;  %14193 = vmatpush3.msra.mxu1 %v24814_v43  ;;  %v24907_v12 = vand.u32 4294901760, %v19131_v22  ;;  %v24911_v43 = vld [vmem:[#allocation134_spill] sm:$0xff] }
 0x468   :  { %14067 = vmatmul.mubr.f32.gmra.mxu1 %v24904_v18  ;;  %14194 = vmatprep.subr.mxu1 %v24816_v33  ;;  %v24962_v18 = vld [vmem:[#allocation159_spill] sm:$0xff] }
 0x469   :  { %14069 = vmatprep.mubr.f32.mxu1 %v24905_v46  ;;  %14195 = vmatpush3.msra.mxu1 %v24816_v33  ;;  %v24917_v33 = vand.u32 4294901760, %v19250_v8  ;;  %v24963_v46 = vld [vmem:[#allocation158_spill] sm:$0xff] }
 0x46a   :  { %13981 = vmatmul.mubr.f32.vlgmr.msra.gmra.mxu0 %v19021_v37  ;;  %v24908_v37 = vand.u32 4294901760, %v19186_v5  ;;  %14196 = vmatprep.subr.mxu1 %v24820_v28 }
 0x46b   :  { %14109 = vmatpush3.msra.mxu0 %v24902_v2  ;;  %13983 = vmatprep.mubr.f32.mxu0 %v19077_v54  ;;  %v24910_v54 = vand.u32 4294901760, %v19170_v42  ;;  %v24938_v2 = vand.u32 4294901760, %v19457_v44 }
 0x46c   :  { %14110 = vmatprep.subr.mxu0 %v24906_v30  ;;  %14070 = vmatmul.mubr.f32.gmra.mxu1 %v24907_v12  ;;  %v24965_v12 = vld [vmem:[#allocation176_spill] sm:$0xff] }
 0x46d   :  { %14111 = vmatpush3.msra.mxu0 %v24906_v30  ;;  %14072 = vmatprep.mubr.f32.mxu1 %v24908_v37  ;;  %v24964_v30 = vld [vmem:[#allocation174_spill] sm:$0xff]  ;;  %v24966_v37 = vld [vmem:[#allocation143_spill] sm:$0xff] }
 0x46e   :  { %13984 = vmatmul.mubr.f32.gmra.mxu0 %v19060_v51  ;;  %14112 = vmatprep.subr.mxu0 %v24909_v6  ;;  %v24912_v51 = vand.u32 4294901760, %v19226_v32 }
 0x46f   :  { %13986 = vmatprep.mubr.f32.mxu0 %v19108_v49  ;;  %14113 = vmatpush3.msra.mxu0 %v24909_v6  ;;  %v24913_v49 = vld [vmem:[#allocation100_spill] sm:$0xff] }
 0x470   :  { %14073 = vmatmul.mubr.f32.gmra.mxu1 %v24910_v54  ;;  %14114 = vmatprep.subr.mxu0 %v24911_v43  ;;  %v24967_v6 = vld [vmem:[#allocation160_spill] sm:$0xff]  ;;  %v24968_v54 = vld [vmem:[#allocation178_spill] sm:$0xff] }
 0x471   :  { %14075 = vmatprep.mubr.f32.mxu1 %v24912_v51  ;;  %14115 = vmatpush3.msra.mxu0 %v24911_v43  ;;  %v24969_v43 = vld [vmem:[#allocation180_spill] sm:$0xff] }
 0x472   :  { %13987 = vmatmul.mubr.f32.gmra.mxu0 %v19099_v53  ;;  %14116 = vmatprep.subr.mxu0 %v24913_v49  ;;  %v24915_v53 = vand.u32 4294901760, %v19266_v47  ;;  %v24970_v51 = vld [vmem:[#allocation144_spill] sm:$0xff] }
 0x473   :  { %13989 = vmatprep.mubr.f32.mxu0 %v19147_v63  ;;  %14117 = vmatpush3.msra.mxu0 %v24913_v49  ;;  %v24916_v63 = vld [vmem:[#allocation106_spill] sm:$0xff] }
 0x474   :  { %14076 = vmatmul.mubr.f32.gmra.mxu1 %v24914_v29  ;;  %14118 = vmatprep.subr.mxu0 %v24916_v63 }
 0x475   :  { %14078 = vmatprep.mubr.f32.mxu1 %v24915_v53  ;;  %14197 = vmatpush3.msra.mxu1 %v24820_v28  ;;  %v24920_v28 = vand.u32 4294901760, %v19288_v59 }
 0x476   :  { %13990 = vmatmul.mubr.f32.gmra.mxu0 %v19131_v22  ;;  %v24918_v22 = vand.u32 4294901760, %v19304_v39  ;;  %14198 = vmatprep.subr.mxu1 %v24830_v16 }
 0x477   :  { %13992 = vmatprep.mubr.f32.mxu0 %v19186_v5  ;;  %14119 = vmatpush3.msra.mxu0 %v24916_v63  ;;  %v24919_v5 = vld [vmem:[#allocation105_spill] sm:$0xff] }
 0x478   :  { %14079 = vmatmul.mubr.f32.gmra.mxu1 %v24917_v33  ;;  %14120 = vmatprep.subr.mxu0 %v24919_v5 }
 0x479   :  { %14081 = vmatprep.mubr.f32.mxu1 %v24918_v22  ;;  %14199 = vmatpush3.msra.mxu1 %v24830_v16  ;;  %v24923_v16 = vand.u32 4294901760, %v19326_v40 }
 0x47a   :  { %13993 = vmatmul.mubr.f32.gmra.mxu0 %v19170_v42  ;;  %v24921_v42 = vand.u32 4294901760, %v19343_v23  ;;  %14200 = vmatprep.subr.mxu1 %v24836_v52 }
 0x47b   :  { %13995 = vmatprep.mubr.f32.mxu0 %v19226_v32  ;;  %14121 = vmatpush3.msra.mxu0 %v24919_v5  ;;  %v24922_v32 = vld [vmem:[#allocation109_spill] sm:$0xff] }
 0x47c   :  { %14082 = vmatmul.mubr.f32.gmra.mxu1 %v24920_v28  ;;  %14122 = vmatprep.subr.mxu0 %v24922_v32 }
 0x47d   :  { %14084 = vmatprep.mubr.f32.mxu1 %v24921_v42  ;;  %14201 = vmatpush3.msra.mxu1 %v24836_v52  ;;  %v24927_v52 = vand.u32 4294901760, %v19361_v25 }
 0x47e   :  { %13996 = vmatmul.mubr.f32.gmra.mxu0 %v19210_v10  ;;  %v24924_v10 = vand.u32 4294901760, %v19378_v14  ;;  %14202 = vmatprep.subr.mxu1 %v24925_v35 }
 0x47f   :  { %13998 = vmatprep.mubr.f32.mxu0 %v19266_v47  ;;  %14123 = vmatpush3.msra.mxu0 %v24922_v32  ;;  %v24926_v47 = vld [vmem:[#allocation114_spill] sm:$0xff] }
 0x480   :  { %14085 = vmatmul.mubr.f32.gmra.mxu1 %v24923_v16  ;;  %14124 = vmatprep.subr.mxu0 %v24926_v47 }
 0x481   :  { %14087 = vmatprep.mubr.f32.mxu1 %v24924_v10  ;;  %14203 = vmatpush3.msra.mxu1 %v24925_v35 }
 0x482   :  { %13999 = vmatmul.mubr.f32.gmra.mxu0 %v19250_v8  ;;  %v24928_v8 = vand.u32 4294901760, %v19410_v38  ;;  %14204 = vmatprep.subr.mxu1 %v24929_v17 }
 0x483   :  { %14001 = vmatprep.mubr.f32.mxu0 %v19304_v39  ;;  %14125 = vmatpush3.msra.mxu0 %v24926_v47  ;;  %v24930_v39 = vld [vmem:[#allocation115_spill] sm:$0xff] }
 0x484   :  { %14088 = vmatmul.mubr.f32.gmra.mxu1 %v24927_v52  ;;  %14126 = vmatprep.subr.mxu0 %v24930_v39 }
 0x485   :  { %14090 = vmatprep.mubr.f32.mxu1 %v24928_v8  ;;  %14205 = vmatpush3.msra.mxu1 %v24929_v17 }
 0x486   :  { %14002 = vmatmul.mubr.f32.gmra.mxu0 %v19288_v59  ;;  %v24932_v59 = vand.u32 4294901760, %v19442_v57  ;;  %14206 = vmatprep.subr.mxu1 %v24933_v45 }
 0x487   :  { %14004 = vmatprep.mubr.f32.mxu0 %v19343_v23  ;;  %14127 = vmatpush3.msra.mxu0 %v24930_v39  ;;  %v24934_v23 = vld [vmem:[#allocation121_spill] sm:$0xff] }
 0x488   :  { %14091 = vmatmul.mubr.f32.gmra.mxu1 %v24931_v13  ;;  %14128 = vmatprep.subr.mxu0 %v24934_v23 }
 0x489   :  { %14093 = vmatprep.mubr.f32.mxu1 %v24932_v59  ;;  %14207 = vmatpush3.msra.mxu1 %v24933_v45 }
 0x48a   :  { %14005 = vmatmul.mubr.f32.gmra.mxu0 %v19326_v40  ;;  %v24936_v40 = vand.u32 4294901760, %v19472_v3  ;;  %14208 = vmatprep.subr.mxu1 %v24864_v0 }
 0x48b   :  { %14007 = vmatprep.mubr.f32.mxu0 %v19378_v14  ;;  %14129 = vmatpush3.msra.mxu0 %v24934_v23  ;;  %v24937_v14 = vld [vmem:[#allocation126_spill] sm:$0xff] }
 0x48c   :  { %14094 = vmatmul.mubr.f32.gmra.mxu1 %v24935_v61  ;;  %14130 = vmatprep.subr.mxu0 %v24937_v14 }
 0x48d   :  { %14096 = vmatprep.mubr.f32.mxu1 %v24936_v40  ;;  %14209 = vmatpush3.msra.mxu1 %v24864_v0  ;;  %v24940_v0 = vand.u32 4294901760, %v19490_v41 }
 0x48e   :  { %14008 = vmatmul.mubr.f32.gmra.mxu0 %v19361_v25  ;;  %14210 = vmatprep.subr.mxu1 %v24870_v20  ;;  %v24939_v25 = vld [vmem:[#allocation130_spill] sm:$0xff] }
 0x48f   :  { %14010 = vmatprep.mubr.f32.mxu0 %v19410_v38  ;;  %14131 = vmatpush3.msra.mxu0 %v24937_v14  ;;  %v24942_v38 = vld [vmem:[#allocation132_spill] sm:$0xff] }
 0x490   :  { %14097 = vmatmul.mubr.f32.gmra.mxu1 %v24938_v2  ;;  %14132 = vmatprep.subr.mxu0 %v24939_v25 }
 0x491   :  { %14099 = vmatprep.mubr.f32.mxu1 %v4898_v31  ;;  %14211 = vmatpush3.msra.mxu1 %v24870_v20  ;;  %v24943_v20 = vand.u32 4294901760, %v19510_v4  ;;  %v24953_v31 = vld [vmem:[#allocation153_spill] sm:$0xff] }
 0x492   :  { %14011 = vmatmul.mubr.f32.gmra.mxu0 %v19402_v7  ;;  %v24941_v7 = vand.u32 4294901760, %v19523_v34  ;;  %14212 = vmatprep.subr.mxu1 %v24877_v36 }
 0x493   :  { %14013 = vmatprep.mubr.f32.mxu0 %v19442_v57  ;;  %14133 = vmatpush3.msra.mxu0 %v24939_v25  ;;  %v24946_v57 = vld [vmem:[#allocation139_spill] sm:$0xff] }
 0x494   :  { %14100 = vmatmul.mubr.f32.gmra.mxu1 %v24940_v0  ;;  %14134 = vmatprep.subr.mxu0 %v24942_v38 }
 0x495   :  { %14102 = vmatprep.mubr.f32.mxu1 %v24941_v7  ;;  %14213 = vmatpush3.msra.mxu1 %v24877_v36  ;;  %v24945_v36 = vld [vmem:[#allocation140_spill] sm:$0xff] }
 0x496   :  { %14014 = vmatmul.mubr.f32.gmra.mxu0 %v19427_v62  ;;  %14214 = vmatprep.subr.mxu1 %v24882_v19  ;;  %v24944_v62 = vld [vmem:[#allocation137_spill] sm:$0xff] }
 0x497   :  { %14016 = vmatprep.mubr.f32.mxu0 %v19472_v3  ;;  %14215 = vmatpush3.msra.mxu1 %v24882_v19  ;;  %v24950_v19 = vld [vmem:[#allocation166_spill] sm:$0xff]  ;;  %v24951_v3 = vld [vmem:[#allocation152_spill] sm:$0xff] }
 0x498   :  { %14103 = vmatmul.mubr.f32.gmra.mxu1 %v24943_v20  ;;  %14135 = vmatpush3.msra.mxu0 %v24942_v38 }
 0x499   :  { %14105 = vmatprep.mubr.f32.mxu1 %v4938_v50  ;;  %14216 = vmatprep.subr.mxu1 %v24889_v56  ;;  %v24960_v50 = vld [vmem:[#allocation172_spill] sm:$0xff] }
 0x49a   :  { %14017 = vmatmul.mubr.f32.gmra.mxu0 %v19457_v44  ;;  %14136 = vmatprep.subr.mxu0 %v24944_v62  ;;  %v24947_v44 = vld [vmem:[#allocation150_spill] sm:$0xff] }
 0x49b   :  { %14019 = vmatprep.mubr.f32.mxu0 %v19498_v1  ;;  %14217 = vmatpush3.msra.mxu1 %v24889_v56  ;;  %v24949_v56 = vld [vmem:[#allocation164_spill] sm:$0xff]  ;;  %v24952_v1 = vld [vmem:[#allocation154_spill] sm:$0xff] }
 0x49c   :  { %14106 = vmatmul.mubr.f32.gmra.mxu1 %v4948_v9  ;;  %14218 = vmatprep.subr.mxu1 %v24892_v24  ;;  %v24958_v9 = vld [vmem:[#allocation170_spill] sm:$0xff] }
 0x49d   :  { %14220 = vmatprep.mubr.f32.mxu1 %v24945_v36  ;;  %14137 = vmatpush3.msra.mxu0 %v24944_v62 }
 0x49e   :  { %14020 = vmatmul.mubr.f32.gmra.mxu0 %v19490_v41  ;;  %14219 = vmatpush3.msra.mxu1 %v24892_v24  ;;  %v24948_v41 = vld [vmem:[#allocation151_spill] sm:$0xff] }
 0x49f   :  { %14022 = vmatprep.mubr.f32.mxu0 %v19523_v34  ;;  %14138 = vmatprep.subr.mxu0 %v24946_v57  ;;  %v24955_v24 = vld [vmem:[#allocation155_spill] sm:$0xff]  ;;  %v24956_v34 = vld [vmem:[#allocation141_spill] sm:$0xff] }
 0x4a0   :  { %14221 = vmatmul.mubr.f32.vlgmr.msra.gmra.mxu1 %v24947_v44  ;;  %14139 = vmatpush3.msra.mxu0 %v24946_v57 }
 0x4a1   :  { %14223 = vmatprep.mubr.f32.mxu1 %v24948_v41 }
 0x4a2   :  { %14023 = vmatmul.mubr.f32.gmra.mxu0 %v19510_v4  ;;  %v24954_v4 = vld [vmem:[#allocation156_spill] sm:$0xff] }
 0x4a3   :  { %14025 = vmatprep.mubr.f32.mxu0 %v19543_v55  ;;  %v24959_v55 = vld [vmem:[#allocation168_spill] sm:$0xff] }
 0x4a4   :  { %14224 = vmatmul.mubr.f32.gmra.mxu1 %v24949_v56 }
 0x4a5   :  { %14226 = vmatprep.mubr.f32.mxu1 %v24950_v19 }
 0x4a6   :  { %14026 = vmatmul.mubr.f32.gmra.mxu0 %v19534_v26  ;;  %v24957_v26 = vld [vmem:[#allocation157_spill] sm:$0xff] }
 0x4a7   :  { %14140 = vmatprep.mubr.f32.mxu0 %v24945_v36 }
 0x4a8   :  { %14227 = vmatmul.mubr.f32.gmra.mxu1 %v24951_v3 }
 0x4a9   :  { %14229 = vmatprep.mubr.f32.mxu1 %v24952_v1 }
 0x4aa   :  { %14141 = vmatmul.mubr.f32.vlgmr.msra.gmra.mxu0 %v24947_v44 }
 0x4ab   :  { %14143 = vmatprep.mubr.f32.mxu0 %v24948_v41 }
 0x4ac   :  { %14230 = vmatmul.mubr.f32.gmra.mxu1 %v24953_v31 }
 0x4ad   :  { %14232 = vmatprep.mubr.f32.mxu1 %v24954_v4 }
 0x4ae   :  { %14144 = vmatmul.mubr.f32.gmra.mxu0 %v24949_v56 }
 0x4af   :  { %14146 = vmatprep.mubr.f32.mxu0 %v24950_v19 }
 0x4b0   :  { %14233 = vmatmul.mubr.f32.gmra.mxu1 %v24955_v24 }
 0x4b1   :  { %14235 = vmatprep.mubr.f32.mxu1 %v24956_v34 }
 0x4b2   :  { %14147 = vmatmul.mubr.f32.gmra.mxu0 %v24951_v3 }
 0x4b3   :  { %14149 = vmatprep.mubr.f32.mxu0 %v24952_v1 }
 0x4b4   :  { %14236 = vmatmul.mubr.f32.gmra.mxu1 %v24957_v26 }
 0x4b5   :  { %14238 = vmatprep.mubr.f32.mxu1 %v24958_v9 }
 0x4b6   :  { %14150 = vmatmul.mubr.f32.gmra.mxu0 %v24953_v31 }
 0x4b7   :  { %14152 = vmatprep.mubr.f32.mxu0 %v24954_v4 }
 0x4b8   :  { %14239 = vmatmul.mubr.f32.gmra.mxu1 %v24959_v55 }
 0x4b9   :  { %14241 = vmatprep.mubr.f32.mxu1 %v24960_v50 }
 0x4ba   :  { %14153 = vmatmul.mubr.f32.gmra.mxu0 %v24955_v24 }
 0x4bb   :  { %14155 = vmatprep.mubr.f32.mxu0 %v24956_v34 }
 0x4bc   :  { %14242 = vmatmul.mubr.f32.gmra.mxu1 %v24961_v60 }
 0x4bd   :  { %14244 = vmatprep.mubr.f32.mxu1 %v24962_v18 }
 0x4be   :  { %14156 = vmatmul.mubr.f32.gmra.mxu0 %v24957_v26 }
 0x4bf   :  { %14158 = vmatprep.mubr.f32.mxu0 %v24958_v9 }
 0x4c0   :  { %14245 = vmatmul.mubr.f32.gmra.mxu1 %v24963_v46 }
 0x4c1   :  { %14247 = vmatprep.mubr.f32.mxu1 %v19363_v58 }
 0x4c2   :  { %14159 = vmatmul.mubr.f32.gmra.mxu0 %v24959_v55 }
 0x4c3   :  { %14161 = vmatprep.mubr.f32.mxu0 %v24960_v50 }
 0x4c4   :  { %14248 = vmatmul.mubr.f32.gmra.mxu1 %v24964_v30 }
 0x4c5   :  { %14250 = vmatprep.mubr.f32.mxu1 %v24965_v12 }
 0x4c6   :  { %14162 = vmatmul.mubr.f32.gmra.mxu0 %v24961_v60 }
 0x4c7   :  { %14164 = vmatprep.mubr.f32.mxu0 %v24962_v18 }
 0x4c8   :  { %14251 = vmatmul.mubr.f32.gmra.mxu1 %v24966_v37 }
 0x4c9   :  { %14253 = vmatprep.mubr.f32.mxu1 %v24967_v6 }
 0x4ca   :  { %14165 = vmatmul.mubr.f32.gmra.mxu0 %v24963_v46 }
 0x4cb   :  { %14167 = vmatprep.mubr.f32.mxu0 %v19363_v58  ;;  %v24971_v58 = vld [vmem:[#allocation161_spill] sm:$0xff] }
 0x4cc   :  { %14254 = vmatmul.mubr.f32.gmra.mxu1 %v24968_v54 }
 0x4cd   :  { %14256 = vmatprep.mubr.f32.mxu1 %v24969_v43 }
 0x4ce   :  { %14168 = vmatmul.mubr.f32.gmra.mxu0 %v24964_v30 }
 0x4cf   :  { %14170 = vmatprep.mubr.f32.mxu0 %v24965_v12 }
 0x4d0   :  { %14257 = vmatmul.mubr.f32.gmra.mxu1 %v24970_v51 }
 0x4d1   :  { %14259 = vmatprep.mubr.f32.mxu1 %v19485_v27 }
 0x4d2   :  { %14171 = vmatmul.mubr.f32.gmra.mxu0 %v24966_v37 }
 0x4d3   :  { %14173 = vmatprep.mubr.f32.mxu0 %v24967_v6 }
 0x4d4   :  { %14260 = vmatmul.mubr.f32.gmra.mxu1 %v24971_v58 }
 0x4d5   :  { %14262 = vmatprep.mubr.f32.mxu1 %v19512_v48 }
 0x4d6   :  { %14174 = vmatmul.mubr.f32.gmra.mxu0 %v24968_v54 }
 0x4d7   :  { %14176 = vmatprep.mubr.f32.mxu0 %v24969_v43 }
 0x4d8   :  { %14263 = vmatmul.mubr.f32.gmra.mxu1 %v19500_v11 }
 0x4d9   :  { %14265 = vmatprep.mubr.f32.mxu1 %v19536_v21 }
 0x4da   :  { %14177 = vmatmul.mubr.f32.gmra.mxu0 %v24970_v51 }
 0x4db   :  { %14179 = vmatprep.mubr.f32.mxu0 %v19485_v27 }
 0x4dc   :  { %14266 = vmatmul.mubr.f32.gmra.mxu1 %v19525_v15  ;;  %v13902_v49 = vpop.f32.mrf.mxu1 }
 0x4de   :  { %14180 = vmatmul.mubr.f32.gmra.mxu0 %v24971_v58  ;;  %v5103_v29 = vpop.f32.mrf.mxu1 }
 0x4df   :  { %14182 = vmatprep.mubr.f32.mxu0 %v19512_v48 }
 0x4e1   :  { %v13905_v53 = vpop.f32.mrf.mxu1 }
 0x4e2   :  { %14183 = vmatmul.mubr.f32.gmra.mxu0 %v19500_v11 }
 0x4e3   :  { %14185 = vmatprep.mubr.f32.mxu0 %v19536_v21  ;;  %v5115_v63 = vpop.f32.mrf.mxu1 }
 0x4e5   :  { %v13908_v33 = vpop.f32.mrf.mxu1 }
 0x4e6   :  { %14186 = vmatmul.mubr.f32.gmra.mxu0 %v19525_v15  ;;  %v13822_v27 = vpop.f32.mrf.mxu0 }
 0x4e7   :  { %v19789_v22 = vadd.f32 %v13902_v49, %v13822_v27  ;;  %v5127_v5 = vpop.f32.mrf.mxu1 }
 0x4e8   :  { %v4642_v28 = vpop.f32.mrf.mxu0 }
 0x4e9   :  { %v19791_v42 = vadd.f32 %v5103_v29, %v4642_v28  ;;  %v13911_v32 = vpop.f32.mrf.mxu1 }
 0x4ea   :  { %v13825_v48 = vpop.f32.mrf.mxu0 }
 0x4eb   :  { %v19793_v16 = vadd.f32 %v13905_v53, %v13825_v48  ;;  %v5139_v11 = vpop.f32.mrf.mxu1 }
 0x4ec   :  { %v4662_v10 = vpop.f32.mrf.mxu0 }
 0x4ed   :  { %v19795_v21 = vadd.f32 %v5115_v63, %v4662_v10  ;;  %v13914_v35 = vpop.f32.mrf.mxu1 }
 0x4ee   :  { %v13828_v47 = vpop.f32.mrf.mxu0 }
 0x4ef   :  { %v19797_v15 = vadd.f32 %v13908_v33, %v13828_v47  ;;  %v5151_v52 = vpop.f32.mrf.mxu1 }
 0x4f0   :  { %v4682_v8 = vpop.f32.mrf.mxu0 }
 0x4f1   :  { %v19799_v17 = vadd.f32 %v5127_v5, %v4682_v8 }
 0x4f2   :  { %v13917_v39 = vpop.f32.mrf.mxu1 }
 0x4f3   :  { %v13831_v13 = vpop.f32.mrf.mxu0 }
 0x4f4   :  { %v19801_v59 = vadd.f32 %v13911_v32, %v13831_v13  ;;  %v5163_v45 = vpop.f32.mrf.mxu1 }
 0x4f5   :  { %v4702_v23 = vpop.f32.mrf.mxu0 }
 0x4f6   :  { %v19803_v61 = vadd.f32 %v5139_v11, %v4702_v23  ;;  %v13920_v40 = vpop.f32.mrf.mxu1 }
 0x4f7   :  { %v13834_v14 = vpop.f32.mrf.mxu0 }
 0x4f8   :  { %v19805_v2 = vadd.f32 %v13914_v35, %v13834_v14  ;;  %v5175_v25 = vpop.f32.mrf.mxu1 }
 0x4f9   :  { %v4722_v0 = vpop.f32.mrf.mxu0 }
 0x4fa   :  { %v19807_v7 = vadd.f32 %v5151_v52, %v4722_v0 }
 0x4fb   :  { %v13923_v38 = vpop.f32.mrf.mxu1  ;;  %v13837_v20 = vpop.f32.mrf.mxu0 }
 0x4fc   :  { %v19809_v62 = vadd.f32 %v13917_v39, %v13837_v20 }
 0x4fd   :  { %v5187_v36 = vpop.f32.mrf.mxu1  ;;  %v4742_v57 = vpop.f32.mrf.mxu0 }
 0x4fe   :  { %v19811_v44 = vadd.f32 %v5163_v45, %v4742_v57 }
 0x4ff   :  { %v13926_v41 = vpop.f32.mrf.mxu1 }
 0x500   :  { %v13840_v56 = vpop.f32.mrf.mxu0 }
 0x501   :  { %v19813_v19 = vadd.f32 %v13920_v40, %v13840_v56  ;;  %v5199_v3 = vpop.f32.mrf.mxu1 }
 0x502   :  { %v4762_v1 = vpop.f32.mrf.mxu0 }
 0x503   :  { %v19815_v31 = vadd.f32 %v5175_v25, %v4762_v1  ;;  %v13929_v4 = vpop.f32.mrf.mxu1 }
 0x504   :  { %v13843_v24 = vpop.f32.mrf.mxu0 }
 0x505   :  { %v19817_v34 = vadd.f32 %v13923_v38, %v13843_v24  ;;  %v5211_v26 = vpop.f32.mrf.mxu1 }
 0x506   :  { %v4782_v9 = vpop.f32.mrf.mxu0 }
 0x507   :  { %v19819_v55 = vadd.f32 %v5187_v36, %v4782_v9  ;;  %v13932_v50 = vpop.f32.mrf.mxu1 }
 0x508   :  { %v13846_v60 = vpop.f32.mrf.mxu0 }
 0x509   :  { %v19821_v18 = vadd.f32 %v13926_v41, %v13846_v60  ;;  %v5223_v46 = vpop.f32.mrf.mxu1 }
 0x50a   :  { %v4802_v30 = vpop.f32.mrf.mxu0 }
 0x50b   :  { %v19823_v12 = vadd.f32 %v5199_v3, %v4802_v30  ;;  %v13935_v37 = vpop.f32.mrf.mxu1 }
 0x50c   :  { %v13849_v6 = vpop.f32.mrf.mxu0 }
 0x50d   :  { %v19825_v54 = vadd.f32 %v13929_v4, %v13849_v6  ;;  %v5235_v43 = vpop.f32.mrf.mxu1 }
 0x50e   :  { %v4822_v51 = vpop.f32.mrf.mxu0 }
 0x50f   :  { %24972 = vst [vmem:[#allocation162_spill] sm:$0xff] %v19825_v54  ;;  %v19827_v58 = vadd.f32 %v5211_v26, %v4822_v51 }
 0x510   :  { %v13938_v49 = vpop.f32.mrf.mxu1  ;;  %v13852_v29 = vpop.f32.mrf.mxu0 }
 0x511   :  { %24973 = vst [vmem:[#allocation163_spill] sm:$0xff] %v19827_v58  ;;  %v19829_v53 = vadd.f32 %v13932_v50, %v13852_v29 }
 0x512   :  { %v5247_v63 = vpop.f32.mrf.mxu1  ;;  %v4842_v33 = vpop.f32.mrf.mxu0 }
 0x513   :  { %24974 = vst [vmem:[#allocation165_spill] sm:$0xff] %v19829_v53  ;;  %v19831_v27 = vadd.f32 %v5223_v46, %v4842_v33 }
 0x514   :  { %v13941_v5 = vpop.f32.mrf.mxu1 }
 0x515   :  { %24975 = vst [vmem:[#allocation167_spill] sm:$0xff] %v19831_v27 }
 0x516   :  { %v13855_v28 = vpop.f32.mrf.mxu0  ;;  %v5259_v48 = vpop.f32.mrf.mxu1 }
 0x517   :  { %v19833_v32 = vadd.f32 %v13935_v37, %v13855_v28 }
 0x518   :  { %v4862_v11 = vpop.f32.mrf.mxu0  ;;  %v13944_v35 = vpop.f32.mrf.mxu1 }
 0x519   :  { %24976 = vst [vmem:[#allocation169_spill] sm:$0xff] %v19833_v32  ;;  %v19835_v10 = vadd.f32 %v5235_v43, %v4862_v11 }
 0x51a   :  { %v13858_v47 = vpop.f32.mrf.mxu0  ;;  %v5271_v8 = vpop.f32.mrf.mxu1 }
 0x51b   :  { %24977 = vst [vmem:[#allocation182_spill] sm:$0xff] %v19835_v10  ;;  %v19837_v52 = vadd.f32 %v13938_v49, %v13858_v47 }
 0x51c   :  { %v4882_v39 = vpop.f32.mrf.mxu0  ;;  %v13947_v45 = vpop.f32.mrf.mxu1 }
 0x51d   :  { %24978 = vst [vmem:[#allocation92_spill] sm:$0xff] %v19837_v52  ;;  %v19839_v13 = vadd.f32 %v5247_v63, %v4882_v39 }
 0x51e   :  { %v13861_v23 = vpop.f32.mrf.mxu0  ;;  %v5283_v14 = vpop.f32.mrf.mxu1 }
 0x51f   :  { %24979 = vst [vmem:[#allocation122_spill] sm:$0xff] %v19839_v13  ;;  %v19841_v40 = vadd.f32 %v13941_v5, %v13861_v23 }
 0x520   :  { %v4902_v25 = vpop.f32.mrf.mxu0  ;;  %v19845_v38 = vpop.f32.mrf.mxu1 }
 0x521   :  { %24980 = vst [vmem:[#allocation171_spill] sm:$0xff] %v19841_v40  ;;  %v19843_v0 = vadd.f32 %v5259_v48, %v4902_v25 }
 0x522   :  { %v13864_v20 = vpop.f32.mrf.mxu0  ;;  %v19849_v57 = vpop.f32.mrf.mxu1 }
 0x523   :  { %24981 = vst [vmem:[#allocation145_spill] sm:$0xff] %v19843_v0  ;;  %v19847_v36 = vadd.f32 %v13944_v35, %v13864_v20 }
 0x524   :  { %v4922_v41 = vpop.f32.mrf.mxu0  ;;  %v19853_v3 = vpop.f32.mrf.mxu1 }
 0x525   :  { %24982 = vst [vmem:[#allocation184_spill] sm:$0xff] %v19847_v36  ;;  %v19851_v56 = vadd.f32 %v5271_v8, %v4922_v41 }
 0x526   :  { %v13867_v1 = vpop.f32.mrf.mxu0  ;;  %v19857_v24 = vpop.f32.mrf.mxu1 }
 0x527   :  { %24983 = vst [vmem:[#allocation95_spill] sm:$0xff] %v19851_v56  ;;  %v19855_v4 = vadd.f32 %v13947_v45, %v13867_v1 }
 0x528   :  { %v4942_v26 = vpop.f32.mrf.mxu0  ;;  %v19861_v50 = vpop.f32.mrf.mxu1 }
 0x529   :  { %24984 = vst [vmem:[#allocation131_spill] sm:$0xff] %v19855_v4  ;;  %v19859_v9 = vadd.f32 %v5283_v14, %v4942_v26 }
 0x52a   :  { %v13982_v60 = vpop.f32.mrf.mxu0  ;;  %v19863_v46 = vpop.f32.mrf.mxu1 }
 0x52b   :  { %24985 = vst [vmem:[#allocation173_spill] sm:$0xff] %v19859_v9 }
 0x52c   :  { %v5393_v30 = vpop.f32.mrf.mxu0  ;;  %v19865_v37 = vpop.f32.mrf.mxu1 }
 0x52e   :  { %v13985_v6 = vpop.f32.mrf.mxu0  ;;  %v19867_v43 = vpop.f32.mrf.mxu1 }
 0x530   :  { %v19869_v51 = vpop.f32.mrf.mxu0  ;;  %v19871_v49 = vpop.f32.mrf.mxu1 }
 0x532   :  { %v19873_v29 = vpop.f32.mrf.mxu0  ;;  %v19875_v63 = vpop.f32.mrf.mxu1 }
 0x534   :  { %v19877_v33 = vpop.f32.mrf.mxu0  ;;  %v19879_v5 = vpop.f32.mrf.mxu1 }
 0x536   :  { %v19881_v28 = vpop.f32.mrf.mxu0  ;;  %v19883_v48 = vpop.f32.mrf.mxu1 }
 0x538   :  { %v19885_v11 = vpop.f32.mrf.mxu0  ;;  %v19887_v35 = vpop.f32.mrf.mxu1 }
 0x53a   :  { %v19889_v47 = vpop.f32.mrf.mxu0  ;;  %v19891_v8 = vpop.f32.mrf.mxu1 }
 0x53c   :  { %v19893_v39 = vpop.f32.mrf.mxu0  ;;  %v19895_v45 = vpop.f32.mrf.mxu1 }
 0x53e   :  { %v19897_v23 = vpop.f32.mrf.mxu0  ;;  %v19899_v14 = vpop.f32.mrf.mxu1 }
 0x53f   :  { %24986 = vst [vmem:[#allocation98_spill] sm:$0xff] %v19899_v14 }
 0x540   :  { %v19901_v25 = vpop.f32.mrf.mxu0  ;;  %v19903_v20 = vpop.f32.mrf.mxu1 }
 0x541   :  { %24987 = vst [vmem:[#allocation119_spill] sm:$0xff] %v19903_v20 }
 0x542   :  { %v19905_v41 = vpop.f32.mrf.mxu0  ;;  %v19907_v1 = vpop.f32.mrf.mxu1 }
 0x543   :  { %24988 = vst [vmem:[#allocation94_spill] sm:$0xff] %v19907_v1 }
 0x544   :  { %v19909_v26 = vpop.f32.mrf.mxu0  ;;  %v19911_v9 = vpop.f32.mrf.mxu1 }
 0x545   :  { %24989 = vst [vmem:[#allocation146_spill] sm:$0xff] %v19911_v9 }
 0x546   :  { %v19913_v4 = vpop.f32.mrf.mxu0  ;;  %v19915_v56 = vpop.f32.mrf.mxu1 }
 0x547   :  { %24990 = vst [vmem:[#allocation187_spill] sm:$0xff] %v19915_v56 }
 0x548   :  { %v19917_v36 = vpop.f32.mrf.mxu0  ;;  %v19919_v0 = vpop.f32.mrf.mxu1 }
 0x549   :  { %24991 = vst [vmem:[#allocation175_spill] sm:$0xff] %v19919_v0 }
 0x54a   :  { %v19921_v40 = vpop.f32.mrf.mxu0  ;;  %v19923_v13 = vpop.f32.mrf.mxu1 }
 0x54b   :  { %24992 = vst [vmem:[#allocation104_spill] sm:$0xff] %v19923_v13 }
 0x54c   :  { %v19925_v52 = vpop.f32.mrf.mxu0  ;;  %v19927_v10 = vpop.f32.mrf.mxu1 }
 0x54d   :  { %24993 = vst [vmem:[#allocation128_spill] sm:$0xff] %v19925_v52  ;;  %24994 = vst [vmem:[#allocation177_spill] sm:$0xff] %v19927_v10 }
 0x54e   :  { %v19929_v32 = vpop.f32.mrf.mxu0  ;;  %v19931_v27 = vpop.f32.mrf.mxu1 }
 0x54f   :  { %24995 = vst [vmem:[#allocation103_spill] sm:$0xff] %v19929_v32  ;;  %24996 = vst [vmem:[#allocation97_spill] sm:$0xff] %v19931_v27 }
 0x550   :  { %v19933_v9 = vpop.f32.mrf.mxu0  ;;  %v19935_v53 = vpop.f32.mrf.mxu1 }
 0x551   :  { %24997 = vst [vmem:[#allocation147_spill] sm:$0xff] %v19933_v9  ;;  %24998 = vst [vmem:[#allocation179_spill] sm:$0xff] %v19935_v53 }
 0x552   :  { %v19937_v56 = vpop.f32.mrf.mxu0  ;;  %v19939_v58 = vpop.f32.mrf.mxu1 }
 0x553   :  { %24999 = vst [vmem:[#allocation99_spill] sm:$0xff] %v19937_v56  ;;  %25000 = vst [vmem:[#allocation191_spill] sm:$0xff] %v19939_v58 }
 0x554   :  { %v19941_v0 = vpop.f32.mrf.mxu0  ;;  %v19943_v1 = vpop.f32.mrf.mxu1 }
 0x555   :  { %25001 = vst [vmem:[#allocation181_spill] sm:$0xff] %v19941_v0  ;;  %25002 = vst [vmem:[#allocation101_spill] sm:$0xff] %v19943_v1 }
 0x556   :  { %v19945_v13 = vpop.f32.mrf.mxu0  ;;  %v19947_v54 = vpop.f32.mrf.mxu1 }
 0x557   :  { %25003 = vst [vmem:[#allocation148_spill] sm:$0xff] %v19945_v13  ;;  %25004 = vst [vmem:[#allocation192_spill] sm:$0xff] %v19947_v54 }
 0x558   :  { %v19949_v10 = vpop.f32.mrf.mxu0  ;;  %v19951_v32 = vpop.f32.mrf.mxu1 }
 0x559   :  { %25005 = vst [vmem:[#allocation183_spill] sm:$0xff] %v19949_v10  ;;  %25006 = vst [vmem:[#allocation102_spill] sm:$0xff] %v19951_v32 }
 0x55a   :  { %v19953_v27 = vpop.f32.mrf.mxu0  ;;  %v19955_v9 = vpop.f32.mrf.mxu1 }
 0x55b   :  { %25007 = vst [vmem:[#allocation185_spill] sm:$0xff] %v19953_v27  ;;  %25008 = vst [vmem:[#allocation116_spill] sm:$0xff] %v19955_v9  ;;  %v5401_v27 = vadd.f32 %v13982_v60, %v19789_v22  ;;  %v5429_v60 = vadd.f32 %v19873_v29, %v19797_v15 }
 0x55c   :  { %v19957_v53 = vpop.f32.mrf.mxu0  ;;  %v19959_v56 = vpop.f32.mrf.mxu1 }
 0x55d   :  { %25009 = vst [vmem:[#allocation107_spill] sm:$0xff] %v19957_v53  ;;  %25010 = vst [vmem:[#allocation186_spill] sm:$0xff] %v19959_v56  ;;  %v5394_v53 = vadd.f32 %v5393_v30, %v19791_v42  ;;  %v6530_v42 = vld [vmem:[%s23409_s7 + $0x8] sm:$0xff] }
 0x55e   :  { %v19961_v58 = vpop.f32.mrf.mxu0  ;;  %v19963_v0 = vpop.f32.mrf.mxu1 }
 0x55f   :  { %25011 = vst [vmem:[#allocation117_spill] sm:$0xff] %v19961_v58  ;;  %25012 = vst [vmem:[#allocation112_spill] sm:$0xff] %v19963_v0  ;;  %v5415_v0 = vadd.f32 %v13985_v6, %v19793_v16  ;;  %v5700_v22 = vadd.f32 %v19849_v57, %v5394_v53 }
 0x560   :  { %v19965_v1 = vpop.f32.mrf.mxu0  ;;  %v14222_v54 = vpop.f32.mrf.mxu1 }
 0x561   :  { %25013 = vst [vmem:[#allocation149_spill] sm:$0xff] %v19965_v1  ;;  %v5708_v1 = vadd.f32 %v19845_v38, %v5401_v27  ;;  %v5724_v27 = vadd.f32 %v19853_v3, %v5415_v0  ;;  %v5422_v38 = vadd.f32 %v19877_v33, %v19799_v17  ;;  %v5740_v3 = vadd.f32 %v19861_v50, %v5429_v60 }
 0x562   :  { %v19967_v13 = vpop.f32.mrf.mxu0  ;;  %v6339_v32 = vpop.f32.mrf.mxu1  ;;  %v5443_v17 = vadd.f32 %v19881_v28, %v19801_v59  ;;  %v5436_v50 = vadd.f32 %v19885_v11, %v19803_v61 }
 0x563   :  { %25014 = vst [vmem:[#allocation188_spill] sm:$0xff] %v19967_v13 }
 0x564   :  { %v19969_v10 = vpop.f32.mrf.mxu0  ;;  %v14225_v9 = vpop.f32.mrf.mxu1 }
 0x565   :  { %25015 = vst [vmem:[#allocation120_spill] sm:$0xff] %v19969_v10  ;;  %v5408_v10 = vadd.f32 %v19869_v51, %v19795_v21  ;;  %v6529_v21 = vld [vmem:[%s23409_s7] sm:$0xff] }
 0x566   :  { %v19972_v20 = vpop.f32.mrf.mxu0  ;;  %v6351_v58 = vpop.f32.mrf.mxu1 }
 0x568   :  { %v19975_v56 = vpop.f32.mrf.mxu0  ;;  %v14228_v13 = vpop.f32.mrf.mxu1 }
 0x569   :  { %25016 = vst [vmem:[#allocation113_spill] sm:$0xff] %v19975_v56 }
 0x56a   :  { %v14142_v14 = vpop.f32.mrf.mxu0  ;;  %v6363_v56 = vpop.f32.mrf.mxu1 }
 0x56b   :  { %v6073_v52 = vadd.f32 %v14142_v14, %v5708_v1  ;;  %v5716_v14 = vadd.f32 %v19857_v24, %v5408_v10  ;;  %v6531_v10 = vld [vmem:[%s23409_s7 + $0x10] sm:$0xff] }
 0x56c   :  { %v6066_v30 = vpop.f32.mrf.mxu0  ;;  %v14231_v57 = vpop.f32.mrf.mxu1 }
 0x56d   :  { %v6346_v16 = vadd.f32 %v14222_v54, %v6073_v52  ;;  %v6067_v6 = vadd.f32 %v6066_v30, %v5700_v22  ;;  %v6532_v54 = vld [vmem:[%s23409_s7 + $0x18] sm:$0xff]  ;;  %v6534_v30 = vld [vmem:[%s23409_s7 + $0x28] sm:$0xff] }
 0x56e   :  { %v14145_v53 = vpop.f32.mrf.mxu0  ;;  %v6375_v0 = vpop.f32.mrf.mxu1 }
 0x56f   :  { %v6562_v15 = vadd.f32 %v6530_v42, %v6346_v16  ;;  %v6340_v51 = vadd.f32 %v6339_v32, %v6067_v6  ;;  %v6085_v29 = vadd.f32 %v14145_v53, %v5724_v27  ;;  %v5732_v42 = vadd.f32 %v19863_v46, %v5422_v38 }
 0x570   :  { %v6078_v52 = vpop.f32.mrf.mxu0  ;;  %v14234_v22 = vpop.f32.mrf.mxu1  ;;  %v5756_v27 = vadd.f32 %v19865_v37, %v5443_v17  ;;  %v6536_v37 = vld [vmem:[%s23409_s7 + $0x38] sm:$0xff] }
 0x571   :  { %6594 = vst [vmem:[%s23409_s7 + $0x8] sm:$0xff] %v6562_v15  ;;  %v6561_v33 = vadd.f32 %v6529_v21, %v6340_v51  ;;  %v6358_v32 = vadd.f32 %v14225_v9, %v6085_v29  ;;  %v6079_v1 = vadd.f32 %v6078_v52, %v5716_v14  ;;  %v5457_v9 = vadd.f32 %v19889_v47, %v19805_v2  ;;  %v6533_v2 = vld [vmem:[%s23409_s7 + $0x20] sm:$0xff] }
 0x572   :  { %v14148_v24 = vpop.f32.mrf.mxu0  ;;  %v6387_v6 = vpop.f32.mrf.mxu1  ;;  %v5471_v29 = vadd.f32 %v19897_v23, %v19809_v62 }
 0x573   :  { %6593 = vst [vmem:[%s23409_s7] sm:$0xff] %v6561_v33  ;;  %v6564_v59 = vadd.f32 %v6532_v54, %v6358_v32  ;;  %v6352_v28 = vadd.f32 %v6351_v58, %v6079_v1  ;;  %v6097_v60 = vadd.f32 %v14148_v24, %v5740_v3  ;;  %v5450_v58 = vadd.f32 %v19893_v39, %v19807_v7  ;;  %v6538_v32 = vld [vmem:[%s23409_s7 + $0x48] sm:$0xff] }
 0x574   :  { %v6090_v16 = vpop.f32.mrf.mxu0  ;;  %v14237_v38 = vpop.f32.mrf.mxu1  ;;  %v5772_v51 = vadd.f32 %v19871_v49, %v5457_v9  ;;  %v5464_v49 = vadd.f32 %v19901_v25, %v19811_v44  ;;  %v5788_v24 = vadd.f32 %v19879_v5, %v5471_v29  ;;  %v6540_v5 = vld [vmem:[%s23409_s7 + $0x58] sm:$0xff]  ;;  %v5499_v9 = vadd.f32 %v19913_v4, %v19817_v34 }
 0x575   :  { %6596 = vst [vmem:[%s23409_s7 + $0x18] sm:$0xff] %v6564_v59  ;;  %v6563_v61 = vadd.f32 %v6531_v10, %v6352_v28  ;;  %v6370_v46 = vadd.f32 %v14228_v13, %v6097_v60  ;;  %v6091_v11 = vadd.f32 %v6090_v16, %v5732_v42  ;;  %v5748_v13 = vadd.f32 %v19867_v43, %v5436_v50  ;;  %v6535_v43 = vld [vmem:[%s23409_s7 + $0x30] sm:$0xff] }
 0x576   :  { %v14151_v47 = vpop.f32.mrf.mxu0  ;;  %v6399_v39 = vpop.f32.mrf.mxu1  ;;  %v5764_v17 = vadd.f32 %v19875_v63, %v5450_v58  ;;  %v5513_v58 = vadd.f32 %v19921_v40, %v19821_v18  ;;  %v6541_v18 = vld [vmem:[%s23409_s7 + $0x60] sm:$0xff] }
 0x577   :  { %6595 = vst [vmem:[%s23409_s7 + $0x10] sm:$0xff] %v6563_v61  ;;  %v6566_v21 = vadd.f32 %v6534_v30, %v6370_v46  ;;  %v6364_v53 = vadd.f32 %v6363_v56, %v6091_v11  ;;  %v6109_v15 = vadd.f32 %v14151_v47, %v5756_v27 }
 0x578   :  { %v6102_v7 = vpop.f32.mrf.mxu0  ;;  %v14240_v3 = vpop.f32.mrf.mxu1 }
 0x579   :  { %6598 = vst [vmem:[%s23409_s7 + $0x28] sm:$0xff] %v6566_v21  ;;  %v6565_v14 = vadd.f32 %v6533_v2, %v6364_v53  ;;  %v6382_v56 = vadd.f32 %v14231_v57, %v6109_v15  ;;  %v6103_v54 = vadd.f32 %v6102_v7, %v5748_v13  ;;  %v5485_v57 = vadd.f32 %v19905_v41, %v19813_v19  ;;  %v6537_v19 = vld [vmem:[%s23409_s7 + $0x40] sm:$0xff]  ;;  %v6542_v2 = vld [vmem:[%s23409_s7 + $0x68] sm:$0xff] }
 0x57a   :  { %v14154_v52 = vpop.f32.mrf.mxu0  ;;  %v6411_v10 = vpop.f32.mrf.mxu1  ;;  %v5820_v21 = vadd.f32 %v19895_v45, %v5499_v9  ;;  %v25017_v53 = vld [vmem:[#allocation128_spill] sm:$0xff]  ;;  %v6544_v45 = vld [vmem:[%s23409_s7 + $0x78] sm:$0xff] }
 0x57b   :  { %6597 = vst [vmem:[%s23409_s7 + $0x20] sm:$0xff] %v6565_v14  ;;  %v6568_v62 = vadd.f32 %v6536_v37, %v6382_v56  ;;  %v6376_v23 = vadd.f32 %v6375_v0, %v6103_v54  ;;  %v6121_v33 = vadd.f32 %v14154_v52, %v5772_v51  ;;  %v5478_v0 = vadd.f32 %v19909_v26, %v19815_v31  ;;  %v25018_v51 = vld [vmem:[#allocation98_spill] sm:$0xff]  ;;  %v25019_v56 = vld [vmem:[#allocation119_spill] sm:$0xff] }
 0x57c   :  { %v6114_v1 = vpop.f32.mrf.mxu0  ;;  %v14243_v42 = vpop.f32.mrf.mxu1  ;;  %v5804_v60 = vadd.f32 %v19887_v35, %v5485_v57  ;;  %v5492_v35 = vadd.f32 %v19917_v36, %v19819_v55  ;;  %v5506_v15 = vadd.f32 %v25017_v53, %v19823_v12  ;;  %v5836_v54 = vadd.f32 %v25019_v56, %v5513_v58  ;;  %v25021_v52 = vld [vmem:[#allocation103_spill] sm:$0xff] }
 0x57d   :  { %6600 = vst [vmem:[%s23409_s7 + $0x38] sm:$0xff] %v6568_v62  ;;  %v6567_v44 = vadd.f32 %v6535_v43, %v6376_v23  ;;  %v6394_v63 = vadd.f32 %v14234_v22, %v6121_v33  ;;  %v6115_v25 = vadd.f32 %v6114_v1, %v5764_v17  ;;  %v5780_v22 = vadd.f32 %v19883_v48, %v5464_v49  ;;  %v6539_v48 = vld [vmem:[%s23409_s7 + $0x50] sm:$0xff] }
 0x57e   :  { %v14157_v41 = vpop.f32.mrf.mxu0  ;;  %v6423_v26 = vpop.f32.mrf.mxu1  ;;  %v5796_v11 = vadd.f32 %v19891_v8, %v5478_v0  ;;  %v5812_v29 = vadd.f32 %v25018_v51, %v5492_v35  ;;  %v25020_v43 = vld [vmem:[#allocation162_spill] sm:$0xff] }
 0x57f   :  { %6599 = vst [vmem:[%s23409_s7 + $0x30] sm:$0xff] %v6567_v44  ;;  %v6570_v50 = vadd.f32 %v6538_v32, %v6394_v63  ;;  %v6388_v59 = vadd.f32 %v6387_v6, %v6115_v25  ;;  %v6133_v28 = vadd.f32 %v14157_v41, %v5788_v24  ;;  %v6543_v23 = vld [vmem:[%s23409_s7 + $0x70] sm:$0xff]  ;;  %v25024_v44 = vld [vmem:[#allocation147_spill] sm:$0xff] }
 0x580   :  { %v6126_v31 = vpop.f32.mrf.mxu0  ;;  %v14246_v46 = vpop.f32.mrf.mxu1  ;;  %v25022_v32 = vld [vmem:[#allocation94_spill] sm:$0xff]  ;;  %v25026_v41 = vld [vmem:[#allocation99_spill] sm:$0xff] }
 0x581   :  { %6602 = vst [vmem:[%s23409_s7 + $0x48] sm:$0xff] %v6570_v50  ;;  %v6569_v30 = vadd.f32 %v6537_v19, %v6388_v59  ;;  %v6406_v16 = vadd.f32 %v14237_v38, %v6133_v28  ;;  %v6127_v6 = vadd.f32 %v6126_v31, %v5780_v22  ;;  %v5828_v1 = vadd.f32 %v25022_v32, %v5506_v15  ;;  %v25025_v19 = vld [vmem:[#allocation165_spill] sm:$0xff]  ;;  %v25035_v51 = vld [vmem:[#allocation182_spill] sm:$0xff] }
 0x582   :  { %v14160_v61 = vpop.f32.mrf.mxu0  ;;  %v6435_v38 = vpop.f32.mrf.mxu1  ;;  %v6546_v50 = vld [vmem:[%s23409_s7 + $0x88] sm:$0xff] }
 0x583   :  { %6601 = vst [vmem:[%s23409_s7 + $0x40] sm:$0xff] %v6569_v30  ;;  %v6572_v34 = vadd.f32 %v6540_v5, %v6406_v16  ;;  %v6400_v4 = vadd.f32 %v6399_v39, %v6127_v6  ;;  %v6145_v27 = vadd.f32 %v14160_v61, %v5804_v60  ;;  %v25027_v60 = vld [vmem:[#allocation146_spill] sm:$0xff]  ;;  %v25029_v30 = vld [vmem:[#allocation181_spill] sm:$0xff]  ;;  %v6545_v6 = vld [vmem:[%s23409_s7 + $0x80] sm:$0xff] }
 0x584   :  { %v6138_v47 = vpop.f32.mrf.mxu0  ;;  %v14249_v13 = vpop.f32.mrf.mxu1  ;;  %v25039_v32 = vld [vmem:[#allocation177_spill] sm:$0xff] }
 0x585   :  { %6604 = vst [vmem:[%s23409_s7 + $0x58] sm:$0xff] %v6572_v34  ;;  %v6571_v55 = vadd.f32 %v6539_v48, %v6400_v4  ;;  %v6418_v36 = vadd.f32 %v14240_v3, %v6145_v27  ;;  %v6139_v8 = vadd.f32 %v6138_v47, %v5796_v11  ;;  %v5527_v3 = vadd.f32 %v25021_v52, %v25020_v43  ;;  %v6548_v27 = vld [vmem:[%s23409_s7 + $0x98] sm:$0xff]  ;;  %v25038_v43 = vld [vmem:[#allocation185_spill] sm:$0xff] }
 0x586   :  { %v14163_v40 = vpop.f32.mrf.mxu0  ;;  %v6447_v14 = vpop.f32.mrf.mxu1  ;;  %v25031_v47 = vld [vmem:[#allocation175_spill] sm:$0xff] }
 0x587   :  { %6603 = vst [vmem:[%s23409_s7 + $0x50] sm:$0xff] %v6571_v55  ;;  %v6574_v37 = vadd.f32 %v6542_v2, %v6418_v36  ;;  %v6412_v7 = vadd.f32 %v6411_v10, %v6139_v8  ;;  %v6157_v39 = vadd.f32 %v14163_v40, %v5820_v21  ;;  %v25023_v10 = vld [vmem:[#allocation163_spill] sm:$0xff]  ;;  %v5852_v9 = vadd.f32 %v25027_v60, %v5527_v3  ;;  %v25032_v36 = vld [vmem:[#allocation169_spill] sm:$0xff]  ;;  %v25033_v8 = vld [vmem:[#allocation148_spill] sm:$0xff] }
 0x588   :  { %v6150_v12 = vpop.f32.mrf.mxu0  ;;  %v14252_v57 = vpop.f32.mrf.mxu1  ;;  %v5520_v63 = vadd.f32 %v25024_v44, %v25023_v10  ;;  %v5555_v21 = vadd.f32 %v25033_v8, %v25032_v36  ;;  %v6550_v3 = vld [vmem:[%s23409_s7 + $0xa8] sm:$0xff]  ;;  %v25041_v10 = vld [vmem:[#allocation107_spill] sm:$0xff] }
 0x589   :  { %6606 = vst [vmem:[%s23409_s7 + $0x68] sm:$0xff] %v6574_v37  ;;  %v6573_v17 = vadd.f32 %v6541_v18, %v6412_v7  ;;  %v6430_v49 = vadd.f32 %v14243_v42, %v6157_v39  ;;  %v6151_v62 = vadd.f32 %v6150_v12, %v5812_v29  ;;  %v5541_v42 = vadd.f32 %v25026_v41, %v25025_v19  ;;  %v6547_v18 = vld [vmem:[%s23409_s7 + $0x90] sm:$0xff]  ;;  %v25034_v7 = vld [vmem:[#allocation104_spill] sm:$0xff]  ;;  %v25036_v29 = vld [vmem:[#allocation183_spill] sm:$0xff] }
 0x58a   :  { %v14166_v33 = vpop.f32.mrf.mxu0  ;;  %v6459_v28 = vpop.f32.mrf.mxu1  ;;  %v25045_v60 = vld [vmem:[#allocation117_spill] sm:$0xff] }
 0x58b   :  { %6605 = vst [vmem:[%s23409_s7 + $0x60] sm:$0xff] %v6573_v17  ;;  %v6576_v25 = vadd.f32 %v6544_v45, %v6430_v49  ;;  %v6424_v24 = vadd.f32 %v6423_v26, %v6151_v62  ;;  %v6169_v0 = vadd.f32 %v14166_v33, %v5836_v54  ;;  %v25028_v26 = vld [vmem:[#allocation167_spill] sm:$0xff]  ;;  %v5868_v55 = vadd.f32 %v25031_v47, %v5541_v42  ;;  %v6554_v8 = vld [vmem:[%s23409_s7 + $0xc8] sm:$0xff] }
 0x58c   :  { %v6162_v59 = vpop.f32.mrf.mxu0  ;;  %v5534_v16 = vadd.f32 %v25029_v30, %v25028_v26  ;;  %v14255_v61 = vpop.f32.mrf.mxu1  ;;  %v5548_v45 = vadd.f32 %v25036_v29, %v25035_v51  ;;  %v6553_v29 = vld [vmem:[%s23409_s7 + $0xc0] sm:$0xff] }
 0x58d   :  { %6608 = vst [vmem:[%s23409_s7 + $0x78] sm:$0xff] %v6576_v25  ;;  %v6575_v22 = vadd.f32 %v6543_v23, %v6424_v24  ;;  %v6442_v5 = vadd.f32 %v14246_v46, %v6169_v0  ;;  %v6163_v31 = vadd.f32 %v6162_v59, %v5828_v1  ;;  %v25030_v46 = vld [vmem:[#allocation187_spill] sm:$0xff]  ;;  %v5884_v1 = vadd.f32 %v25039_v32, %v5555_v21 }
 0x58e   :  { %v14169_v48 = vpop.f32.mrf.mxu0  ;;  %v5844_v4 = vadd.f32 %v25030_v46, %v5520_v63  ;;  %v6471_v2 = vpop.f32.mrf.mxu1  ;;  %v5860_v39 = vadd.f32 %v25034_v7, %v5534_v16  ;;  %v6549_v63 = vld [vmem:[%s23409_s7 + $0xa0] sm:$0xff]  ;;  %v6551_v16 = vld [vmem:[%s23409_s7 + $0xb0] sm:$0xff]  ;;  %v25048_v46 = vld [vmem:[#allocation149_spill] sm:$0xff] }
 0x58f   :  { %6607 = vst [vmem:[%s23409_s7 + $0x70] sm:$0xff] %v6575_v22  ;;  %v6578_v11 = vadd.f32 %v6546_v50, %v6442_v5  ;;  %v6436_v35 = vadd.f32 %v6435_v38, %v6163_v31  ;;  %v6181_v34 = vadd.f32 %v14169_v48, %v5852_v9  ;;  %v6552_v50 = vld [vmem:[%s23409_s7 + $0xb8] sm:$0xff] }
 0x590   :  { %v6174_v58 = vpop.f32.mrf.mxu0  ;;  %v14258_v37 = vpop.f32.mrf.mxu1  ;;  %v25043_v22 = vld [vmem:[#allocation179_spill] sm:$0xff] }
 0x591   :  { %6610 = vst [vmem:[%s23409_s7 + $0x88] sm:$0xff] %v6578_v11  ;;  %v6577_v53 = vadd.f32 %v6545_v6, %v6436_v35  ;;  %v6454_v38 = vadd.f32 %v14249_v13, %v6181_v34  ;;  %v6175_v15 = vadd.f32 %v6174_v58, %v5844_v4  ;;  %v25037_v13 = vld [vmem:[#allocation92_spill] sm:$0xff]  ;;  %v25044_v31 = vld [vmem:[#allocation171_spill] sm:$0xff]  ;;  %v25047_v34 = vld [vmem:[#allocation145_spill] sm:$0xff] }
 0x592   :  { %v14172_v40 = vpop.f32.mrf.mxu0  ;;  %v5569_v52 = vadd.f32 %v25038_v43, %v25037_v13  ;;  %v6483_v49 = vpop.f32.mrf.mxu1  ;;  %v5583_v9 = vadd.f32 %v25045_v60, %v25044_v31  ;;  %v25046_v11 = vld [vmem:[#allocation191_spill] sm:$0xff]  ;;  %v5576_v4 = vadd.f32 %v25048_v46, %v25047_v34 }
 0x593   :  { %6609 = vst [vmem:[%s23409_s7 + $0x80] sm:$0xff] %v6577_v53  ;;  %v6580_v12 = vadd.f32 %v6548_v27, %v6454_v38  ;;  %v6448_v56 = vadd.f32 %v6447_v14, %v6175_v15  ;;  %v6193_v54 = vadd.f32 %v14172_v40, %v5868_v55  ;;  %v25040_v14 = vld [vmem:[#allocation122_spill] sm:$0xff]  ;;  %v25050_v55 = vld [vmem:[#allocation188_spill] sm:$0xff]  ;;  %v25052_v7 = vld [vmem:[#allocation95_spill] sm:$0xff] }
 0x594   :  { %v6186_v17 = vpop.f32.mrf.mxu0  ;;  %v5562_v44 = vadd.f32 %v25041_v10, %v25040_v14  ;;  %v14261_v24 = vpop.f32.mrf.mxu1  ;;  %v5900_v5 = vadd.f32 %v25043_v22, %v5569_v52  ;;  %v6556_v43 = vld [vmem:[%s23409_s7 + $0xd8] sm:$0xff]  ;;  %v6555_v14 = vld [vmem:[%s23409_s7 + $0xd0] sm:$0xff] }
 0x595   :  { %6612 = vst [vmem:[%s23409_s7 + $0x98] sm:$0xff] %v6580_v12  ;;  %v6579_v62 = vadd.f32 %v6547_v18, %v6448_v56  ;;  %v6466_v23 = vadd.f32 %v14252_v57, %v6193_v54  ;;  %v6187_v33 = vadd.f32 %v6186_v17, %v5860_v39  ;;  %v25042_v57 = vld [vmem:[#allocation97_spill] sm:$0xff] }
 0x596   :  { %v14175_v25 = vpop.f32.mrf.mxu0  ;;  %v5876_v42 = vadd.f32 %v25042_v57, %v5548_v45  ;;  %v6495_v6 = vpop.f32.mrf.mxu1  ;;  %v5892_v35 = vadd.f32 %v25046_v11, %v5562_v44  ;;  %v25051_v18 = vld [vmem:[#allocation101_spill] sm:$0xff]  ;;  %v25057_v44 = vld [vmem:[#allocation116_spill] sm:$0xff]  ;;  %v6560_v11 = vld [vmem:[%s23409_s7 + $0xf8] sm:$0xff] }
 0x597   :  { %6611 = vst [vmem:[%s23409_s7 + $0x90] sm:$0xff] %v6579_v62  ;;  %v6582_v0 = vadd.f32 %v6550_v3, %v6466_v23  ;;  %v6460_v19 = vadd.f32 %v6459_v28, %v6187_v33  ;;  %v6205_v41 = vadd.f32 %v14175_v25, %v5884_v1  ;;  %v5916_v40 = vadd.f32 %v25051_v18, %v5583_v9  ;;  %v25055_v3 = vld [vmem:[#allocation102_spill] sm:$0xff]  ;;  %v25056_v62 = vld [vmem:[#allocation131_spill] sm:$0xff]  ;;  %v25058_v25 = vld [vmem:[#allocation173_spill] sm:$0xff] }
 0x598   :  { %v6198_v59 = vpop.f32.mrf.mxu0  ;;  %v14264_v51 = vpop.f32.mrf.mxu1  ;;  %v5611_v23 = vadd.f32 %v19972_v20, %v25056_v62  ;;  %v6557_v9 = vld [vmem:[%s23409_s7 + $0xe0] sm:$0xff] }
 0x599   :  { %6614 = vst [vmem:[%s23409_s7 + $0xa8] sm:$0xff] %v6582_v0  ;;  %v6581_v26 = vadd.f32 %v6549_v63, %v6460_v19  ;;  %v6478_v30 = vadd.f32 %v14255_v61, %v6205_v41  ;;  %v6199_v28 = vadd.f32 %v6198_v59, %v5876_v42  ;;  %v25049_v61 = vld [vmem:[#allocation184_spill] sm:$0xff]  ;;  %v25059_v0 = vld [vmem:[#allocation113_spill] sm:$0xff] }
 0x59a   :  { %v14178_v48 = vpop.f32.mrf.mxu0  ;;  %v5597_v36 = vadd.f32 %v25050_v55, %v25049_v61  ;;  %v6507_v1 = vpop.f32.mrf.mxu1  ;;  %v5604_v19 = vadd.f32 %v25059_v0, %v25058_v25 }
 0x59b   :  { %6613 = vst [vmem:[%s23409_s7 + $0xa0] sm:$0xff] %v6581_v26  ;;  %v6584_v27 = vadd.f32 %v6552_v50, %v6478_v30  ;;  %v6472_v58 = vadd.f32 %v6471_v2, %v6199_v28  ;;  %v6217_v47 = vadd.f32 %v14178_v48, %v5900_v5  ;;  %v25053_v2 = vld [vmem:[#allocation120_spill] sm:$0xff]  ;;  %v25060_v5 = vld [vmem:[#allocation186_spill] sm:$0xff] }
 0x59c   :  { %v6210_v21 = vpop.f32.mrf.mxu0  ;;  %v5590_v39 = vadd.f32 %v25053_v2, %v25052_v7  ;;  %v5932_v17 = vadd.f32 %v25055_v3, %v5597_v36  ;;  %v5948_v31 = vadd.f32 %v25060_v5, %v5611_v23  ;;  %v14267_v60 = vpop.f32.mrf.mxu1 }
 0x59d   :  { %6616 = vst [vmem:[%s23409_s7 + $0xb8] sm:$0xff] %v6584_v27  ;;  %v6583_v53 = vadd.f32 %v6551_v16, %v6472_v58  ;;  %v6490_v38 = vadd.f32 %v14258_v37, %v6217_v47  ;;  %v6211_v15 = vadd.f32 %v6210_v21, %v5892_v35  ;;  %v25054_v37 = vld [vmem:[#allocation192_spill] sm:$0xff]  ;;  %v6559_v58 = vld [vmem:[%s23409_s7 + $0xf0] sm:$0xff] }
 0x59e   :  { %v14181_v45 = vpop.f32.mrf.mxu0  ;;  %v5908_v13 = vadd.f32 %v25054_v37, %v5576_v4  ;;  %v5924_v63 = vadd.f32 %v25057_v44, %v5590_v39  ;;  %v6519_v27 = vpop.f32.mrf.mxu1 }
 0x59f   :  { %6615 = vst [vmem:[%s23409_s7 + $0xb0] sm:$0xff] %v6583_v53  ;;  %v6586_v12 = vadd.f32 %v6554_v8, %v6490_v38  ;;  %v6484_v56 = vadd.f32 %v6483_v49, %v6211_v15  ;;  %v6229_v54 = vadd.f32 %v14181_v45, %v5916_v40 }
 0x5a0   :  { %v6222_v52 = vpop.f32.mrf.mxu0 }
 0x5a1   :  { %6618 = vst [vmem:[%s23409_s7 + $0xc8] sm:$0xff] %v6586_v12  ;;  %v6585_v33 = vadd.f32 %v6553_v29, %v6484_v56  ;;  %v6502_v32 = vadd.f32 %v14261_v24, %v6229_v54  ;;  %v6223_v49 = vadd.f32 %v6222_v52, %v5908_v13  ;;  %v6558_v24 = vld [vmem:[%s23409_s7 + $0xe8] sm:$0xff] }
 0x5a2   :  { %v14184_v10 = vpop.f32.mrf.mxu0 }
 0x5a3   :  { %6617 = vst [vmem:[%s23409_s7 + $0xc0] sm:$0xff] %v6585_v33  ;;  %v6588_v20 = vadd.f32 %v6556_v43, %v6502_v32  ;;  %v6496_v41 = vadd.f32 %v6495_v6, %v6223_v49  ;;  %v6241_v57 = vadd.f32 %v14184_v10, %v5932_v17  ;;  %v25061_v6 = vld [vmem:[#allocation112_spill] sm:$0xff] }
 0x5a4   :  { %v6234_v42 = vpop.f32.mrf.mxu0  ;;  %v5940_v48 = vadd.f32 %v25061_v6, %v5604_v19 }
 0x5a5   :  { %6620 = vst [vmem:[%s23409_s7 + $0xd8] sm:$0xff] %v6588_v20  ;;  %v6587_v50 = vadd.f32 %v6555_v14, %v6496_v41  ;;  %v6514_v59 = vadd.f32 %v14264_v51, %v6241_v57  ;;  %v6235_v22 = vadd.f32 %v6234_v42, %v5924_v63 }
 0x5a6   :  { %v14187_v26 = vpop.f32.mrf.mxu0 }
 0x5a7   :  { %6619 = vst [vmem:[%s23409_s7 + $0xd0] sm:$0xff] %v6587_v50  ;;  %v6590_v30 = vadd.f32 %v6558_v24, %v6514_v59  ;;  %v6508_v28 = vadd.f32 %v6507_v1, %v6235_v22  ;;  %v6253_v16 = vadd.f32 %v14187_v26, %v5948_v31 }
 0x5a8   :  { %v6246_v35 = vpop.f32.mrf.mxu0 }
 0x5a9   :  { %6622 = vst [vmem:[%s23409_s7 + $0xe8] sm:$0xff] %v6590_v30  ;;  %v6589_v34 = vadd.f32 %v6557_v9, %v6508_v28  ;;  %v6526_v46 = vadd.f32 %v14267_v60, %v6253_v16  ;;  %v6247_v4 = vadd.f32 %v6246_v35, %v5940_v48 }
 0x5ab   :  { %6621 = vst [vmem:[%s23409_s7 + $0xe0] sm:$0xff] %v6589_v34  ;;  %v6592_v47 = vadd.f32 %v6560_v11, %v6526_v46  ;;  %v6520_v61 = vadd.f32 %v6519_v27, %v6247_v4 }
 0x5ad   :  { %6624 = vst [vmem:[%s23409_s7 + $0xf8] sm:$0xff] %v6592_v47  ;;  %v6591_v55 = vadd.f32 %v6559_v58, %v6520_v61 }
 0x5af   :  { %6623 = vst [vmem:[%s23409_s7 + $0xf0] sm:$0xff] %v6591_v55 }
 0x5b0 PF:  { %s11226_s30 = sld [smem:[#allocation3 + $0x1]] }
 0x5b6   :  { %p11227_p7 = scmp.le.s32.totalorder %s11226_s30, 0 }
 0x5b8   :  { %6630 = sbr.rel (%p11227_p7) target bundleno = 2345 (0x929), region = 45 }
 0x5bd   :  { %v25062_v36 = vld [vmem:[#allocation12_spill] sm:$0xff]  ;;  %v25063_v21 = vld [vmem:[#allocation13_spill] sm:$0xff]  ;;  %v15339_v38 = vmov 0   ;;  %v25064_v15 = vld [vmem:[#allocation14_spill] sm:$0xff] }
 0x5be   :  { %v11230_v8 = vadd.s32 4294967264, %v25062_v36  ;;  %v11228_v53 = vadd.s32 4294967264, %v25063_v21  ;;  %15248 = vset.pattern.permute.xlu1 %v15339_v38  ;;  %15247 = vset.pattern.permute.xlu0 %v15339_v38  ;;  %v11231_v18 = vadd.s32 4294967264, %v25064_v15  ;;  %v25065_v40 = vld [vmem:[#allocation15_spill] sm:$0xff]  ;;  %v6645_v39 = vld [vmem:[%s23407_s5 + $0x70] sm:$0xff]  ;;  %v6644_v51 = vld [vmem:[%s23407_s5 + $0x68] sm:$0xff] }
 0x5bf   :  { %v11229_v7 = vadd.s32 4294967264, %v25065_v40  ;;  %v6646_v2 = vld [vmem:[%s23407_s5 + $0x78] sm:$0xff]  ;;  %v25066_v29 = vld [vmem:[#allocation16_spill] sm:$0xff]  ;;  %v25067_v12 = vld [vmem:[#allocation17_spill] sm:$0xff]  ;;  %v20283_v43 = vand.u32 4294901760, %v6645_v39  ;;  %v20285_v52 = vand.u32 4294901760, %v6644_v51 }
 0x5c0   :  { %6702 = vperm.xlu1 %15248, %v11230_v8   ;;  %6696 = vperm.xlu0 %15247, %v11228_v53   ;;  %v11233_v45 = vadd.s32 4294967264, %v25066_v29  ;;  %v11232_v56 = vadd.s32 4294967264, %v25067_v12  ;;  %v6643_v54 = vld [vmem:[%s23407_s5 + $0x60] sm:$0xff]  ;;  %v6642_v37 = vld [vmem:[%s23407_s5 + $0x58] sm:$0xff]  ;;  %v20281_v13 = vand.u32 4294901760, %v6646_v2  ;;  %v25068_v3 = vld [vmem:[#allocation18_spill] sm:$0xff] }
 0x5c1   :  { %v11235_v17 = vadd.s32 4294967264, %v25068_v3  ;;  %v20288_v62 = vand.u32 4294901760, %v6643_v54  ;;  %v20290_v23 = vand.u32 4294901760, %v6642_v37  ;;  %v6641_v33 = vld [vmem:[%s23407_s5 + $0x50] sm:$0xff]  ;;  %v25069_v32 = vld [vmem:[#allocation19_spill] sm:$0xff]  ;;  %v20300_v14 = vsub.f32 %v6645_v39, %v20283_v43  ;;  %v6640_v20 = vld [vmem:[%s23407_s5 + $0x48] sm:$0xff] }
 0x5c2   :  { %v11234_v49 = vadd.s32 4294967264, %v25069_v32  ;;  %v20297_v1 = vsub.f32 %v6646_v2, %v20281_v13  ;;  %v20303_v10 = vsub.f32 %v6644_v51, %v20285_v52  ;;  %14268 = vmatprep.subr.mxu0 %v20281_v13  ;;  %v20319_v19 = vand.u32 4294901760, %v6641_v33  ;;  %v25070_v57 = vld [vmem:[#allocation20_spill] sm:$0xff]  ;;  %v25071_v42 = vld [vmem:[#allocation21_spill] sm:$0xff]  ;;  %v6638_v48 = vld [vmem:[%s23407_s5 + $0x38] sm:$0xff] }
 0x5c3   :  { %v20306_v44 = vsub.f32 %v6643_v54, %v20288_v62  ;;  %v20313_v25 = vand.u32 4294901760, %v20300_v14  ;;  %14269 = vmatpush3.msra.mxu0 %v20281_v13  ;;  %v20325_v41 = vsub.f32 %v6642_v37, %v20290_v23  ;;  %v11237_v24 = vadd.s32 4294967264, %v25070_v57  ;;  %v6639_v5 = vld [vmem:[%s23407_s5 + $0x40] sm:$0xff]  ;;  %v25072_v11 = vld [vmem:[#allocation22_spill] sm:$0xff]  ;;  %v25073_v34 = vld [vmem:[#allocation23_spill] sm:$0xff] }
 0x5c4   :  { %6705 = vperm.xlu1 %15248, %v11231_v18   ;;  %6699 = vperm.xlu0 %15247, %v11229_v7   ;;  %v20310_v63 = vand.u32 4294901760, %v20297_v1  ;;  %v20316_v0 = vand.u32 4294901760, %v20303_v10  ;;  %v11236_v50 = vadd.s32 4294967264, %v25071_v42  ;;  %v20341_v60 = vand.u32 4294901760, %v6640_v20  ;;  %v6637_v55 = vld [vmem:[%s23407_s5 + $0x30] sm:$0xff]  ;;  %v25075_v21 = vld [vmem:[#allocation24_spill] sm:$0xff] }
 0x5c5   :  { %14270 = vmatprep.subr.mxu0 %v20283_v43  ;;  %v7299_v22 = vsub.f32 %v20300_v14, %v20313_v25  ;;  %v20338_v31 = vand.u32 4294901760, %v20306_v44  ;;  %v20346_v30 = vsub.f32 %v6641_v33, %v20319_v19  ;;  %v20350_v16 = vand.u32 4294901760, %v20325_v41  ;;  %v25076_v38 = vld [vmem:[#allocation25_spill] sm:$0xff]  ;;  %v25079_v54 = vld [vmem:[#allocation26_spill] sm:$0xff]  ;;  %v25080_v3 = vld [vmem:[#allocation27_spill] sm:$0xff] }
 0x5c6   :  { %v7292_v59 = vsub.f32 %v20297_v1, %v20310_v63  ;;  %14271 = vmatpush3.msra.mxu0 %v20283_v43  ;;  %v7306_v26 = vsub.f32 %v20303_v10, %v20316_v0  ;;  %v20353_v6 = vand.u32 4294901760, %v6639_v5  ;;  %v11239_v35 = vadd.s32 4294967264, %v25072_v11  ;;  %v6636_v18 = vld [vmem:[%s23407_s5 + $0x28] sm:$0xff] }
 0x5c7   :  { %14272 = vmatprep.subr.mxu0 %v20285_v52  ;;  %v7300_v28 = vand.u32 4294901760, %v7299_v22  ;;  %v11238_v46 = vadd.s32 4294967264, %v25073_v34  ;;  %v7313_v4 = vsub.f32 %v20306_v44, %v20338_v31  ;;  %v20363_v27 = vsub.f32 %v6640_v20, %v20341_v60 }
 0x5c8   :  { %6711 = vperm.xlu1 %15248, %v11233_v45   ;;  %6708 = vperm.xlu0 %15247, %v11232_v56   ;;  %v7293_v9 = vand.u32 4294901760, %v7292_v59  ;;  %v7307_v58 = vand.u32 4294901760, %v7306_v26  ;;  %v20367_v47 = vand.u32 4294901760, %v20346_v30  ;;  %v20370_v61 = vand.u32 4294901760, %v6638_v48  ;;  %v6635_v56 = vld [vmem:[%s23407_s5 + $0x20] sm:$0xff]  ;;  %v25082_v59 = vld [vmem:[#allocation30_spill] sm:$0xff] }
 0x5c9   :  { %14273 = vmatpush3.msra.mxu0 %v20285_v52  ;;  %v7320_v36 = vsub.f32 %v20325_v41, %v20350_v16  ;;  %v20378_v8 = vsub.f32 %v6639_v5, %v20353_v6  ;;  %v11241_v53 = vadd.s32 4294967264, %v25075_v21  ;;  %v11240_v15 = vadd.s32 4294967264, %v25076_v38  ;;  %v25083_v5 = vld [vmem:[#allocation31_spill] sm:$0xff]  ;;  %v6633_v26 = vld [vmem:[%s23407_s5 + $0x10] sm:$0xff] }
 0x5ca   :  { %14348 = vmatprep.subr.mxu1 %v7293_v9  ;;  %14274 = vmatprep.subr.mxu0 %v20288_v62  ;;  %25074 = vst [vmem:[#allocation193_spill] sm:$0xff] %v20367_v47  ;;  %v7314_v40 = vand.u32 4294901760, %v7313_v4  ;;  %v20387_v7 = vand.u32 4294901760, %v20363_v27  ;;  %v20390_v2 = vand.u32 4294901760, %v6637_v55  ;;  %v7327_v39 = vsub.f32 %v20346_v30, %v20367_v47 }
 0x5cb   :  { %14349 = vmatpush3.msra.mxu1 %v7293_v9  ;;  %14275 = vmatpush3.msra.mxu0 %v20288_v62  ;;  %v20395_v51 = vsub.f32 %v6638_v48, %v20370_v61  ;;  %v7321_v29 = vand.u32 4294901760, %v7320_v36  ;;  %v20399_v45 = vand.u32 4294901760, %v20378_v8  ;;  %v20402_v12 = vand.u32 4294901760, %v6636_v18  ;;  %v25086_v36 = vld [vmem:[#allocation34_spill] sm:$0xff] }
 0x5cc   :  { %6717 = vperm.xlu1 %15248, %v11235_v17   ;;  %6714 = vperm.xlu0 %15247, %v11234_v49   ;;  %25077 = vst [vmem:[#allocation194_spill] sm:$0xff] %v20387_v7  ;;  %v11243_v37 = vadd.s32 4294967264, %v25079_v54  ;;  %v11242_v17 = vadd.s32 4294967264, %v25080_v3  ;;  %v7334_v33 = vsub.f32 %v20363_v27, %v20387_v7  ;;  %v20412_v32 = vsub.f32 %v6637_v55, %v20390_v2  ;;  %v6632_v55 = vld [vmem:[%s23407_s5 + $0x8] sm:$0xff]  ;;  %v25089_v3 = vld [vmem:[#allocation38_spill] sm:$0xff] }
 0x5cd   :  { %14350 = vmatprep.subr.mxu1 %v7300_v28  ;;  %14276 = vmatprep.subr.mxu0 %v20290_v23  ;;  %25078 = vst [vmem:[#allocation195_spill] sm:$0xff] %v20399_v45  ;;  %v7328_v49 = vand.u32 4294901760, %v7327_v39  ;;  %v20416_v20 = vand.u32 4294901760, %v20395_v51  ;;  %v20419_v57 = vand.u32 4294901760, %v6635_v56  ;;  %v7341_v42 = vsub.f32 %v20378_v8, %v20399_v45 }
 0x5ce   :  { %14351 = vmatpush3.msra.mxu1 %v7300_v28  ;;  %14277 = vmatpush3.msra.mxu0 %v20290_v23  ;;  %v11245_v22 = vadd.s32 4294967264, %v25082_v59  ;;  %v11244_v9 = vadd.s32 4294967264, %v25083_v5  ;;  %v7335_v28 = vand.u32 4294901760, %v7334_v33  ;;  %v20436_v48 = vand.u32 4294901760, %v20412_v32  ;;  %v25090_v33 = vld [vmem:[#allocation39_spill] sm:$0xff] }
 0x5cf   :  { %14352 = vmatprep.subr.mxu1 %v7307_v58  ;;  %14278 = vmatprep.subr.mxu0 %v20319_v19  ;;  %25081 = vst [vmem:[#allocation196_spill] sm:$0xff] %v20416_v20  ;;  %v20444_v34 = vsub.f32 %v6635_v56, %v20419_v57  ;;  %v11247_v21 = vadd.s32 4294967264, %v25086_v36  ;;  %v6631_v56 = vld [vmem:[%s23407_s5] sm:$0xff] }
 0x5d0   :  { %6723 = vperm.xlu1 %15248, %v11237_v24   ;;  %6720 = vperm.xlu0 %15247, %v11236_v50   ;;  %v6634_v24 = vld [vmem:[%s23407_s5 + $0x18] sm:$0xff]  ;;  %v20427_v50 = vsub.f32 %v6636_v18, %v20402_v12  ;;  %25084 = vst [vmem:[#allocation197_spill] sm:$0xff] %v20436_v48  ;;  %v20485_v59 = vand.u32 4294901760, %v6631_v56 }
 0x5d1   :  { %14353 = vmatpush3.msra.mxu1 %v7307_v58  ;;  %14279 = vmatpush3.msra.mxu0 %v20319_v19  ;;  %v20439_v11 = vand.u32 4294901760, %v6634_v24  ;;  %v20451_v58 = vand.u32 4294901760, %v6633_v26  ;;  %v20465_v39 = vand.u32 4294901760, %v20444_v34 }
 0x5d2   :  { %14354 = vmatprep.subr.mxu1 %v7314_v40  ;;  %14280 = vmatprep.subr.mxu0 %v20341_v60  ;;  %v20448_v4 = vand.u32 4294901760, %v20427_v50 }
 0x5d3   :  { %14355 = vmatpush3.msra.mxu1 %v7314_v40  ;;  %14281 = vmatpush3.msra.mxu0 %v20341_v60  ;;  %v20461_v18 = vsub.f32 %v6634_v24, %v20439_v11  ;;  %25088 = vst [vmem:[#allocation199_spill] sm:$0xff] %v20465_v39 }
 0x5d4   :  { %6729 = vperm.xlu1 %15248, %v11239_v35   ;;  %6726 = vperm.xlu0 %15247, %v11238_v46   ;;  %v7348_v35 = vsub.f32 %v20395_v51, %v20416_v20  ;;  %v7342_v46 = vand.u32 4294901760, %v7341_v42  ;;  %25085 = vst [vmem:[#allocation198_spill] sm:$0xff] %v20448_v4  ;;  %v7362_v54 = vsub.f32 %v20427_v50, %v20448_v4 }
 0x5d5   :  { %14356 = vmatprep.subr.mxu1 %v7321_v29  ;;  %14282 = vmatprep.subr.mxu0 %v20353_v6  ;;  %v20482_v42 = vand.u32 4294901760, %v20461_v18 }
 0x5d6   :  { %14357 = vmatpush3.msra.mxu1 %v7321_v29  ;;  %14283 = vmatpush3.msra.mxu0 %v20353_v6  ;;  %v7349_v40 = vand.u32 4294901760, %v7348_v35  ;;  %v20468_v29 = vand.u32 4294901760, %v6632_v55 }
 0x5d7   :  { %14358 = vmatprep.subr.mxu1 %v7328_v49  ;;  %14284 = vmatprep.subr.mxu0 %v20370_v61  ;;  %25091 = vst [vmem:[#allocation200_spill] sm:$0xff] %v20482_v42 }
 0x5d8   :  { %6735 = vperm.xlu1 %15248, %v11241_v53   ;;  %6732 = vperm.xlu0 %15247, %v11240_v15   ;;  %v25087_v53 = vld [vmem:[#allocation35_spill] sm:$0xff]  ;;  %v7355_v15 = vsub.f32 %v20412_v32, %v20436_v48  ;;  %v20490_v5 = vsub.f32 %v6632_v55, %v20468_v29  ;;  %v7376_v55 = vsub.f32 %v20461_v18, %v20482_v42 }
 0x5d9   :  { %14359 = vmatpush3.msra.mxu1 %v7328_v49  ;;  %14285 = vmatpush3.msra.mxu0 %v20370_v61  ;;  %v11246_v38 = vadd.s32 4294967264, %v25087_v53  ;;  %v11248_v49 = vadd.s32 4294967264, %v25090_v33 }
 0x5da   :  { %14360 = vmatprep.subr.mxu1 %v7335_v28  ;;  %14286 = vmatprep.subr.mxu0 %v20390_v2  ;;  %v7356_v24 = vand.u32 4294901760, %v7355_v15 }
 0x5db   :  { %14361 = vmatpush3.msra.mxu1 %v7335_v28  ;;  %14287 = vmatpush3.msra.mxu0 %v20390_v2  ;;  %v25093_v28 = vld [vmem:[#allocation41_spill] sm:$0xff] }
 0x5dc   :  { %6741 = vperm.xlu1 %15248, %v11243_v37   ;;  %6738 = vperm.xlu0 %15247, %v11242_v17   ;;  %v20476_v37 = vsub.f32 %v6633_v26, %v20451_v58  ;;  %v11249_v17 = vadd.s32 4294967264, %v25089_v3  ;;  %v11251_v35 = vadd.s32 4294967264, %v25093_v28  ;;  %v25100_v28 = vld [vmem:[#allocation49_spill] sm:$0xff] }
 0x5dd   :  { %14362 = vmatprep.subr.mxu1 %v7342_v46  ;;  %14288 = vmatprep.subr.mxu0 %v20402_v12 }
 0x5de   :  { %14363 = vmatpush3.msra.mxu1 %v7342_v46  ;;  %14289 = vmatpush3.msra.mxu0 %v20402_v12  ;;  %v20494_v26 = vand.u32 4294901760, %v20476_v37  ;;  %v25094_v46 = vld [vmem:[#allocation42_spill] sm:$0xff] }
 0x5df   :  { %14364 = vmatprep.subr.mxu1 %v7349_v40  ;;  %14290 = vmatprep.subr.mxu0 %v20419_v57  ;;  %v11250_v36 = vadd.s32 4294967264, %v25094_v46 }
 0x5e0   :  { %6747 = vperm.xlu1 %15248, %v11245_v22   ;;  %6744 = vperm.xlu0 %15247, %v11244_v9   ;;  %v7369_v22 = vsub.f32 %v20444_v34, %v20465_v39  ;;  %v7363_v9 = vand.u32 4294901760, %v7362_v54  ;;  %25092 = vst [vmem:[#allocation201_spill] sm:$0xff] %v20494_v26  ;;  %v7383_v15 = vsub.f32 %v20476_v37, %v20494_v26  ;;  %v25097_v54 = vld [vmem:[#allocation46_spill] sm:$0xff] }
 0x5e1   :  { %14365 = vmatpush3.msra.mxu1 %v7349_v40  ;;  %14291 = vmatpush3.msra.mxu0 %v20419_v57  ;;  %v25096_v40 = vld [vmem:[#allocation45_spill] sm:$0xff]  ;;  %v11252_v3 = vadd.s32 4294967264, %v25097_v54 }
 0x5e2   :  { %14366 = vmatprep.subr.mxu1 %v7356_v24  ;;  %14292 = vmatprep.subr.mxu0 %v20439_v11  ;;  %v7370_v53 = vand.u32 4294901760, %v7369_v22  ;;  %v25099_v22 = vld [vmem:[#allocation48_spill] sm:$0xff]  ;;  %v25103_v54 = vld [vmem:[#allocation53_spill] sm:$0xff] }
 0x5e3   :  { %14367 = vmatpush3.msra.mxu1 %v7356_v24  ;;  %14293 = vmatpush3.msra.mxu0 %v20439_v11  ;;  %v7384_v24 = vand.u32 4294901760, %v7383_v15  ;;  %v25102_v15 = vld [vmem:[#allocation52_spill] sm:$0xff] }
 0x5e4   :  { %6753 = vperm.xlu1 %15248, %v11247_v21   ;;  %6750 = vperm.xlu0 %15247, %v11246_v38   ;;  %v20502_v21 = vsub.f32 %v6631_v56, %v20485_v59  ;;  %v20506_v38 = vand.u32 4294901760, %v20490_v5  ;;  %v11253_v56 = vadd.s32 4294967264, %v25096_v40  ;;  %v11256_v40 = vadd.s32 4294967264, %v25102_v15 }
 0x5e5   :  { %14368 = vmatprep.subr.mxu1 %v7363_v9  ;;  %14294 = vmatprep.subr.mxu0 %v20451_v58 }
 0x5e6   :  { %25095 = vst [vmem:[#allocation202_spill] sm:$0xff] %v20506_v38  ;;  %14369 = vmatpush3.msra.mxu1 %v7363_v9  ;;  %v20515_v33 = vand.u32 4294901760, %v20502_v21  ;;  %14295 = vmatpush3.msra.mxu0 %v20451_v58  ;;  %v11255_v9 = vadd.s32 4294967264, %v25099_v22 }
 0x5e7   :  { %14370 = vmatprep.subr.mxu1 %v7370_v53  ;;  %14296 = vmatprep.subr.mxu0 %v20468_v29 }
 0x5e8   :  { %6759 = vperm.xlu1 %15248, %v11249_v17   ;;  %6756 = vperm.xlu0 %15247, %v11248_v49   ;;  %v7377_v17 = vand.u32 4294901760, %v7376_v55  ;;  %25098 = vst [vmem:[#allocation203_spill] sm:$0xff] %v20515_v33  ;;  %v7390_v49 = vsub.f32 %v20490_v5, %v20506_v38  ;;  %v7397_v46 = vsub.f32 %v20502_v21, %v20515_v33  ;;  %v25101_v55 = vld [vmem:[#allocation51_spill] sm:$0xff] }
 0x5e9   :  { %14371 = vmatpush3.msra.mxu1 %v7370_v53  ;;  %14297 = vmatpush3.msra.mxu0 %v20468_v29  ;;  %v11257_v53 = vadd.s32 4294967264, %v25101_v55 }
 0x5ea   :  { %14372 = vmatprep.subr.mxu1 %v7377_v17  ;;  %14298 = vmatprep.subr.mxu0 %v20485_v59 }
 0x5eb   :  { %14373 = vmatpush3.msra.mxu1 %v7377_v17  ;;  %14299 = vmatpush3.msra.mxu0 %v20485_v59  ;;  %v25104_v17 = vld [vmem:[#allocation54_spill] sm:$0xff] }
 0x5ec   :  { %6765 = vperm.xlu1 %15248, %v11251_v35   ;;  %6762 = vperm.xlu0 %15247, %v11250_v36   ;;  %v11254_v35 = vadd.s32 4294967264, %v25100_v28  ;;  %v7391_v36 = vand.u32 4294901760, %v7390_v49  ;;  %v11258_v49 = vadd.s32 4294967264, %v25104_v17  ;;  %v23868_v28 = vmov 0.0  }
 0x5ed   :  { %14374 = vmatprep.subr.mxu1 %v7384_v24  ;;  %14428 = vmatprep.subr.mxu0 %v20297_v1  ;;  %v25112_v17 = vmov 0.0  }
 0x5ee   :  { %14375 = vmatpush3.msra.mxu1 %v7384_v24  ;;  %v25107_v24 = vld [vmem:[#allocation55_spill] sm:$0xff] }
 0x5ef   :  { %14376 = vmatprep.subr.mxu1 %v7391_v36 }
 0x5f0   :  { %6771 = vperm.xlu1 %15248, %v11253_v56   ;;  %6768 = vperm.xlu0 %15247, %v11252_v3   ;;  %v7398_v56 = vand.u32 4294901760, %v7397_v46  ;;  %v11259_v3 = vadd.s32 4294967264, %v25103_v54 }
 0x5f1   :  { %14377 = vmatpush3.msra.mxu1 %v7391_v36  ;;  %v23873_v36 = vmov 1.0  }
 0x5f2   :  { %14378 = vmatprep.subr.mxu1 %v7398_v56 }
 0x5f3   :  { %14379 = vmatpush3.msra.mxu1 %v7398_v56 }
 0x5f4   :  { %6777 = vperm.xlu1 %15248, %v11255_v9   ;;  %6774 = vperm.xlu0 %15247, %v11254_v35  }
 0x5f5   :  { %14508 = vmatprep.subr.mxu1 %v20281_v13 }
 0x5f8   :  { %6783 = vperm.xlu1 %15248, %v11257_v53   ;;  %6780 = vperm.xlu0 %15247, %v11256_v40  }
 0x5fc   :  { %6789 = vperm.xlu1 %15248, %v11259_v3   ;;  %6786 = vperm.xlu0 %15247, %v11258_v49  }
 0x63b   :  { %v20534_v22 = vpop.permute.xlu1 %6702  ;;  %v20536_v9 = vpop.permute.xlu0 %6696 }
 0x63c   :  { %25105 = vst [vmem:[#allocation204_spill] sm:$0xff] %v20534_v22  ;;  %25106 = vst [vmem:[#allocation205_spill] sm:$0xff] %v20536_v9  ;;  %vm6793_vm2 = vcmp.eq.s32.totalorder %v20534_v22, %v25107_v24  ;;  %vm6791_vm4 = vcmp.eq.s32.totalorder %v20536_v9, %v25107_v24  ;;  %v25113_v22 = vmov 1.0  }
 0x63d   :  { %v11262_v35 = vsel %vm6793_vm2, 1.0, %v23868_v28  ;;  %v11260_v46 = vsel %vm6791_vm4, 1.0, %v23868_v28  ;;  %14380 = vmatprep.mubr.msk.f32.mxu1 %vm6791_vm4, %v23873_v36 }
 0x63e   :  { %v20554_v55 = vsub.f32 %v11262_v35, %v11262_v35  ;;  %v20556_v53 = vsub.f32 %v11260_v46, %v11260_v46 }
 0x63f   :  { %v20558_v15 = vpop.permute.xlu1 %6705  ;;  %v20560_v40 = vpop.permute.xlu0 %6699 }
 0x640   :  { %25108 = vst [vmem:[#allocation206_spill] sm:$0xff] %v20558_v15  ;;  %25109 = vst [vmem:[#allocation207_spill] sm:$0xff] %v20560_v40  ;;  %vm6794_vm5 = vcmp.eq.s32.totalorder %v20558_v15, %v25107_v24  ;;  %vm6792_vm9 = vcmp.eq.s32.totalorder %v20560_v40, %v25107_v24  ;;  %v23872_v56 = vand.u32 4294901760, %v20556_v53 }
 0x641   :  { %v11263_v54 = vsel %vm6794_vm5, 1.0, %v23868_v28  ;;  %v11261_v3 = vsel %vm6792_vm9, 1.0, %v23868_v28  ;;  %14381 = vmatmul.mubr.msk.f32.vlgmr.msra.gmra.mxu1 %vm6792_vm9, %v23873_v36 }
 0x642   :  { %v20580_v49 = vsub.f32 %v11263_v54, %v11263_v54  ;;  %v20582_v35 = vsub.f32 %v11261_v3, %v11261_v3  ;;  %14383 = vmatprep.mubr.msk.f32.mxu1 %vm6793_vm2, %v23873_v36  ;;  %v6971_v46 = vsub.f32 %v20556_v53, %v23872_v56  ;;  %14509 = vmatpush3.msra.mxu1 %v20281_v13 }
 0x643   :  { %v20591_v28 = vpop.permute.xlu1 %6711  ;;  %v20593_v33 = vpop.permute.xlu0 %6708  ;;  %14510 = vmatprep.subr.mxu1 %v20283_v43 }
 0x644   :  { %25110 = vst [vmem:[#allocation208_spill] sm:$0xff] %v20591_v28  ;;  %25111 = vst [vmem:[#allocation209_spill] sm:$0xff] %v20593_v33  ;;  %vm6796_vm10 = vcmp.eq.s32.totalorder %v20591_v28, %v25107_v24  ;;  %vm6795_vm11 = vcmp.eq.s32.totalorder %v20593_v33, %v25107_v24  ;;  %v6972_v54 = vand.u32 4294901760, %v6971_v46  ;;  %v25114_v46 = vand.u32 4294901760, %v20554_v55  ;;  %14511 = vmatpush3.msra.mxu1 %v20283_v43 }
 0x645   :  { %v11265_v56 = vsel %vm6796_vm10, 1.0, %v25112_v17  ;;  %v11264_v36 = vsel %vm6795_vm11, 1.0, %v25112_v17  ;;  %14384 = vmatmul.mubr.msk.f32.gmra.mxu1 %vm6794_vm5, %v25113_v22  ;;  %v23891_v40 = vand.u32 4294901760, %v20580_v49  ;;  %v25115_v26 = vand.u32 4294901760, %v20582_v35  ;;  %14512 = vmatprep.subr.mxu1 %v20285_v52 }
 0x646   :  { %v6991_v3 = vsub.f32 %v20554_v55, %v25114_v46  ;;  %v20618_v38 = vsub.f32 %v11265_v56, %v11265_v56  ;;  %v20620_v9 = vsub.f32 %v11264_v36, %v11264_v36  ;;  %14300 = vmatprep.mubr.f32.mxu0 %v6972_v54  ;;  %14386 = vmatprep.mubr.msk.f32.mxu1 %vm6795_vm11, %v25113_v22 }
 0x647   :  { %v6981_v15 = vsub.f32 %v20582_v35, %v25115_v26  ;;  %v20629_v42 = vpop.permute.xlu1 %6717  ;;  %v20631_v39 = vpop.permute.xlu0 %6714  ;;  %v7001_v56 = vsub.f32 %v20580_v49, %v23891_v40  ;;  %14513 = vmatpush3.msra.mxu1 %v20285_v52 }
 0x648   :  { %25116 = vst [vmem:[#allocation210_spill] sm:$0xff] %v20629_v42  ;;  %25117 = vst [vmem:[#allocation211_spill] sm:$0xff] %v20631_v39  ;;  %vm6798_vm13 = vcmp.eq.s32.totalorder %v20629_v42, %v25107_v24  ;;  %vm6797_vm0 = vcmp.eq.s32.totalorder %v20631_v39, %v25107_v24  ;;  %v23900_v40 = vand.u32 4294901760, %v20618_v38  ;;  %v25118_v4 = vand.u32 4294901760, %v20620_v9  ;;  %14514 = vmatprep.subr.mxu1 %v20288_v62 }
 0x649   :  { %v6982_v36 = vand.u32 4294901760, %v6981_v15  ;;  %v11267_v26 = vsel %vm6798_vm13, 1.0, %v25112_v17  ;;  %v11266_v46 = vsel %vm6797_vm0, 1.0, %v25112_v17  ;;  %14387 = vmatmul.mubr.msk.f32.gmra.mxu1 %vm6796_vm10, %v25113_v22  ;;  %v6992_v15 = vand.u32 4294901760, %v6991_v3 }
 0x64a   :  { %v20656_v54 = vsub.f32 %v11267_v26, %v11267_v26  ;;  %v20658_v33 = vsub.f32 %v11266_v46, %v11266_v46  ;;  %14389 = vmatprep.mubr.msk.f32.mxu1 %vm6797_vm0, %v25113_v22  ;;  %v7011_v48 = vsub.f32 %v20620_v9, %v25118_v4  ;;  %v7002_v26 = vand.u32 4294901760, %v7001_v56  ;;  %14515 = vmatpush3.msra.mxu1 %v20288_v62 }
 0x64b   :  { %14301 = vmatmul.mubr.f32.vlgmr.msra.gmra.mxu0 %v6982_v36  ;;  %v20668_v28 = vpop.permute.xlu1 %6723  ;;  %v20670_v3 = vpop.permute.xlu0 %6720  ;;  %v7021_v36 = vsub.f32 %v20618_v38, %v23900_v40  ;;  %14516 = vmatprep.subr.mxu1 %v20290_v23 }
 0x64c   :  { %14429 = vmatpush3.msra.mxu0 %v20297_v1  ;;  %25119 = vst [vmem:[#allocation212_spill] sm:$0xff] %v20668_v28  ;;  %25120 = vst [vmem:[#allocation213_spill] sm:$0xff] %v20670_v3  ;;  %14303 = vmatprep.mubr.f32.mxu0 %v6992_v15  ;;  %vm6800_vm1 = vcmp.eq.s32.totalorder %v20668_v28, %v25107_v24  ;;  %vm6799_vm3 = vcmp.eq.s32.totalorder %v20670_v3, %v25107_v24  ;;  %v7012_v4 = vand.u32 4294901760, %v7011_v48 }
 0x64d   :  { %14430 = vmatprep.subr.mxu0 %v20300_v14  ;;  %v23908_v1 = vand.u32 4294901760, %v20658_v33  ;;  %v11269_v56 = vsel %vm6800_vm1, 1.0, %v25112_v17  ;;  %v11268_v46 = vsel %vm6799_vm3, 1.0, %v25112_v17  ;;  %14390 = vmatmul.mubr.msk.f32.gmra.mxu1 %vm6798_vm13, %v25113_v22  ;;  %v23907_v48 = vand.u32 4294901760, %v20656_v54 }
 0x64e   :  { %14431 = vmatpush3.msra.mxu0 %v20300_v14  ;;  %v20696_v15 = vsub.f32 %v11269_v56, %v11269_v56  ;;  %v20698_v40 = vsub.f32 %v11268_v46, %v11268_v46  ;;  %14392 = vmatprep.mubr.msk.f32.mxu1 %vm6799_vm3, %v25113_v22  ;;  %v7022_v14 = vand.u32 4294901760, %v7021_v36 }
 0x64f   :  { %14304 = vmatmul.mubr.f32.gmra.mxu0 %v7002_v26  ;;  %v7031_v39 = vsub.f32 %v20658_v33, %v23908_v1  ;;  %v20707_v42 = vpop.permute.xlu1 %6729  ;;  %v20709_v20 = vpop.permute.xlu0 %6726  ;;  %14432 = vmatprep.subr.mxu0 %v20303_v10  ;;  %v7041_v26 = vsub.f32 %v20656_v54, %v23907_v48 }
 0x650   :  { %25121 = vst [vmem:[#allocation214_spill] sm:$0xff] %v20707_v42  ;;  %25122 = vst [vmem:[#allocation215_spill] sm:$0xff] %v20709_v20  ;;  %14306 = vmatprep.mubr.f32.mxu0 %v7012_v4  ;;  %vm6802_vm12 = vcmp.eq.s32.totalorder %v20707_v42, %v25107_v24  ;;  %vm6801_vm14 = vcmp.eq.s32.totalorder %v20709_v20, %v25107_v24  ;;  %14433 = vmatpush3.msra.mxu0 %v20303_v10  ;;  %v23913_v46 = vand.u32 4294901760, %v20698_v40 }
 0x651   :  { %v7032_v56 = vand.u32 4294901760, %v7031_v39  ;;  %v11271_v36 = vsel %vm6802_vm12, 1.0, %v25112_v17  ;;  %v11270_v4 = vsel %vm6801_vm14, 1.0, %v25112_v17  ;;  %14393 = vmatmul.mubr.msk.f32.gmra.mxu1 %vm6800_vm1, %v25113_v22  ;;  %14434 = vmatprep.subr.mxu0 %v20306_v44  ;;  %v7042_v10 = vand.u32 4294901760, %v7041_v26 }
 0x652   :  { %v20736_v39 = vsub.f32 %v11271_v36, %v11271_v36  ;;  %v20738_v48 = vsub.f32 %v11270_v4, %v11270_v4  ;;  %14395 = vmatprep.mubr.msk.f32.mxu1 %vm6801_vm14, %v25113_v22  ;;  %v7051_v1 = vsub.f32 %v20698_v40, %v23913_v46  ;;  %14435 = vmatpush3.msra.mxu0 %v20306_v44  ;;  %v25125_v36 = vand.u32 4294901760, %v20696_v15 }
 0x653   :  { %14307 = vmatmul.mubr.f32.gmra.mxu0 %v7022_v14  ;;  %v20747_v28 = vpop.permute.xlu1 %6735  ;;  %v20749_v3 = vpop.permute.xlu0 %6732  ;;  %14436 = vmatprep.subr.mxu0 %v20325_v41 }
 0x654   :  { %25123 = vst [vmem:[#allocation216_spill] sm:$0xff] %v20747_v28  ;;  %25124 = vst [vmem:[#allocation217_spill] sm:$0xff] %v20749_v3  ;;  %14309 = vmatprep.mubr.f32.mxu0 %v7032_v56  ;;  %v7061_v14 = vsub.f32 %v20696_v15, %v25125_v36  ;;  %vm23928_vm15 = vcmp.eq.s32.totalorder %v20747_v28, %v25107_v24  ;;  %vm6803_vm6 = vcmp.eq.s32.totalorder %v20749_v3, %v25107_v24 }
 0x655   :  { %v7052_v4 = vand.u32 4294901760, %v7051_v1  ;;  %v23921_v56 = vand.u32 4294901760, %v20738_v48  ;;  %v11273_v44 = vsel %vm23928_vm15, 1.0, %v25112_v17  ;;  %v11272_v26 = vsel %vm6803_vm6, 1.0, %v25112_v17  ;;  %14396 = vmatmul.mubr.msk.f32.gmra.mxu1 %vm6802_vm12, %v25113_v22  ;;  %14437 = vmatpush3.msra.mxu0 %v20325_v41 }
 0x656   :  { %v23920_v1 = vand.u32 4294901760, %v20736_v39  ;;  %v20776_v36 = vsub.f32 %v11273_v44, %v11273_v44  ;;  %v20778_v46 = vsub.f32 %v11272_v26, %v11272_v26  ;;  %14398 = vmatprep.mubr.msk.f32.mxu1 %vm6803_vm6, %v25113_v22  ;;  %v7062_v41 = vand.u32 4294901760, %v7061_v14  ;;  %14517 = vmatpush3.msra.mxu1 %v20290_v23 }
 0x657   :  { %14310 = vmatmul.mubr.f32.gmra.mxu0 %v7042_v10  ;;  %v7071_v20 = vsub.f32 %v20738_v48, %v23921_v56  ;;  %v20787_v42 = vpop.permute.xlu1 %6741  ;;  %v20789_v45 = vpop.permute.xlu0 %6738  ;;  %14438 = vmatprep.subr.mxu0 %v20346_v30 }
 0x658   :  { %25126 = vst [vmem:[#allocation218_spill] sm:$0xff] %v20787_v42  ;;  %25127 = vst [vmem:[#allocation219_spill] sm:$0xff] %v20789_v45  ;;  %14312 = vmatprep.mubr.f32.mxu0 %v7052_v4  ;;  %v7081_v10 = vsub.f32 %v20736_v39, %v23920_v1  ;;  %vm23938_vm7 = vcmp.eq.s32.totalorder %v20787_v42, %v25107_v24  ;;  %vm23929_vm8 = vcmp.eq.s32.totalorder %v20789_v45, %v25107_v24 }
 0x659   :  { %v7072_v44 = vand.u32 4294901760, %v7071_v20  ;;  %v23931_v4 = vand.u32 4294901760, %v20778_v46  ;;  %v11275_v14 = vsel %vm23938_vm7, 1.0, %v25112_v17  ;;  %v11274_v26 = vsel %vm23929_vm8, 1.0, %v25112_v17  ;;  %14399 = vmatmul.mubr.msk.f32.gmra.mxu1 %vm23928_vm15, %v25113_v22  ;;  %14439 = vmatpush3.msra.mxu0 %v20346_v30 }
 0x65a   :  { %v23930_v20 = vand.u32 4294901760, %v20776_v36  ;;  %v20816_v1 = vsub.f32 %v11275_v14, %v11275_v14  ;;  %v20818_v56 = vsub.f32 %v11274_v26, %v11274_v26  ;;  %14401 = vmatprep.mubr.msk.f32.mxu1 %vm23929_vm8, %v25113_v22  ;;  %v7082_v30 = vand.u32 4294901760, %v7081_v10  ;;  %14518 = vmatprep.subr.mxu1 %v20319_v19 }
 0x65b   :  { %14313 = vmatmul.mubr.f32.gmra.mxu0 %v7062_v41  ;;  %v7091_v3 = vsub.f32 %v20778_v46, %v23931_v4  ;;  %v20827_v28 = vpop.permute.xlu1 %6747  ;;  %v20829_v7 = vpop.permute.xlu0 %6744  ;;  %14519 = vmatpush3.msra.mxu1 %v20319_v19 }
 0x65c   :  { %25128 = vst [vmem:[#allocation220_spill] sm:$0xff] %v20816_v1  ;;  %25129 = vst [vmem:[#allocation221_spill] sm:$0xff] %v20827_v28  ;;  %14315 = vmatprep.mubr.f32.mxu0 %v7072_v44  ;;  %v7101_v41 = vsub.f32 %v20776_v36, %v23930_v20  ;;  %vm23948_vm15 = vcmp.eq.s32.totalorder %v20827_v28, %v25107_v24  ;;  %vm23939_vm8 = vcmp.eq.s32.totalorder %v20829_v7, %v25107_v24 }
 0x65d   :  { %25130 = vst [vmem:[#allocation222_spill] sm:$0xff] %v20829_v7  ;;  %v7092_v14 = vand.u32 4294901760, %v7091_v3  ;;  %14440 = vmatprep.subr.mxu0 %v20363_v27  ;;  %v23941_v44 = vand.u32 4294901760, %v20818_v56  ;;  %v11277_v10 = vsel %vm23948_vm15, 1.0, %v25112_v17  ;;  %v11276_v26 = vsel %vm23939_vm8, 1.0, %v25112_v17  ;;  %14402 = vmatmul.mubr.msk.f32.gmra.mxu1 %vm23938_vm7, %v25113_v22 }
 0x65e   :  { %14441 = vmatpush3.msra.mxu0 %v20363_v27  ;;  %v23940_v3 = vand.u32 4294901760, %v20816_v1  ;;  %v20856_v20 = vsub.f32 %v11277_v10, %v11277_v10  ;;  %v20858_v4 = vsub.f32 %v11276_v26, %v11276_v26  ;;  %14404 = vmatprep.mubr.msk.f32.mxu1 %vm23939_vm8, %v25113_v22  ;;  %v7102_v27 = vand.u32 4294901760, %v7101_v41 }
 0x65f   :  { %14316 = vmatmul.mubr.f32.gmra.mxu0 %v7082_v30  ;;  %v7111_v45 = vsub.f32 %v20818_v56, %v23941_v44  ;;  %v20867_v42 = vpop.permute.xlu1 %6753  ;;  %v20869_v47 = vpop.permute.xlu0 %6750  ;;  %14520 = vmatprep.subr.mxu1 %v20341_v60 }
 0x660   :  { %25131 = vst [vmem:[#allocation223_spill] sm:$0xff] %v20856_v20  ;;  %25132 = vst [vmem:[#allocation224_spill] sm:$0xff] %v20867_v42  ;;  %14318 = vmatprep.mubr.f32.mxu0 %v7092_v14  ;;  %v7121_v30 = vsub.f32 %v20816_v1, %v23940_v3  ;;  %vm23958_vm7 = vcmp.eq.s32.totalorder %v20867_v42, %v25107_v24  ;;  %vm23949_vm8 = vcmp.eq.s32.totalorder %v20869_v47, %v25107_v24 }
 0x661   :  { %25133 = vst [vmem:[#allocation225_spill] sm:$0xff] %v20869_v47  ;;  %v7112_v10 = vand.u32 4294901760, %v7111_v45  ;;  %14521 = vmatpush3.msra.mxu1 %v20341_v60  ;;  %14442 = vmatprep.subr.mxu0 %v20378_v8  ;;  %v23951_v14 = vand.u32 4294901760, %v20858_v4  ;;  %v11279_v41 = vsel %vm23958_vm7, 1.0, %v25112_v17  ;;  %v11278_v26 = vsel %vm23949_vm8, 1.0, %v25112_v17 }
 0x662   :  { %14405 = vmatmul.mubr.msk.f32.gmra.mxu1 %vm23948_vm15, %v25113_v22  ;;  %14443 = vmatpush3.msra.mxu0 %v20378_v8  ;;  %v23950_v45 = vand.u32 4294901760, %v20856_v20  ;;  %v20896_v3 = vsub.f32 %v11279_v41, %v11279_v41  ;;  %v20898_v44 = vsub.f32 %v11278_v26, %v11278_v26  ;;  %v7122_v8 = vand.u32 4294901760, %v7121_v30 }
 0x663   :  { %14319 = vmatmul.mubr.f32.gmra.mxu0 %v7102_v27  ;;  %14407 = vmatprep.mubr.msk.f32.mxu1 %vm23949_vm8, %v25113_v22  ;;  %v7131_v7 = vsub.f32 %v20858_v4, %v23951_v14  ;;  %v20907_v28 = vpop.permute.xlu1 %6759  ;;  %v20909_v1 = vpop.permute.xlu0 %6756 }
 0x664   :  { %25134 = vst [vmem:[#allocation226_spill] sm:$0xff] %v20896_v3  ;;  %25135 = vst [vmem:[#allocation227_spill] sm:$0xff] %v20907_v28  ;;  %14321 = vmatprep.mubr.f32.mxu0 %v7112_v10  ;;  %14522 = vmatprep.subr.mxu1 %v20353_v6  ;;  %v7141_v27 = vsub.f32 %v20856_v20, %v23950_v45  ;;  %vm23968_vm15 = vcmp.eq.s32.totalorder %v20907_v28, %v25107_v24  ;;  %v23961_v10 = vand.u32 4294901760, %v20898_v44 }
 0x665   :  { %25136 = vst [vmem:[#allocation228_spill] sm:$0xff] %v20909_v1  ;;  %vm23959_vm8 = vcmp.eq.s32.totalorder %v20909_v1, %v25107_v24  ;;  %v7132_v41 = vand.u32 4294901760, %v7131_v7  ;;  %14523 = vmatpush3.msra.mxu1 %v20353_v6  ;;  %14444 = vmatprep.subr.mxu0 %v20395_v51  ;;  %v11281_v30 = vsel %vm23968_vm15, 1.0, %v25112_v17  ;;  %v23960_v7 = vand.u32 4294901760, %v20896_v3 }
 0x666   :  { %v11280_v26 = vsel %vm23959_vm8, 1.0, %v25112_v17  ;;  %14408 = vmatmul.mubr.msk.f32.gmra.mxu1 %vm23958_vm7, %v25113_v22  ;;  %14445 = vmatpush3.msra.mxu0 %v20395_v51  ;;  %v20936_v45 = vsub.f32 %v11281_v30, %v11281_v30  ;;  %v7151_v47 = vsub.f32 %v20898_v44, %v23961_v10  ;;  %v7142_v51 = vand.u32 4294901760, %v7141_v27 }
 0x667   :  { %v20938_v14 = vsub.f32 %v11280_v26, %v11280_v26  ;;  %14322 = vmatmul.mubr.f32.gmra.mxu0 %v7122_v8  ;;  %14410 = vmatprep.mubr.msk.f32.mxu1 %vm23959_vm8, %v25113_v22  ;;  %v20947_v42 = vpop.permute.xlu1 %6765  ;;  %v20949_v20 = vpop.permute.xlu0 %6762  ;;  %v7161_v8 = vsub.f32 %v20896_v3, %v23960_v7 }
 0x668   :  { %25137 = vst [vmem:[#allocation229_spill] sm:$0xff] %v20936_v45  ;;  %25138 = vst [vmem:[#allocation230_spill] sm:$0xff] %v20947_v42  ;;  %14324 = vmatprep.mubr.f32.mxu0 %v7132_v41  ;;  %14524 = vmatprep.subr.mxu1 %v20370_v61  ;;  %vm23978_vm7 = vcmp.eq.s32.totalorder %v20947_v42, %v25107_v24  ;;  %vm23969_vm8 = vcmp.eq.s32.totalorder %v20949_v20, %v25107_v24  ;;  %v7152_v30 = vand.u32 4294901760, %v7151_v47 }
 0x669   :  { %25139 = vst [vmem:[#allocation231_spill] sm:$0xff] %v20949_v20  ;;  %14525 = vmatpush3.msra.mxu1 %v20370_v61  ;;  %14446 = vmatprep.subr.mxu0 %v20412_v32  ;;  %v23971_v41 = vand.u32 4294901760, %v20938_v14  ;;  %v11283_v27 = vsel %vm23978_vm7, 1.0, %v25112_v17  ;;  %v11282_v26 = vsel %vm23969_vm8, 1.0, %v25112_v17  ;;  %v23970_v47 = vand.u32 4294901760, %v20936_v45 }
 0x66a   :  { %14411 = vmatmul.mubr.msk.f32.gmra.mxu1 %vm23968_vm15, %v25113_v22  ;;  %14447 = vmatpush3.msra.mxu0 %v20412_v32  ;;  %v20976_v7 = vsub.f32 %v11283_v27, %v11283_v27  ;;  %v20978_v10 = vsub.f32 %v11282_v26, %v11282_v26  ;;  %v7162_v32 = vand.u32 4294901760, %v7161_v8 }
 0x66b   :  { %14325 = vmatmul.mubr.f32.gmra.mxu0 %v7142_v51  ;;  %14413 = vmatprep.mubr.msk.f32.mxu1 %vm23969_vm8, %v25113_v22  ;;  %v7171_v1 = vsub.f32 %v20938_v14, %v23971_v41  ;;  %v20987_v28 = vpop.permute.xlu1 %6771  ;;  %v20989_v3 = vpop.permute.xlu0 %6768  ;;  %v7181_v51 = vsub.f32 %v20936_v45, %v23970_v47 }
 0x66c   :  { %25140 = vst [vmem:[#allocation232_spill] sm:$0xff] %v20976_v7  ;;  %25141 = vst [vmem:[#allocation233_spill] sm:$0xff] %v20987_v28  ;;  %14327 = vmatprep.mubr.f32.mxu0 %v7152_v30  ;;  %14526 = vmatprep.subr.mxu1 %v20390_v2  ;;  %vm23988_vm15 = vcmp.eq.s32.totalorder %v20987_v28, %v25107_v24  ;;  %vm23979_vm8 = vcmp.eq.s32.totalorder %v20989_v3, %v25107_v24  ;;  %v23981_v30 = vand.u32 4294901760, %v20978_v10 }
 0x66d   :  { %25142 = vst [vmem:[#allocation234_spill] sm:$0xff] %v20989_v3  ;;  %v7172_v27 = vand.u32 4294901760, %v7171_v1  ;;  %14527 = vmatpush3.msra.mxu1 %v20390_v2  ;;  %14448 = vmatprep.subr.mxu0 %v20427_v50  ;;  %v11285_v8 = vsel %vm23988_vm15, 1.0, %v25112_v17  ;;  %v11284_v26 = vsel %vm23979_vm8, 1.0, %v25112_v17  ;;  %v23980_v1 = vand.u32 4294901760, %v20976_v7 }
 0x66e   :  { %14414 = vmatmul.mubr.msk.f32.gmra.mxu1 %vm23978_vm7, %v25113_v22  ;;  %14449 = vmatpush3.msra.mxu0 %v20427_v50  ;;  %v21016_v47 = vsub.f32 %v11285_v8, %v11285_v8  ;;  %v21018_v41 = vsub.f32 %v11284_v26, %v11284_v26  ;;  %v7191_v20 = vsub.f32 %v20978_v10, %v23981_v30  ;;  %v7182_v50 = vand.u32 4294901760, %v7181_v51 }
 0x66f   :  { %14328 = vmatmul.mubr.f32.gmra.mxu0 %v7162_v32  ;;  %14416 = vmatprep.mubr.msk.f32.mxu1 %vm23979_vm8, %v25113_v22  ;;  %v21027_v42 = vpop.permute.xlu1 %6777  ;;  %v21029_v45 = vpop.permute.xlu0 %6774  ;;  %v7201_v32 = vsub.f32 %v20976_v7, %v23980_v1 }
 0x670   :  { %25143 = vst [vmem:[#allocation235_spill] sm:$0xff] %v21016_v47  ;;  %25144 = vst [vmem:[#allocation236_spill] sm:$0xff] %v21027_v42  ;;  %14330 = vmatprep.mubr.f32.mxu0 %v7172_v27  ;;  %14528 = vmatprep.subr.mxu1 %v20402_v12  ;;  %vm23998_vm7 = vcmp.eq.s32.totalorder %v21027_v42, %v25107_v24  ;;  %vm23989_vm8 = vcmp.eq.s32.totalorder %v21029_v45, %v25107_v24  ;;  %v7192_v8 = vand.u32 4294901760, %v7191_v20 }
 0x671   :  { %25145 = vst [vmem:[#allocation237_spill] sm:$0xff] %v21029_v45  ;;  %14529 = vmatpush3.msra.mxu1 %v20402_v12  ;;  %14450 = vmatprep.subr.mxu0 %v20444_v34  ;;  %v23991_v27 = vand.u32 4294901760, %v21018_v41  ;;  %v11287_v51 = vsel %vm23998_vm7, 1.0, %v25112_v17  ;;  %v11286_v26 = vsel %vm23989_vm8, 1.0, %v25112_v17  ;;  %v23990_v20 = vand.u32 4294901760, %v21016_v47 }
 0x672   :  { %14417 = vmatmul.mubr.msk.f32.gmra.mxu1 %vm23988_vm15, %v25113_v22  ;;  %14451 = vmatpush3.msra.mxu0 %v20444_v34  ;;  %v21056_v1 = vsub.f32 %v11287_v51, %v11287_v51  ;;  %v21058_v30 = vsub.f32 %v11286_v26, %v11286_v26  ;;  %v7202_v34 = vand.u32 4294901760, %v7201_v32 }
 0x673   :  { %14331 = vmatmul.mubr.f32.gmra.mxu0 %v7182_v50  ;;  %14419 = vmatprep.mubr.msk.f32.mxu1 %vm23989_vm8, %v25113_v22  ;;  %v7211_v3 = vsub.f32 %v21018_v41, %v23991_v27  ;;  %v21067_v28 = vpop.permute.xlu1 %6783  ;;  %v21069_v7 = vpop.permute.xlu0 %6780  ;;  %v7221_v50 = vsub.f32 %v21016_v47, %v23990_v20 }
 0x674   :  { %25146 = vst [vmem:[#allocation238_spill] sm:$0xff] %v21067_v28  ;;  %14333 = vmatprep.mubr.f32.mxu0 %v7192_v8  ;;  %14530 = vmatprep.subr.mxu1 %v20419_v57  ;;  %vm6820_vm15 = vcmp.eq.s32.totalorder %v21067_v28, %v25107_v24  ;;  %vm23999_vm8 = vcmp.eq.s32.totalorder %v21069_v7, %v25107_v24  ;;  %v24000_v8 = vand.u32 4294901760, %v21058_v30 }
 0x675   :  { %v7212_v51 = vand.u32 4294901760, %v7211_v3  ;;  %14531 = vmatpush3.msra.mxu1 %v20419_v57  ;;  %14452 = vmatprep.subr.mxu0 %v20461_v18  ;;  %v11289_v32 = vsel %vm6820_vm15, 1.0, %v25112_v17  ;;  %v11288_v26 = vsel %vm23999_vm8, 1.0, %v25112_v17  ;;  %v7222_v3 = vand.u32 4294901760, %v7221_v50 }
 0x676   :  { %14420 = vmatmul.mubr.msk.f32.gmra.mxu1 %vm23998_vm7, %v25113_v22  ;;  %14532 = vmatprep.subr.mxu1 %v20439_v11  ;;  %v21096_v20 = vsub.f32 %v11289_v32, %v11289_v32  ;;  %v21098_v27 = vsub.f32 %v11288_v26, %v11288_v26  ;;  %v7231_v45 = vsub.f32 %v21058_v30, %v24000_v8  ;;  %v25148_v32 = vand.u32 4294901760, %v21056_v1 }
 0x677   :  { %14334 = vmatmul.mubr.f32.gmra.mxu0 %v7202_v34  ;;  %14422 = vmatprep.mubr.msk.f32.mxu1 %vm23999_vm8, %v25113_v22  ;;  %v21107_v42 = vpop.permute.xlu1 %6789  ;;  %v21109_v47 = vpop.permute.xlu0 %6786 }
 0x678   :  { %25147 = vst [vmem:[#allocation239_spill] sm:$0xff] %v21109_v47  ;;  %14336 = vmatprep.mubr.f32.mxu0 %v7212_v51  ;;  %14453 = vmatpush3.msra.mxu0 %v20461_v18  ;;  %v7241_v34 = vsub.f32 %v21056_v1, %v25148_v32  ;;  %vm6822_vm7 = vcmp.eq.s32.totalorder %v21107_v42, %v25107_v24  ;;  %v7232_v26 = vand.u32 4294901760, %v7231_v45  ;;  %v7250_v51 = vand.u32 4294901760, %v21098_v27 }
 0x679   :  { %vm6821_vm8 = vcmp.eq.s32.totalorder %v21109_v47, %v25107_v24  ;;  %14533 = vmatpush3.msra.mxu1 %v20439_v11  ;;  %14454 = vmatprep.subr.mxu0 %v20476_v37  ;;  %v11291_v18 = vsel %vm6822_vm7, 1.0, %v25112_v17  ;;  %v7260_v45 = vand.u32 4294901760, %v21096_v20 }
 0x67a   :  { %v11290_v50 = vsel %vm6821_vm8, 1.0, %v25112_v17  ;;  %14423 = vmatmul.mubr.msk.f32.gmra.mxu1 %vm6820_vm15, %v25113_v22  ;;  %14534 = vmatprep.subr.mxu1 %v20451_v58  ;;  %v21136_v32 = vsub.f32 %v11291_v18, %v11291_v18  ;;  %v7251_v17 = vsub.f32 %v21098_v27, %v7250_v51  ;;  %v7242_v28 = vand.u32 4294901760, %v7241_v34 }
 0x67b   :  { %v21138_v8 = vsub.f32 %v11290_v50, %v11290_v50  ;;  %14337 = vmatmul.mubr.f32.gmra.mxu0 %v7222_v3  ;;  %14425 = vmatprep.mubr.msk.f32.mxu1 %vm6821_vm8, %v25113_v22  ;;  %v7261_v3 = vsub.f32 %v21096_v20, %v7260_v45  ;;  %v25149_v34 = vand.u32 4294901760, %v20556_v53 }
 0x67c   :  { %14339 = vmatprep.mubr.f32.mxu0 %v7232_v26  ;;  %14535 = vmatpush3.msra.mxu1 %v20451_v58  ;;  %v7252_v18 = vand.u32 4294901760, %v7251_v17  ;;  %v7280_v47 = vand.u32 4294901760, %v21136_v32 }
 0x67d   :  { %14536 = vmatprep.subr.mxu1 %v20468_v29  ;;  %14455 = vmatpush3.msra.mxu0 %v20476_v37  ;;  %v24005_v50 = vand.u32 4294901760, %v21138_v8  ;;  %v7262_v26 = vand.u32 4294901760, %v7261_v3 }
 0x67e   :  { %14426 = vmatmul.mubr.msk.f32.gmra.mxu1 %vm6822_vm7, %v25113_v22  ;;  %14456 = vmatprep.subr.mxu0 %v20490_v5 }
 0x67f   :  { %14340 = vmatmul.mubr.f32.gmra.mxu0 %v7242_v28  ;;  %14537 = vmatpush3.msra.mxu1 %v20468_v29  ;;  %v7271_v37 = vsub.f32 %v21138_v8, %v24005_v50  ;;  %v7281_v28 = vsub.f32 %v21136_v32, %v7280_v47  ;;  %v25150_v50 = vand.u32 4294901760, %v20582_v35 }
 0x680   :  { %14540 = vmatprep.mubr.f32.mxu1 %v25149_v34  ;;  %14342 = vmatprep.mubr.f32.mxu0 %v7252_v18  ;;  %v25151_v18 = vand.u32 4294901760, %v20554_v55  ;;  %v25188_v34 = vld [vmem:[#allocation199_spill] sm:$0xff] }
 0x681   :  { %14538 = vmatprep.subr.mxu1 %v20485_v59  ;;  %14457 = vmatpush3.msra.mxu0 %v20490_v5  ;;  %v7272_v17 = vand.u32 4294901760, %v7271_v37  ;;  %v7282_v3 = vand.u32 4294901760, %v7281_v28  ;;  %v25152_v5 = vand.u32 4294901760, %v20580_v49  ;;  %v25187_v37 = vand.u32 4294901760, %v21058_v30  ;;  %v25210_v28 = vld [vmem:[#allocation219_spill] sm:$0xff] }
 0x682   :  { %14539 = vmatpush3.msra.mxu1 %v20485_v59  ;;  %14458 = vmatprep.subr.mxu0 %v20502_v21 }
 0x683   :  { %14541 = vmatmul.mubr.f32.vlgmr.msra.gmra.mxu1 %v25150_v50  ;;  %14343 = vmatmul.mubr.f32.gmra.mxu0 %v7262_v26  ;;  %v25153_v50 = vand.u32 4294901760, %v20620_v9  ;;  %v6647_v26 = vld [vmem:[%s23408_s6] sm:$0xff] }
 0x684   :  { %14543 = vmatprep.mubr.f32.mxu1 %v25151_v18  ;;  %14345 = vmatprep.mubr.f32.mxu0 %v7272_v17  ;;  %v25208_v17 = vld [vmem:[#allocation216_spill] sm:$0xff] }
 0x685   :  { %14459 = vmatpush3.msra.mxu0 %v20502_v21  ;;  %14668 = vmatprep.subr.mxu1 %v20281_v13  ;;  %v25154_v21 = vand.u32 4294901760, %v20618_v38  ;;  %v6662_v18 = vld [vmem:[%s23408_s6 + $0x78] sm:$0xff] }
 0x686   :  { %14588 = vmatprep.subr.mxu0 %v20310_v63  ;;  %14669 = vmatpush3.msra.mxu1 %v20281_v13  ;;  %v25155_v13 = vand.u32 4294901760, %v20658_v33 }
 0x687   :  { %14544 = vmatmul.mubr.f32.gmra.mxu1 %v25152_v5  ;;  %14346 = vmatmul.mubr.f32.gmra.mxu0 %v7282_v3  ;;  %v21439_v3 = vand.u32 4294901760, %v6662_v18  ;;  %v25213_v5 = vld [vmem:[#allocation218_spill] sm:$0xff] }
 0x688   :  { %14546 = vmatprep.mubr.f32.mxu1 %v25153_v50  ;;  %14460 = vmatprep.mubr.f32.mxu0 %v20556_v53  ;;  %v25157_v53 = vand.u32 4294901760, %v20698_v40  ;;  %v25215_v50 = vld [vmem:[#allocation222_spill] sm:$0xff] }
 0x689   :  { %14670 = vmatprep.subr.mxu1 %v20283_v43 }
 0x68a   :  { %14671 = vmatpush3.msra.mxu1 %v20283_v43  ;;  %v25156_v43 = vand.u32 4294901760, %v20656_v54 }
 0x68b   :  { %14547 = vmatmul.mubr.f32.gmra.mxu1 %v25154_v21  ;;  %14461 = vmatmul.mubr.f32.vlgmr.msra.gmra.mxu0 %v20582_v35  ;;  %v21458_v21 = vsub.f32 %v6662_v18, %v21439_v3 }
 0x68c   :  { %14549 = vmatprep.mubr.f32.mxu1 %v25155_v13  ;;  %14589 = vmatpush3.msra.mxu0 %v20310_v63  ;;  %v25158_v63 = vand.u32 4294901760, %v20696_v15  ;;  %v6661_v13 = vld [vmem:[%s23408_s6 + $0x70] sm:$0xff] }
 0x68d   :  { %14463 = vmatprep.mubr.f32.mxu0 %v20554_v55  ;;  %14590 = vmatprep.subr.mxu0 %v20313_v25 }
 0x68e   :  { %14591 = vmatpush3.msra.mxu0 %v20313_v25  ;;  %14672 = vmatprep.subr.mxu1 %v20285_v52  ;;  %v25159_v25 = vand.u32 4294901760, %v20738_v48 }
 0x68f   :  { %14550 = vmatmul.mubr.f32.gmra.mxu1 %v25156_v43  ;;  %14464 = vmatmul.mubr.f32.gmra.mxu0 %v20580_v49  ;;  %v25172_v49 = vld [vmem:[#allocation195_spill] sm:$0xff]  ;;  %v21466_v43 = vand.u32 4294901760, %v21458_v21 }
 0x690   :  { %14552 = vmatprep.mubr.f32.mxu1 %v25157_v53  ;;  %14466 = vmatprep.mubr.f32.mxu0 %v20620_v9  ;;  %v25168_v9 = vld [vmem:[#allocation194_spill] sm:$0xff]  ;;  %v21468_v53 = vand.u32 4294901760, %v6661_v13 }
 0x691   :  { %14592 = vmatprep.subr.mxu0 %v20316_v0  ;;  %14673 = vmatpush3.msra.mxu1 %v20285_v52  ;;  %v25160_v52 = vand.u32 4294901760, %v20736_v39  ;;  %25218 = vst [vmem:[#allocation194_spill] sm:$0xff] %v21466_v43 }
 0x692   :  { %14593 = vmatpush3.msra.mxu0 %v20316_v0  ;;  %14674 = vmatprep.subr.mxu1 %v20288_v62  ;;  %v25161_v0 = vand.u32 4294901760, %v20778_v46 }
 0x693   :  { %14553 = vmatmul.mubr.f32.gmra.mxu1 %v25158_v63  ;;  %14467 = vmatmul.mubr.f32.gmra.mxu0 %v20618_v38  ;;  %v25164_v38 = vld [vmem:[#allocation193_spill] sm:$0xff] }
 0x694   :  { %14555 = vmatprep.mubr.f32.mxu1 %v25159_v25  ;;  %14469 = vmatprep.mubr.f32.mxu0 %v20658_v33  ;;  %v25167_v33 = vand.u32 4294901760, %v20858_v4  ;;  %25212 = vst [vmem:[#allocation193_spill] sm:$0xff] %v21439_v3  ;;  %v25220_v63 = vld [vmem:[#allocation221_spill] sm:$0xff] }
 0x695   :  { %14594 = vmatprep.subr.mxu0 %v20338_v31  ;;  %14675 = vmatpush3.msra.mxu1 %v20288_v62  ;;  %v25162_v62 = vand.u32 4294901760, %v20776_v36  ;;  %v25223_v25 = vld [vmem:[#allocation225_spill] sm:$0xff] }
 0x696   :  { %14595 = vmatpush3.msra.mxu0 %v20338_v31  ;;  %14676 = vmatprep.subr.mxu1 %v20290_v23  ;;  %v25163_v31 = vand.u32 4294901760, %v20818_v56 }
 0x697   :  { %14556 = vmatmul.mubr.f32.gmra.mxu1 %v25160_v52  ;;  %14470 = vmatmul.mubr.f32.gmra.mxu0 %v20656_v54  ;;  %v25175_v54 = vand.u32 4294901760, %v20938_v14  ;;  %v9266_v52 = vsub.f32 %v21458_v21, %v21466_v43 }
 0x698   :  { %14558 = vmatprep.mubr.f32.mxu1 %v25161_v0  ;;  %14472 = vmatprep.mubr.f32.mxu0 %v20698_v40  ;;  %v25171_v40 = vand.u32 4294901760, %v20898_v44  ;;  %v21489_v0 = vsub.f32 %v6661_v13, %v21468_v53 }
 0x699   :  { %14596 = vmatprep.subr.mxu0 %v20350_v16  ;;  %14677 = vmatpush3.msra.mxu1 %v20290_v23  ;;  %v25165_v23 = vld [vmem:[#allocation220_spill] sm:$0xff] }
 0x69a   :  { %14597 = vmatpush3.msra.mxu0 %v20350_v16  ;;  %14678 = vmatprep.subr.mxu1 %v20319_v19  ;;  %v25166_v16 = vand.u32 4294901760, %v25165_v23  ;;  %25217 = vst [vmem:[#allocation220_spill] sm:$0xff] %v21458_v21  ;;  %25226 = vst [vmem:[#allocation195_spill] sm:$0xff] %v21489_v0 }
 0x69b   :  { %14559 = vmatmul.mubr.f32.gmra.mxu1 %v25162_v62  ;;  %14473 = vmatmul.mubr.f32.gmra.mxu0 %v20696_v15  ;;  %v6660_v62 = vld [vmem:[%s23408_s6 + $0x68] sm:$0xff] }
 0x69c   :  { %14561 = vmatprep.mubr.f32.mxu1 %v25163_v31  ;;  %14475 = vmatprep.mubr.f32.mxu0 %v20738_v48  ;;  %v25176_v48 = vld [vmem:[#allocation196_spill] sm:$0xff]  ;;  %v9267_v31 = vand.u32 4294901760, %v9266_v52  ;;  %v6652_v52 = vld [vmem:[%s23408_s6 + $0x28] sm:$0xff] }
 0x69d   :  { %14598 = vmatprep.subr.mxu0 %v25164_v38  ;;  %14679 = vmatpush3.msra.mxu1 %v20319_v19  ;;  %v25169_v19 = vld [vmem:[#allocation223_spill] sm:$0xff] }
 0x69e   :  { %14599 = vmatpush3.msra.mxu0 %v25164_v38  ;;  %14680 = vmatprep.subr.mxu1 %v20341_v60  ;;  %v25170_v55 = vand.u32 4294901760, %v25169_v19  ;;  %25219 = vst [vmem:[#allocation223_spill] sm:$0xff] %v21468_v53  ;;  %v21497_v38 = vand.u32 4294901760, %v21489_v0 }
 0x69f   :  { %14562 = vmatmul.mubr.f32.gmra.mxu1 %v25166_v16  ;;  %14476 = vmatmul.mubr.f32.gmra.mxu0 %v20736_v39  ;;  %v25180_v39 = vld [vmem:[#allocation197_spill] sm:$0xff]  ;;  %v25229_v16 = vld [vmem:[#allocation224_spill] sm:$0xff] }
 0x6a0   :  { %14564 = vmatprep.mubr.f32.mxu1 %v25167_v33  ;;  %14478 = vmatprep.mubr.f32.mxu0 %v20778_v46  ;;  %v25179_v46 = vand.u32 4294901760, %v20978_v10  ;;  %v25232_v33 = vld [vmem:[#allocation228_spill] sm:$0xff] }
 0x6a1   :  { %14600 = vmatprep.subr.mxu0 %v25168_v9  ;;  %14681 = vmatpush3.msra.mxu1 %v20341_v60  ;;  %v25173_v60 = vld [vmem:[#allocation226_spill] sm:$0xff] }
 0x6a2   :  { %14601 = vmatpush3.msra.mxu0 %v25168_v9  ;;  %14682 = vmatprep.subr.mxu1 %v20353_v6  ;;  %v25174_v35 = vand.u32 4294901760, %v25173_v60  ;;  %25227 = vst [vmem:[#allocation226_spill] sm:$0xff] %v21497_v38  ;;  %v9273_v9 = vsub.f32 %v21489_v0, %v21497_v38 }
 0x6a3   :  { %14565 = vmatmul.mubr.f32.gmra.mxu1 %v25170_v55  ;;  %14479 = vmatmul.mubr.f32.gmra.mxu0 %v20776_v36  ;;  %v25183_v36 = vand.u32 4294901760, %v21018_v41  ;;  %v6659_v55 = vld [vmem:[%s23408_s6 + $0x60] sm:$0xff] }
 0x6a4   :  { %14567 = vmatprep.mubr.f32.mxu1 %v25171_v40  ;;  %14481 = vmatprep.mubr.f32.mxu0 %v20818_v56  ;;  %v9274_v40 = vand.u32 4294901760, %v9273_v9 }
 0x6a5   :  { %14602 = vmatprep.subr.mxu0 %v25172_v49  ;;  %14683 = vmatpush3.msra.mxu1 %v20353_v6  ;;  %v25177_v6 = vld [vmem:[#allocation229_spill] sm:$0xff] }
 0x6a6   :  { %14603 = vmatpush3.msra.mxu0 %v25172_v49  ;;  %14684 = vmatprep.subr.mxu1 %v20370_v61  ;;  %v25178_v15 = vand.u32 4294901760, %v25177_v6 }
 0x6a7   :  { %14568 = vmatmul.mubr.f32.gmra.mxu1 %v25174_v35  ;;  %14482 = vmatmul.mubr.f32.gmra.mxu0 %v25165_v23  ;;  %v21499_v23 = vand.u32 4294901760, %v6660_v62  ;;  %v25238_v35 = vld [vmem:[#allocation227_spill] sm:$0xff] }
 0x6a8   :  { %14570 = vmatprep.mubr.f32.mxu1 %v25175_v54  ;;  %14484 = vmatprep.mubr.f32.mxu0 %v20858_v4  ;;  %v25184_v4 = vld [vmem:[#allocation198_spill] sm:$0xff]  ;;  %v25241_v54 = vld [vmem:[#allocation231_spill] sm:$0xff] }
 0x6a9   :  { %14604 = vmatprep.subr.mxu0 %v25176_v48  ;;  %14685 = vmatpush3.msra.mxu1 %v20370_v61  ;;  %v25181_v61 = vld [vmem:[#allocation232_spill] sm:$0xff]  ;;  %25228 = vst [vmem:[#allocation196_spill] sm:$0xff] %v21499_v23 }
 0x6aa   :  { %14605 = vmatpush3.msra.mxu0 %v25176_v48  ;;  %14686 = vmatprep.subr.mxu1 %v20390_v2  ;;  %v25182_v56 = vand.u32 4294901760, %v25181_v61 }
 0x6ab   :  { %14571 = vmatmul.mubr.f32.gmra.mxu1 %v25178_v15  ;;  %14485 = vmatmul.mubr.f32.gmra.mxu0 %v25169_v19  ;;  %v21520_v19 = vsub.f32 %v6660_v62, %v21499_v23  ;;  %v6658_v15 = vld [vmem:[%s23408_s6 + $0x58] sm:$0xff] }
 0x6ac   :  { %14573 = vmatprep.mubr.f32.mxu1 %v25179_v46  ;;  %14487 = vmatprep.mubr.f32.mxu0 %v20898_v44 }
 0x6ad   :  { %14606 = vmatprep.subr.mxu0 %v25180_v39  ;;  %14687 = vmatpush3.msra.mxu1 %v20390_v2  ;;  %v25185_v2 = vld [vmem:[#allocation235_spill] sm:$0xff]  ;;  %25235 = vst [vmem:[#allocation229_spill] sm:$0xff] %v21520_v19  ;;  %v21528_v49 = vand.u32 4294901760, %v21520_v19 }
 0x6ae   :  { %14607 = vmatpush3.msra.mxu0 %v25180_v39  ;;  %14688 = vmatprep.subr.mxu1 %v20402_v12  ;;  %v25186_v44 = vand.u32 4294901760, %v25185_v2 }
 0x6af   :  { %14574 = vmatmul.mubr.f32.gmra.mxu1 %v25182_v56  ;;  %14488 = vmatmul.mubr.f32.gmra.mxu0 %v25173_v60  ;;  %25236 = vst [vmem:[#allocation197_spill] sm:$0xff] %v21528_v49  ;;  %v21530_v60 = vand.u32 4294901760, %v6659_v55  ;;  %v9280_v48 = vsub.f32 %v21520_v19, %v21528_v49  ;;  %v25247_v56 = vld [vmem:[#allocation230_spill] sm:$0xff] }
 0x6b0   :  { %14576 = vmatprep.mubr.f32.mxu1 %v25183_v36  ;;  %14490 = vmatprep.mubr.f32.mxu0 %v20938_v14  ;;  %v25190_v14 = vld [vmem:[#allocation200_spill] sm:$0xff]  ;;  %v25250_v36 = vld [vmem:[#allocation234_spill] sm:$0xff] }
 0x6b1   :  { %14608 = vmatprep.subr.mxu0 %v25184_v4  ;;  %14689 = vmatpush3.msra.mxu1 %v20402_v12  ;;  %v25189_v12 = vand.u32 4294901760, %v21056_v1  ;;  %25237 = vst [vmem:[#allocation232_spill] sm:$0xff] %v21530_v60  ;;  %v9281_v46 = vand.u32 4294901760, %v9280_v48 }
 0x6b2   :  { %14609 = vmatpush3.msra.mxu0 %v25184_v4  ;;  %14690 = vmatprep.subr.mxu1 %v20419_v57 }
 0x6b3   :  { %14577 = vmatmul.mubr.f32.gmra.mxu1 %v25186_v44  ;;  %14491 = vmatmul.mubr.f32.gmra.mxu0 %v25177_v6  ;;  %v21551_v6 = vsub.f32 %v6659_v55, %v21530_v60  ;;  %v6657_v44 = vld [vmem:[%s23408_s6 + $0x50] sm:$0xff] }
 0x6b4   :  { %14579 = vmatprep.mubr.f32.mxu1 %v25187_v37  ;;  %14493 = vmatprep.mubr.f32.mxu0 %v20978_v10  ;;  %v25192_v10 = vld [vmem:[#allocation201_spill] sm:$0xff] }
 0x6b5   :  { %14610 = vmatprep.subr.mxu0 %v25188_v34  ;;  %14691 = vmatpush3.msra.mxu1 %v20419_v57  ;;  %v25191_v57 = vand.u32 4294901760, %v21138_v8  ;;  %25244 = vst [vmem:[#allocation198_spill] sm:$0xff] %v21551_v6  ;;  %v21559_v39 = vand.u32 4294901760, %v21551_v6 }
 0x6b6   :  { %14611 = vmatpush3.msra.mxu0 %v25188_v34  ;;  %14692 = vmatprep.subr.mxu1 %v20439_v11 }
 0x6b7   :  { %14580 = vmatmul.mubr.f32.gmra.mxu1 %v25189_v12  ;;  %14494 = vmatmul.mubr.f32.gmra.mxu0 %v25181_v61  ;;  %25245 = vst [vmem:[#allocation235_spill] sm:$0xff] %v21559_v39  ;;  %v21561_v61 = vand.u32 4294901760, %v6658_v15  ;;  %v9287_v4 = vsub.f32 %v21551_v6, %v21559_v39  ;;  %v21592_v12 = vand.u32 4294901760, %v6657_v44 }
 0x6b8   :  { %14582 = vmatprep.mubr.f32.mxu1 %v7250_v51  ;;  %14496 = vmatprep.mubr.f32.mxu0 %v21018_v41 }
 0x6b9   :  { %14612 = vmatprep.subr.mxu0 %v25190_v14  ;;  %14693 = vmatpush3.msra.mxu1 %v20439_v11  ;;  %25246 = vst [vmem:[#allocation199_spill] sm:$0xff] %v21561_v61  ;;  %v9288_v37 = vand.u32 4294901760, %v9287_v4  ;;  %25255 = vst [vmem:[#allocation205_spill] sm:$0xff] %v21592_v12  ;;  %v21613_v11 = vsub.f32 %v6657_v44, %v21592_v12 }
 0x6ba   :  { %14613 = vmatpush3.msra.mxu0 %v25190_v14  ;;  %14694 = vmatprep.subr.mxu1 %v20451_v58  ;;  %v25256_v14 = vld [vmem:[#allocation233_spill] sm:$0xff] }
 0x6bb   :  { %14583 = vmatmul.mubr.f32.gmra.mxu1 %v7260_v45  ;;  %14497 = vmatmul.mubr.f32.gmra.mxu0 %v25185_v2  ;;  %v21582_v2 = vsub.f32 %v6658_v15, %v21561_v61  ;;  %v6650_v15 = vld [vmem:[%s23408_s6 + $0x18] sm:$0xff] }
 0x6bc   :  { %14585 = vmatprep.mubr.f32.mxu1 %v25191_v57  ;;  %14499 = vmatprep.mubr.f32.mxu0 %v21058_v30  ;;  %v25259_v57 = vld [vmem:[#allocation237_spill] sm:$0xff]  ;;  %v21754_v44 = vand.u32 4294901760, %v6650_v15 }
 0x6bd   :  { %14695 = vmatpush3.msra.mxu1 %v20451_v58  ;;  %14614 = vmatprep.subr.mxu0 %v25192_v10  ;;  %v25194_v58 = vld [vmem:[#allocation202_spill] sm:$0xff]  ;;  %25253 = vst [vmem:[#allocation200_spill] sm:$0xff] %v21582_v2  ;;  %v21590_v34 = vand.u32 4294901760, %v21582_v2 }
 0x6be   :  { %14696 = vmatprep.subr.mxu1 %v20468_v29  ;;  %14615 = vmatpush3.msra.mxu0 %v25192_v10  ;;  %25262 = vst [vmem:[#allocation202_spill] sm:$0xff] %v21613_v11  ;;  %25291 = vst [vmem:[#allocation221_spill] sm:$0xff] %v21754_v44 }
 0x6bf   :  { %14586 = vmatmul.mubr.f32.gmra.mxu1 %v7280_v47  ;;  %14500 = vmatmul.mubr.f32.gmra.mxu0 %v21056_v1  ;;  %v25197_v47 = vld [vmem:[#allocation203_spill] sm:$0xff]  ;;  %25254 = vst [vmem:[#allocation201_spill] sm:$0xff] %v21590_v34  ;;  %v9294_v10 = vsub.f32 %v21582_v2, %v21590_v34 }
 0x6c0   :  { %14697 = vmatpush3.msra.mxu1 %v20468_v29  ;;  %14700 = vmatprep.mubr.msk.f32.mxu1 %vm6791_vm4, %v25113_v22  ;;  %v21621_v29 = vand.u32 4294901760, %v21613_v11 }
 0x6c1   :  { %14502 = vmatprep.mubr.f32.mxu0 %v21098_v27  ;;  %14698 = vmatprep.subr.mxu1 %v20485_v59  ;;  %v9295_v41 = vand.u32 4294901760, %v9294_v10  ;;  %v6655_v27 = vld [vmem:[%s23408_s6 + $0x40] sm:$0xff] }
 0x6c2   :  { %14699 = vmatpush3.msra.mxu1 %v20485_v59  ;;  %14616 = vmatprep.subr.mxu0 %v25194_v58  ;;  %25263 = vst [vmem:[#allocation207_spill] sm:$0xff] %v21621_v29  ;;  %v25265_v59 = vld [vmem:[#allocation236_spill] sm:$0xff]  ;;  %v9301_v30 = vsub.f32 %v21613_v11, %v21621_v29  ;;  %v21654_v51 = vand.u32 4294901760, %v6655_v27 }
 0x6c3   :  { %14701 = vmatmul.mubr.msk.f32.vlgmr.msra.gmra.mxu1 %vm6792_vm9, %v25113_v22  ;;  %14503 = vmatmul.mubr.f32.gmra.mxu0 %v21096_v20 }
 0x6c4   :  { %14617 = vmatpush3.msra.mxu0 %v25194_v58  ;;  %14703 = vmatprep.mubr.msk.f32.mxu1 %vm6793_vm2, %v25113_v22  ;;  %v6656_v58 = vld [vmem:[%s23408_s6 + $0x48] sm:$0xff]  ;;  %v9302_v20 = vand.u32 4294901760, %v9301_v30  ;;  %25272 = vst [vmem:[#allocation209_spill] sm:$0xff] %v21654_v51 }
 0x6c5   :  { %14505 = vmatprep.mubr.f32.mxu0 %v21138_v8  ;;  %14618 = vmatprep.subr.mxu0 %v25197_v47 }
 0x6c6   :  { %14619 = vmatpush3.msra.mxu0 %v25197_v47  ;;  %14828 = vmatprep.subr.mxu1 %v9267_v31  ;;  %v21623_v47 = vand.u32 4294901760, %v6656_v58 }
 0x6c7   :  { %14704 = vmatmul.mubr.msk.f32.gmra.mxu1 %vm6794_vm5, %v25113_v22  ;;  %14506 = vmatmul.mubr.f32.gmra.mxu0 %v21136_v32  ;;  %v6654_v32 = vld [vmem:[%s23408_s6 + $0x38] sm:$0xff] }
 0x6c8   :  { %14706 = vmatprep.mubr.msk.f32.mxu1 %vm6795_vm11, %v25113_v22  ;;  %14620 = vmatprep.mubr.msk.f32.mxu0 %vm6791_vm4, %v25113_v22  ;;  %vm25211_vm4 = vcmp.eq.s32.totalorder %v25210_v28, %v25107_v24  ;;  %25264 = vst [vmem:[#allocation204_spill] sm:$0xff] %v21623_v47  ;;  %v21644_v1 = vsub.f32 %v6656_v58, %v21623_v47  ;;  %v21680_v18 = vand.u32 4294901760, %v6654_v32 }
 0x6c9   :  { %14748 = vmatprep.subr.mxu0 %v21439_v3  ;;  %14829 = vmatpush3.msra.mxu1 %v9267_v31  ;;  %v21678_v28 = vsub.f32 %v6655_v27, %v21654_v51  ;;  %v6648_v27 = vld [vmem:[%s23408_s6 + $0x8] sm:$0xff] }
 0x6ca   :  { %14830 = vmatprep.subr.mxu1 %v9274_v40  ;;  %25270 = vst [vmem:[#allocation203_spill] sm:$0xff] %v21644_v1  ;;  %v21652_v8 = vand.u32 4294901760, %v21644_v1  ;;  %25278 = vst [vmem:[#allocation211_spill] sm:$0xff] %v21680_v18 }
 0x6cb   :  { %14707 = vmatmul.mubr.msk.f32.gmra.mxu1 %vm6796_vm10, %v25113_v22  ;;  %14621 = vmatmul.mubr.msk.f32.vlgmr.msra.gmra.mxu0 %vm6792_vm9, %v25113_v22  ;;  %vm25216_vm9 = vcmp.eq.s32.totalorder %v25215_v50, %v25107_v24  ;;  %25277 = vst [vmem:[#allocation208_spill] sm:$0xff] %v21678_v28  ;;  %v21688_v13 = vand.u32 4294901760, %v21678_v28 }
 0x6cc   :  { %14709 = vmatprep.mubr.msk.f32.mxu1 %vm6797_vm0, %v25113_v22  ;;  %14623 = vmatprep.mubr.msk.f32.mxu0 %vm6793_vm2, %v25113_v22  ;;  %vm25209_vm2 = vcmp.eq.s32.totalorder %v25208_v17, %v25107_v24  ;;  %25271 = vst [vmem:[#allocation206_spill] sm:$0xff] %v21652_v8  ;;  %v9308_v17 = vsub.f32 %v21644_v1, %v21652_v8 }
 0x6cd   :  { %14749 = vmatpush3.msra.mxu0 %v21439_v3  ;;  %14831 = vmatpush3.msra.mxu1 %v9274_v40  ;;  %25279 = vst [vmem:[#allocation210_spill] sm:$0xff] %v21688_v13  ;;  %v9315_v62 = vsub.f32 %v21678_v28, %v21688_v13 }
 0x6ce   :  { %14750 = vmatprep.subr.mxu0 %v21468_v53  ;;  %14832 = vmatprep.subr.mxu1 %v9281_v46  ;;  %v9309_v50 = vand.u32 4294901760, %v9308_v17 }
 0x6cf   :  { %14710 = vmatmul.mubr.msk.f32.gmra.mxu1 %vm6798_vm13, %v25113_v22  ;;  %14624 = vmatmul.mubr.msk.f32.gmra.mxu0 %vm6794_vm5, %v25113_v22  ;;  %vm25214_vm5 = vcmp.eq.s32.totalorder %v25213_v5, %v25107_v24  ;;  %v6653_v5 = vld [vmem:[%s23408_s6 + $0x30] sm:$0xff]  ;;  %v9316_v55 = vand.u32 4294901760, %v9315_v62  ;;  %v21807_v62 = vand.u32 4294901760, %v6647_v26 }
 0x6d0   :  { %14712 = vmatprep.mubr.msk.f32.mxu1 %vm6799_vm3, %v25113_v22  ;;  %14626 = vmatprep.mubr.msk.f32.mxu0 %vm6795_vm11, %v25113_v22  ;;  %vm25222_vm11 = vmmov %vm25209_vm2 }
 0x6d1   :  { %14751 = vmatpush3.msra.mxu0 %v21468_v53  ;;  %14833 = vmatpush3.msra.mxu1 %v9281_v46  ;;  %25301 = vst [vmem:[#allocation236_spill] sm:$0xff] %v21807_v62 }
 0x6d2   :  { %14752 = vmatprep.subr.mxu0 %v21499_v23  ;;  %14834 = vmatprep.subr.mxu1 %v9288_v37 }
 0x6d3   :  { %14713 = vmatmul.mubr.msk.f32.gmra.mxu1 %vm6800_vm1, %v25113_v22  ;;  %14627 = vmatmul.mubr.msk.f32.gmra.mxu0 %vm6796_vm10, %v25113_v22  ;;  %vm25221_vm10 = vcmp.eq.s32.totalorder %v25220_v63, %v25107_v24  ;;  %v21691_v63 = vsub.f32 %v6654_v32, %v21680_v18 }
 0x6d4   :  { %14715 = vmatprep.mubr.msk.f32.mxu1 %vm6801_vm14, %v25113_v22  ;;  %14629 = vmatprep.mubr.msk.f32.mxu0 %vm6797_vm0, %v25113_v22  ;;  %vm25225_vm0 = vmmov %vm25211_vm4 }
 0x6d5   :  { %14753 = vmatpush3.msra.mxu0 %v21499_v23  ;;  %14835 = vmatpush3.msra.mxu1 %v9288_v37  ;;  %25280 = vst [vmem:[#allocation213_spill] sm:$0xff] %v21691_v63  ;;  %v21713_v31 = vand.u32 4294901760, %v21691_v63 }
 0x6d6   :  { %14754 = vmatprep.subr.mxu0 %v21530_v60  ;;  %14836 = vmatprep.subr.mxu1 %v9295_v41 }
 0x6d7   :  { %14716 = vmatmul.mubr.msk.f32.gmra.mxu1 %vm6802_vm12, %v25113_v22  ;;  %14630 = vmatmul.mubr.msk.f32.gmra.mxu0 %vm6798_vm13, %v25113_v22  ;;  %vm25224_vm13 = vcmp.eq.s32.totalorder %v25223_v25, %v25107_v24  ;;  %v21693_v25 = vand.u32 4294901760, %v6653_v5  ;;  %25284 = vst [vmem:[#allocation215_spill] sm:$0xff] %v21713_v31  ;;  %v9322_v40 = vsub.f32 %v21691_v63, %v21713_v31 }
 0x6d8   :  { %14718 = vmatprep.mubr.msk.f32.mxu1 %vm6803_vm6, %v25113_v22  ;;  %14632 = vmatprep.mubr.msk.f32.mxu0 %vm6799_vm3, %v25113_v22  ;;  %vm25231_vm3 = vmmov %vm25214_vm5 }
 0x6d9   :  { %14755 = vmatpush3.msra.mxu0 %v21530_v60  ;;  %14837 = vmatpush3.msra.mxu1 %v9295_v41  ;;  %25281 = vst [vmem:[#allocation212_spill] sm:$0xff] %v21693_v25  ;;  %v21767_v41 = vsub.f32 %v6650_v15, %v21754_v44 }
 0x6da   :  { %14756 = vmatprep.subr.mxu0 %v21561_v61  ;;  %14838 = vmatprep.subr.mxu1 %v9302_v20 }
 0x6db   :  { %14719 = vmatmul.mubr.msk.f32.gmra.mxu1 %vm25209_vm2, %v25113_v22  ;;  %14633 = vmatmul.mubr.msk.f32.gmra.mxu0 %vm6800_vm1, %v25113_v22  ;;  %vm25230_vm1 = vcmp.eq.s32.totalorder %v25229_v16, %v25107_v24  ;;  %vm25240_vm2 = vmmov %vm25221_vm10  ;;  %v21716_v16 = vsub.f32 %v6653_v5, %v21693_v25  ;;  %25293 = vst [vmem:[#allocation224_spill] sm:$0xff] %v21767_v41  ;;  %v21785_v32 = vand.u32 4294901760, %v21767_v41 }
 0x6dc   :  { %14721 = vmatprep.mubr.msk.f32.mxu1 %vm25211_vm4, %v25113_v22  ;;  %14635 = vmatprep.mubr.msk.f32.mxu0 %vm6801_vm14, %v25113_v22  ;;  %vm25234_vm14 = vmmov %vm25216_vm9  ;;  %vm25242_vm4 = vcmp.eq.s32.totalorder %v25241_v54, %v25107_v24 }
 0x6dd   :  { %14757 = vmatpush3.msra.mxu0 %v21561_v61  ;;  %14839 = vmatpush3.msra.mxu1 %v9302_v20  ;;  %25285 = vst [vmem:[#allocation214_spill] sm:$0xff] %v21716_v16  ;;  %25296 = vst [vmem:[#allocation231_spill] sm:$0xff] %v21785_v32  ;;  %v9350_v5 = vsub.f32 %v21767_v41, %v21785_v32 }
 0x6de   :  { %14758 = vmatprep.subr.mxu0 %v21592_v12  ;;  %14840 = vmatprep.subr.mxu1 %v9309_v50 }
 0x6df   :  { %14722 = vmatmul.mubr.msk.f32.gmra.mxu1 %vm25214_vm5, %v25113_v22  ;;  %14636 = vmatmul.mubr.msk.f32.gmra.mxu0 %vm6802_vm12, %v25113_v22  ;;  %vm25233_vm12 = vcmp.eq.s32.totalorder %v25232_v33, %v25107_v24  ;;  %vm25243_vm5 = vmmov %vm25224_vm13  ;;  %v21718_v33 = vand.u32 4294901760, %v6652_v52 }
 0x6e0   :  { %14724 = vmatprep.mubr.msk.f32.mxu1 %vm25216_vm9, %v25113_v22  ;;  %14638 = vmatprep.mubr.msk.f32.mxu0 %vm6803_vm6, %v25113_v22  ;;  %vm25239_vm6 = vcmp.eq.s32.totalorder %v25238_v35, %v25107_v24  ;;  %vm25248_vm9 = vcmp.eq.s32.totalorder %v25247_v56, %v25107_v24  ;;  %v21728_v35 = vand.u32 4294901760, %v21716_v16  ;;  %v9323_v56 = vand.u32 4294901760, %v9322_v40 }
 0x6e1   :  { %14759 = vmatpush3.msra.mxu0 %v21592_v12  ;;  %25286 = vst [vmem:[#allocation217_spill] sm:$0xff] %v21718_v33  ;;  %14841 = vmatpush3.msra.mxu1 %v9309_v50  ;;  %v21731_v54 = vsub.f32 %v6652_v52, %v21718_v33 }
 0x6e2   :  { %14760 = vmatprep.subr.mxu0 %v21623_v47  ;;  %25287 = vst [vmem:[#allocation216_spill] sm:$0xff] %v21728_v35  ;;  %14842 = vmatprep.subr.mxu1 %v9316_v55 }
 0x6e3   :  { %14725 = vmatmul.mubr.msk.f32.gmra.mxu1 %vm25221_vm10, %v25113_v22  ;;  %14639 = vmatmul.mubr.msk.f32.gmra.mxu0 %vm25222_vm11, %v25113_v22  ;;  %vm25249_vm10 = vmmov %vm25230_vm1  ;;  %vm25251_vm11 = vcmp.eq.s32.totalorder %v25250_v36, %v25107_v24  ;;  %25288 = vst [vmem:[#allocation219_spill] sm:$0xff] %v21731_v54  ;;  %v9329_v36 = vsub.f32 %v21716_v16, %v21728_v35  ;;  %v21752_v4 = vand.u32 4294901760, %v21731_v54 }
 0x6e4   :  { %14727 = vmatprep.mubr.msk.f32.mxu1 %vm25224_vm13, %v25113_v22  ;;  %14641 = vmatprep.mubr.msk.f32.mxu0 %vm25225_vm0, %v25113_v22  ;;  %vm25252_vm13 = vmmov %vm25233_vm12  ;;  %vm25257_vm0 = vcmp.eq.s32.totalorder %v25256_v14, %v25107_v24  ;;  %v6649_v14 = vld [vmem:[%s23408_s6 + $0x10] sm:$0xff] }
 0x6e5   :  { %14761 = vmatpush3.msra.mxu0 %v21623_v47  ;;  %25290 = vst [vmem:[#allocation222_spill] sm:$0xff] %v21752_v4  ;;  %14843 = vmatpush3.msra.mxu1 %v9316_v55  ;;  %v9330_v10 = vand.u32 4294901760, %v9329_v36  ;;  %v9336_v58 = vsub.f32 %v21731_v54, %v21752_v4 }
 0x6e6   :  { %14762 = vmatprep.subr.mxu0 %v21654_v51  ;;  %14844 = vmatprep.subr.mxu1 %v9323_v56 }
 0x6e7   :  { %14728 = vmatmul.mubr.msk.f32.gmra.mxu1 %vm25230_vm1, %v25113_v22  ;;  %14642 = vmatmul.mubr.msk.f32.gmra.mxu0 %vm25231_vm3, %v25113_v22  ;;  %vm25258_vm1 = vmmov %vm25239_vm6  ;;  %vm25260_vm3 = vcmp.eq.s32.totalorder %v25259_v57, %v25107_v24  ;;  %v9337_v45 = vand.u32 4294901760, %v9336_v58  ;;  %v21824_v58 = vsub.f32 %v6647_v26, %v21807_v62 }
 0x6e8   :  { %14730 = vmatprep.mubr.msk.f32.mxu1 %vm25233_vm12, %v25113_v22  ;;  %14644 = vmatprep.mubr.msk.f32.mxu0 %vm25234_vm14, %v25113_v22  ;;  %vm25261_vm12 = vmmov %vm25242_vm4  ;;  %vm25266_vm14 = vcmp.eq.s32.totalorder %v25265_v59, %v25107_v24  ;;  %v21769_v59 = vand.u32 4294901760, %v6649_v14 }
 0x6e9   :  { %14763 = vmatpush3.msra.mxu0 %v21654_v51  ;;  %14845 = vmatpush3.msra.mxu1 %v9323_v56  ;;  %v9351_v56 = vand.u32 4294901760, %v9350_v5  ;;  %25303 = vst [vmem:[#allocation239_spill] sm:$0xff] %v21824_v58  ;;  %v21830_v5 = vand.u32 4294901760, %v21824_v58 }
 0x6ea   :  { %14764 = vmatprep.subr.mxu0 %v21680_v18  ;;  %25294 = vst [vmem:[#allocation228_spill] sm:$0xff] %v21769_v59  ;;  %14846 = vmatprep.subr.mxu1 %v9330_v10  ;;  %v21788_v42 = vsub.f32 %v6649_v14, %v21769_v59 }
 0x6eb   :  { %14731 = vmatmul.mubr.msk.f32.gmra.mxu1 %vm25239_vm6, %v25113_v22  ;;  %14645 = vmatmul.mubr.msk.f32.gmra.mxu0 %vm25240_vm2, %v25113_v22  ;;  %vm25267_vm6 = vmmov %vm25248_vm9  ;;  %vm25268_vm2 = vcmp.eq.s32.totalorder %v21069_v7, %v25107_v24  ;;  %v6651_v7 = vld [vmem:[%s23408_s6 + $0x20] sm:$0xff]  ;;  %25304 = vst [vmem:[#allocation240_spill] sm:$0xff] %v21830_v5 }
 0x6ec   :  { %14733 = vmatprep.mubr.msk.f32.mxu1 %vm25242_vm4, %v25113_v22  ;;  %14647 = vmatprep.mubr.msk.f32.mxu0 %vm25243_vm5, %v25113_v22  ;;  %vm25269_vm4 = vmmov %vm25251_vm11  ;;  %v21738_v48 = vand.u32 4294901760, %v6651_v7  ;;  %25297 = vst [vmem:[#allocation230_spill] sm:$0xff] %v21788_v42  ;;  %v21802_v50 = vand.u32 4294901760, %v21788_v42 }
 0x6ed   :  { %vm25274_vm5 = vmmov %vm25257_vm0  ;;  %14765 = vmatpush3.msra.mxu0 %v21680_v18  ;;  %14847 = vmatpush3.msra.mxu1 %v9330_v10 }
 0x6ee   :  { %14766 = vmatprep.subr.mxu0 %v21693_v25  ;;  %25289 = vst [vmem:[#allocation218_spill] sm:$0xff] %v21738_v48  ;;  %v21758_v37 = vsub.f32 %v6651_v7, %v21738_v48  ;;  %14848 = vmatprep.subr.mxu1 %v9337_v45  ;;  %25299 = vst [vmem:[#allocation233_spill] sm:$0xff] %v21802_v50  ;;  %v9357_v36 = vsub.f32 %v21788_v42, %v21802_v50 }
 0x6ef   :  { %14734 = vmatmul.mubr.msk.f32.gmra.mxu1 %vm25248_vm9, %v25113_v22  ;;  %14648 = vmatmul.mubr.msk.f32.gmra.mxu0 %vm25249_vm10, %v25113_v22  ;;  %vm25276_vm9 = vmmov %vm25260_vm3 }
 0x6f0   :  { %14736 = vmatprep.mubr.msk.f32.mxu1 %vm25251_vm11, %v25113_v22  ;;  %14650 = vmatprep.mubr.msk.f32.mxu0 %vm25252_vm13, %v25113_v22  ;;  %vm25282_vm10 = vmmov %vm25266_vm14  ;;  %25292 = vst [vmem:[#allocation225_spill] sm:$0xff] %v21758_v37  ;;  %v21776_v30 = vand.u32 4294901760, %v21758_v37 }
 0x6f1   :  { %vm25283_vm11 = vmmov %vm25268_vm2  ;;  %14767 = vmatpush3.msra.mxu0 %v21693_v25  ;;  %14849 = vmatpush3.msra.mxu1 %v9337_v45 }
 0x6f2   :  { %14768 = vmatprep.subr.mxu0 %v21718_v33  ;;  %25295 = vst [vmem:[#allocation227_spill] sm:$0xff] %v21776_v30  ;;  %v9343_v24 = vsub.f32 %v21758_v37, %v21776_v30 }
 0x6f3   :  { %14737 = vmatmul.mubr.msk.f32.gmra.mxu1 %vm25257_vm0, %v25113_v22  ;;  %14651 = vmatmul.mubr.msk.f32.gmra.mxu0 %vm25258_vm1, %v25113_v22 }
 0x6f4   :  { %14739 = vmatprep.mubr.msk.f32.mxu1 %vm25260_vm3, %v25113_v22  ;;  %14653 = vmatprep.mubr.msk.f32.mxu0 %vm25261_vm12, %v25113_v22  ;;  %v9344_v55 = vand.u32 4294901760, %v9343_v24 }
 0x6f5   :  { %14769 = vmatpush3.msra.mxu0 %v21718_v33 }
 0x6f6   :  { %14770 = vmatprep.subr.mxu0 %v21738_v48  ;;  %14850 = vmatprep.subr.mxu1 %v9344_v55 }
 0x6f7   :  { %14740 = vmatmul.mubr.msk.f32.gmra.mxu1 %vm25266_vm14, %v25113_v22  ;;  %14654 = vmatmul.mubr.msk.f32.gmra.mxu0 %vm25267_vm6, %v25113_v22 }
 0x6f8   :  { %14742 = vmatprep.mubr.msk.f32.mxu1 %vm25268_vm2, %v25113_v22  ;;  %14656 = vmatprep.mubr.msk.f32.mxu0 %vm25269_vm4, %v25113_v22 }
 0x6f9   :  { %14771 = vmatpush3.msra.mxu0 %v21738_v48  ;;  %14851 = vmatpush3.msra.mxu1 %v9344_v55 }
 0x6fa   :  { %14772 = vmatprep.subr.mxu0 %v21754_v44  ;;  %14852 = vmatprep.subr.mxu1 %v9351_v56 }
 0x6fb   :  { %14743 = vmatmul.mubr.msk.f32.gmra.mxu1 %vm6820_vm15, %v25113_v22  ;;  %14657 = vmatmul.mubr.msk.f32.gmra.mxu0 %vm25274_vm5, %v25113_v22 }
 0x6fc   :  { %14745 = vmatprep.mubr.msk.f32.mxu1 %vm6821_vm8, %v25113_v22  ;;  %14659 = vmatprep.mubr.msk.f32.mxu0 %vm25276_vm9, %v25113_v22 }
 0x6fd   :  { %14773 = vmatpush3.msra.mxu0 %v21754_v44  ;;  %14853 = vmatpush3.msra.mxu1 %v9351_v56 }
 0x6fe   :  { %14774 = vmatprep.subr.mxu0 %v21769_v59 }
 0x6ff   :  { %14746 = vmatmul.mubr.msk.f32.gmra.mxu1 %vm6822_vm7, %v25113_v22  ;;  %14660 = vmatmul.mubr.msk.f32.gmra.mxu0 %vm25282_vm10, %v25113_v22 }
 0x700   :  { %14662 = vmatprep.mubr.msk.f32.mxu0 %vm25283_vm11, %v25113_v22  ;;  %14775 = vmatpush3.msra.mxu0 %v21769_v59 }
 0x701   :  { %v14382_v9 = vpop.f32.mrf.mxu1 }
 0x703   :  { %14663 = vmatmul.mubr.msk.f32.gmra.mxu0 %vm6820_vm15, %v25113_v22  ;;  %v21743_v46 = vpop.f32.mrf.mxu1 }
 0x704   :  { %14665 = vmatprep.mubr.msk.f32.mxu0 %vm6821_vm8, %v25113_v22 }
 0x705   :  { %v14385_v57 = vpop.f32.mrf.mxu1 }
 0x707   :  { %14666 = vmatmul.mubr.msk.f32.gmra.mxu0 %vm6822_vm7, %v25113_v22  ;;  %v21781_v20 = vpop.f32.mrf.mxu1  ;;  %v21790_v22 = vand.u32 4294901760, %v6648_v27 }
 0x709   :  { %25298 = vst [vmem:[#allocation234_spill] sm:$0xff] %v21790_v22  ;;  %v14388_v17 = vpop.f32.mrf.mxu1  ;;  %v21805_v52 = vsub.f32 %v6648_v27, %v21790_v22  ;;  %v9358_v27 = vand.u32 4294901760, %v9357_v36  ;;  %14776 = vmatprep.subr.mxu0 %v21790_v22  ;;  %v9371_v36 = vsub.f32 %v21824_v58, %v21830_v5 }
 0x70a   :  { %14777 = vmatpush3.msra.mxu0 %v21790_v22 }
 0x70b   :  { %25300 = vst [vmem:[#allocation237_spill] sm:$0xff] %v21805_v52  ;;  %v14302_v7 = vpop.f32.mrf.mxu0  ;;  %v21812_v15 = vpop.f32.mrf.mxu1  ;;  %v21818_v14 = vand.u32 4294901760, %v21805_v52  ;;  %14854 = vmatprep.subr.mxu1 %v9358_v27  ;;  %14778 = vmatprep.subr.mxu0 %v21807_v62 }
 0x70c   :  { %v21810_v40 = vadd.f32 %v14382_v9, %v14302_v7  ;;  %14855 = vmatpush3.msra.mxu1 %v9358_v27  ;;  %14779 = vmatpush3.msra.mxu0 %v21807_v62 }
 0x70d   :  { %25302 = vst [vmem:[#allocation238_spill] sm:$0xff] %v21818_v14  ;;  %v21820_v10 = vpop.f32.mrf.mxu0  ;;  %v14391_v9 = vpop.f32.mrf.mxu1  ;;  %v9364_v45 = vsub.f32 %v21805_v52, %v21818_v14  ;;  %14908 = vmatprep.subr.mxu0 %v21458_v21 }
 0x70f   :  { %v14305_v24 = vpop.f32.mrf.mxu0  ;;  %v21835_v50 = vpop.f32.mrf.mxu1  ;;  %v9365_v26 = vand.u32 4294901760, %v9364_v45 }
 0x710   :  { %v21833_v7 = vadd.f32 %v14385_v57, %v14305_v24  ;;  %v9372_v24 = vand.u32 4294901760, %v9371_v36 }
 0x711   :  { %v21838_v55 = vpop.f32.mrf.mxu0  ;;  %v14394_v14 = vpop.f32.mrf.mxu1  ;;  %14856 = vmatprep.subr.mxu1 %v9365_v26 }
 0x712   :  { %14857 = vmatpush3.msra.mxu1 %v9365_v26 }
 0x713   :  { %v14308_v57 = vpop.f32.mrf.mxu0  ;;  %v21847_v45 = vpop.f32.mrf.mxu1  ;;  %14858 = vmatprep.subr.mxu1 %v9372_v24 }
 0x714   :  { %v21845_v56 = vadd.f32 %v14388_v17, %v14308_v57  ;;  %14859 = vmatpush3.msra.mxu1 %v9372_v24 }
 0x715   :  { %v21849_v32 = vpop.f32.mrf.mxu0  ;;  %v14397_v5 = vpop.f32.mrf.mxu1  ;;  %14988 = vmatprep.subr.mxu1 %v21439_v3 }
 0x717   :  { %v14311_v30 = vpop.f32.mrf.mxu0  ;;  %v21854_v4 = vpop.f32.mrf.mxu1 }
 0x718   :  { %v21852_v27 = vadd.f32 %v14391_v9, %v14311_v30 }
 0x719   :  { %v21856_v36 = vpop.f32.mrf.mxu0  ;;  %v14400_v35 = vpop.f32.mrf.mxu1 }
 0x71b   :  { %v14314_v17 = vpop.f32.mrf.mxu0  ;;  %v21860_v31 = vpop.f32.mrf.mxu1 }
 0x71c   :  { %v21858_v57 = vadd.f32 %v14394_v14, %v14314_v17 }
 0x71d   :  { %v21862_v26 = vpop.f32.mrf.mxu0  ;;  %v14403_v13 = vpop.f32.mrf.mxu1 }
 0x71f   :  { %v14317_v8 = vpop.f32.mrf.mxu0  ;;  %v21866_v29 = vpop.f32.mrf.mxu1 }
 0x720   :  { %v21864_v24 = vadd.f32 %v14397_v5, %v14317_v8 }
 0x721   :  { %v21868_v30 = vpop.f32.mrf.mxu0 }
 0x722   :  { %v14406_v9 = vpop.f32.mrf.mxu1 }
 0x723   :  { %v14320_v34 = vpop.f32.mrf.mxu0 }
 0x724   :  { %v21870_v39 = vadd.f32 %v14400_v35, %v14320_v34  ;;  %v21872_v49 = vpop.f32.mrf.mxu1 }
 0x725   :  { %v21874_v14 = vpop.f32.mrf.mxu0 }
 0x726   :  { %25305 = vst [vmem:[#allocation241_spill] sm:$0xff] %v21870_v39  ;;  %v14409_v17 = vpop.f32.mrf.mxu1 }
 0x727   :  { %v14323_v38 = vpop.f32.mrf.mxu0 }
 0x728   :  { %v21876_v43 = vadd.f32 %v14403_v13, %v14323_v38  ;;  %v21878_v58 = vpop.f32.mrf.mxu1 }
 0x729   :  { %v21880_v8 = vpop.f32.mrf.mxu0 }
 0x72a   :  { %25306 = vst [vmem:[#allocation242_spill] sm:$0xff] %v21876_v43  ;;  %v14412_v5 = vpop.f32.mrf.mxu1 }
 0x72b   :  { %v14326_v52 = vpop.f32.mrf.mxu0 }
 0x72c   :  { %v21882_v42 = vadd.f32 %v14406_v9, %v14326_v52  ;;  %v21884_v41 = vpop.f32.mrf.mxu1 }
 0x72d   :  { %v21886_v34 = vpop.f32.mrf.mxu0 }
 0x72e   :  { %25307 = vst [vmem:[#allocation243_spill] sm:$0xff] %v21882_v42  ;;  %v14415_v35 = vpop.f32.mrf.mxu1 }
 0x72f   :  { %v14329_v62 = vpop.f32.mrf.mxu0 }
 0x730   :  { %v21888_v37 = vadd.f32 %v14409_v17, %v14329_v62  ;;  %v21890_v22 = vpop.f32.mrf.mxu1 }
 0x731   :  { %v21892_v38 = vpop.f32.mrf.mxu0 }
 0x732   :  { %25308 = vst [vmem:[#allocation244_spill] sm:$0xff] %v21888_v37  ;;  %v14418_v13 = vpop.f32.mrf.mxu1 }
 0x733   :  { %v14332_v54 = vpop.f32.mrf.mxu0 }
 0x734   :  { %v21894_v59 = vadd.f32 %v14412_v5, %v14332_v54  ;;  %v21896_v16 = vpop.f32.mrf.mxu1 }
 0x735   :  { %v21898_v52 = vpop.f32.mrf.mxu0 }
 0x736   :  { %25309 = vst [vmem:[#allocation245_spill] sm:$0xff] %v21894_v59  ;;  %v14421_v9 = vpop.f32.mrf.mxu1 }
 0x737   :  { %v14335_v44 = vpop.f32.mrf.mxu0 }
 0x738   :  { %v21900_v63 = vadd.f32 %v14415_v35, %v14335_v44  ;;  %v21902_v48 = vpop.f32.mrf.mxu1 }
 0x739   :  { %v21904_v62 = vpop.f32.mrf.mxu0 }
 0x73a   :  { %25310 = vst [vmem:[#allocation246_spill] sm:$0xff] %v21900_v63  ;;  %v14424_v17 = vpop.f32.mrf.mxu1 }
 0x73b   :  { %v14338_v28 = vpop.f32.mrf.mxu0 }
 0x73c   :  { %v21906_v33 = vadd.f32 %v14418_v13, %v14338_v28  ;;  %v21908_v1 = vpop.f32.mrf.mxu1 }
 0x73d   :  { %v21910_v54 = vpop.f32.mrf.mxu0 }
 0x73e   :  { %25311 = vst [vmem:[#allocation247_spill] sm:$0xff] %v21906_v33  ;;  %v14427_v5 = vpop.f32.mrf.mxu1 }
 0x73f   :  { %v14341_v25 = vpop.f32.mrf.mxu0 }
 0x740   :  { %v21912_v11 = vadd.f32 %v14421_v9, %v14341_v25  ;;  %v21914_v18 = vpop.f32.mrf.mxu1 }
 0x741   :  { %v21916_v44 = vpop.f32.mrf.mxu0 }
 0x742   :  { %25312 = vst [vmem:[#allocation248_spill] sm:$0xff] %v21912_v11 }
 0x743   :  { %v21918_v35 = vpop.f32.mrf.mxu1  ;;  %v14344_v2 = vpop.f32.mrf.mxu0 }
 0x744   :  { %v21920_v51 = vadd.f32 %v14424_v17, %v14344_v2 }
 0x745   :  { %v21922_v6 = vpop.f32.mrf.mxu1  ;;  %v21924_v28 = vpop.f32.mrf.mxu0 }
 0x746   :  { %25313 = vst [vmem:[#allocation249_spill] sm:$0xff] %v21920_v51 }
 0x747   :  { %v21926_v13 = vpop.f32.mrf.mxu1  ;;  %v14347_v47 = vpop.f32.mrf.mxu0 }
 0x748   :  { %v21928_v19 = vadd.f32 %v14427_v5, %v14347_v47 }
 0x749   :  { %v21930_v25 = vpop.f32.mrf.mxu1  ;;  %v21932_v9 = vpop.f32.mrf.mxu0 }
 0x74a   :  { %25314 = vst [vmem:[#allocation250_spill] sm:$0xff] %v21928_v19  ;;  %25315 = vst [vmem:[#allocation251_spill] sm:$0xff] %v21930_v25 }
 0x74b   :  { %v21934_v11 = vpop.f32.mrf.mxu1  ;;  %v21936_v12 = vpop.f32.mrf.mxu0 }
 0x74c   :  { %25316 = vst [vmem:[#allocation252_spill] sm:$0xff] %v21934_v11 }
 0x74d   :  { %v21938_v33 = vpop.f32.mrf.mxu1  ;;  %v21940_v2 = vpop.f32.mrf.mxu0 }
 0x74e   :  { %25317 = vst [vmem:[#allocation253_spill] sm:$0xff] %v21938_v33 }
 0x74f   :  { %v21942_v17 = vpop.f32.mrf.mxu1  ;;  %v21944_v51 = vpop.f32.mrf.mxu0 }
 0x750   :  { %25318 = vst [vmem:[#allocation254_spill] sm:$0xff] %v21942_v17 }
 0x751   :  { %v21946_v0 = vpop.f32.mrf.mxu1  ;;  %v21948_v47 = vpop.f32.mrf.mxu0 }
 0x752   :  { %25319 = vst [vmem:[#allocation255_spill] sm:$0xff] %v21946_v0 }
 0x753   :  { %v21950_v5 = vpop.f32.mrf.mxu1  ;;  %v21952_v19 = vpop.f32.mrf.mxu0 }
 0x754   :  { %25320 = vst [vmem:[#allocation256_spill] sm:$0xff] %v21950_v5 }
 0x755   :  { %v21954_v21 = vpop.f32.mrf.mxu1  ;;  %v21956_v61 = vpop.f32.mrf.mxu0 }
 0x756   :  { %25321 = vst [vmem:[#allocation257_spill] sm:$0xff] %v21954_v21 }
 0x757   :  { %v21958_v60 = vpop.f32.mrf.mxu1  ;;  %v21960_v23 = vpop.f32.mrf.mxu0 }
 0x758   :  { %25322 = vst [vmem:[#allocation258_spill] sm:$0xff] %v21958_v60 }
 0x759   :  { %v21962_v63 = vpop.f32.mrf.mxu1  ;;  %v21964_v53 = vpop.f32.mrf.mxu0 }
 0x75a   :  { %25323 = vst [vmem:[#allocation259_spill] sm:$0xff] %v21962_v63 }
 0x75b   :  { %v21966_v3 = vpop.f32.mrf.mxu1  ;;  %v21968_v59 = vpop.f32.mrf.mxu0 }
 0x75c   :  { %25324 = vst [vmem:[#allocation260_spill] sm:$0xff] %v21966_v3 }
 0x75d   :  { %v21970_v37 = vpop.f32.mrf.mxu1  ;;  %v21972_v42 = vpop.f32.mrf.mxu0 }
 0x75e   :  { %25325 = vst [vmem:[#allocation261_spill] sm:$0xff] %v21970_v37 }
 0x75f   :  { %v21974_v43 = vpop.f32.mrf.mxu1  ;;  %v21976_v21 = vpop.f32.mrf.mxu0 }
 0x760   :  { %25326 = vst [vmem:[#allocation262_spill] sm:$0xff] %v21974_v43 }
 0x761   :  { %v21978_v5 = vpop.f32.mrf.mxu1  ;;  %v21980_v60 = vpop.f32.mrf.mxu0 }
 0x762   :  { %25327 = vst [vmem:[#allocation263_spill] sm:$0xff] %v21978_v5 }
 0x763   :  { %v21982_v0 = vpop.f32.mrf.mxu1  ;;  %v21984_v63 = vpop.f32.mrf.mxu0 }
 0x764   :  { %25328 = vst [vmem:[#allocation264_spill] sm:$0xff] %v21982_v0  ;;  %25329 = vst [vmem:[#allocation265_spill] sm:$0xff] %v21984_v63 }
 0x765   :  { %v21986_v17 = vpop.f32.mrf.mxu1  ;;  %v21988_v3 = vpop.f32.mrf.mxu0 }
 0x766   :  { %25330 = vst [vmem:[#allocation266_spill] sm:$0xff] %v21986_v17  ;;  %25331 = vst [vmem:[#allocation267_spill] sm:$0xff] %v21988_v3 }
 0x767   :  { %v21990_v33 = vpop.f32.mrf.mxu1  ;;  %v21992_v37 = vpop.f32.mrf.mxu0 }
 0x768   :  { %25332 = vst [vmem:[#allocation268_spill] sm:$0xff] %v21990_v33  ;;  %25333 = vst [vmem:[#allocation269_spill] sm:$0xff] %v21992_v37 }
 0x769   :  { %v21994_v11 = vpop.f32.mrf.mxu1  ;;  %v21996_v43 = vpop.f32.mrf.mxu0 }
 0x76a   :  { %25334 = vst [vmem:[#allocation270_spill] sm:$0xff] %v21994_v11  ;;  %25335 = vst [vmem:[#allocation271_spill] sm:$0xff] %v21996_v43 }
 0x76b   :  { %v21998_v39 = vpop.f32.mrf.mxu1  ;;  %v22000_v5 = vpop.f32.mrf.mxu0 }
 0x76c   :  { %25336 = vst [vmem:[#allocation272_spill] sm:$0xff] %v21998_v39  ;;  %25337 = vst [vmem:[#allocation273_spill] sm:$0xff] %v22000_v5 }
 0x76d   :  { %v22002_v25 = vpop.f32.mrf.mxu1  ;;  %v22004_v0 = vpop.f32.mrf.mxu0 }
 0x76e   :  { %25338 = vst [vmem:[#allocation274_spill] sm:$0xff] %v22002_v25  ;;  %25339 = vst [vmem:[#allocation275_spill] sm:$0xff] %v22004_v0 }
 0x76f   :  { %v22006_v63 = vpop.f32.mrf.mxu1  ;;  %v22008_v17 = vpop.f32.mrf.mxu0 }
 0x770   :  { %25340 = vst [vmem:[#allocation276_spill] sm:$0xff] %v22006_v63  ;;  %25341 = vst [vmem:[#allocation277_spill] sm:$0xff] %v22008_v17 }
 0x771   :  { %v22010_v3 = vpop.f32.mrf.mxu1  ;;  %v22012_v33 = vpop.f32.mrf.mxu0 }
 0x772   :  { %25342 = vst [vmem:[#allocation278_spill] sm:$0xff] %v22010_v3  ;;  %25343 = vst [vmem:[#allocation279_spill] sm:$0xff] %v22012_v33 }
 0x773   :  { %v22014_v37 = vpop.f32.mrf.mxu1  ;;  %v22016_v11 = vpop.f32.mrf.mxu0 }
 0x774   :  { %25344 = vst [vmem:[#allocation280_spill] sm:$0xff] %v22014_v37  ;;  %25345 = vst [vmem:[#allocation281_spill] sm:$0xff] %v22016_v11 }
 0x775   :  { %v22018_v43 = vpop.f32.mrf.mxu1  ;;  %v22020_v39 = vpop.f32.mrf.mxu0 }
 0x776   :  { %25346 = vst [vmem:[#allocation282_spill] sm:$0xff] %v22018_v43  ;;  %25347 = vst [vmem:[#allocation283_spill] sm:$0xff] %v22020_v39 }
 0x777   :  { %v22022_v5 = vpop.f32.mrf.mxu1  ;;  %v22024_v25 = vpop.f32.mrf.mxu0 }
 0x778   :  { %25348 = vst [vmem:[#allocation284_spill] sm:$0xff] %v22022_v5  ;;  %25349 = vst [vmem:[#allocation285_spill] sm:$0xff] %v22024_v25 }
 0x779   :  { %v22026_v0 = vpop.f32.mrf.mxu1  ;;  %v22028_v63 = vpop.f32.mrf.mxu0 }
 0x77a   :  { %25350 = vst [vmem:[#allocation286_spill] sm:$0xff] %v22026_v0 }
 0x77b   :  { %v22030_v17 = vpop.f32.mrf.mxu1  ;;  %v22032_v3 = vpop.f32.mrf.mxu0 }
 0x77c   :  { %25351 = vst [vmem:[#allocation287_spill] sm:$0xff] %v22030_v17  ;;  %25352 = vst [vmem:[#allocation288_spill] sm:$0xff] %v22032_v3  ;;  %v7436_v17 = vadd.f32 %v21743_v46, %v21820_v10  ;;  %v7448_v3 = vadd.f32 %v21781_v20, %v21838_v55  ;;  %v7520_v46 = vadd.f32 %v21866_v29, %v21880_v8  ;;  %v25363_v8 = vld [vmem:[#allocation267_spill] sm:$0xff] }
 0x77d   :  { %v22034_v33 = vpop.f32.mrf.mxu1  ;;  %v22036_v37 = vpop.f32.mrf.mxu0  ;;  %v7747_v55 = vadd.f32 %v21944_v51, %v21833_v7  ;;  %v22099_v51 = vadd.f32 %v21908_v1, %v21924_v28  ;;  %v7803_v1 = vadd.f32 %v21976_v21, %v21864_v24  ;;  %v25362_v21 = vld [vmem:[#allocation253_spill] sm:$0xff] }
 0x77e   :  { %25353 = vst [vmem:[#allocation289_spill] sm:$0xff] %v22034_v33  ;;  %v7460_v33 = vadd.f32 %v21812_v15, %v21849_v32  ;;  %v7532_v32 = vadd.f32 %v21872_v49, %v21886_v34  ;;  %v22072_v15 = vadd.f32 %v21884_v41, %v21898_v52  ;;  %v7726_v29 = vadd.f32 %v21940_v2, %v7436_v17  ;;  %v25364_v52 = vld [vmem:[#allocation254_spill] sm:$0xff] }
 0x77f   :  { %v22038_v11 = vpop.f32.mrf.mxu1  ;;  %v22040_v43 = vpop.f32.mrf.mxu0  ;;  %v7740_v49 = vadd.f32 %v21948_v47, %v7448_v3  ;;  %v22088_v41 = vadd.f32 %v21896_v16, %v21910_v54  ;;  %v7775_v3 = vadd.f32 %v21960_v23, %v21852_v27  ;;  %v7789_v16 = vadd.f32 %v21968_v59, %v21858_v57  ;;  %v25358_v27 = vld [vmem:[#allocation251_spill] sm:$0xff]  ;;  %v25368_v17 = vld [vmem:[#allocation258_spill] sm:$0xff] }
 0x780   :  { %25354 = vst [vmem:[#allocation290_spill] sm:$0xff] %v22038_v11  ;;  %v7472_v11 = vadd.f32 %v21835_v50, %v21856_v36  ;;  %v7544_v50 = vadd.f32 %v21878_v58, %v21892_v38  ;;  %v8032_v59 = vadd.f32 %v21922_v6, %v7726_v29  ;;  %v25365_v54 = vld [vmem:[#allocation255_spill] sm:$0xff]  ;;  %v22138_v47 = vadd.f32 %v25368_v17, %v7803_v1 }
 0x781   :  { %v22042_v39 = vpop.f32.mrf.mxu1  ;;  %v22044_v5 = vpop.f32.mrf.mxu0  ;;  %v8048_v57 = vadd.f32 %v25358_v27, %v7740_v49  ;;  %v25371_v29 = vld [vmem:[#allocation271_spill] sm:$0xff] }
 0x782   :  { %25355 = vst [vmem:[#allocation291_spill] sm:$0xff] %v22042_v39  ;;  %25356 = vst [vmem:[#allocation292_spill] sm:$0xff] %v22044_v5  ;;  %v7484_v39 = vadd.f32 %v21847_v45, %v21862_v26  ;;  %v7496_v5 = vadd.f32 %v21854_v4, %v21868_v30  ;;  %v7733_v4 = vadd.f32 %v21936_v12, %v21810_v40  ;;  %v25360_v26 = vld [vmem:[#allocation265_spill] sm:$0xff]  ;;  %v25372_v49 = vld [vmem:[#allocation243_spill] sm:$0xff] }
 0x783   :  { %v14702_v25 = vpop.f32.mrf.mxu1  ;;  %v22046_v0 = vpop.f32.mrf.mxu0  ;;  %v22092_v12 = vadd.f32 %v21902_v48, %v21916_v44  ;;  %v7754_v40 = vadd.f32 %v21956_v61, %v7460_v33  ;;  %v7768_v7 = vadd.f32 %v21964_v53, %v7472_v11  ;;  %v25366_v44 = vld [vmem:[#allocation256_spill] sm:$0xff]  ;;  %v25377_v27 = vld [vmem:[#allocation275_spill] sm:$0xff] }
 0x784   :  { %25357 = vst [vmem:[#allocation293_spill] sm:$0xff] %v22046_v0  ;;  %v7508_v0 = vadd.f32 %v21860_v31, %v21874_v14  ;;  %v22078_v31 = vadd.f32 %v21890_v22, %v21904_v62  ;;  %v7761_v22 = vadd.f32 %v21952_v19, %v21845_v56  ;;  %v22110_v19 = vadd.f32 %v21914_v18, %v21932_v9  ;;  %v25359_v18 = vld [vmem:[#allocation241_spill] sm:$0xff] }
 0x785   :  { %v8671_v10 = vpop.f32.mrf.mxu1  ;;  %v22064_v20 = vpop.f32.mrf.mxu0  ;;  %v7782_v61 = vadd.f32 %v21972_v42, %v7484_v39  ;;  %v8040_v33 = vadd.f32 %v21918_v35, %v7733_v4  ;;  %v7796_v23 = vadd.f32 %v21980_v60, %v7496_v5  ;;  %v8056_v56 = vadd.f32 %v21926_v13, %v7747_v55  ;;  %v25361_v42 = vld [vmem:[#allocation252_spill] sm:$0xff]  ;;  %v25367_v9 = vld [vmem:[#allocation257_spill] sm:$0xff]  ;;  %v25369_v5 = vld [vmem:[#allocation242_spill] sm:$0xff] }
 0x786   :  { %v7817_v30 = vadd.f32 %v25360_v26, %v25359_v18  ;;  %v8072_v14 = vadd.f32 %v25361_v42, %v7761_v22  ;;  %v8064_v24 = vadd.f32 %v25362_v21, %v7754_v40  ;;  %v7810_v34 = vadd.f32 %v25363_v8, %v7508_v0  ;;  %v25370_v0 = vld [vmem:[#allocation269_spill] sm:$0xff]  ;;  %v25378_v26 = vld [vmem:[#allocation244_spill] sm:$0xff]  ;;  %v25380_v42 = vld [vmem:[#allocation279_spill] sm:$0xff] }
 0x787   :  { %v14705_v45 = vpop.f32.mrf.mxu1  ;;  %v22084_v58 = vpop.f32.mrf.mxu0  ;;  %v8088_v62 = vadd.f32 %v25364_v52, %v7775_v3  ;;  %v22129_v6 = vadd.f32 %v25365_v54, %v7768_v7  ;;  %v22132_v35 = vadd.f32 %v25366_v44, %v7789_v16  ;;  %v22135_v2 = vadd.f32 %v25367_v9, %v7782_v61  ;;  %v25373_v22 = vld [vmem:[#allocation273_spill] sm:$0xff]  ;;  %v25374_v16 = vld [vmem:[#allocation259_spill] sm:$0xff] }
 0x788   :  { %v7831_v4 = vadd.f32 %v25370_v0, %v25369_v5  ;;  %v7824_v55 = vadd.f32 %v25371_v29, %v7520_v46  ;;  %v7845_v40 = vadd.f32 %v25373_v22, %v25372_v49  ;;  %v7838_v18 = vadd.f32 %v25377_v27, %v7532_v32  ;;  %v25381_v52 = vld [vmem:[#allocation261_spill] sm:$0xff]  ;;  %v25386_v0 = vld [vmem:[#allocation263_spill] sm:$0xff]  ;;  %v25391_v27 = vld [vmem:[#allocation270_spill] sm:$0xff] }
 0x789   :  { %v8683_v36 = vpop.f32.mrf.mxu1  ;;  %v22106_v48 = vpop.f32.mrf.mxu0  ;;  %v7852_v21 = vadd.f32 %v25380_v42, %v7544_v50  ;;  %v25383_v44 = vld [vmem:[#allocation245_spill] sm:$0xff]  ;;  %v25385_v50 = vld [vmem:[#allocation262_spill] sm:$0xff] }
 0x78a   :  { %v25384_v32 = vld [vmem:[#allocation281_spill] sm:$0xff]  ;;  %v22172_v5 = vadd.f32 %v25385_v50, %v7831_v4  ;;  %v22175_v29 = vadd.f32 %v25386_v0, %v7824_v55  ;;  %v25389_v55 = vld [vmem:[#allocation266_spill] sm:$0xff] }
 0x78b   :  { %v22117_v53 = vpop.f32.mrf.mxu1  ;;  %v14622_v11 = vpop.f32.mrf.mxu0  ;;  %v25398_v50 = vld [vmem:[#allocation285_spill] sm:$0xff] }
 0x78c   :  { %v8405_v39 = vadd.f32 %v14622_v11, %v8040_v33  ;;  %v22146_v33 = vadd.f32 %v25374_v16, %v7796_v23  ;;  %v22160_v23 = vadd.f32 %v25381_v52, %v7810_v34  ;;  %v25387_v34 = vld [vmem:[#allocation264_spill] sm:$0xff] }
 0x78d   :  { %v8695_v60 = vpop.f32.mrf.mxu1  ;;  %v8398_v38 = vpop.f32.mrf.mxu0  ;;  %v22178_v49 = vadd.f32 %v25387_v34, %v7845_v40  ;;  %v25390_v40 = vld [vmem:[#allocation268_spill] sm:$0xff] }
 0x78e   :  { %v8678_v28 = vadd.f32 %v14702_v25, %v8405_v39  ;;  %v8399_v13 = vadd.f32 %v8398_v38, %v8032_v59  ;;  %v25376_v59 = vld [vmem:[#allocation260_spill] sm:$0xff]  ;;  %v25379_v39 = vld [vmem:[#allocation277_spill] sm:$0xff] }
 0x78f   :  { %v14711_v3 = vpop.f32.mrf.mxu1  ;;  %v14625_v7 = vpop.f32.mrf.mxu0  ;;  %v22151_v1 = vadd.f32 %v25376_v59, %v7817_v30  ;;  %v7859_v46 = vadd.f32 %v25379_v39, %v25378_v26  ;;  %v25392_v26 = vld [vmem:[#allocation283_spill] sm:$0xff] }
 0x790   :  { %v22148_v25 = vand.u32 4294901760, %v8678_v28  ;;  %v8672_v61 = vadd.f32 %v8671_v10, %v8399_v13  ;;  %v8417_v11 = vadd.f32 %v14625_v7, %v8056_v56  ;;  %v7873_v13 = vadd.f32 %v25384_v32, %v25383_v44 }
 0x791   :  { %v22157_v8 = vpop.f32.mrf.mxu1  ;;  %v8410_v38 = vpop.f32.mrf.mxu0  ;;  %v22194_v59 = vadd.f32 %v25390_v40, %v7859_v46 }
 0x792   :  { %25375 = vst [vmem:[#allocation251_spill] sm:$0xff] %v22148_v25  ;;  %v22163_v54 = vsub.f32 %v8678_v28, %v22148_v25  ;;  %v22165_v10 = vand.u32 4294901760, %v8672_v61  ;;  %v8690_v56 = vadd.f32 %v14705_v45, %v8417_v11  ;;  %v8411_v30 = vadd.f32 %v8410_v38, %v8048_v57  ;;  %v25394_v38 = vld [vmem:[#allocation193_spill] sm:$0xff] }
 0x793   :  { %v22169_v9 = vpop.f32.mrf.mxu1  ;;  %v14628_v17 = vpop.f32.mrf.mxu0  ;;  %v22191_v11 = vadd.f32 %v25389_v55, %v7838_v18 }
 0x794   :  { %25382 = vst [vmem:[#allocation241_spill] sm:$0xff] %v22165_v10  ;;  %v24101_v28 = vand.u32 4294901760, %v22163_v54  ;;  %v22182_v45 = vsub.f32 %v8672_v61, %v22165_v10  ;;  %v22184_v57 = vand.u32 4294901760, %v8690_v56  ;;  %v8684_v22 = vadd.f32 %v8683_v36, %v8411_v30  ;;  %14860 = vmatprep.mubr.f32.mxu1 %v22165_v10 }
 0x795   :  { %v8429_v7 = vadd.f32 %v14628_v17, %v8072_v14  ;;  %v22187_v16 = vpop.f32.mrf.mxu1  ;;  %v8422_v4 = vpop.f32.mrf.mxu0  ;;  %14861 = vmatmul.mubr.f32.vlgmr.msra.gmra.mxu1 %v22148_v25  ;;  %v22197_v61 = vadd.f32 %v25391_v27, %v7852_v21  ;;  %v7866_v36 = vadd.f32 %v25392_v26, %v22072_v15  ;;  %v25395_v15 = vld [vmem:[#allocation223_spill] sm:$0xff] }
 0x796   :  { %25388 = vst [vmem:[#allocation265_spill] sm:$0xff] %v22184_v57  ;;  %v22202_v39 = vsub.f32 %v8690_v56, %v22184_v57  ;;  %v22204_v14 = vand.u32 4294901760, %v8684_v22  ;;  %v8423_v42 = vadd.f32 %v8422_v4, %v8064_v24  ;;  %14989 = vmatpush3.msra.mxu1 %v25394_v38  ;;  %v8955_v18 = vsub.f32 %v22163_v54, %v24101_v28  ;;  %v25396_v56 = vld [vmem:[#allocation272_spill] sm:$0xff] }
 0x797   :  { %v8702_v46 = vadd.f32 %v22117_v53, %v8429_v7  ;;  %v22211_v52 = vpop.f32.mrf.mxu1  ;;  %v14631_v21 = vpop.f32.mrf.mxu0  ;;  %v24103_v30 = vand.u32 4294901760, %v22182_v45  ;;  %14990 = vmatprep.subr.mxu1 %v25395_v15  ;;  %v22216_v44 = vadd.f32 %v25396_v56, %v7873_v13  ;;  %v25397_v53 = vld [vmem:[#allocation246_spill] sm:$0xff]  ;;  %v25402_v28 = vld [vmem:[#allocation232_spill] sm:$0xff] }
 0x798   :  { %25393 = vst [vmem:[#allocation252_spill] sm:$0xff] %v22204_v14  ;;  %v22219_v24 = vsub.f32 %v8684_v22, %v22204_v14  ;;  %v8696_v32 = vadd.f32 %v8695_v60, %v8423_v42  ;;  %v8441_v17 = vadd.f32 %v14631_v21, %v8088_v62  ;;  %14863 = vmatprep.mubr.f32.mxu1 %v22204_v14  ;;  %v24102_v60 = vand.u32 4294901760, %v22202_v39  ;;  %v25400_v62 = vld [vmem:[#allocation196_spill] sm:$0xff] }
 0x799   :  { %14991 = vmatpush3.msra.mxu1 %v25395_v15  ;;  %v7887_v0 = vadd.f32 %v25398_v50, %v25397_v53  ;;  %v22225_v34 = vand.u32 4294901760, %v8702_v46  ;;  %v22227_v7 = vpop.f32.mrf.mxu1  ;;  %v8434_v4 = vpop.f32.mrf.mxu0  ;;  %v8945_v13 = vsub.f32 %v22182_v45, %v24103_v30  ;;  %v8956_v26 = vand.u32 4294901760, %v8955_v18  ;;  %v25407_v30 = vld [vmem:[#allocation220_spill] sm:$0xff] }
 0x79a   :  { %14864 = vmatmul.mubr.f32.gmra.mxu1 %v22184_v57  ;;  %14992 = vmatprep.subr.mxu1 %v25400_v62  ;;  %v22235_v22 = vand.u32 4294901760, %v8696_v32  ;;  %v8714_v55 = vadd.f32 %v14711_v3, %v8441_v17  ;;  %v8435_v40 = vadd.f32 %v8434_v4, %v22129_v6  ;;  %v24104_v27 = vand.u32 4294901760, %v22219_v24 }
 0x79b   :  { %25399 = vst [vmem:[#allocation253_spill] sm:$0xff] %v22225_v34  ;;  %14993 = vmatpush3.msra.mxu1 %v25400_v62  ;;  %v22241_v42 = vsub.f32 %v8702_v46, %v22225_v34  ;;  %v22243_v21 = vpop.f32.mrf.mxu1  ;;  %v14634_v56 = vpop.f32.mrf.mxu0  ;;  %v8946_v53 = vand.u32 4294901760, %v8945_v13  ;;  %v8975_v50 = vsub.f32 %v22202_v39, %v24102_v60  ;;  %v22260_v17 = vadd.f32 %v22028_v63, %v22078_v31  ;;  %v25406_v60 = vld [vmem:[#allocation199_spill] sm:$0xff] }
 0x79c   :  { %25401 = vst [vmem:[#allocation267_spill] sm:$0xff] %v22235_v22  ;;  %14994 = vmatprep.subr.mxu1 %v25402_v28  ;;  %v22250_v6 = vsub.f32 %v8696_v32, %v22235_v22  ;;  %v22252_v3 = vand.u32 4294901760, %v8714_v55  ;;  %v8708_v18 = vadd.f32 %v22157_v8, %v8435_v40  ;;  %v8453_v46 = vadd.f32 %v14634_v56, %v22132_v35  ;;  %v25404_v32 = vld [vmem:[#allocation274_spill] sm:$0xff] }
 0x79d   :  { %14866 = vmatprep.mubr.f32.mxu1 %v22235_v22  ;;  %14995 = vmatpush3.msra.mxu1 %v25402_v28  ;;  %v22262_v4 = vpop.f32.mrf.mxu1  ;;  %v8446_v13 = vpop.f32.mrf.mxu0  ;;  %v8965_v8 = vsub.f32 %v22219_v24, %v24104_v27  ;;  %v22270_v40 = vadd.f32 %v25404_v32, %v7866_v36  ;;  %v8976_v36 = vand.u32 4294901760, %v8975_v50  ;;  %v25410_v50 = vld [vmem:[#allocation195_spill] sm:$0xff] }
 0x79e   :  { %25403 = vst [vmem:[#allocation254_spill] sm:$0xff] %v22252_v3  ;;  %14780 = vmatprep.mubr.f32.mxu0 %v8946_v53  ;;  %14867 = vmatmul.mubr.f32.gmra.mxu1 %v22225_v34  ;;  %v22273_v56 = vsub.f32 %v8714_v55, %v22252_v3  ;;  %v22275_v63 = vand.u32 4294901760, %v8708_v18  ;;  %v8726_v31 = vadd.f32 %v22169_v9, %v8453_v46  ;;  %v25408_v55 = vand.u32 4294901760, %v22241_v42  ;;  %v25411_v46 = vld [vmem:[#allocation247_spill] sm:$0xff] }
 0x79f   :  { %v8447_v53 = vadd.f32 %v8446_v13, %v22135_v2  ;;  %14781 = vmatmul.mubr.f32.vlgmr.msra.gmra.mxu0 %v8956_v26  ;;  %14996 = vmatprep.subr.mxu1 %v25406_v60  ;;  %v22281_v27 = vpop.f32.mrf.mxu1  ;;  %v14637_v35 = vpop.f32.mrf.mxu0  ;;  %v8966_v34 = vand.u32 4294901760, %v8965_v8  ;;  %v25412_v13 = vld [vmem:[#allocation288_spill] sm:$0xff] }
 0x7a0   :  { %25405 = vst [vmem:[#allocation255_spill] sm:$0xff] %v22275_v63  ;;  %14909 = vmatpush3.msra.mxu0 %v25407_v30  ;;  %v8995_v22 = vsub.f32 %v22241_v42, %v25408_v55  ;;  %14997 = vmatpush3.msra.mxu1 %v25406_v60  ;;  %v22289_v2 = vsub.f32 %v8708_v18, %v22275_v63  ;;  %v22291_v9 = vand.u32 4294901760, %v8726_v31  ;;  %v25413_v18 = vand.u32 4294901760, %v22250_v6 }
 0x7a1   :  { %v8720_v30 = vadd.f32 %v22187_v16, %v8447_v53  ;;  %v8465_v26 = vadd.f32 %v14637_v35, %v22138_v47  ;;  %14869 = vmatprep.mubr.f32.mxu1 %v22275_v63  ;;  %14910 = vmatprep.subr.mxu0 %v25410_v50  ;;  %v22299_v8 = vadd.f32 %v25412_v13, %v25411_v46  ;;  %v22301_v55 = vpop.f32.mrf.mxu1  ;;  %v8458_v32 = vpop.f32.mrf.mxu0  ;;  %v25414_v35 = vld [vmem:[#allocation276_spill] sm:$0xff] }
 0x7a2   :  { %25409 = vst [vmem:[#allocation256_spill] sm:$0xff] %v22291_v9  ;;  %14783 = vmatprep.mubr.f32.mxu0 %v8966_v34  ;;  %14870 = vmatmul.mubr.f32.gmra.mxu1 %v22252_v3  ;;  %v8985_v16 = vsub.f32 %v22250_v6, %v25413_v18  ;;  %v22309_v53 = vadd.f32 %v25414_v35, %v7887_v0  ;;  %v25416_v3 = vld [vmem:[#allocation205_spill] sm:$0xff]  ;;  %v8996_v0 = vand.u32 4294901760, %v8995_v22  ;;  %v24117_v35 = vand.u32 4294901760, %v22289_v2 }
 0x7a3   :  { %v22312_v63 = vsub.f32 %v8726_v31, %v22291_v9  ;;  %v22314_v46 = vand.u32 4294901760, %v8720_v30  ;;  %v8738_v13 = vadd.f32 %v22211_v52, %v8465_v26  ;;  %v8459_v34 = vadd.f32 %v8458_v32, %v22146_v33  ;;  %14784 = vmatmul.mubr.f32.gmra.mxu0 %v8976_v36  ;;  %14998 = vmatprep.subr.mxu1 %v25416_v3  ;;  %v22320_v18 = vpop.f32.mrf.mxu1  ;;  %v14640_v47 = vpop.f32.mrf.mxu0  ;;  %v25419_v22 = vld [vmem:[#allocation229_spill] sm:$0xff] }
 0x7a4   :  { %14911 = vmatpush3.msra.mxu0 %v25410_v50  ;;  %v8986_v57 = vand.u32 4294901760, %v8985_v16  ;;  %v25417_v31 = vand.u32 4294901760, %v22273_v56  ;;  %14999 = vmatpush3.msra.mxu1 %v25416_v3  ;;  %v8477_v32 = vadd.f32 %v14640_v47, %v22151_v1  ;;  %v22338_v26 = vadd.f32 %v22036_v37, %v22088_v41 }
 0x7a5   :  { %25415 = vst [vmem:[#allocation257_spill] sm:$0xff] %v22314_v46  ;;  %v22328_v33 = vsub.f32 %v8720_v30, %v22314_v46  ;;  %v22330_v52 = vand.u32 4294901760, %v8738_v13  ;;  %v8732_v36 = vadd.f32 %v22227_v7, %v8459_v34  ;;  %14872 = vmatprep.mubr.f32.mxu1 %v22314_v46  ;;  %14912 = vmatprep.subr.mxu0 %v25419_v22  ;;  %v22340_v50 = vpop.f32.mrf.mxu1  ;;  %v8470_v16 = vpop.f32.mrf.mxu0  ;;  %v25420_v30 = vld [vmem:[#allocation278_spill] sm:$0xff] }
 0x7a6   :  { %v9015_v14 = vsub.f32 %v22273_v56, %v25417_v31  ;;  %14786 = vmatprep.mubr.f32.mxu0 %v8986_v57  ;;  %14873 = vmatmul.mubr.f32.gmra.mxu1 %v22291_v9  ;;  %v9005_v7 = vsub.f32 %v22289_v2, %v24117_v35  ;;  %v22349_v47 = vadd.f32 %v25420_v30, %v22260_v17  ;;  %v25422_v31 = vld [vmem:[#allocation204_spill] sm:$0xff] }
 0x7a7   :  { %25418 = vst [vmem:[#allocation258_spill] sm:$0xff] %v22330_v52  ;;  %v22352_v34 = vsub.f32 %v8738_v13, %v22330_v52  ;;  %v22354_v37 = vand.u32 4294901760, %v8732_v36  ;;  %v8750_v41 = vadd.f32 %v22243_v21, %v8477_v32  ;;  %v8471_v57 = vadd.f32 %v8470_v16, %v22160_v23  ;;  %14787 = vmatmul.mubr.f32.gmra.mxu0 %v8996_v0  ;;  %v22360_v35 = vpop.f32.mrf.mxu1  ;;  %v14643_v1 = vpop.f32.mrf.mxu0 }
 0x7a8   :  { %15000 = vmatprep.subr.mxu1 %v25422_v31  ;;  %14913 = vmatpush3.msra.mxu0 %v25419_v22  ;;  %v9006_v9 = vand.u32 4294901760, %v9005_v7  ;;  %v9016_v17 = vand.u32 4294901760, %v9015_v14  ;;  %v24124_v30 = vand.u32 4294901760, %v22328_v33  ;;  %v25423_v13 = vand.u32 4294901760, %v22312_v63  ;;  %v25425_v14 = vld [vmem:[#allocation198_spill] sm:$0xff]  ;;  %v25426_v22 = vld [vmem:[#allocation248_spill] sm:$0xff] }
 0x7a9   :  { %25421 = vst [vmem:[#allocation242_spill] sm:$0xff] %v22354_v37  ;;  %15001 = vmatpush3.msra.mxu1 %v25422_v31  ;;  %v22368_v23 = vsub.f32 %v8732_v36, %v22354_v37  ;;  %v22370_v21 = vand.u32 4294901760, %v8750_v41  ;;  %v8744_v0 = vadd.f32 %v22262_v4, %v8471_v57  ;;  %v8489_v32 = vadd.f32 %v14643_v1, %v22172_v5  ;;  %v22380_v7 = vpop.f32.mrf.mxu1  ;;  %v25427_v36 = vld [vmem:[#allocation280_spill] sm:$0xff] }
 0x7aa   :  { %v9035_v46 = vsub.f32 %v22312_v63, %v25423_v13  ;;  %14875 = vmatprep.mubr.f32.mxu1 %v22354_v37  ;;  %14914 = vmatprep.subr.mxu0 %v25425_v14  ;;  %v22378_v16 = vadd.f32 %v22040_v43, %v25426_v22  ;;  %v8482_v13 = vpop.f32.mrf.mxu0  ;;  %v9025_v4 = vsub.f32 %v22328_v33, %v24124_v30 }
 0x7ab   :  { %25424 = vst [vmem:[#allocation269_spill] sm:$0xff] %v22370_v21  ;;  %14789 = vmatprep.mubr.f32.mxu0 %v9006_v9  ;;  %14876 = vmatmul.mubr.f32.gmra.mxu1 %v22330_v52  ;;  %v22389_v1 = vadd.f32 %v25427_v36, %v22299_v8  ;;  %v22392_v57 = vsub.f32 %v8750_v41, %v22370_v21  ;;  %v22394_v43 = vand.u32 4294901760, %v8744_v0  ;;  %v25429_v52 = vld [vmem:[#allocation209_spill] sm:$0xff]  ;;  %v22400_v30 = vpop.f32.mrf.mxu1  ;;  %v24131_v36 = vand.u32 4294901760, %v22368_v23 }
 0x7ac   :  { %v8762_v9 = vadd.f32 %v22281_v27, %v8489_v32  ;;  %v8483_v22 = vadd.f32 %v8482_v13, %v22175_v29  ;;  %14790 = vmatmul.mubr.f32.gmra.mxu0 %v9016_v17  ;;  %15002 = vmatprep.subr.mxu1 %v25429_v52  ;;  %v14646_v5 = vpop.f32.mrf.mxu0  ;;  %v9026_v37 = vand.u32 4294901760, %v9025_v4  ;;  %v9036_v8 = vand.u32 4294901760, %v9035_v46  ;;  %v25432_v46 = vld [vmem:[#allocation200_spill] sm:$0xff] }
 0x7ad   :  { %25428 = vst [vmem:[#allocation271_spill] sm:$0xff] %v22394_v43  ;;  %14915 = vmatpush3.msra.mxu0 %v25425_v14  ;;  %v25430_v41 = vand.u32 4294901760, %v22352_v34  ;;  %15003 = vmatpush3.msra.mxu1 %v25429_v52  ;;  %v22408_v29 = vsub.f32 %v8744_v0, %v22394_v43  ;;  %v8501_v32 = vadd.f32 %v14646_v5, %v22178_v49  ;;  %v25433_v14 = vld [vmem:[#allocation292_spill] sm:$0xff]  ;;  %v22418_v4 = vpop.f32.mrf.mxu1  ;;  %v25434_v49 = vld [vmem:[#allocation282_spill] sm:$0xff] }
 0x7ae   :  { %v22410_v27 = vand.u32 4294901760, %v8762_v9  ;;  %v8756_v17 = vadd.f32 %v22301_v55, %v8483_v22  ;;  %14878 = vmatprep.mubr.f32.mxu1 %v22394_v43  ;;  %14916 = vmatprep.subr.mxu0 %v25432_v46  ;;  %v7908_v13 = vadd.f32 %v25433_v14, %v22092_v12  ;;  %v9045_v0 = vsub.f32 %v22368_v23, %v24131_v36 }
 0x7af   :  { %v9055_v25 = vsub.f32 %v22352_v34, %v25430_v41  ;;  %14792 = vmatprep.mubr.f32.mxu0 %v9026_v37  ;;  %v8494_v41 = vpop.f32.mrf.mxu0  ;;  %14879 = vmatmul.mubr.f32.gmra.mxu1 %v22370_v21  ;;  %v22427_v5 = vadd.f32 %v25434_v49, %v22338_v26  ;;  %v8774_v37 = vadd.f32 %v22320_v18, %v8501_v32  ;;  %v25436_v21 = vld [vmem:[#allocation211_spill] sm:$0xff]  ;;  %v22438_v36 = vpop.f32.mrf.mxu1 }
 0x7b0   :  { %25431 = vst [vmem:[#allocation243_spill] sm:$0xff] %v22410_v27  ;;  %v22430_v22 = vsub.f32 %v8762_v9, %v22410_v27  ;;  %v22432_v12 = vand.u32 4294901760, %v8756_v17  ;;  %v8495_v14 = vadd.f32 %v8494_v41, %v22191_v11  ;;  %14793 = vmatmul.mubr.f32.gmra.mxu0 %v9036_v8  ;;  %15004 = vmatprep.subr.mxu1 %v25436_v21  ;;  %v9046_v43 = vand.u32 4294901760, %v9045_v0  ;;  %v25441_v41 = vld [vmem:[#allocation293_spill] sm:$0xff] }
 0x7b1   :  { %14917 = vmatpush3.msra.mxu0 %v25432_v46  ;;  %v14649_v55 = vpop.f32.mrf.mxu0  ;;  %v9056_v26 = vand.u32 4294901760, %v9055_v25  ;;  %v25437_v9 = vand.u32 4294901760, %v22392_v57  ;;  %15005 = vmatpush3.msra.mxu1 %v25436_v21  ;;  %v22448_v18 = vand.u32 4294901760, %v8774_v37  ;;  %v25439_v25 = vld [vmem:[#allocation202_spill] sm:$0xff]  ;;  %v25440_v46 = vld [vmem:[#allocation249_spill] sm:$0xff]  ;;  %v22456_v49 = vpop.f32.mrf.mxu1 }
 0x7b2   :  { %25435 = vst [vmem:[#allocation273_spill] sm:$0xff] %v22432_v12  ;;  %v22446_v11 = vsub.f32 %v8756_v17, %v22432_v12  ;;  %v8768_v8 = vadd.f32 %v22340_v50, %v8495_v14  ;;  %v8513_v32 = vadd.f32 %v14649_v55, %v22194_v59  ;;  %14881 = vmatprep.mubr.f32.mxu1 %v22432_v12  ;;  %v25442_v17 = vand.u32 4294901760, %v22408_v29  ;;  %v25443_v59 = vld [vmem:[#allocation284_spill] sm:$0xff] }
 0x7b3   :  { %v9075_v10 = vsub.f32 %v22392_v57, %v25437_v9  ;;  %25438 = vst [vmem:[#allocation259_spill] sm:$0xff] %v22448_v18  ;;  %14918 = vmatprep.subr.mxu0 %v25439_v25  ;;  %v7929_v0 = vadd.f32 %v25441_v41, %v25440_v46  ;;  %14795 = vmatprep.mubr.f32.mxu0 %v9046_v43  ;;  %v8506_v9 = vpop.f32.mrf.mxu0 }
 0x7b4   :  { %14882 = vmatmul.mubr.f32.gmra.mxu1 %v22410_v27  ;;  %v9065_v21 = vsub.f32 %v22408_v29, %v25442_v17  ;;  %v22465_v55 = vadd.f32 %v25443_v59, %v22378_v16  ;;  %v22468_v14 = vsub.f32 %v8774_v37, %v22448_v18  ;;  %v22470_v46 = vand.u32 4294901760, %v8768_v8  ;;  %14796 = vmatmul.mubr.f32.gmra.mxu0 %v9056_v26  ;;  %v25445_v27 = vld [vmem:[#allocation212_spill] sm:$0xff]  ;;  %v22476_v17 = vpop.f32.mrf.mxu1 }
 0x7b5   :  { %v8786_v43 = vadd.f32 %v22360_v35, %v8513_v32  ;;  %v8507_v41 = vadd.f32 %v8506_v9, %v22197_v61  ;;  %15006 = vmatprep.subr.mxu1 %v25445_v27  ;;  %14919 = vmatpush3.msra.mxu0 %v25439_v25  ;;  %v14652_v50 = vpop.f32.mrf.mxu0  ;;  %v9076_v16 = vand.u32 4294901760, %v9075_v10  ;;  %v24144_v59 = vand.u32 4294901760, %v22446_v11  ;;  %v25448_v10 = vld [vmem:[#allocation203_spill] sm:$0xff] }
 0x7b6   :  { %25444 = vst [vmem:[#allocation260_spill] sm:$0xff] %v22470_v46  ;;  %v9066_v12 = vand.u32 4294901760, %v9065_v21  ;;  %v25446_v37 = vand.u32 4294901760, %v22430_v22  ;;  %15007 = vmatpush3.msra.mxu1 %v25445_v27  ;;  %v22485_v35 = vsub.f32 %v8768_v8, %v22470_v46  ;;  %14884 = vmatprep.mubr.f32.mxu1 %v22470_v46  ;;  %v8525_v21 = vadd.f32 %v14652_v50, %v22216_v44  ;;  %v22493_v25 = vpop.f32.mrf.mxu1  ;;  %v25450_v50 = vld [vmem:[#allocation217_spill] sm:$0xff] }
 0x7b7   :  { %v22487_v26 = vand.u32 4294901760, %v8786_v43  ;;  %v8780_v32 = vadd.f32 %v22380_v7, %v8507_v41  ;;  %14920 = vmatprep.subr.mxu0 %v25448_v10  ;;  %v8518_v9 = vpop.f32.mrf.mxu0  ;;  %v9085_v8 = vsub.f32 %v22446_v11, %v24144_v59  ;;  %15008 = vmatprep.subr.mxu1 %v25450_v50 }
 0x7b8   :  { %v9095_v52 = vsub.f32 %v22430_v22, %v25446_v37  ;;  %14798 = vmatprep.mubr.f32.mxu0 %v9066_v12  ;;  %14885 = vmatmul.mubr.f32.gmra.mxu1 %v22448_v18  ;;  %v25449_v37 = vld [vmem:[#allocation286_spill] sm:$0xff]  ;;  %v8519_v44 = vadd.f32 %v8518_v9, %v22270_v40  ;;  %v24148_v12 = vand.u32 4294901760, %v22485_v35  ;;  %v8798_v18 = vadd.f32 %v22400_v30, %v8525_v21  ;;  %v22512_v59 = vpop.f32.mrf.mxu1  ;;  %v25452_v21 = vld [vmem:[#allocation208_spill] sm:$0xff] }
 0x7b9   :  { %25447 = vst [vmem:[#allocation275_spill] sm:$0xff] %v22487_v26  ;;  %v22500_v61 = vadd.f32 %v25449_v37, %v7908_v13  ;;  %v22503_v7 = vsub.f32 %v8786_v43, %v22487_v26  ;;  %v22505_v41 = vand.u32 4294901760, %v8780_v32  ;;  %14799 = vmatmul.mubr.f32.gmra.mxu0 %v9076_v16  ;;  %v14655_v13 = vpop.f32.mrf.mxu0  ;;  %v9086_v37 = vand.u32 4294901760, %v9085_v8  ;;  %15009 = vmatpush3.msra.mxu1 %v25450_v50 }
 0x7ba   :  { %14921 = vmatpush3.msra.mxu0 %v25448_v10  ;;  %v9096_v46 = vand.u32 4294901760, %v9095_v52  ;;  %v25451_v43 = vand.u32 4294901760, %v22468_v14  ;;  %v8792_v30 = vadd.f32 %v22418_v4, %v8519_v44  ;;  %v8537_v10 = vadd.f32 %v14655_v13, %v22309_v53  ;;  %v25454_v4 = vld [vmem:[#allocation287_spill] sm:$0xff]  ;;  %v8827_v40 = vpop.f32.mrf.mxu1 }
 0x7bb   :  { %v22520_v16 = vsub.f32 %v8780_v32, %v22505_v41  ;;  %14887 = vmatprep.mubr.f32.mxu1 %v22505_v41  ;;  %14922 = vmatprep.subr.mxu0 %v25452_v21  ;;  %v7922_v52 = vadd.f32 %v22064_v20, %v22099_v51  ;;  %v22528_v9 = vand.u32 4294901760, %v8798_v18  ;;  %v8530_v8 = vpop.f32.mrf.mxu0  ;;  %v9105_v32 = vsub.f32 %v22485_v35, %v24148_v12  ;;  %v25456_v51 = vld [vmem:[#allocation218_spill] sm:$0xff] }
 0x7bc   :  { %v9115_v27 = vsub.f32 %v22468_v14, %v25451_v43  ;;  %14801 = vmatprep.mubr.f32.mxu0 %v9086_v37  ;;  %14888 = vmatmul.mubr.f32.gmra.mxu1 %v22487_v26  ;;  %v22535_v44 = vadd.f32 %v25454_v4, %v7929_v0  ;;  %v22537_v53 = vand.u32 4294901760, %v8792_v30  ;;  %v8810_v13 = vadd.f32 %v22438_v36, %v8537_v10 }
 0x7bd   :  { %25453 = vst [vmem:[#allocation244_spill] sm:$0xff] %v22528_v9  ;;  %v8531_v43 = vadd.f32 %v8530_v8, %v22349_v47  ;;  %14802 = vmatmul.mubr.f32.gmra.mxu0 %v9096_v46  ;;  %v24155_v20 = vand.u32 4294901760, %v22520_v16  ;;  %15010 = vmatprep.subr.mxu1 %v25456_v51  ;;  %v22544_v37 = vsub.f32 %v8798_v18, %v22528_v9  ;;  %v14658_v12 = vpop.f32.mrf.mxu0  ;;  %v9106_v0 = vand.u32 4294901760, %v9105_v32 }
 0x7be   :  { %25455 = vst [vmem:[#allocation277_spill] sm:$0xff] %v22537_v53  ;;  %14923 = vmatpush3.msra.mxu0 %v25452_v21  ;;  %v9116_v4 = vand.u32 4294901760, %v9115_v27  ;;  %v25457_v26 = vand.u32 4294901760, %v22503_v7  ;;  %15011 = vmatpush3.msra.mxu1 %v25456_v51  ;;  %v22552_v47 = vsub.f32 %v8792_v30, %v22537_v53  ;;  %v22554_v46 = vand.u32 4294901760, %v8810_v13  ;;  %v25459_v21 = vld [vmem:[#allocation213_spill] sm:$0xff]  ;;  %v25460_v27 = vld [vmem:[#allocation250_spill] sm:$0xff] }
 0x7bf   :  { %v8804_v18 = vadd.f32 %v22456_v49, %v8531_v43  ;;  %v8549_v10 = vadd.f32 %v14658_v12, %v22389_v1  ;;  %14890 = vmatprep.mubr.f32.mxu1 %v22537_v53  ;;  %14924 = vmatprep.subr.mxu0 %v25459_v21  ;;  %v7943_v8 = vadd.f32 %v22084_v58, %v25460_v27  ;;  %v8542_v32 = vpop.f32.mrf.mxu0  ;;  %v25461_v49 = vld [vmem:[#allocation289_spill] sm:$0xff]  ;;  %v14744_v27 = vpop.f32.mrf.mxu1 }
 0x7c0   :  { %v9135_v36 = vsub.f32 %v22503_v7, %v25457_v26  ;;  %25458 = vst [vmem:[#allocation279_spill] sm:$0xff] %v22554_v46  ;;  %14804 = vmatprep.mubr.f32.mxu0 %v9106_v0  ;;  %14891 = vmatmul.mubr.f32.gmra.mxu1 %v22528_v9  ;;  %v9125_v30 = vsub.f32 %v22520_v16, %v24155_v20  ;;  %v25463_v0 = vld [vmem:[#allocation221_spill] sm:$0xff] }
 0x7c1   :  { %v8256_v43 = vadd.f32 %v25461_v49, %v7922_v52  ;;  %v22569_v1 = vsub.f32 %v8810_v13, %v22554_v46  ;;  %v22571_v12 = vand.u32 4294901760, %v8804_v18  ;;  %v8822_v53 = vadd.f32 %v22476_v17, %v8549_v10  ;;  %14805 = vmatmul.mubr.f32.gmra.mxu0 %v9116_v4  ;;  %15012 = vmatprep.subr.mxu1 %v25463_v0  ;;  %v14661_v26 = vpop.f32.mrf.mxu0 }
 0x7c2   :  { %v8543_v58 = vadd.f32 %v8542_v32, %v22427_v5  ;;  %14925 = vmatpush3.msra.mxu0 %v25459_v21  ;;  %v9126_v9 = vand.u32 4294901760, %v9125_v30  ;;  %v9136_v20 = vand.u32 4294901760, %v9135_v36  ;;  %v24156_v52 = vand.u32 4294901760, %v22552_v47  ;;  %15013 = vmatpush3.msra.mxu1 %v25463_v0  ;;  %v25466_v36 = vld [vmem:[#allocation214_spill] sm:$0xff] }
 0x7c3   :  { %25462 = vst [vmem:[#allocation261_spill] sm:$0xff] %v22571_v12  ;;  %v25464_v13 = vand.u32 4294901760, %v22544_v37  ;;  %v22584_v5 = vsub.f32 %v8804_v18, %v22571_v12  ;;  %v22586_v4 = vand.u32 4294901760, %v8822_v53  ;;  %14893 = vmatprep.mubr.f32.mxu1 %v22571_v12  ;;  %14926 = vmatprep.subr.mxu0 %v25466_v36  ;;  %v7936_v21 = vadd.f32 %v22106_v48, %v22110_v19  ;;  %v8554_v30 = vpop.f32.mrf.mxu0  ;;  %v25468_v19 = vld [vmem:[#allocation228_spill] sm:$0xff]  ;;  %v25475_v12 = vld [vmem:[#allocation234_spill] sm:$0xff] }
 0x7c4   :  { %v8816_v10 = vadd.f32 %v22493_v25, %v8543_v58  ;;  %v8561_v32 = vadd.f32 %v14661_v26, %v22465_v55  ;;  %14807 = vmatprep.mubr.f32.mxu0 %v9126_v9  ;;  %14894 = vmatmul.mubr.f32.gmra.mxu1 %v22554_v46  ;;  %v9145_v18 = vsub.f32 %v22552_v47, %v24156_v52  ;;  %v8839_v55 = vpop.f32.mrf.mxu1 }
 0x7c5   :  { %v9155_v49 = vsub.f32 %v22544_v37, %v25464_v13  ;;  %25465 = vst [vmem:[#allocation245_spill] sm:$0xff] %v22586_v4  ;;  %v22599_v13 = vsub.f32 %v8822_v53, %v22586_v4  ;;  %v8555_v58 = vadd.f32 %v8554_v30, %v22500_v61  ;;  %14808 = vmatmul.mubr.f32.gmra.mxu0 %v9136_v20  ;;  %v14664_v26 = vpop.f32.mrf.mxu0  ;;  %v25469_v53 = vand.u32 4294901760, %v22569_v1  ;;  %v25474_v61 = vld [vmem:[#allocation291_spill] sm:$0xff] }
 0x7c6   :  { %v22601_v25 = vand.u32 4294901760, %v8816_v10  ;;  %15014 = vmatprep.subr.mxu1 %v25468_v19  ;;  %v8834_v9 = vadd.f32 %v22512_v59, %v8561_v32  ;;  %14927 = vmatpush3.msra.mxu0 %v25466_v36  ;;  %v9146_v17 = vand.u32 4294901760, %v9145_v18  ;;  %v8573_v48 = vadd.f32 %v14664_v26, %v22535_v44  ;;  %v25470_v59 = vld [vmem:[#allocation219_spill] sm:$0xff]  ;;  %v25472_v32 = vld [vmem:[#allocation290_spill] sm:$0xff] }
 0x7c7   :  { %v9156_v52 = vand.u32 4294901760, %v9155_v49  ;;  %v9175_v46 = vsub.f32 %v22569_v1, %v25469_v53  ;;  %15015 = vmatpush3.msra.mxu1 %v25468_v19  ;;  %v8828_v30 = vadd.f32 %v8827_v40, %v8555_v58  ;;  %14928 = vmatprep.subr.mxu0 %v25470_v59  ;;  %v8566_v49 = vpop.f32.mrf.mxu0  ;;  %v8280_v18 = vadd.f32 %v25472_v32, %v7943_v8 }
 0x7c8   :  { %25467 = vst [vmem:[#allocation281_spill] sm:$0xff] %v22601_v25  ;;  %v22614_v20 = vsub.f32 %v8816_v10, %v22601_v25  ;;  %14896 = vmatprep.mubr.f32.mxu1 %v22601_v25  ;;  %v22619_v36 = vand.u32 4294901760, %v8834_v9  ;;  %14810 = vmatprep.mubr.f32.mxu0 %v9146_v17  ;;  %v25473_v53 = vand.u32 4294901760, %v22584_v5  ;;  %v8272_v40 = vadd.f32 %v25474_v61, %v7936_v21  ;;  %v14747_v17 = vpop.f32.mrf.mxu1 }
 0x7c9   :  { %14897 = vmatmul.mubr.f32.gmra.mxu1 %v22586_v4  ;;  %v22627_v58 = vand.u32 4294901760, %v8828_v30  ;;  %v8846_v44 = vadd.f32 %v14744_v27, %v8573_v48  ;;  %v8567_v26 = vadd.f32 %v8566_v49, %v8256_v43  ;;  %14811 = vmatmul.mubr.f32.gmra.mxu0 %v9156_v52  ;;  %v14667_v8 = vpop.f32.mrf.mxu0  ;;  %v25476_v21 = vand.u32 4294901760, %v22599_v13 }
 0x7ca   :  { %25471 = vst [vmem:[#allocation262_spill] sm:$0xff] %v22619_v36  ;;  %v9165_v10 = vsub.f32 %v22584_v5, %v25473_v53  ;;  %v24167_v25 = vand.u32 4294901760, %v22614_v20  ;;  %15016 = vmatprep.subr.mxu1 %v25475_v12  ;;  %v22632_v4 = vsub.f32 %v8834_v9, %v22619_v36  ;;  %14929 = vmatpush3.msra.mxu0 %v25470_v59  ;;  %v9176_v53 = vand.u32 4294901760, %v9175_v46  ;;  %v25477_v9 = vld [vmem:[#allocation225_spill] sm:$0xff] }
 0x7cb   :  { %v9195_v61 = vsub.f32 %v22599_v13, %v25476_v21  ;;  %15017 = vmatpush3.msra.mxu1 %v25475_v12  ;;  %v22640_v43 = vsub.f32 %v8828_v30, %v22627_v58  ;;  %v22642_v27 = vand.u32 4294901760, %v8846_v44  ;;  %v8840_v52 = vadd.f32 %v8839_v55, %v8567_v26  ;;  %14899 = vmatprep.mubr.f32.mxu1 %v22627_v58  ;;  %v8578_v46 = vpop.f32.mrf.mxu0  ;;  %v25478_v26 = vld [vmem:[#allocation236_spill] sm:$0xff] }
 0x7cc   :  { %v9166_v32 = vand.u32 4294901760, %v9165_v10  ;;  %v8585_v48 = vadd.f32 %v14667_v8, %v8280_v18  ;;  %14930 = vmatprep.subr.mxu0 %v25477_v9  ;;  %v9185_v49 = vsub.f32 %v22614_v20, %v24167_v25  ;;  %v8579_v18 = vadd.f32 %v8578_v46, %v8272_v40  ;;  %15018 = vmatprep.subr.mxu1 %v25478_v26  ;;  %v8851_v8 = vpop.f32.mrf.mxu1 }
 0x7cd   :  { %14900 = vmatmul.mubr.f32.gmra.mxu1 %v22619_v36  ;;  %v22652_v30 = vsub.f32 %v8846_v44, %v22642_v27  ;;  %v22654_v10 = vand.u32 4294901760, %v8840_v52  ;;  %14931 = vmatpush3.msra.mxu0 %v25477_v9  ;;  %v9196_v21 = vand.u32 4294901760, %v9195_v61  ;;  %v9204_v59 = vand.u32 4294901760, %v22640_v43 }
 0x7ce   :  { %14813 = vmatprep.mubr.f32.mxu0 %v9166_v32  ;;  %v8858_v55 = vadd.f32 %v14747_v17, %v8585_v48  ;;  %v9186_v32 = vand.u32 4294901760, %v9185_v49  ;;  %v25479_v36 = vand.u32 4294901760, %v22632_v4  ;;  %15019 = vmatpush3.msra.mxu1 %v25478_v26  ;;  %v25480_v48 = vld [vmem:[#allocation224_spill] sm:$0xff] }
 0x7cf   :  { %14814 = vmatmul.mubr.f32.gmra.mxu0 %v9176_v53  ;;  %v24169_v44 = vand.u32 4294901760, %v22652_v30  ;;  %v22665_v40 = vsub.f32 %v8840_v52, %v22654_v10  ;;  %v8852_v53 = vadd.f32 %v8851_v8, %v8579_v18  ;;  %14902 = vmatprep.mubr.f32.mxu1 %v22654_v10 }
 0x7d0   :  { %v9215_v25 = vsub.f32 %v22632_v4, %v25479_v36  ;;  %v22667_v17 = vand.u32 4294901760, %v8858_v55  ;;  %14932 = vmatprep.subr.mxu0 %v25480_v48  ;;  %14816 = vmatprep.mubr.f32.mxu0 %v9186_v32  ;;  %v9205_v36 = vsub.f32 %v22640_v43, %v9204_v59 }
 0x7d1   :  { %14903 = vmatmul.mubr.f32.gmra.mxu1 %v22642_v27  ;;  %v22678_v9 = vand.u32 4294901760, %v8852_v53  ;;  %v24168_v52 = vand.u32 4294901760, %v22665_v40  ;;  %15148 = vmatprep.subr.mxu1 %v25394_v38 }
 0x7d2   :  { %v22676_v61 = vsub.f32 %v8858_v55, %v22667_v17  ;;  %14933 = vmatpush3.msra.mxu0 %v25480_v48  ;;  %v9206_v46 = vand.u32 4294901760, %v9205_v36  ;;  %v9216_v49 = vand.u32 4294901760, %v9215_v25  ;;  %v25481_v55 = vld [vmem:[#allocation230_spill] sm:$0xff]  ;;  %v25482_v25 = vand.u32 4294901760, %v22182_v45  ;;  %v25483_v36 = vld [vmem:[#allocation237_spill] sm:$0xff] }
 0x7d3   :  { %14817 = vmatmul.mubr.f32.gmra.mxu0 %v9196_v21  ;;  %v22685_v8 = vsub.f32 %v8852_v53, %v22678_v9  ;;  %14905 = vmatprep.mubr.f32.mxu1 %v22678_v9  ;;  %v9225_v32 = vsub.f32 %v22665_v40, %v24168_v52  ;;  %v9235_v21 = vsub.f32 %v22652_v30, %v24169_v44 }
 0x7d4   :  { %v9254_v18 = vand.u32 4294901760, %v22676_v61  ;;  %14934 = vmatprep.subr.mxu0 %v25481_v55  ;;  %14819 = vmatprep.mubr.f32.mxu0 %v9206_v46 }
 0x7d5   :  { %14906 = vmatmul.mubr.f32.gmra.mxu1 %v22667_v17  ;;  %v9226_v53 = vand.u32 4294901760, %v9225_v32  ;;  %v9244_v48 = vand.u32 4294901760, %v22685_v8  ;;  %14935 = vmatpush3.msra.mxu0 %v25481_v55  ;;  %v9236_v52 = vand.u32 4294901760, %v9235_v21  ;;  %v25485_v55 = vand.u32 4294901760, %v22219_v24 }
 0x7d6   :  { %15020 = vmatprep.mubr.f32.mxu1 %v25482_v25  ;;  %14936 = vmatprep.subr.mxu0 %v25483_v36  ;;  %v9255_v46 = vsub.f32 %v22676_v61, %v9254_v18  ;;  %v25486_v25 = vld [vmem:[#allocation239_spill] sm:$0xff] }
 0x7d7   :  { %14820 = vmatmul.mubr.f32.gmra.mxu0 %v9216_v49  ;;  %v9245_v44 = vsub.f32 %v22685_v8, %v9244_v48  ;;  %v25484_v49 = vand.u32 4294901760, %v22163_v54 }
 0x7d8   :  { %14822 = vmatprep.mubr.f32.mxu0 %v9226_v53  ;;  %14937 = vmatpush3.msra.mxu0 %v25483_v36  ;;  %v9256_v21 = vand.u32 4294901760, %v9255_v46  ;;  %v25487_v53 = vand.u32 4294901760, %v22202_v39  ;;  %v25488_v36 = vld [vmem:[#allocation194_spill] sm:$0xff] }
 0x7d9   :  { %15021 = vmatmul.mubr.f32.vlgmr.msra.gmra.mxu1 %v25484_v49  ;;  %v9246_v32 = vand.u32 4294901760, %v9245_v44  ;;  %14938 = vmatprep.subr.mxu0 %v25486_v25  ;;  %v25491_v44 = vand.u32 4294901760, %v22289_v2  ;;  %v25492_v46 = vld [vmem:[#allocation226_spill] sm:$0xff]  ;;  %v25500_v49 = vand.u32 4294901760, %v22352_v34 }
 0x7da   :  { %15023 = vmatprep.mubr.f32.mxu1 %v25485_v55  ;;  %15149 = vmatpush3.msra.mxu1 %v25394_v38  ;;  %v25490_v38 = vand.u32 4294901760, %v22241_v42  ;;  %v25511_v55 = vld [vmem:[#allocation209_spill] sm:$0xff] }
 0x7db   :  { %14823 = vmatmul.mubr.f32.gmra.mxu0 %v9236_v52  ;;  %v25489_v52 = vand.u32 4294901760, %v22250_v6  ;;  %15150 = vmatprep.subr.mxu1 %v25395_v15 }
 0x7dc   :  { %14825 = vmatprep.mubr.f32.mxu0 %v9246_v32  ;;  %14939 = vmatpush3.msra.mxu0 %v25486_v25  ;;  %v25515_v32 = vld [vmem:[#allocation211_spill] sm:$0xff]  ;;  %v25517_v25 = vand.u32 4294901760, %v22544_v37 }
 0x7dd   :  { %15024 = vmatmul.mubr.f32.gmra.mxu1 %v25487_v53  ;;  %15068 = vmatprep.subr.mxu0 %v25488_v36  ;;  %v25521_v53 = vand.u32 4294901760, %v22569_v1 }
 0x7de   :  { %15026 = vmatprep.mubr.f32.mxu1 %v25489_v52  ;;  %15151 = vmatpush3.msra.mxu1 %v25395_v15  ;;  %v25495_v15 = vld [vmem:[#allocation197_spill] sm:$0xff]  ;;  %v25547_v52 = vld [vmem:[#allocation243_spill] sm:$0xff] }
 0x7df   :  { %14826 = vmatmul.mubr.f32.gmra.mxu0 %v9256_v21  ;;  %15152 = vmatprep.subr.mxu1 %v25400_v62  ;;  %v25519_v21 = vld [vmem:[#allocation212_spill] sm:$0xff] }
 0x7e0   :  { %14940 = vmatprep.mubr.f32.mxu0 %v22182_v45  ;;  %15153 = vmatpush3.msra.mxu1 %v25400_v62  ;;  %v25493_v45 = vand.u32 4294901760, %v22273_v56  ;;  %v25497_v62 = vld [vmem:[#allocation235_spill] sm:$0xff] }
 0x7e1   :  { %15027 = vmatmul.mubr.f32.gmra.mxu1 %v25490_v38  ;;  %15154 = vmatprep.subr.mxu1 %v25402_v28  ;;  %v25548_v38 = vld [vmem:[#allocation260_spill] sm:$0xff] }
 0x7e2   :  { %15029 = vmatprep.mubr.f32.mxu1 %v25491_v44  ;;  %15155 = vmatpush3.msra.mxu1 %v25402_v28  ;;  %v25503_v28 = vand.u32 4294901760, %v22392_v57  ;;  %v25549_v44 = vld [vmem:[#allocation259_spill] sm:$0xff] }
 0x7e3   :  { %14941 = vmatmul.mubr.f32.vlgmr.msra.gmra.mxu0 %v22163_v54  ;;  %v25494_v54 = vand.u32 4294901760, %v22328_v33  ;;  %15156 = vmatprep.subr.mxu1 %v25406_v60 }
 0x7e4   :  { %15069 = vmatpush3.msra.mxu0 %v25488_v36  ;;  %14943 = vmatprep.mubr.f32.mxu0 %v22219_v24  ;;  %v25496_v24 = vand.u32 4294901760, %v22312_v63  ;;  %v25524_v36 = vand.u32 4294901760, %v22599_v13 }
 0x7e5   :  { %15070 = vmatprep.subr.mxu0 %v25492_v46  ;;  %15030 = vmatmul.mubr.f32.gmra.mxu1 %v25493_v45  ;;  %v25551_v45 = vld [vmem:[#allocation277_spill] sm:$0xff] }
 0x7e6   :  { %15071 = vmatpush3.msra.mxu0 %v25492_v46  ;;  %15032 = vmatprep.mubr.f32.mxu1 %v25494_v54  ;;  %v25550_v46 = vld [vmem:[#allocation275_spill] sm:$0xff]  ;;  %v25552_v54 = vld [vmem:[#allocation244_spill] sm:$0xff] }
 0x7e7   :  { %14944 = vmatmul.mubr.f32.gmra.mxu0 %v22202_v39  ;;  %15072 = vmatprep.subr.mxu0 %v25495_v15  ;;  %v25498_v39 = vand.u32 4294901760, %v22368_v23 }
 0x7e8   :  { %14946 = vmatprep.mubr.f32.mxu0 %v22250_v6  ;;  %15073 = vmatpush3.msra.mxu0 %v25495_v15  ;;  %v25499_v6 = vld [vmem:[#allocation201_spill] sm:$0xff] }
 0x7e9   :  { %15033 = vmatmul.mubr.f32.gmra.mxu1 %v25496_v24  ;;  %15074 = vmatprep.subr.mxu0 %v25497_v62  ;;  %v25553_v15 = vld [vmem:[#allocation261_spill] sm:$0xff]  ;;  %v25554_v24 = vld [vmem:[#allocation279_spill] sm:$0xff] }
 0x7ea   :  { %15035 = vmatprep.mubr.f32.mxu1 %v25498_v39  ;;  %15075 = vmatpush3.msra.mxu0 %v25497_v62  ;;  %v25555_v62 = vld [vmem:[#allocation281_spill] sm:$0xff] }
 0x7eb   :  { %14947 = vmatmul.mubr.f32.gmra.mxu0 %v22241_v42  ;;  %15076 = vmatprep.subr.mxu0 %v25499_v6  ;;  %v25501_v42 = vand.u32 4294901760, %v22408_v29  ;;  %v25556_v39 = vld [vmem:[#allocation245_spill] sm:$0xff] }
 0x7ec   :  { %14949 = vmatprep.mubr.f32.mxu0 %v22289_v2  ;;  %15077 = vmatpush3.msra.mxu0 %v25499_v6  ;;  %v25502_v2 = vld [vmem:[#allocation207_spill] sm:$0xff] }
 0x7ed   :  { %15036 = vmatmul.mubr.f32.gmra.mxu1 %v25500_v49  ;;  %15078 = vmatprep.subr.mxu0 %v25502_v2 }
 0x7ee   :  { %15038 = vmatprep.mubr.f32.mxu1 %v25501_v42  ;;  %15157 = vmatpush3.msra.mxu1 %v25406_v60  ;;  %v25506_v60 = vand.u32 4294901760, %v22430_v22 }
 0x7ef   :  { %14950 = vmatmul.mubr.f32.gmra.mxu0 %v22273_v56  ;;  %v25504_v56 = vand.u32 4294901760, %v22446_v11  ;;  %15158 = vmatprep.subr.mxu1 %v25416_v3 }
 0x7f0   :  { %14952 = vmatprep.mubr.f32.mxu0 %v22328_v33  ;;  %15079 = vmatpush3.msra.mxu0 %v25502_v2  ;;  %v25505_v33 = vld [vmem:[#allocation206_spill] sm:$0xff] }
 0x7f1   :  { %15039 = vmatmul.mubr.f32.gmra.mxu1 %v25503_v28  ;;  %15080 = vmatprep.subr.mxu0 %v25505_v33 }
 0x7f2   :  { %15041 = vmatprep.mubr.f32.mxu1 %v25504_v56  ;;  %15159 = vmatpush3.msra.mxu1 %v25416_v3  ;;  %v25509_v3 = vand.u32 4294901760, %v22468_v14 }
 0x7f3   :  { %14953 = vmatmul.mubr.f32.gmra.mxu0 %v22312_v63  ;;  %v25507_v63 = vand.u32 4294901760, %v22485_v35  ;;  %15160 = vmatprep.subr.mxu1 %v25422_v31 }
 0x7f4   :  { %14955 = vmatprep.mubr.f32.mxu0 %v22368_v23  ;;  %15081 = vmatpush3.msra.mxu0 %v25505_v33  ;;  %v25508_v23 = vld [vmem:[#allocation210_spill] sm:$0xff] }
 0x7f5   :  { %15042 = vmatmul.mubr.f32.gmra.mxu1 %v25506_v60  ;;  %15082 = vmatprep.subr.mxu0 %v25508_v23 }
 0x7f6   :  { %15044 = vmatprep.mubr.f32.mxu1 %v25507_v63  ;;  %15161 = vmatpush3.msra.mxu1 %v25422_v31  ;;  %v25513_v31 = vand.u32 4294901760, %v22503_v7 }
 0x7f7   :  { %14956 = vmatmul.mubr.f32.gmra.mxu0 %v22352_v34  ;;  %v25510_v34 = vand.u32 4294901760, %v22520_v16  ;;  %15162 = vmatprep.subr.mxu1 %v25511_v55 }
 0x7f8   :  { %14958 = vmatprep.mubr.f32.mxu0 %v22408_v29  ;;  %15083 = vmatpush3.msra.mxu0 %v25508_v23  ;;  %v25512_v29 = vld [vmem:[#allocation215_spill] sm:$0xff] }
 0x7f9   :  { %15045 = vmatmul.mubr.f32.gmra.mxu1 %v25509_v3  ;;  %15084 = vmatprep.subr.mxu0 %v25512_v29 }
 0x7fa   :  { %15047 = vmatprep.mubr.f32.mxu1 %v25510_v34  ;;  %15163 = vmatpush3.msra.mxu1 %v25511_v55 }
 0x7fb   :  { %14959 = vmatmul.mubr.f32.gmra.mxu0 %v22392_v57  ;;  %v25514_v57 = vand.u32 4294901760, %v22552_v47  ;;  %15164 = vmatprep.subr.mxu1 %v25515_v32 }
 0x7fc   :  { %14961 = vmatprep.mubr.f32.mxu0 %v22446_v11  ;;  %15085 = vmatpush3.msra.mxu0 %v25512_v29  ;;  %v25516_v11 = vld [vmem:[#allocation216_spill] sm:$0xff] }
 0x7fd   :  { %15048 = vmatmul.mubr.f32.gmra.mxu1 %v25513_v31  ;;  %15086 = vmatprep.subr.mxu0 %v25516_v11 }
 0x7fe   :  { %15050 = vmatprep.mubr.f32.mxu1 %v25514_v57  ;;  %15165 = vmatpush3.msra.mxu1 %v25515_v32 }
 0x7ff   :  { %14962 = vmatmul.mubr.f32.gmra.mxu0 %v22430_v22  ;;  %v25518_v22 = vand.u32 4294901760, %v22584_v5  ;;  %15166 = vmatprep.subr.mxu1 %v25519_v21 }
 0x800   :  { %14964 = vmatprep.mubr.f32.mxu0 %v22485_v35  ;;  %15087 = vmatpush3.msra.mxu0 %v25516_v11  ;;  %v25520_v35 = vld [vmem:[#allocation222_spill] sm:$0xff] }
 0x801   :  { %15051 = vmatmul.mubr.f32.gmra.mxu1 %v25517_v25  ;;  %15088 = vmatprep.subr.mxu0 %v25520_v35 }
 0x802   :  { %15053 = vmatprep.mubr.f32.mxu1 %v25518_v22  ;;  %15167 = vmatpush3.msra.mxu1 %v25519_v21 }
 0x803   :  { %14965 = vmatmul.mubr.f32.gmra.mxu0 %v22468_v14  ;;  %v25522_v14 = vand.u32 4294901760, %v22614_v20  ;;  %15168 = vmatprep.subr.mxu1 %v25450_v50 }
 0x804   :  { %14967 = vmatprep.mubr.f32.mxu0 %v22520_v16  ;;  %15089 = vmatpush3.msra.mxu0 %v25520_v35  ;;  %v25523_v16 = vld [vmem:[#allocation227_spill] sm:$0xff] }
 0x805   :  { %15054 = vmatmul.mubr.f32.gmra.mxu1 %v25521_v53  ;;  %15090 = vmatprep.subr.mxu0 %v25523_v16 }
 0x806   :  { %15056 = vmatprep.mubr.f32.mxu1 %v25522_v14  ;;  %15169 = vmatpush3.msra.mxu1 %v25450_v50  ;;  %v25526_v50 = vand.u32 4294901760, %v22632_v4 }
 0x807   :  { %14968 = vmatmul.mubr.f32.gmra.mxu0 %v22503_v7  ;;  %15170 = vmatprep.subr.mxu1 %v25456_v51  ;;  %v25525_v7 = vld [vmem:[#allocation231_spill] sm:$0xff] }
 0x808   :  { %14970 = vmatprep.mubr.f32.mxu0 %v22552_v47  ;;  %15091 = vmatpush3.msra.mxu0 %v25523_v16  ;;  %v25528_v47 = vld [vmem:[#allocation233_spill] sm:$0xff] }
 0x809   :  { %15057 = vmatmul.mubr.f32.gmra.mxu1 %v25524_v36  ;;  %15092 = vmatprep.subr.mxu0 %v25525_v7 }
 0x80a   :  { %15059 = vmatprep.mubr.f32.mxu1 %v9204_v59  ;;  %15171 = vmatpush3.msra.mxu1 %v25456_v51  ;;  %v25529_v51 = vand.u32 4294901760, %v22652_v30  ;;  %v25539_v59 = vld [vmem:[#allocation254_spill] sm:$0xff] }
 0x80b   :  { %14971 = vmatmul.mubr.f32.gmra.mxu0 %v22544_v37  ;;  %v25527_v37 = vand.u32 4294901760, %v22665_v40  ;;  %15172 = vmatprep.subr.mxu1 %v25463_v0 }
 0x80c   :  { %14973 = vmatprep.mubr.f32.mxu0 %v22584_v5  ;;  %15093 = vmatpush3.msra.mxu0 %v25525_v7  ;;  %v25532_v5 = vld [vmem:[#allocation240_spill] sm:$0xff] }
 0x80d   :  { %15060 = vmatmul.mubr.f32.gmra.mxu1 %v25526_v50  ;;  %15094 = vmatprep.subr.mxu0 %v25528_v47 }
 0x80e   :  { %15062 = vmatprep.mubr.f32.mxu1 %v25527_v37  ;;  %15173 = vmatpush3.msra.mxu1 %v25463_v0  ;;  %v25531_v0 = vld [vmem:[#allocation241_spill] sm:$0xff] }
 0x80f   :  { %14974 = vmatmul.mubr.f32.gmra.mxu0 %v22569_v1  ;;  %15174 = vmatprep.subr.mxu1 %v25468_v19  ;;  %v25530_v1 = vld [vmem:[#allocation238_spill] sm:$0xff] }
 0x810   :  { %14976 = vmatprep.mubr.f32.mxu0 %v22614_v20  ;;  %15175 = vmatpush3.msra.mxu1 %v25468_v19  ;;  %v25536_v19 = vld [vmem:[#allocation267_spill] sm:$0xff]  ;;  %v25537_v20 = vld [vmem:[#allocation253_spill] sm:$0xff] }
 0x811   :  { %15063 = vmatmul.mubr.f32.gmra.mxu1 %v25529_v51  ;;  %15095 = vmatpush3.msra.mxu0 %v25528_v47 }
 0x812   :  { %15065 = vmatprep.mubr.f32.mxu1 %v9244_v48  ;;  %15176 = vmatprep.subr.mxu1 %v25475_v12  ;;  %v25546_v48 = vld [vmem:[#allocation273_spill] sm:$0xff] }
 0x813   :  { %14977 = vmatmul.mubr.f32.gmra.mxu0 %v22599_v13  ;;  %15096 = vmatprep.subr.mxu0 %v25530_v1  ;;  %v25533_v13 = vld [vmem:[#allocation251_spill] sm:$0xff] }
 0x814   :  { %14979 = vmatprep.mubr.f32.mxu0 %v22640_v43  ;;  %15177 = vmatpush3.msra.mxu1 %v25475_v12  ;;  %v25535_v12 = vld [vmem:[#allocation265_spill] sm:$0xff]  ;;  %v25538_v43 = vld [vmem:[#allocation255_spill] sm:$0xff] }
 0x815   :  { %15066 = vmatmul.mubr.f32.gmra.mxu1 %v9254_v18  ;;  %15178 = vmatprep.subr.mxu1 %v25478_v26  ;;  %v25544_v18 = vld [vmem:[#allocation271_spill] sm:$0xff] }
 0x816   :  { %15180 = vmatprep.mubr.f32.mxu1 %v25531_v0  ;;  %15097 = vmatpush3.msra.mxu0 %v25530_v1 }
 0x817   :  { %14980 = vmatmul.mubr.f32.gmra.mxu0 %v22632_v4  ;;  %15179 = vmatpush3.msra.mxu1 %v25478_v26  ;;  %v25534_v4 = vld [vmem:[#allocation252_spill] sm:$0xff] }
 0x818   :  { %14982 = vmatprep.mubr.f32.mxu0 %v22665_v40  ;;  %15098 = vmatprep.subr.mxu0 %v25532_v5  ;;  %v25541_v26 = vld [vmem:[#allocation256_spill] sm:$0xff]  ;;  %v25542_v40 = vld [vmem:[#allocation242_spill] sm:$0xff] }
 0x819   :  { %15181 = vmatmul.mubr.f32.vlgmr.msra.gmra.mxu1 %v25533_v13  ;;  %15099 = vmatpush3.msra.mxu0 %v25532_v5 }
 0x81a   :  { %15183 = vmatprep.mubr.f32.mxu1 %v25534_v4 }
 0x81b   :  { %14983 = vmatmul.mubr.f32.gmra.mxu0 %v22652_v30  ;;  %v25540_v30 = vld [vmem:[#allocation257_spill] sm:$0xff] }
 0x81c   :  { %14985 = vmatprep.mubr.f32.mxu0 %v22685_v8  ;;  %v25545_v8 = vld [vmem:[#allocation269_spill] sm:$0xff] }
 0x81d   :  { %15184 = vmatmul.mubr.f32.gmra.mxu1 %v25535_v12 }
 0x81e   :  { %15186 = vmatprep.mubr.f32.mxu1 %v25536_v19 }
 0x81f   :  { %14986 = vmatmul.mubr.f32.gmra.mxu0 %v22676_v61  ;;  %v25543_v61 = vld [vmem:[#allocation258_spill] sm:$0xff] }
 0x820   :  { %15100 = vmatprep.mubr.f32.mxu0 %v25531_v0 }
 0x821   :  { %15187 = vmatmul.mubr.f32.gmra.mxu1 %v25537_v20 }
 0x822   :  { %15189 = vmatprep.mubr.f32.mxu1 %v25538_v43 }
 0x823   :  { %15101 = vmatmul.mubr.f32.vlgmr.msra.gmra.mxu0 %v25533_v13 }
 0x824   :  { %15103 = vmatprep.mubr.f32.mxu0 %v25534_v4 }
 0x825   :  { %15190 = vmatmul.mubr.f32.gmra.mxu1 %v25539_v59 }
 0x826   :  { %15192 = vmatprep.mubr.f32.mxu1 %v25540_v30 }
 0x827   :  { %15104 = vmatmul.mubr.f32.gmra.mxu0 %v25535_v12 }
 0x828   :  { %15106 = vmatprep.mubr.f32.mxu0 %v25536_v19 }
 0x829   :  { %15193 = vmatmul.mubr.f32.gmra.mxu1 %v25541_v26 }
 0x82a   :  { %15195 = vmatprep.mubr.f32.mxu1 %v25542_v40 }
 0x82b   :  { %15107 = vmatmul.mubr.f32.gmra.mxu0 %v25537_v20 }
 0x82c   :  { %15109 = vmatprep.mubr.f32.mxu0 %v25538_v43 }
 0x82d   :  { %15196 = vmatmul.mubr.f32.gmra.mxu1 %v25543_v61 }
 0x82e   :  { %15198 = vmatprep.mubr.f32.mxu1 %v25544_v18 }
 0x82f   :  { %15110 = vmatmul.mubr.f32.gmra.mxu0 %v25539_v59 }
 0x830   :  { %15112 = vmatprep.mubr.f32.mxu0 %v25540_v30 }
 0x831   :  { %15199 = vmatmul.mubr.f32.gmra.mxu1 %v25545_v8 }
 0x832   :  { %15201 = vmatprep.mubr.f32.mxu1 %v25546_v48 }
 0x833   :  { %15113 = vmatmul.mubr.f32.gmra.mxu0 %v25541_v26 }
 0x834   :  { %15115 = vmatprep.mubr.f32.mxu0 %v25542_v40 }
 0x835   :  { %15202 = vmatmul.mubr.f32.gmra.mxu1 %v25547_v52 }
 0x836   :  { %15204 = vmatprep.mubr.f32.mxu1 %v25548_v38 }
 0x837   :  { %15116 = vmatmul.mubr.f32.gmra.mxu0 %v25543_v61 }
 0x838   :  { %15118 = vmatprep.mubr.f32.mxu0 %v25544_v18 }
 0x839   :  { %15205 = vmatmul.mubr.f32.gmra.mxu1 %v25549_v44 }
 0x83a   :  { %15207 = vmatprep.mubr.f32.mxu1 %v22505_v41 }
 0x83b   :  { %15119 = vmatmul.mubr.f32.gmra.mxu0 %v25545_v8 }
 0x83c   :  { %15121 = vmatprep.mubr.f32.mxu0 %v25546_v48 }
 0x83d   :  { %15208 = vmatmul.mubr.f32.gmra.mxu1 %v25550_v46 }
 0x83e   :  { %15210 = vmatprep.mubr.f32.mxu1 %v25551_v45 }
 0x83f   :  { %15122 = vmatmul.mubr.f32.gmra.mxu0 %v25547_v52 }
 0x840   :  { %15124 = vmatprep.mubr.f32.mxu0 %v25548_v38 }
 0x841   :  { %15211 = vmatmul.mubr.f32.gmra.mxu1 %v25552_v54 }
 0x842   :  { %15213 = vmatprep.mubr.f32.mxu1 %v25553_v15 }
 0x843   :  { %15125 = vmatmul.mubr.f32.gmra.mxu0 %v25549_v44 }
 0x844   :  { %15127 = vmatprep.mubr.f32.mxu0 %v22505_v41  ;;  %v25557_v41 = vld [vmem:[#allocation262_spill] sm:$0xff] }
 0x845   :  { %15214 = vmatmul.mubr.f32.gmra.mxu1 %v25554_v24 }
 0x846   :  { %15216 = vmatprep.mubr.f32.mxu1 %v25555_v62 }
 0x847   :  { %15128 = vmatmul.mubr.f32.gmra.mxu0 %v25550_v46 }
 0x848   :  { %15130 = vmatprep.mubr.f32.mxu0 %v25551_v45 }
 0x849   :  { %15217 = vmatmul.mubr.f32.gmra.mxu1 %v25556_v39 }
 0x84a   :  { %15219 = vmatprep.mubr.f32.mxu1 %v22627_v58 }
 0x84b   :  { %15131 = vmatmul.mubr.f32.gmra.mxu0 %v25552_v54 }
 0x84c   :  { %15133 = vmatprep.mubr.f32.mxu0 %v25553_v15 }
 0x84d   :  { %15220 = vmatmul.mubr.f32.gmra.mxu1 %v25557_v41 }
 0x84e   :  { %15222 = vmatprep.mubr.f32.mxu1 %v22654_v10 }
 0x84f   :  { %15134 = vmatmul.mubr.f32.gmra.mxu0 %v25554_v24 }
 0x850   :  { %15136 = vmatprep.mubr.f32.mxu0 %v25555_v62 }
 0x851   :  { %15223 = vmatmul.mubr.f32.gmra.mxu1 %v22642_v27 }
 0x852   :  { %15225 = vmatprep.mubr.f32.mxu1 %v22678_v9 }
 0x853   :  { %15137 = vmatmul.mubr.f32.gmra.mxu0 %v25556_v39 }
 0x854   :  { %15139 = vmatprep.mubr.f32.mxu0 %v22627_v58 }
 0x855   :  { %15226 = vmatmul.mubr.f32.gmra.mxu1 %v22667_v17  ;;  %v14862_v6 = vpop.f32.mrf.mxu1 }
 0x857   :  { %15140 = vmatmul.mubr.f32.gmra.mxu0 %v25557_v41  ;;  %v9409_v49 = vpop.f32.mrf.mxu1 }
 0x858   :  { %15142 = vmatprep.mubr.f32.mxu0 %v22654_v10 }
 0x85a   :  { %v14865_v42 = vpop.f32.mrf.mxu1 }
 0x85b   :  { %15143 = vmatmul.mubr.f32.gmra.mxu0 %v22642_v27 }
 0x85c   :  { %15145 = vmatprep.mubr.f32.mxu0 %v22678_v9  ;;  %v9421_v2 = vpop.f32.mrf.mxu1 }
 0x85e   :  { %v14868_v28 = vpop.f32.mrf.mxu1 }
 0x85f   :  { %15146 = vmatmul.mubr.f32.gmra.mxu0 %v22667_v17  ;;  %v14782_v58 = vpop.f32.mrf.mxu0 }
 0x860   :  { %v22931_v56 = vadd.f32 %v14862_v6, %v14782_v58  ;;  %v9433_v33 = vpop.f32.mrf.mxu1 }
 0x861   :  { %v8948_v60 = vpop.f32.mrf.mxu0 }
 0x862   :  { %v22933_v63 = vadd.f32 %v9409_v49, %v8948_v60  ;;  %v14871_v23 = vpop.f32.mrf.mxu1 }
 0x863   :  { %v14785_v10 = vpop.f32.mrf.mxu0 }
 0x864   :  { %v22935_v3 = vadd.f32 %v14865_v42, %v14785_v10  ;;  %v9445_v27 = vpop.f32.mrf.mxu1 }
 0x865   :  { %v8968_v34 = vpop.f32.mrf.mxu0 }
 0x866   :  { %v22937_v9 = vadd.f32 %v9421_v2, %v8968_v34  ;;  %v14874_v55 = vpop.f32.mrf.mxu1 }
 0x867   :  { %v14788_v29 = vpop.f32.mrf.mxu0 }
 0x868   :  { %v22939_v17 = vadd.f32 %v14868_v28, %v14788_v29  ;;  %v9457_v31 = vpop.f32.mrf.mxu1 }
 0x869   :  { %v8988_v57 = vpop.f32.mrf.mxu0 }
 0x86a   :  { %v22941_v32 = vadd.f32 %v9433_v33, %v8988_v57 }
 0x86b   :  { %v14877_v11 = vpop.f32.mrf.mxu1 }
 0x86c   :  { %v14791_v25 = vpop.f32.mrf.mxu0 }
 0x86d   :  { %v22943_v22 = vadd.f32 %v14871_v23, %v14791_v25  ;;  %v9469_v21 = vpop.f32.mrf.mxu1 }
 0x86e   :  { %v9008_v35 = vpop.f32.mrf.mxu0 }
 0x86f   :  { %v22945_v53 = vadd.f32 %v9445_v27, %v9008_v35  ;;  %v14880_v14 = vpop.f32.mrf.mxu1 }
 0x870   :  { %v14794_v16 = vpop.f32.mrf.mxu0 }
 0x871   :  { %v22947_v36 = vadd.f32 %v14874_v55, %v14794_v16  ;;  %v9481_v7 = vpop.f32.mrf.mxu1 }
 0x872   :  { %v9028_v50 = vpop.f32.mrf.mxu0 }
 0x873   :  { %v22949_v37 = vadd.f32 %v9457_v31, %v9028_v50 }
 0x874   :  { %v14883_v47 = vpop.f32.mrf.mxu1  ;;  %v14797_v51 = vpop.f32.mrf.mxu0 }
 0x875   :  { %v22951_v1 = vadd.f32 %v14877_v11, %v14797_v51 }
 0x876   :  { %v9493_v0 = vpop.f32.mrf.mxu1  ;;  %v9048_v5 = vpop.f32.mrf.mxu0 }
 0x877   :  { %v22953_v13 = vadd.f32 %v9469_v21, %v9048_v5 }
 0x878   :  { %v14886_v4 = vpop.f32.mrf.mxu1 }
 0x879   :  { %v14800_v12 = vpop.f32.mrf.mxu0 }
 0x87a   :  { %v22955_v19 = vadd.f32 %v14880_v14, %v14800_v12  ;;  %v9505_v20 = vpop.f32.mrf.mxu1 }
 0x87b   :  { %v9068_v43 = vpop.f32.mrf.mxu0 }
 0x87c   :  { %v22957_v59 = vadd.f32 %v9481_v7, %v9068_v43  ;;  %v14889_v30 = vpop.f32.mrf.mxu1 }
 0x87d   :  { %v14803_v26 = vpop.f32.mrf.mxu0 }
 0x87e   :  { %v22959_v40 = vadd.f32 %v14883_v47, %v14803_v26  ;;  %v9517_v61 = vpop.f32.mrf.mxu1 }
 0x87f   :  { %v9088_v18 = vpop.f32.mrf.mxu0 }
 0x880   :  { %v22961_v8 = vadd.f32 %v9493_v0, %v9088_v18  ;;  %v14892_v48 = vpop.f32.mrf.mxu1 }
 0x881   :  { %v14806_v52 = vpop.f32.mrf.mxu0 }
 0x882   :  { %v22963_v38 = vadd.f32 %v14886_v4, %v14806_v52  ;;  %v9529_v44 = vpop.f32.mrf.mxu1 }
 0x883   :  { %v9108_v46 = vpop.f32.mrf.mxu0 }
 0x884   :  { %v22965_v45 = vadd.f32 %v9505_v20, %v9108_v46  ;;  %v14895_v54 = vpop.f32.mrf.mxu1 }
 0x885   :  { %v14809_v15 = vpop.f32.mrf.mxu0 }
 0x886   :  { %v22967_v24 = vadd.f32 %v14889_v30, %v14809_v15  ;;  %v9541_v62 = vpop.f32.mrf.mxu1 }
 0x887   :  { %v9128_v39 = vpop.f32.mrf.mxu0 }
 0x888   :  { %25558 = vst [vmem:[#allocation263_spill] sm:$0xff] %v22967_v24  ;;  %v22969_v41 = vadd.f32 %v9517_v61, %v9128_v39 }
 0x889   :  { %v14898_v6 = vpop.f32.mrf.mxu1  ;;  %v14812_v49 = vpop.f32.mrf.mxu0 }
 0x88a   :  { %25559 = vst [vmem:[#allocation264_spill] sm:$0xff] %v22969_v41  ;;  %v22971_v42 = vadd.f32 %v14892_v48, %v14812_v49 }
 0x88b   :  { %v9553_v2 = vpop.f32.mrf.mxu1  ;;  %v9148_v28 = vpop.f32.mrf.mxu0 }
 0x88c   :  { %25560 = vst [vmem:[#allocation266_spill] sm:$0xff] %v22971_v42  ;;  %v22973_v58 = vadd.f32 %v9529_v44, %v9148_v28 }
 0x88d   :  { %v14901_v33 = vpop.f32.mrf.mxu1 }
 0x88e   :  { %25561 = vst [vmem:[#allocation268_spill] sm:$0xff] %v22973_v58 }
 0x88f   :  { %v14815_v60 = vpop.f32.mrf.mxu0  ;;  %v9565_v10 = vpop.f32.mrf.mxu1 }
 0x890   :  { %v22975_v23 = vadd.f32 %v14895_v54, %v14815_v60 }
 0x891   :  { %v9168_v27 = vpop.f32.mrf.mxu0  ;;  %v14904_v55 = vpop.f32.mrf.mxu1 }
 0x892   :  { %25562 = vst [vmem:[#allocation270_spill] sm:$0xff] %v22975_v23  ;;  %v22977_v34 = vadd.f32 %v9541_v62, %v9168_v27 }
 0x893   :  { %v14818_v29 = vpop.f32.mrf.mxu0  ;;  %v9577_v57 = vpop.f32.mrf.mxu1 }
 0x894   :  { %25563 = vst [vmem:[#allocation283_spill] sm:$0xff] %v22977_v34  ;;  %v22979_v31 = vadd.f32 %v14898_v6, %v14818_v29 }
 0x895   :  { %v9188_v11 = vpop.f32.mrf.mxu0  ;;  %v14907_v21 = vpop.f32.mrf.mxu1 }
 0x896   :  { %25564 = vst [vmem:[#allocation193_spill] sm:$0xff] %v22979_v31  ;;  %v22981_v25 = vadd.f32 %v9553_v2, %v9188_v11 }
 0x897   :  { %v14821_v35 = vpop.f32.mrf.mxu0  ;;  %v9589_v16 = vpop.f32.mrf.mxu1 }
 0x898   :  { %25565 = vst [vmem:[#allocation223_spill] sm:$0xff] %v22981_v25  ;;  %v22983_v14 = vadd.f32 %v14901_v33, %v14821_v35 }
 0x899   :  { %v9208_v7 = vpop.f32.mrf.mxu0  ;;  %v22987_v47 = vpop.f32.mrf.mxu1 }
 0x89a   :  { %25566 = vst [vmem:[#allocation272_spill] sm:$0xff] %v22983_v14  ;;  %v22985_v50 = vadd.f32 %v9565_v10, %v9208_v7 }
 0x89b   :  { %v14824_v51 = vpop.f32.mrf.mxu0  ;;  %v22991_v5 = vpop.f32.mrf.mxu1 }
 0x89c   :  { %25567 = vst [vmem:[#allocation246_spill] sm:$0xff] %v22985_v50  ;;  %v22989_v0 = vadd.f32 %v14904_v55, %v14824_v51 }
 0x89d   :  { %v9228_v4 = vpop.f32.mrf.mxu0  ;;  %v22995_v20 = vpop.f32.mrf.mxu1 }
 0x89e   :  { %25568 = vst [vmem:[#allocation285_spill] sm:$0xff] %v22989_v0  ;;  %v22993_v12 = vadd.f32 %v9577_v57, %v9228_v4 }
 0x89f   :  { %v14827_v43 = vpop.f32.mrf.mxu0  ;;  %v22999_v26 = vpop.f32.mrf.mxu1 }
 0x8a0   :  { %25569 = vst [vmem:[#allocation196_spill] sm:$0xff] %v22993_v12  ;;  %v22997_v30 = vadd.f32 %v14907_v21, %v14827_v43 }
 0x8a1   :  { %v9248_v61 = vpop.f32.mrf.mxu0  ;;  %v23003_v48 = vpop.f32.mrf.mxu1 }
 0x8a2   :  { %25570 = vst [vmem:[#allocation232_spill] sm:$0xff] %v22997_v30  ;;  %v23001_v18 = vadd.f32 %v9589_v16, %v9248_v61 }
 0x8a3   :  { %v14942_v52 = vpop.f32.mrf.mxu0  ;;  %v23005_v44 = vpop.f32.mrf.mxu1 }
 0x8a4   :  { %25571 = vst [vmem:[#allocation274_spill] sm:$0xff] %v23001_v18 }
 0x8a5   :  { %v9699_v46 = vpop.f32.mrf.mxu0  ;;  %v23007_v54 = vpop.f32.mrf.mxu1 }
 0x8a7   :  { %v14945_v15 = vpop.f32.mrf.mxu0  ;;  %v23009_v62 = vpop.f32.mrf.mxu1 }
 0x8a9   :  { %v23011_v39 = vpop.f32.mrf.mxu0  ;;  %v23013_v6 = vpop.f32.mrf.mxu1 }
 0x8ab   :  { %v23015_v49 = vpop.f32.mrf.mxu0  ;;  %v23017_v2 = vpop.f32.mrf.mxu1 }
 0x8ad   :  { %v23019_v28 = vpop.f32.mrf.mxu0  ;;  %v23021_v33 = vpop.f32.mrf.mxu1 }
 0x8af   :  { %v23023_v60 = vpop.f32.mrf.mxu0  ;;  %v23025_v10 = vpop.f32.mrf.mxu1 }
 0x8b1   :  { %v23027_v27 = vpop.f32.mrf.mxu0  ;;  %v23029_v55 = vpop.f32.mrf.mxu1 }
 0x8b3   :  { %v23031_v29 = vpop.f32.mrf.mxu0  ;;  %v23033_v57 = vpop.f32.mrf.mxu1 }
 0x8b5   :  { %v23035_v11 = vpop.f32.mrf.mxu0  ;;  %v23037_v21 = vpop.f32.mrf.mxu1 }
 0x8b7   :  { %v23039_v35 = vpop.f32.mrf.mxu0  ;;  %v23041_v16 = vpop.f32.mrf.mxu1 }
 0x8b8   :  { %25572 = vst [vmem:[#allocation199_spill] sm:$0xff] %v23041_v16 }
 0x8b9   :  { %v23043_v7 = vpop.f32.mrf.mxu0  ;;  %v23045_v51 = vpop.f32.mrf.mxu1 }
 0x8ba   :  { %25573 = vst [vmem:[#allocation220_spill] sm:$0xff] %v23045_v51 }
 0x8bb   :  { %v23047_v4 = vpop.f32.mrf.mxu0  ;;  %v23049_v43 = vpop.f32.mrf.mxu1 }
 0x8bc   :  { %25574 = vst [vmem:[#allocation195_spill] sm:$0xff] %v23049_v43 }
 0x8bd   :  { %v23051_v61 = vpop.f32.mrf.mxu0  ;;  %v23053_v18 = vpop.f32.mrf.mxu1 }
 0x8be   :  { %25575 = vst [vmem:[#allocation247_spill] sm:$0xff] %v23053_v18 }
 0x8bf   :  { %v23055_v30 = vpop.f32.mrf.mxu0  ;;  %v23057_v12 = vpop.f32.mrf.mxu1 }
 0x8c0   :  { %25576 = vst [vmem:[#allocation288_spill] sm:$0xff] %v23057_v12 }
 0x8c1   :  { %v23059_v0 = vpop.f32.mrf.mxu0  ;;  %v23061_v50 = vpop.f32.mrf.mxu1 }
 0x8c2   :  { %25577 = vst [vmem:[#allocation276_spill] sm:$0xff] %v23061_v50 }
 0x8c3   :  { %v23063_v14 = vpop.f32.mrf.mxu0  ;;  %v23065_v25 = vpop.f32.mrf.mxu1 }
 0x8c4   :  { %25578 = vst [vmem:[#allocation205_spill] sm:$0xff] %v23065_v25 }
 0x8c5   :  { %v23067_v31 = vpop.f32.mrf.mxu0  ;;  %v23069_v34 = vpop.f32.mrf.mxu1 }
 0x8c6   :  { %25579 = vst [vmem:[#allocation229_spill] sm:$0xff] %v23067_v31  ;;  %25580 = vst [vmem:[#allocation278_spill] sm:$0xff] %v23069_v34 }
 0x8c7   :  { %v23071_v23 = vpop.f32.mrf.mxu0  ;;  %v23073_v58 = vpop.f32.mrf.mxu1 }
 0x8c8   :  { %25581 = vst [vmem:[#allocation204_spill] sm:$0xff] %v23071_v23  ;;  %25582 = vst [vmem:[#allocation198_spill] sm:$0xff] %v23073_v58 }
 0x8c9   :  { %v23075_v18 = vpop.f32.mrf.mxu0  ;;  %v23077_v42 = vpop.f32.mrf.mxu1 }
 0x8ca   :  { %25583 = vst [vmem:[#allocation248_spill] sm:$0xff] %v23075_v18  ;;  %25584 = vst [vmem:[#allocation280_spill] sm:$0xff] %v23077_v42 }
 0x8cb   :  { %v23079_v12 = vpop.f32.mrf.mxu0  ;;  %v23081_v41 = vpop.f32.mrf.mxu1 }
 0x8cc   :  { %25585 = vst [vmem:[#allocation200_spill] sm:$0xff] %v23079_v12  ;;  %25586 = vst [vmem:[#allocation292_spill] sm:$0xff] %v23081_v41 }
 0x8cd   :  { %v23083_v50 = vpop.f32.mrf.mxu0  ;;  %v23085_v43 = vpop.f32.mrf.mxu1 }
 0x8ce   :  { %25587 = vst [vmem:[#allocation282_spill] sm:$0xff] %v23083_v50  ;;  %25588 = vst [vmem:[#allocation202_spill] sm:$0xff] %v23085_v43 }
 0x8cf   :  { %v23087_v25 = vpop.f32.mrf.mxu0  ;;  %v23089_v24 = vpop.f32.mrf.mxu1 }
 0x8d0   :  { %25589 = vst [vmem:[#allocation249_spill] sm:$0xff] %v23087_v25  ;;  %25590 = vst [vmem:[#allocation293_spill] sm:$0xff] %v23089_v24 }
 0x8d1   :  { %v23091_v34 = vpop.f32.mrf.mxu0  ;;  %v23093_v23 = vpop.f32.mrf.mxu1 }
 0x8d2   :  { %25591 = vst [vmem:[#allocation284_spill] sm:$0xff] %v23091_v34  ;;  %25592 = vst [vmem:[#allocation203_spill] sm:$0xff] %v23093_v23 }
 0x8d3   :  { %v23095_v58 = vpop.f32.mrf.mxu0  ;;  %v23097_v18 = vpop.f32.mrf.mxu1 }
 0x8d4   :  { %25593 = vst [vmem:[#allocation286_spill] sm:$0xff] %v23095_v58  ;;  %25594 = vst [vmem:[#allocation217_spill] sm:$0xff] %v23097_v18  ;;  %v9707_v58 = vadd.f32 %v14942_v52, %v22931_v56  ;;  %v9735_v52 = vadd.f32 %v23015_v49, %v22939_v17 }
 0x8d5   :  { %v23099_v42 = vpop.f32.mrf.mxu0  ;;  %v23101_v12 = vpop.f32.mrf.mxu1 }
 0x8d6   :  { %25595 = vst [vmem:[#allocation208_spill] sm:$0xff] %v23099_v42  ;;  %25596 = vst [vmem:[#allocation287_spill] sm:$0xff] %v23101_v12  ;;  %v9700_v42 = vadd.f32 %v9699_v46, %v22933_v63  ;;  %v10836_v63 = vld [vmem:[%s23409_s7 + $0x8] sm:$0xff] }
 0x8d7   :  { %v23103_v41 = vpop.f32.mrf.mxu0  ;;  %v23105_v50 = vpop.f32.mrf.mxu1 }
 0x8d8   :  { %25597 = vst [vmem:[#allocation218_spill] sm:$0xff] %v23103_v41  ;;  %25598 = vst [vmem:[#allocation213_spill] sm:$0xff] %v23105_v50  ;;  %v9721_v50 = vadd.f32 %v14945_v15, %v22935_v3  ;;  %v10006_v56 = vadd.f32 %v22991_v5, %v9700_v42 }
 0x8d9   :  { %v23107_v43 = vpop.f32.mrf.mxu0  ;;  %v15182_v24 = vpop.f32.mrf.mxu1 }
 0x8da   :  { %25599 = vst [vmem:[#allocation250_spill] sm:$0xff] %v23107_v43  ;;  %v10014_v43 = vadd.f32 %v22987_v47, %v9707_v58  ;;  %v10030_v58 = vadd.f32 %v22995_v20, %v9721_v50  ;;  %v9728_v47 = vadd.f32 %v23019_v28, %v22941_v32  ;;  %v10046_v20 = vadd.f32 %v23003_v48, %v9735_v52 }
 0x8db   :  { %v23109_v25 = vpop.f32.mrf.mxu0  ;;  %v10645_v23 = vpop.f32.mrf.mxu1  ;;  %v9749_v32 = vadd.f32 %v23023_v60, %v22943_v22  ;;  %v9742_v48 = vadd.f32 %v23027_v27, %v22945_v53 }
 0x8dc   :  { %25600 = vst [vmem:[#allocation289_spill] sm:$0xff] %v23109_v25 }
 0x8dd   :  { %v23111_v34 = vpop.f32.mrf.mxu0  ;;  %v15185_v18 = vpop.f32.mrf.mxu1 }
 0x8de   :  { %25601 = vst [vmem:[#allocation221_spill] sm:$0xff] %v23111_v34  ;;  %v9714_v34 = vadd.f32 %v23011_v39, %v22937_v9  ;;  %v10835_v9 = vld [vmem:[%s23409_s7] sm:$0xff] }
 0x8df   :  { %v23114_v51 = vpop.f32.mrf.mxu0  ;;  %v10657_v41 = vpop.f32.mrf.mxu1 }
 0x8e1   :  { %v23117_v12 = vpop.f32.mrf.mxu0  ;;  %v15188_v25 = vpop.f32.mrf.mxu1 }
 0x8e2   :  { %25602 = vst [vmem:[#allocation214_spill] sm:$0xff] %v23117_v12 }
 0x8e3   :  { %v15102_v16 = vpop.f32.mrf.mxu0  ;;  %v10669_v12 = vpop.f32.mrf.mxu1 }
 0x8e4   :  { %v10379_v31 = vadd.f32 %v15102_v16, %v10014_v43  ;;  %v10022_v16 = vadd.f32 %v22999_v26, %v9714_v34  ;;  %v10837_v34 = vld [vmem:[%s23409_s7 + $0x10] sm:$0xff] }
 0x8e5   :  { %v10372_v46 = vpop.f32.mrf.mxu0  ;;  %v15191_v5 = vpop.f32.mrf.mxu1 }
 0x8e6   :  { %v10652_v3 = vadd.f32 %v15182_v24, %v10379_v31  ;;  %v10373_v15 = vadd.f32 %v10372_v46, %v10006_v56  ;;  %v10838_v24 = vld [vmem:[%s23409_s7 + $0x18] sm:$0xff]  ;;  %v10840_v46 = vld [vmem:[%s23409_s7 + $0x28] sm:$0xff] }
 0x8e7   :  { %v15105_v42 = vpop.f32.mrf.mxu0  ;;  %v10681_v50 = vpop.f32.mrf.mxu1 }
 0x8e8   :  { %v10868_v17 = vadd.f32 %v10836_v63, %v10652_v3  ;;  %v10646_v39 = vadd.f32 %v10645_v23, %v10373_v15  ;;  %v10391_v49 = vadd.f32 %v15105_v42, %v10030_v58  ;;  %v10038_v63 = vadd.f32 %v23005_v44, %v9728_v47 }
 0x8e9   :  { %v10384_v31 = vpop.f32.mrf.mxu0  ;;  %v15194_v56 = vpop.f32.mrf.mxu1  ;;  %v10062_v58 = vadd.f32 %v23007_v54, %v9749_v32  ;;  %v10842_v54 = vld [vmem:[%s23409_s7 + $0x38] sm:$0xff] }
 0x8ea   :  { %10900 = vst [vmem:[%s23409_s7 + $0x8] sm:$0xff] %v10868_v17  ;;  %v10867_v28 = vadd.f32 %v10835_v9, %v10646_v39  ;;  %v10664_v23 = vadd.f32 %v15185_v18, %v10391_v49  ;;  %v10385_v43 = vadd.f32 %v10384_v31, %v10022_v16  ;;  %v9763_v18 = vadd.f32 %v23031_v29, %v22947_v36  ;;  %v10839_v36 = vld [vmem:[%s23409_s7 + $0x20] sm:$0xff] }
 0x8eb   :  { %v15108_v26 = vpop.f32.mrf.mxu0  ;;  %v10693_v15 = vpop.f32.mrf.mxu1  ;;  %v9777_v49 = vadd.f32 %v23039_v35, %v22951_v1 }
 0x8ec   :  { %10899 = vst [vmem:[%s23409_s7] sm:$0xff] %v10867_v28  ;;  %v10870_v22 = vadd.f32 %v10838_v24, %v10664_v23  ;;  %v10658_v60 = vadd.f32 %v10657_v41, %v10385_v43  ;;  %v10403_v52 = vadd.f32 %v15108_v26, %v10046_v20  ;;  %v9756_v41 = vadd.f32 %v23035_v11, %v22949_v37  ;;  %v10844_v23 = vld [vmem:[%s23409_s7 + $0x48] sm:$0xff] }
 0x8ed   :  { %v10396_v3 = vpop.f32.mrf.mxu0  ;;  %v15197_v47 = vpop.f32.mrf.mxu1  ;;  %v10078_v39 = vadd.f32 %v23013_v6, %v9763_v18  ;;  %v9770_v6 = vadd.f32 %v23043_v7, %v22953_v13  ;;  %v10094_v26 = vadd.f32 %v23021_v33, %v9777_v49  ;;  %v10846_v33 = vld [vmem:[%s23409_s7 + $0x58] sm:$0xff]  ;;  %v9805_v18 = vadd.f32 %v23055_v30, %v22959_v40 }
 0x8ee   :  { %10902 = vst [vmem:[%s23409_s7 + $0x18] sm:$0xff] %v10870_v22  ;;  %v10869_v53 = vadd.f32 %v10837_v34, %v10658_v60  ;;  %v10676_v44 = vadd.f32 %v15188_v25, %v10403_v52  ;;  %v10397_v27 = vadd.f32 %v10396_v3, %v10038_v63  ;;  %v10054_v25 = vadd.f32 %v23009_v62, %v9742_v48  ;;  %v10841_v62 = vld [vmem:[%s23409_s7 + $0x30] sm:$0xff] }
 0x8ef   :  { %v15111_v29 = vpop.f32.mrf.mxu0  ;;  %v10705_v11 = vpop.f32.mrf.mxu1  ;;  %v10070_v32 = vadd.f32 %v23017_v2, %v9756_v41  ;;  %v9819_v41 = vadd.f32 %v23063_v14, %v22963_v38  ;;  %v10847_v38 = vld [vmem:[%s23409_s7 + $0x60] sm:$0xff] }
 0x8f0   :  { %10901 = vst [vmem:[%s23409_s7 + $0x10] sm:$0xff] %v10869_v53  ;;  %v10872_v9 = vadd.f32 %v10840_v46, %v10676_v44  ;;  %v10670_v42 = vadd.f32 %v10669_v12, %v10397_v27  ;;  %v10415_v17 = vadd.f32 %v15111_v29, %v10062_v58 }
 0x8f1   :  { %v10408_v37 = vpop.f32.mrf.mxu0  ;;  %v15200_v20 = vpop.f32.mrf.mxu1 }
 0x8f2   :  { %10904 = vst [vmem:[%s23409_s7 + $0x28] sm:$0xff] %v10872_v9  ;;  %v10871_v16 = vadd.f32 %v10839_v36, %v10670_v42  ;;  %v10688_v12 = vadd.f32 %v15191_v5, %v10415_v17  ;;  %v10409_v24 = vadd.f32 %v10408_v37, %v10054_v25  ;;  %v9791_v5 = vadd.f32 %v23047_v4, %v22955_v19  ;;  %v10843_v19 = vld [vmem:[%s23409_s7 + $0x40] sm:$0xff]  ;;  %v10848_v36 = vld [vmem:[%s23409_s7 + $0x68] sm:$0xff] }
 0x8f3   :  { %v15114_v31 = vpop.f32.mrf.mxu0  ;;  %v10717_v34 = vpop.f32.mrf.mxu1  ;;  %v10126_v9 = vadd.f32 %v23037_v21, %v9805_v18  ;;  %v25603_v42 = vld [vmem:[#allocation229_spill] sm:$0xff]  ;;  %v10850_v21 = vld [vmem:[%s23409_s7 + $0x78] sm:$0xff] }
 0x8f4   :  { %10903 = vst [vmem:[%s23409_s7 + $0x20] sm:$0xff] %v10871_v16  ;;  %v10874_v1 = vadd.f32 %v10842_v54, %v10688_v12  ;;  %v10682_v35 = vadd.f32 %v10681_v50, %v10409_v24  ;;  %v10427_v28 = vadd.f32 %v15114_v31, %v10078_v39  ;;  %v9784_v50 = vadd.f32 %v23051_v61, %v22957_v59  ;;  %v25604_v39 = vld [vmem:[#allocation199_spill] sm:$0xff]  ;;  %v25605_v12 = vld [vmem:[#allocation220_spill] sm:$0xff] }
 0x8f5   :  { %v10420_v43 = vpop.f32.mrf.mxu0  ;;  %v15203_v63 = vpop.f32.mrf.mxu1  ;;  %v10110_v52 = vadd.f32 %v23029_v55, %v9791_v5  ;;  %v9798_v55 = vadd.f32 %v23059_v0, %v22961_v8  ;;  %v9812_v17 = vadd.f32 %v25603_v42, %v22965_v45  ;;  %v10142_v24 = vadd.f32 %v25605_v12, %v9819_v41  ;;  %v25607_v31 = vld [vmem:[#allocation204_spill] sm:$0xff] }
 0x8f6   :  { %10906 = vst [vmem:[%s23409_s7 + $0x38] sm:$0xff] %v10874_v1  ;;  %v10873_v13 = vadd.f32 %v10841_v62, %v10682_v35  ;;  %v10700_v2 = vadd.f32 %v15194_v56, %v10427_v28  ;;  %v10421_v7 = vadd.f32 %v10420_v43, %v10070_v32  ;;  %v10086_v56 = vadd.f32 %v23025_v10, %v9770_v6  ;;  %v10845_v10 = vld [vmem:[%s23409_s7 + $0x50] sm:$0xff] }
 0x8f7   :  { %v15117_v4 = vpop.f32.mrf.mxu0  ;;  %v10729_v61 = vpop.f32.mrf.mxu1  ;;  %v10102_v27 = vadd.f32 %v23033_v57, %v9784_v50  ;;  %v10118_v49 = vadd.f32 %v25604_v39, %v9798_v55  ;;  %v25606_v62 = vld [vmem:[#allocation263_spill] sm:$0xff] }
 0x8f8   :  { %10905 = vst [vmem:[%s23409_s7 + $0x30] sm:$0xff] %v10873_v13  ;;  %v10876_v48 = vadd.f32 %v10844_v23, %v10700_v2  ;;  %v10694_v22 = vadd.f32 %v10693_v15, %v10421_v7  ;;  %v10439_v60 = vadd.f32 %v15117_v4, %v10094_v26  ;;  %v10849_v35 = vld [vmem:[%s23409_s7 + $0x70] sm:$0xff]  ;;  %v25610_v13 = vld [vmem:[#allocation248_spill] sm:$0xff] }
 0x8f9   :  { %v10432_v59 = vpop.f32.mrf.mxu0  ;;  %v15206_v44 = vpop.f32.mrf.mxu1  ;;  %v25608_v23 = vld [vmem:[#allocation195_spill] sm:$0xff]  ;;  %v25612_v4 = vld [vmem:[#allocation200_spill] sm:$0xff] }
 0x8fa   :  { %10908 = vst [vmem:[%s23409_s7 + $0x48] sm:$0xff] %v10876_v48  ;;  %v10875_v46 = vadd.f32 %v10843_v19, %v10694_v22  ;;  %v10712_v3 = vadd.f32 %v15197_v47, %v10439_v60  ;;  %v10433_v15 = vadd.f32 %v10432_v59, %v10086_v56  ;;  %v10134_v43 = vadd.f32 %v25608_v23, %v9812_v17  ;;  %v25611_v19 = vld [vmem:[#allocation266_spill] sm:$0xff]  ;;  %v25621_v39 = vld [vmem:[#allocation283_spill] sm:$0xff] }
 0x8fb   :  { %v15120_v53 = vpop.f32.mrf.mxu0  ;;  %v10741_v47 = vpop.f32.mrf.mxu1  ;;  %v10852_v48 = vld [vmem:[%s23409_s7 + $0x88] sm:$0xff] }
 0x8fc   :  { %10907 = vst [vmem:[%s23409_s7 + $0x40] sm:$0xff] %v10875_v46  ;;  %v10878_v40 = vadd.f32 %v10846_v33, %v10712_v3  ;;  %v10706_v30 = vadd.f32 %v10705_v11, %v10433_v15  ;;  %v10451_v58 = vadd.f32 %v15120_v53, %v10110_v52  ;;  %v25613_v52 = vld [vmem:[#allocation247_spill] sm:$0xff]  ;;  %v25615_v46 = vld [vmem:[#allocation282_spill] sm:$0xff]  ;;  %v10851_v15 = vld [vmem:[%s23409_s7 + $0x80] sm:$0xff] }
 0x8fd   :  { %v10444_v29 = vpop.f32.mrf.mxu0  ;;  %v15209_v25 = vpop.f32.mrf.mxu1  ;;  %v25625_v23 = vld [vmem:[#allocation278_spill] sm:$0xff] }
 0x8fe   :  { %10910 = vst [vmem:[%s23409_s7 + $0x58] sm:$0xff] %v10878_v40  ;;  %v10877_v8 = vadd.f32 %v10845_v10, %v10706_v30  ;;  %v10724_v0 = vadd.f32 %v15200_v20, %v10451_v58  ;;  %v10445_v57 = vadd.f32 %v10444_v29, %v10102_v27  ;;  %v9833_v20 = vadd.f32 %v25607_v31, %v25606_v62  ;;  %v10854_v58 = vld [vmem:[%s23409_s7 + $0x98] sm:$0xff]  ;;  %v25624_v62 = vld [vmem:[#allocation286_spill] sm:$0xff] }
 0x8ff   :  { %v15123_v14 = vpop.f32.mrf.mxu0  ;;  %v10753_v16 = vpop.f32.mrf.mxu1  ;;  %v25617_v29 = vld [vmem:[#allocation276_spill] sm:$0xff] }
 0x900   :  { %10909 = vst [vmem:[%s23409_s7 + $0x50] sm:$0xff] %v10877_v8  ;;  %v10880_v54 = vadd.f32 %v10848_v36, %v10724_v0  ;;  %v10718_v37 = vadd.f32 %v10717_v34, %v10445_v57  ;;  %v10463_v11 = vadd.f32 %v15123_v14, %v10126_v9  ;;  %v25609_v34 = vld [vmem:[#allocation264_spill] sm:$0xff]  ;;  %v10158_v18 = vadd.f32 %v25613_v52, %v9833_v20  ;;  %v25618_v0 = vld [vmem:[#allocation270_spill] sm:$0xff]  ;;  %v25619_v57 = vld [vmem:[#allocation249_spill] sm:$0xff] }
 0x901   :  { %v10456_v45 = vpop.f32.mrf.mxu0  ;;  %v15212_v5 = vpop.f32.mrf.mxu1  ;;  %v9826_v2 = vadd.f32 %v25610_v13, %v25609_v34  ;;  %v9861_v9 = vadd.f32 %v25619_v57, %v25618_v0  ;;  %v10856_v20 = vld [vmem:[%s23409_s7 + $0xa8] sm:$0xff]  ;;  %v25627_v34 = vld [vmem:[#allocation208_spill] sm:$0xff] }
 0x902   :  { %10912 = vst [vmem:[%s23409_s7 + $0x68] sm:$0xff] %v10880_v54  ;;  %v10879_v32 = vadd.f32 %v10847_v38, %v10718_v37  ;;  %v10736_v6 = vadd.f32 %v15203_v63, %v10463_v11  ;;  %v10457_v1 = vadd.f32 %v10456_v45, %v10118_v49  ;;  %v9847_v63 = vadd.f32 %v25612_v4, %v25611_v19  ;;  %v10853_v38 = vld [vmem:[%s23409_s7 + $0x90] sm:$0xff]  ;;  %v25620_v37 = vld [vmem:[#allocation205_spill] sm:$0xff]  ;;  %v25622_v49 = vld [vmem:[#allocation284_spill] sm:$0xff] }
 0x903   :  { %v15126_v28 = vpop.f32.mrf.mxu0  ;;  %v10765_v60 = vpop.f32.mrf.mxu1  ;;  %v25631_v52 = vld [vmem:[#allocation218_spill] sm:$0xff] }
 0x904   :  { %10911 = vst [vmem:[%s23409_s7 + $0x60] sm:$0xff] %v10879_v32  ;;  %v10882_v7 = vadd.f32 %v10850_v21, %v10736_v6  ;;  %v10730_v26 = vadd.f32 %v10729_v61, %v10457_v1  ;;  %v10475_v50 = vadd.f32 %v15126_v28, %v10142_v24  ;;  %v25614_v61 = vld [vmem:[#allocation268_spill] sm:$0xff]  ;;  %v10174_v8 = vadd.f32 %v25617_v29, %v9847_v63  ;;  %v10860_v57 = vld [vmem:[%s23409_s7 + $0xc8] sm:$0xff] }
 0x905   :  { %v10468_v22 = vpop.f32.mrf.mxu0  ;;  %v9840_v3 = vadd.f32 %v25615_v46, %v25614_v61  ;;  %v15215_v53 = vpop.f32.mrf.mxu1  ;;  %v9854_v21 = vadd.f32 %v25622_v49, %v25621_v39  ;;  %v10859_v49 = vld [vmem:[%s23409_s7 + $0xc0] sm:$0xff] }
 0x906   :  { %10914 = vst [vmem:[%s23409_s7 + $0x78] sm:$0xff] %v10882_v7  ;;  %v10881_v56 = vadd.f32 %v10849_v35, %v10730_v26  ;;  %v10748_v33 = vadd.f32 %v15206_v44, %v10475_v50  ;;  %v10469_v59 = vadd.f32 %v10468_v22, %v10134_v43  ;;  %v25616_v44 = vld [vmem:[#allocation288_spill] sm:$0xff]  ;;  %v10190_v43 = vadd.f32 %v25625_v23, %v9861_v9 }
 0x907   :  { %v15129_v10 = vpop.f32.mrf.mxu0  ;;  %v10150_v30 = vadd.f32 %v25616_v44, %v9826_v2  ;;  %v10777_v36 = vpop.f32.mrf.mxu1  ;;  %v10166_v11 = vadd.f32 %v25620_v37, %v9840_v3  ;;  %v10855_v2 = vld [vmem:[%s23409_s7 + $0xa0] sm:$0xff]  ;;  %v10857_v3 = vld [vmem:[%s23409_s7 + $0xb0] sm:$0xff]  ;;  %v25634_v44 = vld [vmem:[#allocation250_spill] sm:$0xff] }
 0x908   :  { %10913 = vst [vmem:[%s23409_s7 + $0x70] sm:$0xff] %v10881_v56  ;;  %v10884_v27 = vadd.f32 %v10852_v48, %v10748_v33  ;;  %v10742_v55 = vadd.f32 %v10741_v47, %v10469_v59  ;;  %v10487_v40 = vadd.f32 %v15129_v10, %v10158_v18  ;;  %v10858_v48 = vld [vmem:[%s23409_s7 + $0xb8] sm:$0xff] }
 0x909   :  { %v10480_v41 = vpop.f32.mrf.mxu0  ;;  %v15218_v54 = vpop.f32.mrf.mxu1  ;;  %v25629_v56 = vld [vmem:[#allocation280_spill] sm:$0xff] }
 0x90a   :  { %10916 = vst [vmem:[%s23409_s7 + $0x88] sm:$0xff] %v10884_v27  ;;  %v10883_v42 = vadd.f32 %v10851_v15, %v10742_v55  ;;  %v10760_v47 = vadd.f32 %v15209_v25, %v10487_v40  ;;  %v10481_v17 = vadd.f32 %v10480_v41, %v10150_v30  ;;  %v25623_v25 = vld [vmem:[#allocation193_spill] sm:$0xff]  ;;  %v25630_v59 = vld [vmem:[#allocation272_spill] sm:$0xff]  ;;  %v25633_v40 = vld [vmem:[#allocation246_spill] sm:$0xff] }
 0x90b   :  { %v15132_v14 = vpop.f32.mrf.mxu0  ;;  %v9875_v31 = vadd.f32 %v25624_v62, %v25623_v25  ;;  %v10789_v6 = vpop.f32.mrf.mxu1  ;;  %v9889_v18 = vadd.f32 %v25631_v52, %v25630_v59  ;;  %v25632_v27 = vld [vmem:[#allocation292_spill] sm:$0xff]  ;;  %v9882_v30 = vadd.f32 %v25634_v44, %v25633_v40 }
 0x90c   :  { %10915 = vst [vmem:[%s23409_s7 + $0x80] sm:$0xff] %v10883_v42  ;;  %v10886_v45 = vadd.f32 %v10854_v58, %v10760_v47  ;;  %v10754_v12 = vadd.f32 %v10753_v16, %v10481_v17  ;;  %v10499_v24 = vadd.f32 %v15132_v14, %v10174_v8  ;;  %v25626_v16 = vld [vmem:[#allocation223_spill] sm:$0xff]  ;;  %v25636_v8 = vld [vmem:[#allocation289_spill] sm:$0xff]  ;;  %v25638_v37 = vld [vmem:[#allocation196_spill] sm:$0xff] }
 0x90d   :  { %v10492_v32 = vpop.f32.mrf.mxu0  ;;  %v9868_v13 = vadd.f32 %v25627_v34, %v25626_v16  ;;  %v15221_v26 = vpop.f32.mrf.mxu1  ;;  %v10206_v33 = vadd.f32 %v25629_v56, %v9875_v31  ;;  %v10862_v62 = vld [vmem:[%s23409_s7 + $0xd8] sm:$0xff]  ;;  %v10861_v16 = vld [vmem:[%s23409_s7 + $0xd0] sm:$0xff] }
 0x90e   :  { %10918 = vst [vmem:[%s23409_s7 + $0x98] sm:$0xff] %v10886_v45  ;;  %v10885_v1 = vadd.f32 %v10853_v38, %v10754_v12  ;;  %v10772_v35 = vadd.f32 %v15212_v5, %v10499_v24  ;;  %v10493_v28 = vadd.f32 %v10492_v32, %v10166_v11  ;;  %v25628_v5 = vld [vmem:[#allocation198_spill] sm:$0xff] }
 0x90f   :  { %v15135_v7 = vpop.f32.mrf.mxu0  ;;  %v10182_v63 = vadd.f32 %v25628_v5, %v9854_v21  ;;  %v10801_v15 = vpop.f32.mrf.mxu1  ;;  %v10198_v55 = vadd.f32 %v25632_v27, %v9868_v13  ;;  %v25637_v38 = vld [vmem:[#allocation202_spill] sm:$0xff]  ;;  %v25643_v13 = vld [vmem:[#allocation217_spill] sm:$0xff]  ;;  %v10866_v27 = vld [vmem:[%s23409_s7 + $0xf8] sm:$0xff] }
 0x910   :  { %10917 = vst [vmem:[%s23409_s7 + $0x90] sm:$0xff] %v10885_v1  ;;  %v10888_v50 = vadd.f32 %v10856_v20, %v10772_v35  ;;  %v10766_v19 = vadd.f32 %v10765_v60, %v10493_v28  ;;  %v10511_v4 = vadd.f32 %v15135_v7, %v10190_v43  ;;  %v10222_v14 = vadd.f32 %v25637_v38, %v9889_v18  ;;  %v25641_v20 = vld [vmem:[#allocation203_spill] sm:$0xff]  ;;  %v25642_v1 = vld [vmem:[#allocation232_spill] sm:$0xff]  ;;  %v25644_v7 = vld [vmem:[#allocation274_spill] sm:$0xff] }
 0x911   :  { %v10504_v22 = vpop.f32.mrf.mxu0  ;;  %v15224_v39 = vpop.f32.mrf.mxu1  ;;  %v9917_v35 = vadd.f32 %v23114_v51, %v25642_v1  ;;  %v10863_v18 = vld [vmem:[%s23409_s7 + $0xe0] sm:$0xff] }
 0x912   :  { %10920 = vst [vmem:[%s23409_s7 + $0xa8] sm:$0xff] %v10888_v50  ;;  %v10887_v61 = vadd.f32 %v10855_v2, %v10766_v19  ;;  %v10784_v46 = vadd.f32 %v15215_v53, %v10511_v4  ;;  %v10505_v60 = vadd.f32 %v10504_v22, %v10182_v63  ;;  %v25635_v53 = vld [vmem:[#allocation285_spill] sm:$0xff]  ;;  %v25645_v50 = vld [vmem:[#allocation214_spill] sm:$0xff] }
 0x913   :  { %v15138_v10 = vpop.f32.mrf.mxu0  ;;  %v9903_v0 = vadd.f32 %v25636_v8, %v25635_v53  ;;  %v10813_v43 = vpop.f32.mrf.mxu1  ;;  %v9910_v19 = vadd.f32 %v25645_v50, %v25644_v7 }
 0x914   :  { %10919 = vst [vmem:[%s23409_s7 + $0xa0] sm:$0xff] %v10887_v61  ;;  %v10890_v58 = vadd.f32 %v10858_v48, %v10784_v46  ;;  %v10778_v41 = vadd.f32 %v10777_v36, %v10505_v60  ;;  %v10523_v29 = vadd.f32 %v15138_v10, %v10206_v33  ;;  %v25639_v36 = vld [vmem:[#allocation221_spill] sm:$0xff]  ;;  %v25646_v33 = vld [vmem:[#allocation287_spill] sm:$0xff] }
 0x915   :  { %v10516_v9 = vpop.f32.mrf.mxu0  ;;  %v9896_v11 = vadd.f32 %v25639_v36, %v25638_v37  ;;  %v10238_v32 = vadd.f32 %v25641_v20, %v9903_v0  ;;  %v10254_v59 = vadd.f32 %v25646_v33, %v9917_v35  ;;  %v15227_v52 = vpop.f32.mrf.mxu1 }
 0x916   :  { %10922 = vst [vmem:[%s23409_s7 + $0xb8] sm:$0xff] %v10890_v58  ;;  %v10889_v42 = vadd.f32 %v10857_v3, %v10778_v41  ;;  %v10796_v47 = vadd.f32 %v15218_v54, %v10523_v29  ;;  %v10517_v17 = vadd.f32 %v10516_v9, %v10198_v55  ;;  %v25640_v54 = vld [vmem:[#allocation293_spill] sm:$0xff]  ;;  %v10865_v41 = vld [vmem:[%s23409_s7 + $0xf0] sm:$0xff] }
 0x917   :  { %v15141_v21 = vpop.f32.mrf.mxu0  ;;  %v10214_v25 = vadd.f32 %v25640_v54, %v9882_v30  ;;  %v10230_v2 = vadd.f32 %v25643_v13, %v9896_v11  ;;  %v10825_v58 = vpop.f32.mrf.mxu1 }
 0x918   :  { %10921 = vst [vmem:[%s23409_s7 + $0xb0] sm:$0xff] %v10889_v42  ;;  %v10892_v45 = vadd.f32 %v10860_v57, %v10796_v47  ;;  %v10790_v12 = vadd.f32 %v10789_v6, %v10517_v17  ;;  %v10535_v24 = vadd.f32 %v15141_v21, %v10222_v14 }
 0x919   :  { %v10528_v31 = vpop.f32.mrf.mxu0 }
 0x91a   :  { %10924 = vst [vmem:[%s23409_s7 + $0xc8] sm:$0xff] %v10892_v45  ;;  %v10891_v28 = vadd.f32 %v10859_v49, %v10790_v12  ;;  %v10808_v23 = vadd.f32 %v15221_v26, %v10535_v24  ;;  %v10529_v6 = vadd.f32 %v10528_v31, %v10214_v25  ;;  %v10864_v26 = vld [vmem:[%s23409_s7 + $0xe8] sm:$0xff] }
 0x91b   :  { %v15144_v34 = vpop.f32.mrf.mxu0 }
 0x91c   :  { %10923 = vst [vmem:[%s23409_s7 + $0xc0] sm:$0xff] %v10891_v28  ;;  %v10894_v51 = vadd.f32 %v10862_v62, %v10808_v23  ;;  %v10802_v4 = vadd.f32 %v10801_v15, %v10529_v6  ;;  %v10547_v5 = vadd.f32 %v15144_v34, %v10238_v32  ;;  %v25647_v15 = vld [vmem:[#allocation213_spill] sm:$0xff] }
 0x91d   :  { %v10540_v63 = vpop.f32.mrf.mxu0  ;;  %v10246_v10 = vadd.f32 %v25647_v15, %v9910_v19 }
 0x91e   :  { %10926 = vst [vmem:[%s23409_s7 + $0xd8] sm:$0xff] %v10894_v51  ;;  %v10893_v48 = vadd.f32 %v10861_v16, %v10802_v4  ;;  %v10820_v22 = vadd.f32 %v15224_v39, %v10547_v5  ;;  %v10541_v56 = vadd.f32 %v10540_v63, %v10230_v2 }
 0x91f   :  { %v15147_v61 = vpop.f32.mrf.mxu0 }
 0x920   :  { %10925 = vst [vmem:[%s23409_s7 + $0xd0] sm:$0xff] %v10893_v48  ;;  %v10896_v46 = vadd.f32 %v10864_v26, %v10820_v22  ;;  %v10814_v60 = vadd.f32 %v10813_v43, %v10541_v56  ;;  %v10559_v3 = vadd.f32 %v15147_v61, %v10254_v59 }
 0x921   :  { %v10552_v55 = vpop.f32.mrf.mxu0 }
 0x922   :  { %10928 = vst [vmem:[%s23409_s7 + $0xe8] sm:$0xff] %v10896_v46  ;;  %v10895_v40 = vadd.f32 %v10863_v18, %v10814_v60  ;;  %v10832_v44 = vadd.f32 %v15227_v52, %v10559_v3  ;;  %v10553_v30 = vadd.f32 %v10552_v55, %v10246_v10 }
 0x924   :  { %10927 = vst [vmem:[%s23409_s7 + $0xe0] sm:$0xff] %v10895_v40  ;;  %v10898_v29 = vadd.f32 %v10866_v27, %v10832_v44  ;;  %v10826_v53 = vadd.f32 %v10825_v58, %v10553_v30 }
 0x926   :  { %10930 = vst [vmem:[%s23409_s7 + $0xf8] sm:$0xff] %v10898_v29  ;;  %v10897_v8 = vadd.f32 %v10865_v41, %v10826_v53 }
 0x928   :  { %10929 = vst [vmem:[%s23409_s7 + $0xf0] sm:$0xff] %v10897_v8 }
 0x929 PF:  { %10935 = vsyncpa [#allocation5], 1 }
 0x92a   :  { %10936 = vsyncpa [#allocation7], 1 }

</bundles_post_ra>
